<compile_context>
chip_gen: v7x
topology: tpu7x:2x2x1
jax: 0.10.0
libtpu: 0.0.40
codegen_flags: <defaults>
</compile_context>

<pallas_src>
import jax
import jax.numpy as jnp
from jax.experimental import pallas as pl
from jax.experimental.pallas import tpu as pltpu

_PH = 3    # leading-dim (H) halo: >= max dilation (3); no alignment constraint
_PW = 16   # sublane (W) halo: bf16 sublane tile is 16 -> aligned interior store


# ---------------------------------------------------------------------------
# Fused PolicyNet kernel (one batch element per grid step)
# ---------------------------------------------------------------------------
def _make_policy_kernel(H, W, C):
    HW = H * W
    Hp, Wp = H + 2 * _PH, W + 2 * _PW

    def kernel(x_ref, w1, b1, w2, b2, wg, bg, w4, b4, o_ref, pad_ref):
        # Zero only the halo border (the interior is fully overwritten by every
        # conv's store).  Re-done every grid step on purpose: with
        # dimension_semantics=("parallel",) each core must see a zeroed halo.
        # All four stores are sublane/lane aligned (offsets 0/16/32, full lanes).
        zdt = pad_ref.dtype
        pad_ref[0:_PH, :, :] = jnp.zeros((_PH, Wp, C), zdt)                 # top
        pad_ref[_PH + H:Hp, :, :] = jnp.zeros((Hp - _PH - H, Wp, C), zdt)   # bot
        pad_ref[_PH:_PH + H, 0:_PW, :] = jnp.zeros((H, _PW, C), zdt)        # left
        pad_ref[_PH:_PH + H, _PW + W:Wp, :] = jnp.zeros((H, Wp - _PW - W, C), zdt)

        def conv3x3(x_act, w_ref, b_ref, dil):
            """3x3 'same' conv with dilation `dil`; returns (HW, Cout) f32.

            Taps are grouped by kernel row: the three horizontally-shifted
            patches of one row are lane-concatenated into a (HW, 3C) bf16 LHS,
            so each conv is 3 MXU dots of depth K=3C (=192) instead of 9 dots
            of depth 64.  Weights arrive pre-flattened as (9C, Cout) bf16.
            """
            # single aligned interior store (+ one bf16 cast) per conv
            pad_ref[_PH:_PH + H, _PW:_PW + W, :] = (
                x_act.reshape(H, W, C).astype(pad_ref.dtype))
            cout = w_ref.shape[-1]
            acc = jnp.zeros((HW, cout), jnp.float32)
            for ky in range(3):
                oy = _PH + (ky - 1) * dil
                parts = []
                for kx in range(3):
                    ox = _PW + (kx - 1) * dil
                    parts.append(pad_ref[oy:oy + H, ox:ox + W, :].reshape(HW, C))
                lhs = jnp.concatenate(parts, axis=-1)             # (HW, 3C) bf16
                acc = acc + jnp.dot(lhs, w_ref[ky * 3 * C:(ky + 1) * 3 * C, :],
                                    preferred_element_type=jnp.float32)
            return acc + b_ref[...]                               # (HW, cout) f32

        # conv1 (dil=3) + ReLU ; conv2 (dil=2) + ReLU
        h = jnp.maximum(conv3x3(x_ref[0], w1, b1, 3), 0.0)
        h = jnp.maximum(conv3x3(h, w2, b2, 2), 0.0)

        # ConvGRU cell, single step, hidden=None -> h0 == 0:
        #   u = sigmoid(conv_u([x, 0]));  o = tanh(conv_o([x, reset*h0]))
        #   h_new = h0*(1-u) + o*u == o*u     (reset gate is dead and removed;
        # gate weights were sliced to the input-channel half in the wrapper).
        # Update/out gate convs are fused along Cout: wg is (9C, 2C).
        z = conv3x3(h, wg, bg, 1)                                 # (HW, 2C) f32
        u = pl.reciprocal(1.0 + jnp.exp(-z[:, :C]), approx=True)  # sigmoid
        h = u * jnp.tanh(z[:, C:])

        # conv4 (dil=1) + softmax over channels.  w4/b4 were padded in the
        # wrapper to 128 output channels (zero weights, -1e30 bias) so the
        # softmax reductions and the output store run on full 128 lanes.
        logits = conv3x3(h, w4, b4, 1)                            # (HW, 128) f32
        m = jnp.max(logits, axis=-1, keepdims=True)
        e = jnp.exp(logits - m)
        probs = e / jnp.sum(e, axis=-1, keepdims=True)            # exact renorm
        o_ref[0] = probs.astype(o_ref.dtype)                      # lane-dense store

    return kernel


# ---------------------------------------------------------------------------
# Public forward: NCHW in, NCHW out
# ---------------------------------------------------------------------------
def policy_net_forward(x_nchw, params):
    N, C, H, W = x_nchw.shape
    A = params["w4"].shape[-1]
    HW = H * W
    CP = 128   # padded conv4 output channels (lane-dense softmax / stores)

    bf, f32 = jnp.bfloat16, jnp.float32

    # NCHW -> NHWC, bf16 (MXU-native input dtype; weights are bf16, f32 accum)
    x = jnp.transpose(x_nchw, (0, 2, 3, 1)).astype(bf)

    def flat(w):   # HWIO (3,3,Cin,Cout) -> (9*Cin, Cout), row-major [ky,kx,cin]
        kh, kw, ci, co = w.shape
        return w.reshape(kh * kw * ci, co).astype(bf)

    # GRU: h0 == 0 -> only the input half of the stacked [x, h0] channels can
    # contribute; slice gate weights to that half and fuse update/out gates
    # along the output-channel axis (reset gate is dead with h0 == 0).
    wg = jnp.concatenate([params["wu"][:, :, :C, :],
                          params["wo"][:, :, :C, :]], axis=-1)        # (3,3,C,2C)
    bg = jnp.concatenate([params["bu"], params["bo"]], axis=0)        # (2C,)

    # conv4: pad output channels to 128 (zero weights, -1e30 bias -> exp == 0)
    w4p = jnp.pad(params["w4"], ((0, 0), (0, 0), (0, 0), (0, CP - A)))
    b4p = jnp.concatenate([params["b4"].astype(f32),
                           jnp.full((CP - A,), -1e30, f32)], axis=0)

    weights = (
        flat(params["w1"]), params["b1"].reshape(1, C).astype(f32),
        flat(params["w2"]), params["b2"].reshape(1, C).astype(f32),
        flat(wg),           bg.reshape(1, 2 * C).astype(f32),
        flat(w4p),          b4p.reshape(1, CP),
    )

    def _const_spec(shape):                 # same whole-array block every step
        zeros = (0,) * len(shape)
        return pl.BlockSpec(shape, lambda i, _z=zeros: _z)

    y = pl.pallas_call(
        _make_policy_kernel(H, W, C),
        grid=(N,),
        in_specs=[pl.BlockSpec((1, H, W, C), lambda i: (i, 0, 0, 0))]
                 + [_const_spec(w.shape) for w in weights],
        out_specs=pl.BlockSpec((1, HW, CP), lambda i: (i, 0, 0)),
        out_shape=jax.ShapeDtypeStruct((N, HW, CP), jnp.float32),
        scratch_shapes=[pltpu.VMEM((H + 2 * _PH, W + 2 * _PW, C), jnp.bfloat16)],
        compiler_params=pltpu.CompilerParams(dimension_semantics=("parallel",)),
    )(x, *weights)

    # (N, HW, 128) -> (N, A, H, W): slice real channels, free reshape, to NCHW.
    return jnp.transpose(y[:, :, :A].reshape(N, H, W, A), (0, 3, 1, 2))


# ---------------------------------------------------------------------------
# Pure-JAX reference (lax conv, f32, full GRU weights + explicit zero hidden)
# ---------------------------------------------------------------------------
def _ref_forward(x_nchw, p):
    x = jnp.transpose(x_nchw, (0, 2, 3, 1)).astype(jnp.float32)

    def conv(v, w, b, d):
        y = jax.lax.conv_general_dilated(
            v, w, window_strides=(1, 1), padding="SAME", rhs_dilation=(d, d),
            dimension_numbers=("NHWC", "HWIO", "NHWC"))
        return y + b.reshape(1, 1, 1, -1)

    h = jnp.maximum(conv(x, p["w1"], p["b1"], 3), 0.0)
    h = jnp.maximum(conv(h, p["w2"], p["b2"], 2), 0.0)
    stacked = jnp.concatenate([h, jnp.zeros_like(h)], axis=-1)   # [x, h0==0]
    u = jax.nn.sigmoid(conv(stacked, p["wu"], p["bu"], 1))
    o = jnp.tanh(conv(stacked, p["wo"], p["bo"], 1))
    h = o * u                                                    # h0 == 0
    y = jax.nn.softmax(conv(h, p["w4"], p["b4"], 1), axis=-1)
    return jnp.transpose(y, (0, 3, 1, 2))


if __name__ == "__main__":
    key = jax.random.PRNGKey(0)
    action_size = 4
    N, C, H, W = 2, 64, 16, 16      # in_channels=64 is fixed by the module

    keys = jax.random.split(key, 13)
    s = 0.05
    params = {
        "w1": jax.random.normal(keys[0], (3, 3, 64, 64), jnp.float32) * s,
        "b1": jax.random.normal(keys[1], (64,), jnp.float32) * s,
        "w2": jax.random.normal(keys[2], (3, 3, 64, 64), jnp.float32) * s,
        "b2": jax.random.normal(keys[3], (64,), jnp.float32) * s,
        "wu": jax.random.normal(keys[4], (3, 3, 128, 64), jnp.float32) * s,
        "bu": jax.random.normal(keys[5], (64,), jnp.float32) * s,
        "wr": jax.random.normal(keys[6], (3, 3, 128, 64), jnp.float32) * s,  # dead with h0==0
        "br": jax.random.normal(keys[7], (64,), jnp.float32) * s,            # dead with h0==0
        "wo": jax.random.normal(keys[8], (3, 3, 128, 64), jnp.float32) * s,
        "bo": jax.random.normal(keys[9], (64,), jnp.float32) * s,
        "w4": jax.random.normal(keys[10], (3, 3, 64, action_size), jnp.float32) * s,
        "b4": jax.random.normal(keys[11], (action_size,), jnp.float32) * s,
    }
    x = jax.random.normal(keys[12], (N, C, H, W), jnp.float32)

    fwd = jax.jit(policy_net_forward)
    out = jax.block_until_ready(fwd(x, params))
    assert out.shape == (N, action_size, H, W), out.shape

    # channel-wise softmax -> probabilities sum to ~1 over dim=1
    sums = jnp.sum(out, axis=1)
    assert bool(jnp.allclose(sums, jnp.ones_like(sums), atol=5e-3))

    # bf16 matmuls vs the f32 reference -> ~1e-2 drift expected
    ref = jax.block_until_ready(_ref_forward(x, params))
    assert bool(jnp.allclose(out, ref, atol=2e-2, rtol=2e-2)), \
        float(jnp.max(jnp.abs(out - ref)))

    print("KERNEL_OK")
</pallas_src>

<mosaic_0001>
module attributes {stable_mosaic.version = 11 : i64} {
  func.func @kernel(%arg0: i32, %arg1: memref<1x16x16x64xbf16, #tpu.memory_space<vmem>>, %arg2: memref<576x64xbf16, #tpu.memory_space<vmem>>, %arg3: memref<1x64xf32, #tpu.memory_space<vmem>>, %arg4: memref<576x64xbf16, #tpu.memory_space<vmem>>, %arg5: memref<1x64xf32, #tpu.memory_space<vmem>>, %arg6: memref<576x128xbf16, #tpu.memory_space<vmem>>, %arg7: memref<1x128xf32, #tpu.memory_space<vmem>>, %arg8: memref<576x128xbf16, #tpu.memory_space<vmem>>, %arg9: memref<1x128xf32, #tpu.memory_space<vmem>>, %arg10: memref<1x256x128xf32, #tpu.memory_space<vmem>>, %arg11: memref<22x48x64xbf16, #tpu.memory_space<vmem>>) attributes {dimension_semantics = [#tpu.dimension_semantics<parallel>], iteration_bounds = array<i64: 2>, scalar_prefetch = 0 : i64, scratch_operands = 1 : i64, tpu.core_type = #tpu.core_type<tc>, window_params = [{transform_indices = @transform_0, window_bounds = array<i64: 1, 16, 16, 64>}, {pipeline_mode = #tpu.pipeline_mode<synchronous>, transform_indices = @transform_1, window_bounds = array<i64: 576, 64>}, {pipeline_mode = #tpu.pipeline_mode<synchronous>, transform_indices = @transform_2, window_bounds = array<i64: 1, 64>}, {pipeline_mode = #tpu.pipeline_mode<synchronous>, transform_indices = @transform_3, window_bounds = array<i64: 576, 64>}, {pipeline_mode = #tpu.pipeline_mode<synchronous>, transform_indices = @transform_4, window_bounds = array<i64: 1, 64>}, {pipeline_mode = #tpu.pipeline_mode<synchronous>, transform_indices = @transform_5, window_bounds = array<i64: 576, 128>}, {pipeline_mode = #tpu.pipeline_mode<synchronous>, transform_indices = @transform_6, window_bounds = array<i64: 1, 128>}, {pipeline_mode = #tpu.pipeline_mode<synchronous>, transform_indices = @transform_7, window_bounds = array<i64: 576, 128>}, {pipeline_mode = #tpu.pipeline_mode<synchronous>, transform_indices = @transform_8, window_bounds = array<i64: 1, 128>}, {transform_indices = @transform_9, window_bounds = array<i64: 1, 256, 128>}]} {
    %cst = arith.constant 0.000000e+00 : bf16
    %0 = vector.broadcast %cst : bf16 to vector<3x48x64xbf16>
    %c0 = arith.constant 0 : index
    %c0_0 = arith.constant 0 : index
    %c0_1 = arith.constant 0 : index
    %1 = vector.load %arg11[%c0, %c0_0, %c0_1] : memref<22x48x64xbf16, #tpu.memory_space<vmem>>, vector<3x48x64xbf16>
    tpu.vector_store %arg11[%c0, %c0_0, %c0_1], %0 {strides = array<i32>} : memref<22x48x64xbf16, #tpu.memory_space<vmem>>, vector<3x48x64xbf16>,
    %cst_2 = arith.constant 0.000000e+00 : bf16
    %2 = vector.broadcast %cst_2 : bf16 to vector<3x48x64xbf16>
    %c19 = arith.constant 19 : index
    %c0_3 = arith.constant 0 : index
    %c0_4 = arith.constant 0 : index
    %3 = vector.load %arg11[%c19, %c0_3, %c0_4] : memref<22x48x64xbf16, #tpu.memory_space<vmem>>, vector<3x48x64xbf16>
    tpu.vector_store %arg11[%c19, %c0_3, %c0_4], %2 {strides = array<i32>} : memref<22x48x64xbf16, #tpu.memory_space<vmem>>, vector<3x48x64xbf16>,
    %cst_5 = arith.constant 0.000000e+00 : bf16
    %4 = vector.broadcast %cst_5 : bf16 to vector<16x16x64xbf16>
    %c3 = arith.constant 3 : index
    %c0_6 = arith.constant 0 : index
    %c0_7 = arith.constant 0 : index
    %5 = vector.load %arg11[%c3, %c0_6, %c0_7] : memref<22x48x64xbf16, #tpu.memory_space<vmem>>, vector<16x16x64xbf16>
    tpu.vector_store %arg11[%c3, %c0_6, %c0_7], %4 {strides = array<i32>} : memref<22x48x64xbf16, #tpu.memory_space<vmem>>, vector<16x16x64xbf16>,
    %cst_8 = arith.constant 0.000000e+00 : bf16
    %6 = vector.broadcast %cst_8 : bf16 to vector<16x16x64xbf16>
    %c3_9 = arith.constant 3 : index
    %c32 = arith.constant 32 : index
    %c0_10 = arith.constant 0 : index
    %7 = vector.load %arg11[%c3_9, %c32, %c0_10] : memref<22x48x64xbf16, #tpu.memory_space<vmem>>, vector<16x16x64xbf16>
    tpu.vector_store %arg11[%c3_9, %c32, %c0_10], %6 {strides = array<i32>} : memref<22x48x64xbf16, #tpu.memory_space<vmem>>, vector<16x16x64xbf16>,
    %c0_11 = arith.constant 0 : index
    %c0_12 = arith.constant 0 : index
    %c0_13 = arith.constant 0 : index
    %c0_14 = arith.constant 0 : index
    %8 = vector.load %arg1[%c0_11, %c0_12, %c0_13, %c0_14] : memref<1x16x16x64xbf16, #tpu.memory_space<vmem>>, vector<1x16x16x64xbf16>
    %9 = vector.shape_cast %8 : vector<1x16x16x64xbf16> to vector<16x16x64xbf16>
    %c3_15 = arith.constant 3 : index
    %c16 = arith.constant 16 : index
    %c0_16 = arith.constant 0 : index
    %10 = vector.load %arg11[%c3_15, %c16, %c0_16] : memref<22x48x64xbf16, #tpu.memory_space<vmem>>, vector<16x16x64xbf16>
    tpu.vector_store %arg11[%c3_15, %c16, %c0_16], %9 {strides = array<i32>} : memref<22x48x64xbf16, #tpu.memory_space<vmem>>, vector<16x16x64xbf16>,
    %cst_17 = arith.constant 0.000000e+00 : f32
    %11 = vector.broadcast %cst_17 : f32 to vector<256x64xf32>
    %c0_18 = arith.constant 0 : index
    %c13 = arith.constant 13 : index
    %c0_19 = arith.constant 0 : index
    %12 = vector.load %arg11[%c0_18, %c13, %c0_19] : memref<22x48x64xbf16, #tpu.memory_space<vmem>>, vector<16x16x64xbf16>
    %13 = vector.shape_cast %12 : vector<16x16x64xbf16> to vector<256x64xbf16>
    %c0_20 = arith.constant 0 : index
    %c16_21 = arith.constant 16 : index
    %c0_22 = arith.constant 0 : index
    %14 = vector.load %arg11[%c0_20, %c16_21, %c0_22] : memref<22x48x64xbf16, #tpu.memory_space<vmem>>, vector<16x16x64xbf16>
    %15 = vector.shape_cast %14 : vector<16x16x64xbf16> to vector<256x64xbf16>
    %c0_23 = arith.constant 0 : index
    %c19_24 = arith.constant 19 : index
    %c0_25 = arith.constant 0 : index
    %16 = vector.load %arg11[%c0_23, %c19_24, %c0_25] : memref<22x48x64xbf16, #tpu.memory_space<vmem>>, vector<16x16x64xbf16>
    %17 = vector.shape_cast %16 : vector<16x16x64xbf16> to vector<256x64xbf16>
    %18 = tpu.concatenate %13, %15, %17 in 1 : vector<256x64xbf16>, vector<256x64xbf16>, vector<256x64xbf16> -> vector<256x192xbf16>
    %c0_26 = arith.constant 0 : index
    %c0_27 = arith.constant 0 : index
    %19 = vector.load %arg2[%c0_26, %c0_27] : memref<576x64xbf16, #tpu.memory_space<vmem>>, vector<192x64xbf16>
    %cst_28 = arith.constant dense<0.000000e+00> : vector<256x64xf32>
    %20 = tpu.matmul %18, %19, %cst_28 {dimension_numbers = #tpu.dot_dimension_numbers<[1], [0], [0], [1], [0, 0, 1, 1], [], []>} : vector<256x192xbf16>, vector<192x64xbf16>, vector<256x64xf32> -> vector<256x64xf32>
    %21 = arith.addf %11, %20 : vector<256x64xf32>
    %c3_29 = arith.constant 3 : index
    %c13_30 = arith.constant 13 : index
    %c0_31 = arith.constant 0 : index
    %22 = vector.load %arg11[%c3_29, %c13_30, %c0_31] : memref<22x48x64xbf16, #tpu.memory_space<vmem>>, vector<16x16x64xbf16>
    %23 = vector.shape_cast %22 : vector<16x16x64xbf16> to vector<256x64xbf16>
    %c3_32 = arith.constant 3 : index
    %c16_33 = arith.constant 16 : index
    %c0_34 = arith.constant 0 : index
    %24 = vector.load %arg11[%c3_32, %c16_33, %c0_34] : memref<22x48x64xbf16, #tpu.memory_space<vmem>>, vector<16x16x64xbf16>
    %25 = vector.shape_cast %24 : vector<16x16x64xbf16> to vector<256x64xbf16>
    %c3_35 = arith.constant 3 : index
    %c19_36 = arith.constant 19 : index
    %c0_37 = arith.constant 0 : index
    %26 = vector.load %arg11[%c3_35, %c19_36, %c0_37] : memref<22x48x64xbf16, #tpu.memory_space<vmem>>, vector<16x16x64xbf16>
    %27 = vector.shape_cast %26 : vector<16x16x64xbf16> to vector<256x64xbf16>
    %28 = tpu.concatenate %23, %25, %27 in 1 : vector<256x64xbf16>, vector<256x64xbf16>, vector<256x64xbf16> -> vector<256x192xbf16>
    %c192 = arith.constant 192 : index
    %c0_38 = arith.constant 0 : index
    %29 = vector.load %arg2[%c192, %c0_38] : memref<576x64xbf16, #tpu.memory_space<vmem>>, vector<192x64xbf16>
    %cst_39 = arith.constant dense<0.000000e+00> : vector<256x64xf32>
    %30 = tpu.matmul %28, %29, %cst_39 {dimension_numbers = #tpu.dot_dimension_numbers<[1], [0], [0], [1], [0, 0, 1, 1], [], []>} : vector<256x192xbf16>, vector<192x64xbf16>, vector<256x64xf32> -> vector<256x64xf32>
    %31 = arith.addf %21, %30 : vector<256x64xf32>
    %c6 = arith.constant 6 : index
    %c13_40 = arith.constant 13 : index
    %c0_41 = arith.constant 0 : index
    %32 = vector.load %arg11[%c6, %c13_40, %c0_41] : memref<22x48x64xbf16, #tpu.memory_space<vmem>>, vector<16x16x64xbf16>
    %33 = vector.shape_cast %32 : vector<16x16x64xbf16> to vector<256x64xbf16>
    %c6_42 = arith.constant 6 : index
    %c16_43 = arith.constant 16 : index
    %c0_44 = arith.constant 0 : index
    %34 = vector.load %arg11[%c6_42, %c16_43, %c0_44] : memref<22x48x64xbf16, #tpu.memory_space<vmem>>, vector<16x16x64xbf16>
    %35 = vector.shape_cast %34 : vector<16x16x64xbf16> to vector<256x64xbf16>
    %c6_45 = arith.constant 6 : index
    %c19_46 = arith.constant 19 : index
    %c0_47 = arith.constant 0 : index
    %36 = vector.load %arg11[%c6_45, %c19_46, %c0_47] : memref<22x48x64xbf16, #tpu.memory_space<vmem>>, vector<16x16x64xbf16>
    %37 = vector.shape_cast %36 : vector<16x16x64xbf16> to vector<256x64xbf16>
    %38 = tpu.concatenate %33, %35, %37 in 1 : vector<256x64xbf16>, vector<256x64xbf16>, vector<256x64xbf16> -> vector<256x192xbf16>
    %c384 = arith.constant 384 : index
    %c0_48 = arith.constant 0 : index
    %39 = vector.load %arg2[%c384, %c0_48] : memref<576x64xbf16, #tpu.memory_space<vmem>>, vector<192x64xbf16>
    %cst_49 = arith.constant dense<0.000000e+00> : vector<256x64xf32>
    %40 = tpu.matmul %38, %39, %cst_49 {dimension_numbers = #tpu.dot_dimension_numbers<[1], [0], [0], [1], [0, 0, 1, 1], [], []>} : vector<256x192xbf16>, vector<192x64xbf16>, vector<256x64xf32> -> vector<256x64xf32>
    %41 = arith.addf %31, %40 : vector<256x64xf32>
    %c0_50 = arith.constant 0 : index
    %c0_51 = arith.constant 0 : index
    %42 = vector.load %arg3[%c0_50, %c0_51] : memref<1x64xf32, #tpu.memory_space<vmem>>, vector<1x64xf32>
    %43 = vector.broadcast %42 : vector<1x64xf32> to vector<256x64xf32>
    %44 = arith.addf %41, %43 : vector<256x64xf32>
    %cst_52 = arith.constant 0.000000e+00 : f32
    %45 = vector.broadcast %cst_52 : f32 to vector<256x64xf32>
    %46 = arith.maximumf %44, %45 : vector<256x64xf32>
    %47 = vector.shape_cast %46 : vector<256x64xf32> to vector<16x16x64xf32>
    %48 = arith.truncf %47 : vector<16x16x64xf32> to vector<16x16x64xbf16>
    %c3_53 = arith.constant 3 : index
    %c16_54 = arith.constant 16 : index
    %c0_55 = arith.constant 0 : index
    %49 = vector.load %arg11[%c3_53, %c16_54, %c0_55] : memref<22x48x64xbf16, #tpu.memory_space<vmem>>, vector<16x16x64xbf16>
    tpu.vector_store %arg11[%c3_53, %c16_54, %c0_55], %48 {strides = array<i32>} : memref<22x48x64xbf16, #tpu.memory_space<vmem>>, vector<16x16x64xbf16>,
    %cst_56 = arith.constant 0.000000e+00 : f32
    %50 = vector.broadcast %cst_56 : f32 to vector<256x64xf32>
    %c1 = arith.constant 1 : index
    %c14 = arith.constant 14 : index
    %c0_57 = arith.constant 0 : index
    %51 = vector.load %arg11[%c1, %c14, %c0_57] : memref<22x48x64xbf16, #tpu.memory_space<vmem>>, vector<16x16x64xbf16>
    %52 = vector.shape_cast %51 : vector<16x16x64xbf16> to vector<256x64xbf16>
    %c1_58 = arith.constant 1 : index
    %c16_59 = arith.constant 16 : index
    %c0_60 = arith.constant 0 : index
    %53 = vector.load %arg11[%c1_58, %c16_59, %c0_60] : memref<22x48x64xbf16, #tpu.memory_space<vmem>>, vector<16x16x64xbf16>
    %54 = vector.shape_cast %53 : vector<16x16x64xbf16> to vector<256x64xbf16>
    %c1_61 = arith.constant 1 : index
    %c18 = arith.constant 18 : index
    %c0_62 = arith.constant 0 : index
    %55 = vector.load %arg11[%c1_61, %c18, %c0_62] : memref<22x48x64xbf16, #tpu.memory_space<vmem>>, vector<16x16x64xbf16>
    %56 = vector.shape_cast %55 : vector<16x16x64xbf16> to vector<256x64xbf16>
    %57 = tpu.concatenate %52, %54, %56 in 1 : vector<256x64xbf16>, vector<256x64xbf16>, vector<256x64xbf16> -> vector<256x192xbf16>
    %c0_63 = arith.constant 0 : index
    %c0_64 = arith.constant 0 : index
    %58 = vector.load %arg4[%c0_63, %c0_64] : memref<576x64xbf16, #tpu.memory_space<vmem>>, vector<192x64xbf16>
    %cst_65 = arith.constant dense<0.000000e+00> : vector<256x64xf32>
    %59 = tpu.matmul %57, %58, %cst_65 {dimension_numbers = #tpu.dot_dimension_numbers<[1], [0], [0], [1], [0, 0, 1, 1], [], []>} : vector<256x192xbf16>, vector<192x64xbf16>, vector<256x64xf32> -> vector<256x64xf32>
    %60 = arith.addf %50, %59 : vector<256x64xf32>
    %c3_66 = arith.constant 3 : index
    %c14_67 = arith.constant 14 : index
    %c0_68 = arith.constant 0 : index
    %61 = vector.load %arg11[%c3_66, %c14_67, %c0_68] : memref<22x48x64xbf16, #tpu.memory_space<vmem>>, vector<16x16x64xbf16>
    %62 = vector.shape_cast %61 : vector<16x16x64xbf16> to vector<256x64xbf16>
    %c3_69 = arith.constant 3 : index
    %c16_70 = arith.constant 16 : index
    %c0_71 = arith.constant 0 : index
    %63 = vector.load %arg11[%c3_69, %c16_70, %c0_71] : memref<22x48x64xbf16, #tpu.memory_space<vmem>>, vector<16x16x64xbf16>
    %64 = vector.shape_cast %63 : vector<16x16x64xbf16> to vector<256x64xbf16>
    %c3_72 = arith.constant 3 : index
    %c18_73 = arith.constant 18 : index
    %c0_74 = arith.constant 0 : index
    %65 = vector.load %arg11[%c3_72, %c18_73, %c0_74] : memref<22x48x64xbf16, #tpu.memory_space<vmem>>, vector<16x16x64xbf16>
    %66 = vector.shape_cast %65 : vector<16x16x64xbf16> to vector<256x64xbf16>
    %67 = tpu.concatenate %62, %64, %66 in 1 : vector<256x64xbf16>, vector<256x64xbf16>, vector<256x64xbf16> -> vector<256x192xbf16>
    %c192_75 = arith.constant 192 : index
    %c0_76 = arith.constant 0 : index
    %68 = vector.load %arg4[%c192_75, %c0_76] : memref<576x64xbf16, #tpu.memory_space<vmem>>, vector<192x64xbf16>
    %cst_77 = arith.constant dense<0.000000e+00> : vector<256x64xf32>
    %69 = tpu.matmul %67, %68, %cst_77 {dimension_numbers = #tpu.dot_dimension_numbers<[1], [0], [0], [1], [0, 0, 1, 1], [], []>} : vector<256x192xbf16>, vector<192x64xbf16>, vector<256x64xf32> -> vector<256x64xf32>
    %70 = arith.addf %60, %69 : vector<256x64xf32>
    %c5 = arith.constant 5 : index
    %c14_78 = arith.constant 14 : index
    %c0_79 = arith.constant 0 : index
    %71 = vector.load %arg11[%c5, %c14_78, %c0_79] : memref<22x48x64xbf16, #tpu.memory_space<vmem>>, vector<16x16x64xbf16>
    %72 = vector.shape_cast %71 : vector<16x16x64xbf16> to vector<256x64xbf16>
    %c5_80 = arith.constant 5 : index
    %c16_81 = arith.constant 16 : index
    %c0_82 = arith.constant 0 : index
    %73 = vector.load %arg11[%c5_80, %c16_81, %c0_82] : memref<22x48x64xbf16, #tpu.memory_space<vmem>>, vector<16x16x64xbf16>
    %74 = vector.shape_cast %73 : vector<16x16x64xbf16> to vector<256x64xbf16>
    %c5_83 = arith.constant 5 : index
    %c18_84 = arith.constant 18 : index
    %c0_85 = arith.constant 0 : index
    %75 = vector.load %arg11[%c5_83, %c18_84, %c0_85] : memref<22x48x64xbf16, #tpu.memory_space<vmem>>, vector<16x16x64xbf16>
    %76 = vector.shape_cast %75 : vector<16x16x64xbf16> to vector<256x64xbf16>
    %77 = tpu.concatenate %72, %74, %76 in 1 : vector<256x64xbf16>, vector<256x64xbf16>, vector<256x64xbf16> -> vector<256x192xbf16>
    %c384_86 = arith.constant 384 : index
    %c0_87 = arith.constant 0 : index
    %78 = vector.load %arg4[%c384_86, %c0_87] : memref<576x64xbf16, #tpu.memory_space<vmem>>, vector<192x64xbf16>
    %cst_88 = arith.constant dense<0.000000e+00> : vector<256x64xf32>
    %79 = tpu.matmul %77, %78, %cst_88 {dimension_numbers = #tpu.dot_dimension_numbers<[1], [0], [0], [1], [0, 0, 1, 1], [], []>} : vector<256x192xbf16>, vector<192x64xbf16>, vector<256x64xf32> -> vector<256x64xf32>
    %80 = arith.addf %70, %79 : vector<256x64xf32>
    %c0_89 = arith.constant 0 : index
    %c0_90 = arith.constant 0 : index
    %81 = vector.load %arg5[%c0_89, %c0_90] : memref<1x64xf32, #tpu.memory_space<vmem>>, vector<1x64xf32>
    %82 = vector.broadcast %81 : vector<1x64xf32> to vector<256x64xf32>
    %83 = arith.addf %80, %82 : vector<256x64xf32>
    %cst_91 = arith.constant 0.000000e+00 : f32
    %84 = vector.broadcast %cst_91 : f32 to vector<256x64xf32>
    %85 = arith.maximumf %83, %84 : vector<256x64xf32>
    %86 = vector.shape_cast %85 : vector<256x64xf32> to vector<16x16x64xf32>
    %87 = arith.truncf %86 : vector<16x16x64xf32> to vector<16x16x64xbf16>
    %c3_92 = arith.constant 3 : index
    %c16_93 = arith.constant 16 : index
    %c0_94 = arith.constant 0 : index
    %88 = vector.load %arg11[%c3_92, %c16_93, %c0_94] : memref<22x48x64xbf16, #tpu.memory_space<vmem>>, vector<16x16x64xbf16>
    tpu.vector_store %arg11[%c3_92, %c16_93, %c0_94], %87 {strides = array<i32>} : memref<22x48x64xbf16, #tpu.memory_space<vmem>>, vector<16x16x64xbf16>,
    %cst_95 = arith.constant 0.000000e+00 : f32
    %89 = vector.broadcast %cst_95 : f32 to vector<256x128xf32>
    %c2 = arith.constant 2 : index
    %c15 = arith.constant 15 : index
    %c0_96 = arith.constant 0 : index
    %90 = vector.load %arg11[%c2, %c15, %c0_96] : memref<22x48x64xbf16, #tpu.memory_space<vmem>>, vector<16x16x64xbf16>
    %91 = vector.shape_cast %90 : vector<16x16x64xbf16> to vector<256x64xbf16>
    %c2_97 = arith.constant 2 : index
    %c16_98 = arith.constant 16 : index
    %c0_99 = arith.constant 0 : index
    %92 = vector.load %arg11[%c2_97, %c16_98, %c0_99] : memref<22x48x64xbf16, #tpu.memory_space<vmem>>, vector<16x16x64xbf16>
    %93 = vector.shape_cast %92 : vector<16x16x64xbf16> to vector<256x64xbf16>
    %c2_100 = arith.constant 2 : index
    %c17 = arith.constant 17 : index
    %c0_101 = arith.constant 0 : index
    %94 = vector.load %arg11[%c2_100, %c17, %c0_101] : memref<22x48x64xbf16, #tpu.memory_space<vmem>>, vector<16x16x64xbf16>
    %95 = vector.shape_cast %94 : vector<16x16x64xbf16> to vector<256x64xbf16>
    %96 = tpu.concatenate %91, %93, %95 in 1 : vector<256x64xbf16>, vector<256x64xbf16>, vector<256x64xbf16> -> vector<256x192xbf16>
    %c0_102 = arith.constant 0 : index
    %c0_103 = arith.constant 0 : index
    %97 = vector.load %arg6[%c0_102, %c0_103] : memref<576x128xbf16, #tpu.memory_space<vmem>>, vector<192x128xbf16>
    %cst_104 = arith.constant dense<0.000000e+00> : vector<256x128xf32>
    %98 = tpu.matmul %96, %97, %cst_104 {dimension_numbers = #tpu.dot_dimension_numbers<[1], [0], [0], [1], [0, 0, 1, 1], [], []>} : vector<256x192xbf16>, vector<192x128xbf16>, vector<256x128xf32> -> vector<256x128xf32>
    %99 = arith.addf %89, %98 : vector<256x128xf32>
    %c3_105 = arith.constant 3 : index
    %c15_106 = arith.constant 15 : index
    %c0_107 = arith.constant 0 : index
    %100 = vector.load %arg11[%c3_105, %c15_106, %c0_107] : memref<22x48x64xbf16, #tpu.memory_space<vmem>>, vector<16x16x64xbf16>
    %101 = vector.shape_cast %100 : vector<16x16x64xbf16> to vector<256x64xbf16>
    %c3_108 = arith.constant 3 : index
    %c16_109 = arith.constant 16 : index
    %c0_110 = arith.constant 0 : index
    %102 = vector.load %arg11[%c3_108, %c16_109, %c0_110] : memref<22x48x64xbf16, #tpu.memory_space<vmem>>, vector<16x16x64xbf16>
    %103 = vector.shape_cast %102 : vector<16x16x64xbf16> to vector<256x64xbf16>
    %c3_111 = arith.constant 3 : index
    %c17_112 = arith.constant 17 : index
    %c0_113 = arith.constant 0 : index
    %104 = vector.load %arg11[%c3_111, %c17_112, %c0_113] : memref<22x48x64xbf16, #tpu.memory_space<vmem>>, vector<16x16x64xbf16>
    %105 = vector.shape_cast %104 : vector<16x16x64xbf16> to vector<256x64xbf16>
    %106 = tpu.concatenate %101, %103, %105 in 1 : vector<256x64xbf16>, vector<256x64xbf16>, vector<256x64xbf16> -> vector<256x192xbf16>
    %c192_114 = arith.constant 192 : index
    %c0_115 = arith.constant 0 : index
    %107 = vector.load %arg6[%c192_114, %c0_115] : memref<576x128xbf16, #tpu.memory_space<vmem>>, vector<192x128xbf16>
    %cst_116 = arith.constant dense<0.000000e+00> : vector<256x128xf32>
    %108 = tpu.matmul %106, %107, %cst_116 {dimension_numbers = #tpu.dot_dimension_numbers<[1], [0], [0], [1], [0, 0, 1, 1], [], []>} : vector<256x192xbf16>, vector<192x128xbf16>, vector<256x128xf32> -> vector<256x128xf32>
    %109 = arith.addf %99, %108 : vector<256x128xf32>
    %c4 = arith.constant 4 : index
    %c15_117 = arith.constant 15 : index
    %c0_118 = arith.constant 0 : index
    %110 = vector.load %arg11[%c4, %c15_117, %c0_118] : memref<22x48x64xbf16, #tpu.memory_space<vmem>>, vector<16x16x64xbf16>
    %111 = vector.shape_cast %110 : vector<16x16x64xbf16> to vector<256x64xbf16>
    %c4_119 = arith.constant 4 : index
    %c16_120 = arith.constant 16 : index
    %c0_121 = arith.constant 0 : index
    %112 = vector.load %arg11[%c4_119, %c16_120, %c0_121] : memref<22x48x64xbf16, #tpu.memory_space<vmem>>, vector<16x16x64xbf16>
    %113 = vector.shape_cast %112 : vector<16x16x64xbf16> to vector<256x64xbf16>
    %c4_122 = arith.constant 4 : index
    %c17_123 = arith.constant 17 : index
    %c0_124 = arith.constant 0 : index
    %114 = vector.load %arg11[%c4_122, %c17_123, %c0_124] : memref<22x48x64xbf16, #tpu.memory_space<vmem>>, vector<16x16x64xbf16>
    %115 = vector.shape_cast %114 : vector<16x16x64xbf16> to vector<256x64xbf16>
    %116 = tpu.concatenate %111, %113, %115 in 1 : vector<256x64xbf16>, vector<256x64xbf16>, vector<256x64xbf16> -> vector<256x192xbf16>
    %c384_125 = arith.constant 384 : index
    %c0_126 = arith.constant 0 : index
    %117 = vector.load %arg6[%c384_125, %c0_126] : memref<576x128xbf16, #tpu.memory_space<vmem>>, vector<192x128xbf16>
    %cst_127 = arith.constant dense<0.000000e+00> : vector<256x128xf32>
    %118 = tpu.matmul %116, %117, %cst_127 {dimension_numbers = #tpu.dot_dimension_numbers<[1], [0], [0], [1], [0, 0, 1, 1], [], []>} : vector<256x192xbf16>, vector<192x128xbf16>, vector<256x128xf32> -> vector<256x128xf32>
    %119 = arith.addf %109, %118 : vector<256x128xf32>
    %c0_128 = arith.constant 0 : index
    %c0_129 = arith.constant 0 : index
    %120 = vector.load %arg7[%c0_128, %c0_129] : memref<1x128xf32, #tpu.memory_space<vmem>>, vector<1x128xf32>
    %121 = vector.broadcast %120 : vector<1x128xf32> to vector<256x128xf32>
    %122 = arith.addf %119, %121 : vector<256x128xf32>
    %123 = vector.extract_strided_slice %122 {offsets = [0, 0], sizes = [256, 64], strides = [1, 1]} : vector<256x128xf32> to vector<256x64xf32>
    %cst_130 = arith.constant 0.000000e+00 : f32
    %124 = vector.broadcast %cst_130 : f32 to vector<256x64xf32>
    %125 = arith.subf %124, %123 : vector<256x64xf32>
    %126 = math.exp %125 : vector<256x64xf32>
    %cst_131 = arith.constant 1.000000e+00 : f32
    %127 = vector.broadcast %cst_131 : f32 to vector<256x64xf32>
    %128 = arith.addf %127, %126 : vector<256x64xf32>
    %129 = tpu.reciprocal %128 {approx = true} : vector<256x64xf32> -> vector<256x64xf32>
    %130 = vector.extract_strided_slice %122 {offsets = [0, 64], sizes = [256, 64], strides = [1, 1]} : vector<256x128xf32> to vector<256x64xf32>
    %131 = math.tanh %130 : vector<256x64xf32>
    %132 = arith.mulf %129, %131 : vector<256x64xf32>
    %133 = vector.shape_cast %132 : vector<256x64xf32> to vector<16x16x64xf32>
    %134 = arith.truncf %133 : vector<16x16x64xf32> to vector<16x16x64xbf16>
    %c3_132 = arith.constant 3 : index
    %c16_133 = arith.constant 16 : index
    %c0_134 = arith.constant 0 : index
    %135 = vector.load %arg11[%c3_132, %c16_133, %c0_134] : memref<22x48x64xbf16, #tpu.memory_space<vmem>>, vector<16x16x64xbf16>
    tpu.vector_store %arg11[%c3_132, %c16_133, %c0_134], %134 {strides = array<i32>} : memref<22x48x64xbf16, #tpu.memory_space<vmem>>, vector<16x16x64xbf16>,
    %cst_135 = arith.constant 0.000000e+00 : f32
    %136 = vector.broadcast %cst_135 : f32 to vector<256x128xf32>
    %c2_136 = arith.constant 2 : index
    %c15_137 = arith.constant 15 : index
    %c0_138 = arith.constant 0 : index
    %137 = vector.load %arg11[%c2_136, %c15_137, %c0_138] : memref<22x48x64xbf16, #tpu.memory_space<vmem>>, vector<16x16x64xbf16>
    %138 = vector.shape_cast %137 : vector<16x16x64xbf16> to vector<256x64xbf16>
    %c2_139 = arith.constant 2 : index
    %c16_140 = arith.constant 16 : index
    %c0_141 = arith.constant 0 : index
    %139 = vector.load %arg11[%c2_139, %c16_140, %c0_141] : memref<22x48x64xbf16, #tpu.memory_space<vmem>>, vector<16x16x64xbf16>
    %140 = vector.shape_cast %139 : vector<16x16x64xbf16> to vector<256x64xbf16>
    %c2_142 = arith.constant 2 : index
    %c17_143 = arith.constant 17 : index
    %c0_144 = arith.constant 0 : index
    %141 = vector.load %arg11[%c2_142, %c17_143, %c0_144] : memref<22x48x64xbf16, #tpu.memory_space<vmem>>, vector<16x16x64xbf16>
    %142 = vector.shape_cast %141 : vector<16x16x64xbf16> to vector<256x64xbf16>
    %143 = tpu.concatenate %138, %140, %142 in 1 : vector<256x64xbf16>, vector<256x64xbf16>, vector<256x64xbf16> -> vector<256x192xbf16>
    %c0_145 = arith.constant 0 : index
    %c0_146 = arith.constant 0 : index
    %144 = vector.load %arg8[%c0_145, %c0_146] : memref<576x128xbf16, #tpu.memory_space<vmem>>, vector<192x128xbf16>
    %cst_147 = arith.constant dense<0.000000e+00> : vector<256x128xf32>
    %145 = tpu.matmul %143, %144, %cst_147 {dimension_numbers = #tpu.dot_dimension_numbers<[1], [0], [0], [1], [0, 0, 1, 1], [], []>} : vector<256x192xbf16>, vector<192x128xbf16>, vector<256x128xf32> -> vector<256x128xf32>
    %146 = arith.addf %136, %145 : vector<256x128xf32>
    %c3_148 = arith.constant 3 : index
    %c15_149 = arith.constant 15 : index
    %c0_150 = arith.constant 0 : index
    %147 = vector.load %arg11[%c3_148, %c15_149, %c0_150] : memref<22x48x64xbf16, #tpu.memory_space<vmem>>, vector<16x16x64xbf16>
    %148 = vector.shape_cast %147 : vector<16x16x64xbf16> to vector<256x64xbf16>
    %c3_151 = arith.constant 3 : index
    %c16_152 = arith.constant 16 : index
    %c0_153 = arith.constant 0 : index
    %149 = vector.load %arg11[%c3_151, %c16_152, %c0_153] : memref<22x48x64xbf16, #tpu.memory_space<vmem>>, vector<16x16x64xbf16>
    %150 = vector.shape_cast %149 : vector<16x16x64xbf16> to vector<256x64xbf16>
    %c3_154 = arith.constant 3 : index
    %c17_155 = arith.constant 17 : index
    %c0_156 = arith.constant 0 : index
    %151 = vector.load %arg11[%c3_154, %c17_155, %c0_156] : memref<22x48x64xbf16, #tpu.memory_space<vmem>>, vector<16x16x64xbf16>
    %152 = vector.shape_cast %151 : vector<16x16x64xbf16> to vector<256x64xbf16>
    %153 = tpu.concatenate %148, %150, %152 in 1 : vector<256x64xbf16>, vector<256x64xbf16>, vector<256x64xbf16> -> vector<256x192xbf16>
    %c192_157 = arith.constant 192 : index
    %c0_158 = arith.constant 0 : index
    %154 = vector.load %arg8[%c192_157, %c0_158] : memref<576x128xbf16, #tpu.memory_space<vmem>>, vector<192x128xbf16>
    %cst_159 = arith.constant dense<0.000000e+00> : vector<256x128xf32>
    %155 = tpu.matmul %153, %154, %cst_159 {dimension_numbers = #tpu.dot_dimension_numbers<[1], [0], [0], [1], [0, 0, 1, 1], [], []>} : vector<256x192xbf16>, vector<192x128xbf16>, vector<256x128xf32> -> vector<256x128xf32>
    %156 = arith.addf %146, %155 : vector<256x128xf32>
    %c4_160 = arith.constant 4 : index
    %c15_161 = arith.constant 15 : index
    %c0_162 = arith.constant 0 : index
    %157 = vector.load %arg11[%c4_160, %c15_161, %c0_162] : memref<22x48x64xbf16, #tpu.memory_space<vmem>>, vector<16x16x64xbf16>
    %158 = vector.shape_cast %157 : vector<16x16x64xbf16> to vector<256x64xbf16>
    %c4_163 = arith.constant 4 : index
    %c16_164 = arith.constant 16 : index
    %c0_165 = arith.constant 0 : index
    %159 = vector.load %arg11[%c4_163, %c16_164, %c0_165] : memref<22x48x64xbf16, #tpu.memory_space<vmem>>, vector<16x16x64xbf16>
    %160 = vector.shape_cast %159 : vector<16x16x64xbf16> to vector<256x64xbf16>
    %c4_166 = arith.constant 4 : index
    %c17_167 = arith.constant 17 : index
    %c0_168 = arith.constant 0 : index
    %161 = vector.load %arg11[%c4_166, %c17_167, %c0_168] : memref<22x48x64xbf16, #tpu.memory_space<vmem>>, vector<16x16x64xbf16>
    %162 = vector.shape_cast %161 : vector<16x16x64xbf16> to vector<256x64xbf16>
    %163 = tpu.concatenate %158, %160, %162 in 1 : vector<256x64xbf16>, vector<256x64xbf16>, vector<256x64xbf16> -> vector<256x192xbf16>
    %c384_169 = arith.constant 384 : index
    %c0_170 = arith.constant 0 : index
    %164 = vector.load %arg8[%c384_169, %c0_170] : memref<576x128xbf16, #tpu.memory_space<vmem>>, vector<192x128xbf16>
    %cst_171 = arith.constant dense<0.000000e+00> : vector<256x128xf32>
    %165 = tpu.matmul %163, %164, %cst_171 {dimension_numbers = #tpu.dot_dimension_numbers<[1], [0], [0], [1], [0, 0, 1, 1], [], []>} : vector<256x192xbf16>, vector<192x128xbf16>, vector<256x128xf32> -> vector<256x128xf32>
    %166 = arith.addf %156, %165 : vector<256x128xf32>
    %c0_172 = arith.constant 0 : index
    %c0_173 = arith.constant 0 : index
    %167 = vector.load %arg9[%c0_172, %c0_173] : memref<1x128xf32, #tpu.memory_space<vmem>>, vector<1x128xf32>
    %168 = vector.broadcast %167 : vector<1x128xf32> to vector<256x128xf32>
    %169 = arith.addf %166, %168 : vector<256x128xf32>
    %cst_174 = arith.constant dense<0xFF800000> : vector<256xf32>
    %170 = vector.multi_reduction <maximumf>, %169, %cst_174 [1] : vector<256x128xf32> to vector<256xf32>
    %171 = vector.shape_cast %170 : vector<256xf32> to vector<256x1xf32>
    %172 = vector.broadcast %171 : vector<256x1xf32> to vector<256x128xf32>
    %173 = arith.subf %169, %172 : vector<256x128xf32>
    %174 = math.exp %173 : vector<256x128xf32>
    %cst_175 = arith.constant dense<0.000000e+00> : vector<256xf32>
    %175 = vector.multi_reduction <add>, %174, %cst_175 [1] : vector<256x128xf32> to vector<256xf32>
    %176 = vector.shape_cast %175 : vector<256xf32> to vector<256x1xf32>
    %177 = vector.broadcast %176 : vector<256x1xf32> to vector<256x128xf32>
    %178 = arith.divf %174, %177 : vector<256x128xf32>
    %c0_176 = arith.constant 0 : index
    %c0_177 = arith.constant 0 : index
    %c0_178 = arith.constant 0 : index
    %179 = vector.load %arg10[%c0_176, %c0_177, %c0_178] : memref<1x256x128xf32, #tpu.memory_space<vmem>>, vector<1x256x128xf32>
    %180 = vector.shape_cast %179 : vector<1x256x128xf32> to vector<256x128xf32>
    %181 = vector.shape_cast %178 : vector<256x128xf32> to vector<1x256x128xf32>
    tpu.vector_store %arg10[%c0_176, %c0_177, %c0_178], %181 {strides = array<i32>} : memref<1x256x128xf32, #tpu.memory_space<vmem>>, vector<1x256x128xf32>,
    return
  }
  func.func @transform_0(%arg0: i32) -> (i32, i32, i32, i32) {
    %c0_i32 = arith.constant 0 : i32
    %c0_i32_0 = arith.constant 0 : i32
    %c0_i32_1 = arith.constant 0 : i32
    %c0_i32_2 = arith.constant 0 : i32
    return %arg0, %c0_i32, %c0_i32_0, %c0_i32_1 : i32, i32, i32, i32
  }
  func.func @transform_1(%arg0: i32) -> (i32, i32) {
    %c0_i32 = arith.constant 0 : i32
    %c0_i32_0 = arith.constant 0 : i32
    %c0_i32_1 = arith.constant 0 : i32
    return %c0_i32, %c0_i32_0 : i32, i32
  }
  func.func @transform_2(%arg0: i32) -> (i32, i32) {
    %c0_i32 = arith.constant 0 : i32
    %c0_i32_0 = arith.constant 0 : i32
    %c0_i32_1 = arith.constant 0 : i32
    return %c0_i32, %c0_i32_0 : i32, i32
  }
  func.func @transform_3(%arg0: i32) -> (i32, i32) {
    %c0_i32 = arith.constant 0 : i32
    %c0_i32_0 = arith.constant 0 : i32
    %c0_i32_1 = arith.constant 0 : i32
    return %c0_i32, %c0_i32_0 : i32, i32
  }
  func.func @transform_4(%arg0: i32) -> (i32, i32) {
    %c0_i32 = arith.constant 0 : i32
    %c0_i32_0 = arith.constant 0 : i32
    %c0_i32_1 = arith.constant 0 : i32
    return %c0_i32, %c0_i32_0 : i32, i32
  }
  func.func @transform_5(%arg0: i32) -> (i32, i32) {
    %c0_i32 = arith.constant 0 : i32
    %c0_i32_0 = arith.constant 0 : i32
    %c0_i32_1 = arith.constant 0 : i32
    return %c0_i32, %c0_i32_0 : i32, i32
  }
  func.func @transform_6(%arg0: i32) -> (i32, i32) {
    %c0_i32 = arith.constant 0 : i32
    %c0_i32_0 = arith.constant 0 : i32
    %c0_i32_1 = arith.constant 0 : i32
    return %c0_i32, %c0_i32_0 : i32, i32
  }
  func.func @transform_7(%arg0: i32) -> (i32, i32) {
    %c0_i32 = arith.constant 0 : i32
    %c0_i32_0 = arith.constant 0 : i32
    %c0_i32_1 = arith.constant 0 : i32
    return %c0_i32, %c0_i32_0 : i32, i32
  }
  func.func @transform_8(%arg0: i32) -> (i32, i32) {
    %c0_i32 = arith.constant 0 : i32
    %c0_i32_0 = arith.constant 0 : i32
    %c0_i32_1 = arith.constant 0 : i32
    return %c0_i32, %c0_i32_0 : i32, i32
  }
  func.func @transform_9(%arg0: i32) -> (i32, i32, i32) {
    %c0_i32 = arith.constant 0 : i32
    %c0_i32_0 = arith.constant 0 : i32
    %c0_i32_1 = arith.constant 0 : i32
    return %arg0, %c0_i32, %c0_i32_0 : i32, i32, i32
  }
}

</mosaic_0001>

<bundles_post_ra>
// kernel: policy_net_forward.1
= control target key start
LH: loop header
LB: loop body
LE: loop exit
PB: predicated region body
PF: predicated region fallthrough
CT: control target
= control target key end

     0   :  { %s12344_s30 = smov 0   ;;  %s16449_s0 = inlined_call_operand.vmem [shape: bf16[2,16,16,64], index: 0, kind: input, shape index: {}]   ;;  %s16450_s1 = inlined_call_operand.vmem [shape: bf16[576,64], index: 1, kind: input, shape index: {}]   ;;  %s16451_s2 = inlined_call_operand.vmem [shape: f32[1,64], index: 2, kind: input, shape index: {}]   ;;  %s16452_s3 = inlined_call_operand.vmem [shape: bf16[576,64], index: 3, kind: input, shape index: {}]   ;;  %s16453_s4 = inlined_call_operand.vmem [shape: f32[1,64], index: 4, kind: input, shape index: {}]   ;;  %s16454_s5 = inlined_call_operand.vmem [shape: bf16[576,128], index: 5, kind: input, shape index: {}]   ;;  %s16455_s6 = inlined_call_operand.vmem [shape: f32[1,128], index: 6, kind: input, shape index: {}]   ;;  %s16456_s7 = inlined_call_operand.vmem [shape: bf16[576,128], index: 7, kind: input, shape index: {}]   ;;  %s16457_s8 = inlined_call_operand.vmem [shape: f32[1,128], index: 8, kind: input, shape index: {}]   ;;  %s16458_s9 = inlined_call_operand.vmem [shape: f32[2,256,128], index: 9, kind: output, shape index: {}]  }
   0x1 LB: > { %s11421_s10 = sadd.s32 4294967295, %s12290_s30   ;;  %p11425_p0 = scmp.ge.s32.totalorder %s12290_s30, 1  ;;  %s12290_s30 = sphi %s12344_s30, %s19_s30  }
   0x2   : > { %p287_p1 = scmp.lt.s32.totalorder %s12290_s30, 3 }
   0x4   : > { %p288_p2 = pnand %p11425_p0, %p287_p1 }
   0x6   : > { %291 = sbr.rel (%p288_p2) target bundleno = 2549 (0x9f5), region = 56 }
   0xd   : > { %p12354_p3 = scmp.lt.s32.totalorder %s11421_s10, 1  ;;  %vm334_vm0 = vcmask 523264   ;;  %v16459_v0 = vmov 0   ;;  %v11812_v1 = vld [vmem:[%s16450_s1 + $0x60] sm:$0xff]   ;;  %v11813_v2 = vld [vmem:[%s16450_s1 + $0x68] sm:$0xff]   ;;  %v11815_v3 = vld [vmem:[%s16450_s1 + $0x70] sm:$0xff]  }
   0xe   : > { %336 = vst.msk [vmem:[#allocation2 + $0x8] sm:$0xff] %vm334_vm0, %v16459_v0  ;;  %335 = vst.msk [vmem:[#allocation2] sm:$0xff] %vm334_vm0, %v16459_v0  ;;  %2173 = vmatprep.subr.bf16.mxu0 %v16459_v0  ;;  %2454 = vmatprep.subr.bf16.mxu1 %v16459_v0  ;;  %v11816_v8 = vld [vmem:[%s16450_s1 + $0x78] sm:$0xff]   ;;  %v11817_v13 = vld [vmem:[%s16450_s1 + $0x80] sm:$0xff]   ;;  %s12293_s26 = smov 64   ;;  %vm3986_vm3 = vcmask 1046528  }
   0xf   : > { %337 = vst.msk [vmem:[#allocation2 + $0x10] sm:$0xff] %vm334_vm0, %v16459_v0  ;;  %338 = vst.msk [vmem:[#allocation2 + $0x18] sm:$0xff] %vm334_vm0, %v16459_v0  ;;  %s16474_s10 = smov (!%p12354_p3, %s11421_s10), 1  ;;  %2174 = vmatpush1.bf16.msra.mxu0 %v11812_v1  ;;  %v11818_v24 = vld [vmem:[%s16450_s1 + $0x88] sm:$0xff]   ;;  %v11820_v29 = vld [vmem:[%s16450_s1 + $0x90] sm:$0xff]   ;;  %vm3857_vm4 = vcmask 1040384  }
  0x10   : > { %339 = vst.msk [vmem:[#allocation2 + $0x20] sm:$0xff] %vm334_vm0, %v16459_v0  ;;  %340 = vst.msk [vmem:[#allocation2 + $0x28] sm:$0xff] %vm334_vm0, %v16459_v0  ;;  %s11788_s16 = sshll.u32 %s16474_s10, 7  ;;  %2175 = vmatprep.subr.bf16.mxu0 %v16459_v0  ;;  %v11821_v33 = vld [vmem:[%s16450_s1 + $0x98] sm:$0xff]   ;;  %v11823_v39 = vld [vmem:[%s16450_s1] sm:$0xff]   ;;  %s11789_s27 = sshll.u32 %s16474_s10, 8 }
  0x11   : > { %341 = vst.msk [vmem:[#allocation2 + $0x30] sm:$0xff] %vm334_vm0, %v16459_v0  ;;  %342 = vst.msk [vmem:[#allocation2 + $0x38] sm:$0xff] %vm334_vm0, %v16459_v0  ;;  %s12477_s19 = scalar_lea.vmem %s16449_s0, %s11788_s16  ;;  %v11822_v41 = vld [vmem:[%s16450_s1 + $0xa0] sm:$0xff]   ;;  %vm884_vm1 = vsmask.f32 6400  ;;  %2455 = vmatpush1.bf16.msra.mxu1 %v11823_v39  ;;  %v11826_v48 = vld [vmem:[%s16450_s1 + $0x8] sm:$0xff]   ;;  %s16380_s11 = scalar_lea.vmem %s16458_s9, %s11789_s27 }
  0x12   : > { %343 = vst.msk [vmem:[#allocation2 + $0x40] sm:$0xff] %vm334_vm0, %v16459_v0  ;;  %345 = vst.msk [vmem:[#allocation2 + $0x1c8] sm:$0xff] %vm334_vm0, %v16459_v0  ;;  %v11800_v4 = vld [vmem:[%s12477_s19] sm:$0xff]   ;;  %v11801_v5 = vld [vmem:[%s12477_s19 + $0x8] sm:$0xff]   ;;  %2456 = vmatprep.subr.bf16.mxu1 %v16459_v0  ;;  %vm563_vm2 = vsmask.f32 1280 }
  0x13   : > { %346 = vst.msk [vmem:[#allocation2 + $0x1d0] sm:$0xff] %vm334_vm0, %v16459_v0  ;;  %347 = vst.msk [vmem:[#allocation2 + $0x1d8] sm:$0xff] %vm334_vm0, %v16459_v0  ;;  %2176 = vmatpush1.bf16.msra.mxu0 %v11813_v2  ;;  %v11802_v6 = vld [vmem:[%s12477_s19 + $0x20] sm:$0xff]   ;;  %v11803_v7 = vld [vmem:[%s12477_s19 + $0x30] sm:$0xff]   ;;  %vm6144_vm5 = vsmask.f32 7424 }
  0x14   : > { %348 = vst.msk [vmem:[#allocation2 + $0x1e0] sm:$0xff] %vm334_vm0, %v16459_v0  ;;  %349 = vst.msk [vmem:[#allocation2 + $0x1e8] sm:$0xff] %vm334_vm0, %v16459_v0  ;;  %2177 = vmatprep.subr.bf16.mxu0 %v16459_v0  ;;  %v11804_v9 = vld [vmem:[%s12477_s19 + $0x10] sm:$0xff]   ;;  %v11805_v10 = vld [vmem:[%s12477_s19 + $0x40] sm:$0xff]   ;;  %vm5935_vm6 = vsmask.f32 256 }
  0x15   : > { %350 = vst.msk [vmem:[#allocation2 + $0x1f0] sm:$0xff] %vm334_vm0, %v16459_v0  ;;  %351 = vst.msk [vmem:[#allocation2 + $0x1f8] sm:$0xff] %vm334_vm0, %v16459_v0  ;;  %v11806_v11 = vld [vmem:[%s12477_s19 + $0x50] sm:$0xff]   ;;  %v11807_v12 = vld [vmem:[%s12477_s19 + $0x18] sm:$0xff]   ;;  %2457 = vmatpush1.bf16.msra.mxu1 %v11826_v48 }
  0x16   : > { %352 = vst.msk [vmem:[#allocation2 + $0x200] sm:$0xff] %vm334_vm0, %v16459_v0  ;;  %353 = vst.msk [vmem:[#allocation2 + $0x208] sm:$0xff] %vm334_vm0, %v16459_v0  ;;  %v11808_v14 = vld [vmem:[%s12477_s19 + $0x60] sm:$0xff]   ;;  %v11809_v16 = vld [vmem:[%s12477_s19 + $0x70] sm:$0xff]   ;;  %2458 = vmatprep.subr.bf16.mxu1 %v16459_v0 }
  0x17   : > { %355 = vst.msk [vmem:[#allocation2 + $0x48] sm:$0xff] %vm334_vm0, %v16459_v0  ;;  %356 = vst.msk [vmem:[#allocation2 + $0x60] sm:$0xff] %vm334_vm0, %v16459_v0  ;;  %2178 = vmatpush1.bf16.msra.mxu0 %v11815_v3  ;;  %v11810_v18 = vld [vmem:[%s12477_s19 + $0x28] sm:$0xff]   ;;  %v11811_v20 = vld [vmem:[%s12477_s19 + $0x38] sm:$0xff]  }
  0x18   : > { %357 = vst.msk [vmem:[#allocation2 + $0x78] sm:$0xff] %vm334_vm0, %v16459_v0  ;;  %358 = vst.msk [vmem:[#allocation2 + $0x90] sm:$0xff] %vm334_vm0, %v16459_v0  ;;  %2179 = vmatprep.subr.bf16.mxu0 %v16459_v0  ;;  %v11814_v23 = vld [vmem:[%s12477_s19 + $0x48] sm:$0xff]   ;;  %v11819_v25 = vld [vmem:[%s12477_s19 + $0x58] sm:$0xff]  }
  0x19   : > { %359 = vst.msk [vmem:[#allocation2 + $0xa8] sm:$0xff] %vm334_vm0, %v16459_v0  ;;  %360 = vst.msk [vmem:[#allocation2 + $0xc0] sm:$0xff] %vm334_vm0, %v16459_v0  ;;  %v11825_v44 = vld [vmem:[%s12477_s19 + $0x68] sm:$0xff]   ;;  %v11828_v54 = vld [vmem:[%s16450_s1 + $0x10] sm:$0xff]  }
  0x1a   : > { %361 = vst.msk [vmem:[#allocation2 + $0xd8] sm:$0xff] %vm334_vm0, %v16459_v0  ;;  %362 = vst.msk [vmem:[#allocation2 + $0xf0] sm:$0xff] %vm334_vm0, %v16459_v0  ;;  %v11824_v52 = vld [vmem:[%s16450_s1 + $0xa8] sm:$0xff]   ;;  %v11827_v55 = vld [vmem:[%s16450_s1 + $0xb0] sm:$0xff]   ;;  %2459 = vmatpush1.bf16.msra.mxu1 %v11828_v54 }
  0x1b   : > { %363 = vst.msk [vmem:[#allocation2 + $0x108] sm:$0xff] %vm334_vm0, %v16459_v0  ;;  %364 = vst.msk [vmem:[#allocation2 + $0x120] sm:$0xff] %vm334_vm0, %v16459_v0  ;;  %2180 = vmatpush1.bf16.msra.mxu0 %v11816_v8  ;;  %v11830_v57 = vld [vmem:[%s16450_s1 + $0x18] sm:$0xff]   ;;  %2460 = vmatprep.subr.bf16.mxu1 %v16459_v0  ;;  %v836_v60 = vld [vmem:[#allocation2 + $0x8] sm:$0xff] }
  0x1c   : > { %365 = vst.msk [vmem:[#allocation2 + $0x138] sm:$0xff] %vm334_vm0, %v16459_v0  ;;  %366 = vst.msk [vmem:[#allocation2 + $0x150] sm:$0xff] %vm334_vm0, %v16459_v0  ;;  %2181 = vmatprep.subr.bf16.mxu0 %v16459_v0  ;;  %v11833_v59 = vld [vmem:[%s12477_s19 + $0x78] sm:$0xff]   ;;  %v11832_v62 = vld [vmem:[%s16450_s1 + $0x20] sm:$0xff]  }
  0x1d   : > { %367 = vst.msk [vmem:[#allocation2 + $0x168] sm:$0xff] %vm334_vm0, %v16459_v0  ;;  %368 = vst.msk [vmem:[#allocation2 + $0x180] sm:$0xff] %vm334_vm0, %v16459_v0  ;;  %v11829_v61 = vld [vmem:[%s16450_s1 + $0xb8] sm:$0xff]   ;;  %v837_v63 = vld [vmem:[#allocation2 + $0x20] sm:$0xff] }
  0x1e   : > { %369 = vst.msk [vmem:[#allocation2 + $0x198] sm:$0xff] %vm334_vm0, %v16459_v0  ;;  %370 = vst.msk [vmem:[#allocation2 + $0x1b0] sm:$0xff] %vm334_vm0, %v16459_v0  ;;  %2461 = vmatpush1.bf16.msra.mxu1 %v11830_v57  ;;  %v11834_v1 = vld [vmem:[%s16450_s1 + $0x28] sm:$0xff]   ;;  %v838_v3 = vld [vmem:[#allocation2 + $0x38] sm:$0xff] }
  0x1f   : > { %371 = vst.msk [vmem:[#allocation2 + $0x58] sm:$0xff] %vm334_vm0, %v16459_v0  ;;  %372 = vst.msk [vmem:[#allocation2 + $0x70] sm:$0xff] %vm334_vm0, %v16459_v0  ;;  %2182 = vmatpush1.bf16.msra.mxu0 %v11817_v13  ;;  %2462 = vmatprep.subr.bf16.mxu1 %v16459_v0  ;;  %v11838_v8 = vld [vmem:[%s16450_s1 + $0x40] sm:$0xff]  }
  0x20   : > { %373 = vst.msk [vmem:[#allocation2 + $0x88] sm:$0xff] %vm334_vm0, %v16459_v0  ;;  %374 = vst.msk [vmem:[#allocation2 + $0xa0] sm:$0xff] %vm334_vm0, %v16459_v0  ;;  %2183 = vmatprep.subr.bf16.mxu0 %v16459_v0 }
  0x21   : > { %375 = vst.msk [vmem:[#allocation2 + $0xb8] sm:$0xff] %vm334_vm0, %v16459_v0  ;;  %376 = vst.msk [vmem:[#allocation2 + $0xd0] sm:$0xff] %vm334_vm0, %v16459_v0 }
  0x22   : > { %377 = vst.msk [vmem:[#allocation2 + $0xe8] sm:$0xff] %vm334_vm0, %v16459_v0  ;;  %378 = vst.msk [vmem:[#allocation2 + $0x100] sm:$0xff] %vm334_vm0, %v16459_v0  ;;  %2463 = vmatpush1.bf16.msra.mxu1 %v11832_v62 }
  0x23   : > { %379 = vst.msk [vmem:[#allocation2 + $0x118] sm:$0xff] %vm334_vm0, %v16459_v0  ;;  %380 = vst.msk [vmem:[#allocation2 + $0x130] sm:$0xff] %vm334_vm0, %v16459_v0  ;;  %2184 = vmatpush1.bf16.msra.mxu0 %v11818_v24  ;;  %2464 = vmatprep.subr.bf16.mxu1 %v16459_v0 }
  0x24   : > { %381 = vst.msk [vmem:[#allocation2 + $0x148] sm:$0xff] %vm334_vm0, %v16459_v0  ;;  %382 = vst.msk [vmem:[#allocation2 + $0x160] sm:$0xff] %vm334_vm0, %v16459_v0  ;;  %2185 = vmatprep.subr.bf16.mxu0 %v16459_v0 }
  0x25   : > { %383 = vst.msk [vmem:[#allocation2 + $0x178] sm:$0xff] %vm334_vm0, %v16459_v0  ;;  %384 = vst.msk [vmem:[#allocation2 + $0x190] sm:$0xff] %vm334_vm0, %v16459_v0 }
  0x26   : > { %385 = vst.msk [vmem:[#allocation2 + $0x1a8] sm:$0xff] %vm334_vm0, %v16459_v0  ;;  %386 = vst.msk [vmem:[#allocation2 + $0x1c0] sm:$0xff] %vm334_vm0, %v16459_v0  ;;  %v1614_v34 = vld [vmem:[#allocation2 + $0x58] sm:$0x3]  ;;  %2465 = vmatpush1.bf16.msra.mxu1 %v11834_v1 }
  0x27   : > { %515 = vst.msk [vmem:[#allocation2 + $0x50] sm:$0xff] %vm334_vm0, %v11800_v4  ;;  %516 = vst.msk [vmem:[#allocation2 + $0x68] sm:$0xff] %vm334_vm0, %v11801_v5  ;;  %2186 = vmatpush1.bf16.msra.mxu0 %v11820_v29  ;;  %v1654_v38 = vshrl.u32 %v1614_v34, 16  ;;  %v1657_v40 = vshll.u32 %v1614_v34, 16  ;;  %v11835_v4 = vld [vmem:[%s16450_s1 + $0x30] sm:$0xff]   ;;  %2466 = vmatprep.subr.bf16.mxu1 %v16459_v0  ;;  %v11837_v5 = vld [vmem:[%s16450_s1 + $0x38] sm:$0xff]  }
  0x28   : > { %519 = vst.msk [vmem:[#allocation2 + $0xb0] sm:$0xff] %vm334_vm0, %v11802_v6  ;;  %521 = vst.msk [vmem:[#allocation2 + $0xe0] sm:$0xff] %vm334_vm0, %v11803_v7  ;;  %2187 = vmatprep.subr.bf16.mxu0 %v16459_v0  ;;  %v1293_v6 = vld [vmem:[#allocation2 + $0x48] sm:$0xc0]  ;;  %v11842_v1 = vld [vmem:[%s16450_s1 + $0x58] sm:$0xff]  }
  0x29   : > { %517 = vst.msk [vmem:[#allocation2 + $0x80] sm:$0xff] %vm334_vm0, %v11804_v9  ;;  %523 = vst.msk [vmem:[#allocation2 + $0x110] sm:$0xff] %vm334_vm0, %v11805_v10  ;;  %v1656_v42 = vrot.slane %v1654_v38, 1  ;;  %v1659_v46 = vrot.slane %v1657_v40, 2  ;;  %v1326_v7 = vshrl.u32 %v1293_v6, 16 }
  0x2a   : > { %525 = vst.msk [vmem:[#allocation2 + $0x140] sm:$0xff] %vm334_vm0, %v11806_v11  ;;  %518 = vst.msk [vmem:[#allocation2 + $0x98] sm:$0xff] %vm334_vm0, %v11807_v12  ;;  %2467 = vmatpush1.bf16.msra.mxu1 %v11835_v4  ;;  %v852_v10 = vld [vmem:[#allocation2 + $0x8] sm:$0xfe]  ;;  %v853_v12 = vld [vmem:[#allocation2 + $0x10] sm:$0x3] }
  0x2b   : > { %527 = vst.msk [vmem:[#allocation2 + $0x170] sm:$0xff] %vm334_vm0, %v11808_v14  ;;  %529 = vst.msk [vmem:[#allocation2 + $0x1a0] sm:$0xff] %vm334_vm0, %v11809_v16  ;;  %2188 = vmatpush1.bf16.msra.mxu0 %v11821_v33  ;;  %v1660_v49 = vor.u32 %v1659_v46, %v1656_v42  ;;  %2468 = vmatprep.subr.bf16.mxu1 %v16459_v0  ;;  %v886_v13 = vshrl.u32 %v852_v10, 16  ;;  %v1329_v14 = vshll.u32 %v1293_v6, 16  ;;  %v12657_v16 = vrot.slane %v1326_v7, 6 }
  0x2c   : > { %520 = vst.msk [vmem:[#allocation2 + $0xc8] sm:$0xff] %vm334_vm0, %v11810_v18  ;;  %522 = vst.msk [vmem:[#allocation2 + $0xf8] sm:$0xff] %vm334_vm0, %v11811_v20  ;;  %2189 = vmatprep.subr.bf16.mxu0 %v16459_v0  ;;  %v897_v29 = vshll.u32 %v853_v12, 16  ;;  %v1618_v42 = vld [vmem:[#allocation2 + $0x88] sm:$0x3] }
  0x2d   : > { %524 = vst.msk [vmem:[#allocation2 + $0x128] sm:$0xff] %vm334_vm0, %v11814_v23  ;;  %526 = vst.msk [vmem:[#allocation2 + $0x158] sm:$0xff] %vm334_vm0, %v11819_v25  ;;  %v11839_v23 = vld [vmem:[%s16450_s1 + $0x48] sm:$0xff]   ;;  %v888_v24 = vrot.slane %v886_v13, 1  ;;  %v1616_v25 = vld [vmem:[#allocation2 + $0x70] sm:$0x3] }
  0x2e   : > { %v12506_v15 = vld [vmem:[#allocation2 + $0x50] sm:$0xff]  ;;  %v12514_v17 = vld [vmem:[#allocation2 + $0x68] sm:$0xff]  ;;  %528 = vst.msk [vmem:[#allocation2 + $0x188] sm:$0xff] %vm334_vm0, %v11825_v44  ;;  %530 = vst.msk [vmem:[#allocation2 + $0x1b8] sm:$0xff] %vm334_vm0, %v11833_v59  ;;  %2469 = vmatpush1.bf16.msra.mxu1 %v11837_v5  ;;  %v899_v38 = vrot.slane %v897_v29, 2  ;;  %v1671_v40 = vshrl.u32 %v1616_v25, 16 }
  0x2f   : > { %1933 = vrot.lane.b32.xlu0 %v12506_v15, %s12293_s26  ;;  %v12526_v21 = vld [vmem:[#allocation2 + $0xb0] sm:$0xff]  ;;  %v12542_v27 = vld [vmem:[#allocation2 + $0xe0] sm:$0xff]  ;;  %2190 = vmatpush1.bf16.msra.mxu0 %v11822_v41  ;;  %v1615_v11 = vld [vmem:[#allocation2 + $0x68] sm:$0xfe]  ;;  %v1674_v41 = vshll.u32 %v1616_v25, 16  ;;  %v1688_v57 = vshrl.u32 %v1618_v42, 16 }
  0x30   : > { %v12518_v19 = vld [vmem:[#allocation2 + $0x80] sm:$0xff]  ;;  %v1613_v26 = vld [vmem:[#allocation2 + $0x50] sm:$0xfe]  ;;  %2191 = vmatprep.subr.bf16.mxu0 %v16459_v0  ;;  %2470 = vmatprep.subr.bf16.mxu1 %v16459_v0  ;;  %v1296_v33 = vld [vmem:[#allocation2 + $0x68] sm:$0x7f]  ;;  %v1666_v39 = vshll.u32 %v1615_v11, 16 }
  0x31   : > { %1937 = vrot.lane.b32.xlu1 %v12518_v19, %s12293_s26  ;;  %v12529_v22 = vld [vmem:[#allocation2 + $0x98] sm:$0xff]  ;;  %v1646_v28 = vshrl.u32 %v1613_v26, 16  ;;  %v1649_v30 = vshll.u32 %v1613_v26, 16  ;;  %v12549_v31 = vld [vmem:[#allocation2 + $0x110] sm:$0xff]  ;;  %v12571_v43 = vld [vmem:[#allocation2 + $0x140] sm:$0xff]  ;;  %v1663_v26 = vshrl.u32 %v1615_v11, 16 }
  0x32   : > { %v12584_v50 = vld [vmem:[#allocation2 + $0x170] sm:$0xff]  ;;  %v1611_v56 = vld [vmem:[#allocation2 + $0x1a0] sm:$0xff]  ;;  %2471 = vmatpush1.bf16.msra.mxu1 %v11838_v8  ;;  %v1351_v48 = vshrl.u32 %v1296_v33, 16  ;;  %v1673_v62 = vrot.slane %v1671_v40, 1  ;;  %v1619_v13 = vld [vmem:[#allocation2 + $0x98] sm:$0xfe] }
  0x33   : > { %1935 = vrot.lane.b32.xlu0 %v12514_v17, %s12293_s26  ;;  %v12551_v32 = vld [vmem:[#allocation2 + $0xc8] sm:$0xff]  ;;  %v1648_v35 = vrot.slane %v1646_v28, 1  ;;  %v1651_v36 = vrot.slane %v1649_v30, 2  ;;  %v12560_v37 = vld [vmem:[#allocation2 + $0xf8] sm:$0xff]  ;;  %2192 = vmatpush1.bf16.msra.mxu0 %v11824_v52  ;;  %v1294_v9 = vld [vmem:[#allocation2 + $0x50] sm:$0x7f] }
  0x34   : > { %v12576_v47 = vld [vmem:[#allocation2 + $0x128] sm:$0xff]  ;;  %v12590_v51 = vld [vmem:[#allocation2 + $0x158] sm:$0xff]  ;;  %2193 = vmatprep.subr.bf16.mxu0 %v16459_v0  ;;  %v1334_v18 = vshrl.u32 %v1294_v9, 16  ;;  %v1337_v20 = vshll.u32 %v1294_v9, 16  ;;  %2472 = vmatprep.subr.bf16.mxu1 %v16459_v0  ;;  %v894_v28 = vshrl.u32 %v853_v12, 16  ;;  %v11841_v44 = vld [vmem:[%s16450_s1 + $0x50] sm:$0xff]  }
  0x35   : > { %1939 = vrot.lane.b32.xlu1 %v12529_v22, %s12293_s26  ;;  %v1652_v45 = vor.u32 %v1651_v36, %v1648_v35  ;;  %v1610_v58 = vld [vmem:[#allocation2 + $0x188] sm:$0xff]  ;;  %v1612_v2 = vld [vmem:[#allocation2 + $0x1b8] sm:$0xff]  ;;  %v1295_v30 = vld [vmem:[#allocation2 + $0x60] sm:$0xc0]  ;;  %v1353_v5 = vrot.slane %v1351_v48, 6  ;;  %v1690_v12 = vrot.slane %v1688_v57, 1 }
  0x36   : > { %v1617_v34 = vld [vmem:[#allocation2 + $0x80] sm:$0xfe]  ;;  %v896_v36 = vrot.slane %v894_v28, 1  ;;  %2473 = vmatpush1.bf16.msra.mxu1 %v11839_v23  ;;  %v1346_v46 = vshll.u32 %v1295_v30, 16  ;;  %v12673_v52 = vrot.slane %v1334_v18, 6  ;;  %v1697_v28 = vshrl.u32 %v1619_v13, 16 }
  0x37   : > { %1941 = vrot.lane.b32.xlu0 %v12526_v21, %s12293_s26  ;;  %v1661_v53 = vsel %vm884_vm1, %v1652_v45, %v1660_v49  ;;  %2194 = vmatpush1.bf16.msra.mxu0 %v11827_v55  ;;  %v1343_v45 = vshrl.u32 %v1295_v30, 16  ;;  %v12671_v49 = vrot.slane %v1329_v14, 7  ;;  %v1680_v54 = vshrl.u32 %v1617_v34, 16  ;;  %v1298_v6 = vld [vmem:[#allocation2 + $0x80] sm:$0x7f] }
  0x38   : > { %11458 = vmatprep.mubr.msk.bf16.mxu0 %vm334_vm0, %v1661_v53  ;;  %2195 = vmatprep.subr.bf16.mxu0 %v16459_v0  ;;  %v1354_v53 = vshll.u32 %v1296_v33, 16  ;;  %v12677_v55 = vrot.slane %v1337_v20, 7  ;;  %v1348_v4 = vrot.slane %v1346_v46, 7  ;;  %v1371_v18 = vshll.u32 %v1298_v6, 16  ;;  %v2926_v20 = vld [vmem:[#allocation2 + $0x128] sm:$0xff] }
  0x39   : > { %1943 = vrot.lane.b32.xlu1 %v12551_v32, %s12293_s26  ;;  %2474 = vmatprep.subr.bf16.mxu1 %v16459_v0  ;;  %v1682_v8 = vrot.slane %v1680_v54, 1  ;;  %v1332_v23 = vor.u32 %v12671_v49, %v12657_v16  ;;  %v1700_v29 = vshll.u32 %v1619_v13, 16  ;;  %v1299_v30 = vld [vmem:[#allocation2 + $0x90] sm:$0xc0]  ;;  %v1300_v33 = vld [vmem:[#allocation2 + $0x98] sm:$0x7f] }
  0x3a   : > { %2475 = vmatpush1.bf16.msra.mxu1 %v11841_v44  ;;  %v1356_v7 = vrot.slane %v1354_v53, 7  ;;  %v12704_v40 = vrot.slane %v1371_v18, 7  ;;  %v1380_v46 = vshll.u32 %v1299_v30, 16  ;;  %v1385_v48 = vshrl.u32 %v1300_v33, 16 }
  0x3b   : > { %1945 = vrot.lane.b32.xlu0 %v12542_v27, %s12293_s26  ;;  %2196 = vmatpush1.bf16.msra.mxu0 %v11829_v61  ;;  %v1668_v61 = vrot.slane %v1666_v39, 2  ;;  %v1388_v49 = vshll.u32 %v1300_v33, 16 }
  0x3c   : > { %3496 = vmatprep.subr.bf16.mxu0 %v16459_v0  ;;  %2476 = vmatprep.subr.bf16.mxu1 %v16459_v0 }
  0x3d   : > { %1947 = vrot.lane.b32.xlu1 %v12560_v37, %s12293_s26 }
  0x3e   : > { %2477 = vmatpush1.bf16.msra.mxu1 %v11842_v1 }
  0x3f   : > { %1949 = vrot.lane.b32.xlu0 %v12549_v31, %s12293_s26  ;;  %4667 = vmatprep.subr.bf16.mxu1 %v16459_v0 }
  0x41   : > { %1951 = vrot.lane.b32.xlu1 %v12576_v47, %s12293_s26 }
  0x43   : > { %1953 = vrot.lane.b32.xlu0 %v12571_v43, %s12293_s26 }
  0x45   : > { %1955 = vrot.lane.b32.xlu1 %v12590_v51, %s12293_s26 }
  0x47   : > { %1957 = vrot.lane.b32.xlu0 %v12584_v50, %s12293_s26 }
  0x49   : > { %1959 = vrot.lane.b32.xlu1 %v1610_v58, %s12293_s26  ;;  %v1297_v58 = vld [vmem:[#allocation2 + $0x78] sm:$0xc0] }
  0x4a   : > { %v1360_v9 = vshrl.u32 %v1297_v58, 16 }
  0x4b   : > { %1961 = vrot.lane.b32.xlu0 %v1611_v56, %s12293_s26  ;;  %v1683_v56 = vshll.u32 %v1617_v34, 16  ;;  %v1357_v34 = vor.u32 %v1356_v7, %v1353_v5 }
  0x4d   : > { %1963 = vrot.lane.b32.xlu1 %v1612_v2, %s12293_s26  ;;  %v1676_v2 = vrot.slane %v1674_v41, 2  ;;  %v1685_v11 = vrot.slane %v1683_v56, 2  ;;  %v1622_v56 = vld [vmem:[#allocation2 + $0xb8] sm:$0x3] }
  0x4e   : > { %v1722_v7 = vshrl.u32 %v1622_v56, 16 }
  0x4f   : > { %1173 = vrot.lane.b32.xlu0 %v836_v60, %s12293_s26  ;;  %v1665_v60 = vrot.slane %v1663_v26, 1  ;;  %v1620_v26 = vld [vmem:[#allocation2 + $0xa0] sm:$0x3] }
  0x50   : > { %v1705_v41 = vshrl.u32 %v1620_v26, 16  ;;  %v1708_v44 = vshll.u32 %v1620_v26, 16 }
  0x51   : > { %3256 = vrot.lane.b32.xlu1 %v12529_v22, %s12293_s26  ;;  %v1669_v25 = vor.u32 %v1668_v61, %v1665_v60  ;;  %v1301_v60 = vld [vmem:[#allocation2 + $0xa8] sm:$0xc0]  ;;  %v1302_v61 = vld [vmem:[#allocation2 + $0xb0] sm:$0x7f] }
  0x53   : > { %1175 = vrot.lane.b32.xlu0 %v837_v63, %s12293_s26  ;;  %v1691_v63 = vshll.u32 %v1618_v42, 16  ;;  %v2927_v42 = vld [vmem:[#allocation2 + $0x140] sm:$0xff] }
  0x55   : > { %3258 = vrot.lane.b32.xlu1 %v12526_v21, %s12293_s26  ;;  %v1693_v14 = vrot.slane %v1691_v63, 2  ;;  %v1710_v63 = vrot.slane %v1708_v44, 2 }
  0x57   : > { %1177 = vrot.lane.b32.xlu0 %v838_v3, %s12293_s26  ;;  %v1345_v3 = vrot.slane %v1343_v45, 6  ;;  %v1377_v45 = vshrl.u32 %v1299_v30, 16 }
  0x59   : > { %3260 = vrot.lane.b32.xlu1 %v12551_v32, %s12293_s26  ;;  %v1379_v1 = vrot.slane %v1377_v45, 6 }
  0x5b   : > { %1179 = vrot.lane.b32.xlu0 %v12506_v15, %s12293_s26  ;;  %v889_v15 = vshll.u32 %v852_v10, 16  ;;  %v1363_v10 = vshll.u32 %v1297_v58, 16 }
  0x5d   : > { %3262 = vrot.lane.b32.xlu1 %v12542_v27, %s12293_s26  ;;  %v12699_v16 = vrot.slane %v1363_v10, 7  ;;  %v1394_v10 = vshrl.u32 %v1301_v60, 16 }
  0x5f   : > { %1181 = vrot.lane.b32.xlu0 %v12514_v17, %s12293_s26  ;;  %v891_v17 = vrot.slane %v889_v15, 2  ;;  %v1368_v15 = vshrl.u32 %v1298_v6, 16  ;;  %v1396_v33 = vrot.slane %v1394_v10, 6  ;;  %v534_v10 = vld [vmem:[#allocation2 + $0x20] sm:$0x7f] }
  0x61   : > { %v892_v35 = vor.u32 %v891_v17, %v888_v24  ;;  %3264 = vrot.lane.b32.xlu1 %v12560_v37, %s12293_s26  ;;  %v1340_v24 = vor.u32 %v12677_v55, %v12673_v52  ;;  %v1349_v17 = vor.u32 %v1348_v4, %v1345_v3  ;;  %v12702_v39 = vrot.slane %v1368_v15, 6  ;;  %v1621_v55 = vld [vmem:[#allocation2 + $0xb0] sm:$0xfe]  ;;  %v531_v3 = vld [vmem:[#allocation2] sm:$0xc0] }
  0x62   : > { %v1390_v4 = vrot.slane %v1388_v49, 7  ;;  %v1714_v5 = vshrl.u32 %v1621_v55, 16  ;;  %v1717_v6 = vshll.u32 %v1621_v55, 16  ;;  %v565_v15 = vshrl.u32 %v531_v3, 16 }
  0x63   : > { %1183 = vrot.lane.b32.xlu0 %v12518_v19, %s12293_s26  ;;  %v900_v19 = vor.u32 %v899_v38, %v896_v36  ;;  %v12697_v36 = vrot.slane %v1360_v9, 6  ;;  %v1694_v38 = vor.u32 %v1693_v14, %v1690_v12  ;;  %v12709_v52 = vsel %vm563_vm2, %v1332_v23, %v1340_v24 }
  0x64   : > { %v12715_v54 = vsel %vm563_vm2, %v1349_v17, %v1357_v34  ;;  %v1725_v9 = vshll.u32 %v1622_v56, 16  ;;  %v1402_v12 = vshrl.u32 %v1302_v61, 16  ;;  %v1405_v14 = vshll.u32 %v1302_v61, 16  ;;  %v1303_v56 = vld [vmem:[#allocation2 + $0xc0] sm:$0xc0] }
  0x65   : > { %v901_v59 = vsel %vm884_vm1, %v892_v35, %v900_v19  ;;  %v1686_v35 = vor.u32 %v1685_v11, %v1682_v8  ;;  %v1702_v19 = vrot.slane %v1700_v29, 2  ;;  %v1366_v58 = vor.u32 %v12699_v16, %v12697_v36  ;;  %v532_v8 = vld [vmem:[#allocation2 + $0x8] sm:$0x7f]  ;;  %v1624_v36 = vld [vmem:[#allocation2 + $0xd0] sm:$0x3] }
  0x66   : > { %11486 = vmatprep.mubr.msk.bf16.mxu1 %vm334_vm0, %v901_v59  ;;  %v1707_v59 = vrot.slane %v1705_v41, 1  ;;  %v1397_v11 = vshll.u32 %v1301_v60, 16  ;;  %v568_v18 = vshll.u32 %v531_v3, 16  ;;  %v576_v26 = vshll.u32 %v532_v8, 16  ;;  %v854_v41 = vld [vmem:[#allocation2 + $0x20] sm:$0xfe] }
  0x67   : > { %1185 = vrot.lane.b32.xlu0 %v12529_v22, %s12293_s26  ;;  %v2925_v22 = vld [vmem:[#allocation2 + $0x110] sm:$0xff]  ;;  %v12719_v57 = vsel %vm884_vm1, %v1686_v35, %v1694_v38  ;;  %v1716_v17 = vrot.slane %v1714_v5, 1  ;;  %v1724_v29 = vrot.slane %v1722_v7, 1  ;;  %v1727_v30 = vrot.slane %v1725_v9, 2  ;;  %v1304_v61 = vld [vmem:[#allocation2 + $0xc8] sm:$0x7f] }
  0x68   : > { %3266 = vrot.lane.b32.xlu1 %v2925_v22, %s12293_s26  ;;  %v1382_v22 = vrot.slane %v1380_v46, 7  ;;  %v1711_v23 = vor.u32 %v1710_v63, %v1707_v59  ;;  %v1399_v34 = vrot.slane %v1397_v11, 7  ;;  %v1404_v35 = vrot.slane %v1402_v12, 6 }
  0x69   : > { %v1407_v38 = vrot.slane %v1405_v14, 7  ;;  %v1739_v49 = vshrl.u32 %v1624_v36, 16  ;;  %v1742_v55 = vshll.u32 %v1624_v36, 16  ;;  %v903_v59 = vshrl.u32 %v854_v41, 16  ;;  %v2931_v36 = vld [vmem:[#allocation2 + $0x1a0] sm:$0xff] }
  0x6a   : > { %v1383_v24 = vor.u32 %v1382_v22, %v1379_v1  ;;  %v906_v60 = vshll.u32 %v854_v41, 16  ;;  %v1411_v5 = vshrl.u32 %v1303_v56, 16  ;;  %v1414_v9 = vshll.u32 %v1303_v56, 16 }
  0x6b   : > { %1187 = vrot.lane.b32.xlu0 %v12526_v21, %s12293_s26  ;;  %v1677_v21 = vor.u32 %v1676_v2, %v1673_v62  ;;  %v2928_v62 = vld [vmem:[#allocation2 + $0x158] sm:$0xff]  ;;  %v1387_v2 = vrot.slane %v1385_v48, 6  ;;  %v855_v48 = vld [vmem:[#allocation2 + $0x28] sm:$0x3]  ;;  %v1408_v63 = vor.u32 %v1407_v38, %v1404_v35  ;;  %v12747_v7 = vrot.slane %v1739_v49, 1 }
  0x6c   : > { %3268 = vrot.lane.b32.xlu1 %v2926_v20, %s12293_s26  ;;  %v2929_v20 = vld [vmem:[#allocation2 + $0x170] sm:$0xff]  ;;  %v911_v22 = vshrl.u32 %v855_v48, 16  ;;  %v12753_v11 = vrot.slane %v903_v59, 1  ;;  %v12755_v12 = vrot.slane %v906_v60, 2  ;;  %v1422_v14 = vshll.u32 %v1304_v61, 16 }
  0x6d   : > { %v12712_v53 = vsel %vm884_vm1, %v1669_v25, %v1677_v21  ;;  %v573_v25 = vshrl.u32 %v532_v8, 16  ;;  %v1391_v21 = vor.u32 %v1390_v4, %v1387_v2  ;;  %v914_v4 = vshll.u32 %v855_v48, 16  ;;  %v1305_v35 = vld [vmem:[#allocation2 + $0xd8] sm:$0xc0] }
  0x6e   : > { %v12749_v8 = vrot.slane %v1742_v55, 2  ;;  %v12784_v41 = vrot.slane %v1422_v14, 7  ;;  %v535_v55 = vld [vmem:[#allocation2 + $0x30] sm:$0xc0] }
  0x6f   : > { %1189 = vrot.lane.b32.xlu0 %v12551_v32, %s12293_s26  ;;  %v1699_v32 = vrot.slane %v1697_v28, 1  ;;  %v1719_v28 = vrot.slane %v1717_v6, 2  ;;  %v575_v45 = vrot.slane %v573_v25, 6  ;;  %v533_v6 = vld [vmem:[#allocation2 + $0x18] sm:$0xc0] }
  0x70   : > { %3270 = vrot.lane.b32.xlu1 %v2927_v42, %s12293_s26  ;;  %v2930_v42 = vld [vmem:[#allocation2 + $0x188] sm:$0xff]  ;;  %v1745_v38 = vor.u32 %v12749_v8, %v12747_v7 }
  0x71   : > { %v1703_v13 = vor.u32 %v1702_v19, %v1699_v32  ;;  %v1720_v32 = vor.u32 %v1719_v28, %v1716_v17  ;;  %v1626_v25 = vld [vmem:[#allocation2 + $0xe8] sm:$0x3]  ;;  %v593_v17 = vshll.u32 %v534_v10, 16  ;;  %v856_v28 = vld [vmem:[#allocation2 + $0x38] sm:$0xfe] }
  0x72   : > { %v1759_v49 = vshll.u32 %v1626_v25, 16  ;;  %v920_v56 = vshrl.u32 %v856_v28, 16 }
  0x73   : > { %1191 = vrot.lane.b32.xlu0 %v12542_v27, %s12293_s26  ;;  %v1374_v27 = vor.u32 %v12704_v40, %v12702_v39  ;;  %v567_v39 = vrot.slane %v565_v15, 6  ;;  %v570_v40 = vrot.slane %v568_v18, 7  ;;  %v12735_v44 = vsel %vm884_vm1, %v1703_v13, %v1711_v23  ;;  %v1625_v15 = vld [vmem:[#allocation2 + $0xe0] sm:$0xfe] }
  0x74   : > { %3272 = vrot.lane.b32.xlu1 %v2928_v62, %s12293_s26  ;;  %v1400_v62 = vor.u32 %v1399_v34, %v1396_v33  ;;  %v1419_v13 = vshrl.u32 %v1304_v61, 16  ;;  %v582_v23 = vshrl.u32 %v533_v6, 16  ;;  %v12774_v33 = vrot.slane %v1414_v9, 7  ;;  %v857_v34 = vld [vmem:[#allocation2 + $0x40] sm:$0x3] }
  0x75   : > { %v12732_v16 = vsel %vm563_vm2, %v1366_v58, %v1374_v27  ;;  %v12740_v58 = vsel %vm563_vm2, %v1383_v24, %v1391_v21  ;;  %v1728_v27 = vor.u32 %v1727_v30, %v1724_v29  ;;  %v571_v1 = vor.u32 %v570_v40, %v567_v39  ;;  %v536_v61 = vld [vmem:[#allocation2 + $0x38] sm:$0x7f] }
  0x76   : > { %v585_v24 = vshll.u32 %v533_v6, 16  ;;  %v12764_v21 = vrot.slane %v1411_v5, 6  ;;  %v12767_v29 = vsel %vm563_vm2, %v1400_v62, %v1408_v63  ;;  %v909_v39 = vor.u32 %v12755_v12, %v12753_v11  ;;  %v1307_v11 = vld [vmem:[#allocation2 + $0xf0] sm:$0xc0]  ;;  %v1308_v12 = vld [vmem:[#allocation2 + $0xf8] sm:$0x7f] }
  0x77   : > { %1193 = vrot.lane.b32.xlu0 %v12560_v37, %s12293_s26  ;;  %v1623_v37 = vld [vmem:[#allocation2 + $0xc8] sm:$0xfe]  ;;  %v12758_v18 = vsel %vm884_vm1, %v1720_v32, %v1728_v27  ;;  %v12782_v40 = vrot.slane %v1419_v13, 6  ;;  %v1751_v48 = vshll.u32 %v1625_v15, 16  ;;  %v12793_v32 = vrot.slane %v593_v17, 7 }
  0x78   : > { %3274 = vrot.lane.b32.xlu1 %v2929_v20, %s12293_s26  ;;  %v1731_v46 = vshrl.u32 %v1623_v37, 16  ;;  %v1734_v19 = vshll.u32 %v1623_v37, 16  ;;  %v12760_v20 = vrot.slane %v911_v22, 1  ;;  %v923_v27 = vshll.u32 %v856_v28, 16 }
  0x79   : > { %v928_v59 = vshrl.u32 %v857_v34, 16  ;;  %v931_v60 = vshll.u32 %v857_v34, 16  ;;  %v1428_v62 = vshrl.u32 %v1305_v35, 16  ;;  %v1431_v63 = vshll.u32 %v1305_v35, 16 }
  0x7a   : > { %v12743_v3 = vrot.slane %v1731_v46, 1  ;;  %v1748_v46 = vshrl.u32 %v1625_v15, 16  ;;  %v599_v5 = vshrl.u32 %v535_v55, 16  ;;  %v602_v6 = vshll.u32 %v535_v55, 16 }
  0x7b   : > { %1195 = vrot.lane.b32.xlu0 %v12549_v31, %s12293_s26  ;;  %v578_v31 = vrot.slane %v576_v26, 7  ;;  %v12762_v26 = vrot.slane %v914_v4, 2  ;;  %v1753_v4 = vrot.slane %v1751_v48, 2  ;;  %v607_v13 = vshrl.u32 %v536_v61, 16 }
  0x7c   : > { %3276 = vrot.lane.b32.xlu1 %v2930_v42, %s12293_s26  ;;  %v1306_v42 = vld [vmem:[#allocation2 + $0xe0] sm:$0x7f]  ;;  %v610_v14 = vshll.u32 %v536_v61, 16  ;;  %v922_v15 = vrot.slane %v920_v56, 1  ;;  %v1433_v17 = vrot.slane %v1431_v63, 7  ;;  %v1417_v35 = vor.u32 %v12774_v33, %v12764_v21  ;;  %v2933_v63 = vld [vmem:[#allocation2 + $0x1d0] sm:$0xff] }
  0x7d   : > { %v579_v2 = vor.u32 %v578_v31, %v575_v45  ;;  %v12787_v45 = vrot.slane %v582_v23, 6  ;;  %v12789_v31 = vrot.slane %v585_v24, 7  ;;  %v1439_v22 = vshll.u32 %v1306_v42, 16  ;;  %v1628_v56 = vld [vmem:[#allocation2 + $0x100] sm:$0x3] }
  0x7e   : > { %v925_v23 = vrot.slane %v923_v27, 2  ;;  %v930_v24 = vrot.slane %v928_v59, 1  ;;  %v917_v34 = vor.u32 %v12762_v26, %v12760_v20  ;;  %v1425_v48 = vor.u32 %v12784_v41, %v12782_v40  ;;  %v2932_v27 = vld [vmem:[#allocation2 + $0x1b8] sm:$0xff]  ;;  %v858_v21 = vld [vmem:[#allocation2 + $0x50] sm:$0xfe] }
  0x7f   : > { %1197 = vrot.lane.b32.xlu0 %v12576_v47, %s12293_s26  ;;  %v12745_v47 = vrot.slane %v1734_v19, 2  ;;  %v12770_v37 = vsel %vm563_vm2, %v571_v1, %v579_v2  ;;  %v1756_v19 = vshrl.u32 %v1626_v25, 16  ;;  %v1436_v1 = vshrl.u32 %v1306_v42, 16  ;;  %v859_v33 = vld [vmem:[#allocation2 + $0x58] sm:$0x3] }
  0x80   : > { %3278 = vrot.lane.b32.xlu1 %v2931_v36, %s12293_s26  ;;  %v1750_v2 = vrot.slane %v1748_v46, 1  ;;  %v933_v25 = vrot.slane %v931_v60, 2  ;;  %v601_v36 = vrot.slane %v599_v5, 6  ;;  %v604_v42 = vrot.slane %v602_v6, 7  ;;  %v1627_v46 = vld [vmem:[#allocation2 + $0xf8] sm:$0xfe] }
  0x81   : > { %v1737_v30 = vor.u32 %v12745_v47, %v12743_v3  ;;  %v1758_v9 = vrot.slane %v1756_v19, 1  ;;  %v1438_v28 = vrot.slane %v1436_v1, 6  ;;  %v588_v19 = vor.u32 %v12789_v31, %v12787_v45 }
  0x82   : > { %v612_v55 = vrot.slane %v610_v14, 7  ;;  %v1754_v20 = vor.u32 %v1753_v4, %v1750_v2  ;;  %v926_v60 = vor.u32 %v925_v23, %v922_v15  ;;  %v934_v61 = vor.u32 %v933_v25, %v930_v24  ;;  %v538_v15 = vld [vmem:[#allocation2 + $0x50] sm:$0x7f] }
  0x83   : > { %1199 = vrot.lane.b32.xlu0 %v12571_v43, %s12293_s26  ;;  %v590_v43 = vshrl.u32 %v534_v10, 16  ;;  %v1761_v10 = vrot.slane %v1759_v49, 2  ;;  %v609_v49 = vrot.slane %v607_v13, 6  ;;  %v1765_v41 = vshrl.u32 %v1627_v46, 16 }
  0x84   : > { %3280 = vrot.lane.b32.xlu1 %v2932_v27, %s12293_s26  ;;  %v605_v45 = vor.u32 %v604_v42, %v601_v36  ;;  %v1768_v31 = vshll.u32 %v1627_v46, 16  ;;  %v1773_v1 = vshrl.u32 %v1628_v56, 16  ;;  %v937_v6 = vshrl.u32 %v858_v21, 16  ;;  %v1630_v36 = vld [vmem:[#allocation2 + $0x118] sm:$0x3] }
  0x85   : > { %v1762_v26 = vor.u32 %v1761_v10, %v1758_v9  ;;  %v613_v5 = vor.u32 %v612_v55, %v609_v49  ;;  %v940_v13 = vshll.u32 %v858_v21, 16  ;;  %v12821_v2 = vsel %vm884_vm1, %v909_v39, %v917_v34 }
  0x86   : > { %v12824_v4 = vsel %vm563_vm2, %v1417_v35, %v1425_v48  ;;  %v948_v9 = vshll.u32 %v859_v33, 16  ;;  %v12834_v47 = vsel %vm884_vm1, %v926_v60, %v934_v61  ;;  %v12841_v39 = vrot.slane %v1768_v31, 2  ;;  %v11831_v61 = vld [vmem:[%s16450_s1 + $0xc0] sm:$0xff]  }
  0x87   : > { %1201 = vrot.lane.b32.xlu0 %v12590_v51, %s12293_s26  ;;  %v12791_v51 = vrot.slane %v590_v43, 6  ;;  %v1430_v43 = vrot.slane %v1428_v62, 6  ;;  %v12831_v3 = vsel %vm884_vm1, %v1754_v20, %v1762_v26  ;;  %v12843_v10 = vrot.slane %v1773_v1, 1 }
  0x88   : > { %3282 = vrot.lane.b32.xlu1 %v2933_v63, %s12293_s26  ;;  %v12848_v23 = vsel %vm563_vm2, %v605_v45, %v613_v5  ;;  %v12850_v24 = vrot.slane %v937_v6, 1  ;;  %v12852_v25 = vrot.slane %v940_v13, 2  ;;  %v1448_v34 = vshll.u32 %v1307_v11, 16  ;;  %v861_v45 = vld [vmem:[#allocation2 + $0x70] sm:$0x3] }
  0x89   : > { %v596_v59 = vor.u32 %v12793_v32, %v12791_v51  ;;  %v1434_v62 = vor.u32 %v1433_v17, %v1430_v43  ;;  %v945_v51 = vshrl.u32 %v859_v33, 16  ;;  %v12815_v32 = vsel %vm884_vm1, %v1737_v30, %v1745_v38  ;;  %v537_v30 = vld [vmem:[#allocation2 + $0x48] sm:$0xc0]  ;;  %v1629_v17 = vld [vmem:[#allocation2 + $0x110] sm:$0xfe] }
  0x8a   : > { %v12839_v38 = vrot.slane %v1765_v41, 1  ;;  %v1453_v35 = vshrl.u32 %v1308_v12, 16  ;;  %v1456_v42 = vshll.u32 %v1308_v12, 16  ;;  %v616_v46 = vshrl.u32 %v537_v30, 16  ;;  %v860_v33 = vld [vmem:[#allocation2 + $0x68] sm:$0xfe] }
  0x8b   : > { %1203 = vrot.lane.b32.xlu0 %v12584_v50, %s12293_s26  ;;  %v1441_v50 = vrot.slane %v1439_v22, 7  ;;  %v1776_v22 = vshll.u32 %v1628_v56, 16  ;;  %v12828_v7 = vsel %vm563_vm2, %v588_v19, %v596_v59  ;;  %v12854_v43 = vrot.slane %v945_v51, 1  ;;  %v2934_v59 = vld [vmem:[#allocation2 + $0x1e8] sm:$0xff]  ;;  %v1310_v12 = vld [vmem:[#allocation2 + $0x110] sm:$0x7f] }
  0x8c   : > { %v619_v48 = vshll.u32 %v537_v30, 16  ;;  %v624_v19 = vshrl.u32 %v538_v15, 16  ;;  %v1771_v49 = vor.u32 %v12841_v39, %v12839_v38  ;;  %v627_v55 = vshll.u32 %v538_v15, 16  ;;  %3284 = vrot.lane.b32.xlu1 %v2934_v59, %s12293_s26  ;;  %v1309_v6 = vld [vmem:[#allocation2 + $0x108] sm:$0xc0] }
  0x8d   : > { %v1442_v40 = vor.u32 %v1441_v50, %v1438_v28  ;;  %v12845_v14 = vrot.slane %v1776_v22, 2  ;;  %v12856_v28 = vrot.slane %v948_v9, 2  ;;  %v1445_v50 = vshrl.u32 %v1307_v11, 16 }
  0x8e   : > { %v1782_v56 = vshrl.u32 %v1629_v17, 16  ;;  %v1785_v27 = vshll.u32 %v1629_v17, 16  ;;  %v943_v26 = vor.u32 %v12852_v25, %v12850_v24  ;;  %v1790_v60 = vshrl.u32 %v1630_v36, 16 }
  0x8f   : > { %v12837_v8 = vsel %vm563_vm2, %v1434_v62, %v1442_v40  ;;  %v1779_v20 = vor.u32 %v12845_v14, %v12843_v10  ;;  %v1793_v21 = vshll.u32 %v1630_v36, 16  ;;  %v951_v62 = vor.u32 %v12856_v28, %v12854_v43 }
  0x90   : > { %v12870_v40 = vrot.slane %v1445_v50, 6  ;;  %v12872_v41 = vrot.slane %v1448_v34, 7  ;;  %v12874_v63 = vrot.slane %v1453_v35, 6  ;;  %v1458_v31 = vrot.slane %v1456_v42, 7  ;;  %v539_v42 = vld [vmem:[#allocation2 + $0x60] sm:$0xc0] }
  0x91   : > { %v618_v1 = vrot.slane %v616_v46, 6  ;;  %v621_v22 = vrot.slane %v619_v48, 7  ;;  %v626_v5 = vrot.slane %v624_v19, 6  ;;  %v629_v13 = vrot.slane %v627_v55, 7 }
  0x92   : > { %v1784_v51 = vrot.slane %v1782_v56, 1  ;;  %v1787_v9 = vrot.slane %v1785_v27, 2  ;;  %v954_v11 = vshrl.u32 %v860_v33, 16  ;;  %v1792_v10 = vrot.slane %v1790_v60, 1  ;;  %v540_v60 = vld [vmem:[#allocation2 + $0x68] sm:$0x7f] }
  0x93   : > { %v1795_v14 = vrot.slane %v1793_v21, 2  ;;  %v957_v15 = vshll.u32 %v860_v33, 16  ;;  %v962_v17 = vshrl.u32 %v861_v45, 16  ;;  %v965_v34 = vshll.u32 %v861_v45, 16  ;;  %v2935_v21 = vld [vmem:[#allocation2 + $0x200] sm:$0xff] }
  0x94   : > { %v1462_v35 = vshrl.u32 %v1309_v6, 16  ;;  %v1465_v36 = vshll.u32 %v1309_v6, 16  ;;  %v1451_v46 = vor.u32 %v12872_v41, %v12870_v40  ;;  %v1459_v48 = vor.u32 %v1458_v31, %v12874_v63  ;;  %3286 = vrot.lane.b32.xlu1 %v2935_v21, %s12293_s26 }
  0x95   : > { %v1470_v19 = vshrl.u32 %v1310_v12, 16  ;;  %v1473_v55 = vshll.u32 %v1310_v12, 16  ;;  %v622_v56 = vor.u32 %v621_v22, %v618_v1  ;;  %v630_v27 = vor.u32 %v629_v13, %v626_v5 }
  0x96   : > { %v1788_v59 = vor.u32 %v1787_v9, %v1784_v51  ;;  %v1796_v40 = vor.u32 %v1795_v14, %v1792_v10  ;;  %v12887_v41 = vrot.slane %v954_v11, 1  ;;  %v12889_v63 = vrot.slane %v957_v15, 2  ;;  %v11840_v11 = vld [vmem:[%s16450_s1 + $0xd0] sm:$0xff]   ;;  %v862_v15 = vld [vmem:[#allocation2 + $0x80] sm:$0xfe] }
  0x97   : > { %v12894_v45 = vrot.slane %v965_v34, 2  ;;  %v12896_v31 = vrot.slane %v1462_v35, 6  ;;  %v12898_v1 = vrot.slane %v1465_v36, 7  ;;  %v633_v22 = vshrl.u32 %v539_v42, 16  ;;  %v1632_v10 = vld [vmem:[#allocation2 + $0x130] sm:$0x3] }
  0x98   : > { %v12904_v5 = vsel %vm884_vm1, %v1771_v49, %v1779_v20  ;;  %v12906_v6 = vrot.slane %v1470_v19, 6  ;;  %v12908_v13 = vrot.slane %v1473_v55, 7  ;;  %v636_v51 = vshll.u32 %v539_v42, 16  ;;  %v1312_v42 = vld [vmem:[#allocation2 + $0x128] sm:$0x7f] }
  0x99   : > { %v641_v12 = vshrl.u32 %v540_v60, 16  ;;  %v12928_v49 = vsel %vm563_vm2, %v1451_v46, %v1459_v48  ;;  %v12931_v20 = vsel %vm563_vm2, %v622_v56, %v630_v27  ;;  %v12934_v14 = vsel %vm884_vm1, %v1788_v59, %v1796_v40  ;;  %v542_v40 = vld [vmem:[#allocation2 + $0x80] sm:$0x7f] }
  0x9a   : > { %16463 = vst [vmem:[#allocation4_spill] sm:$0xff] %v12931_v20  ;;  %16464 = vst [vmem:[#allocation5_spill] sm:$0xff] %v12934_v14  ;;  %v12942_v28 = vrot.slane %v633_v22, 6  ;;  %v12949_v34 = vrot.slane %v636_v51, 7  ;;  %v1807_v36 = vshrl.u32 %v1632_v10, 16  ;;  %v1810_v55 = vshll.u32 %v1632_v10, 16 }
  0x9b   : > { %v12953_v46 = vrot.slane %v641_v12, 6  ;;  %v971_v59 = vshrl.u32 %v862_v15, 16  ;;  %v1487_v22 = vshrl.u32 %v1312_v42, 16  ;;  %v1490_v51 = vshll.u32 %v1312_v42, 16  ;;  %v1634_v14 = vld [vmem:[#allocation2 + $0x148] sm:$0x3] }
  0x9c   : > { %v661_v25 = vshll.u32 %v542_v40, 16 }
  0xa1   : > { %v1934_v30 = vpop.permute.xlu0 %1933 }
  0xa2   : > { %v1967_v50 = vsel %vm334_vm0, %v12709_v52, %v1934_v30  ;;  %v11836_v52 = vld [vmem:[%s16450_s1 + $0xc8] sm:$0xff]   ;;  %v644_v30 = vshll.u32 %v540_v60, 16  ;;  %v974_v60 = vshll.u32 %v862_v15, 16  ;;  %v1812_v15 = vrot.slane %v1810_v55, 2 }
  0xa3   : > { %2206 = vmatmul.mubr.bf16.vlgmr.msra.gmra.mrb[0].mxu0 %v1967_v50  ;;  %v1938_v27 = vpop.permute.xlu1 %1937  ;;  %v639_v55 = vor.u32 %v12949_v34, %v12942_v28 }
  0xa4   : > { %3497 = vmatpush1.bf16.msra.mxu0 %v11831_v61  ;;  %11459 = vmatprep.mubr.msk.bf16.mxu0 %vm334_vm0, %v12712_v53  ;;  %v12891_v61 = vrot.slane %v962_v17, 1  ;;  %v1631_v53 = vld [vmem:[#allocation2 + $0x128] sm:$0xfe]  ;;  %v12955_v48 = vrot.slane %v644_v30, 7  ;;  %v1975_v10 = vsel %vm334_vm0, %v12732_v16, %v1938_v27  ;;  %v1492_v27 = vrot.slane %v1490_v51, 7 }
  0xa5   : > { %v1936_v33 = vpop.permute.xlu0 %1935  ;;  %3498 = vmatprep.subr.bf16.mxu0 %v16459_v0  ;;  %v1799_v38 = vshrl.u32 %v1631_v53, 16  ;;  %v863_v17 = vld [vmem:[#allocation2 + $0x88] sm:$0x3]  ;;  %v1802_v35 = vshll.u32 %v1631_v53, 16 }
  0xa6   : > { %v1971_v9 = vsel %vm334_vm0, %v12715_v54, %v1936_v33  ;;  %v12925_v54 = vsel %vm884_vm1, %v943_v26, %v951_v62  ;;  %v1311_v26 = vld [vmem:[#allocation2 + $0x120] sm:$0xc0]  ;;  %v11843_v62 = vld [vmem:[%s16450_s1 + $0xd8] sm:$0xff]   ;;  %v979_v21 = vshrl.u32 %v863_v17, 16  ;;  %v982_v33 = vshll.u32 %v863_v17, 16 }
  0xa7   : > { %16462 = vst [vmem:[#allocation3_spill] sm:$0xff] %v12925_v54  ;;  %v12957_v19 = vrot.slane %v1799_v38, 1  ;;  %v1482_v53 = vshll.u32 %v1311_v26, 16  ;;  %v11844_v38 = vld [vmem:[%s16450_s1 + $0xe0] sm:$0xff]   ;;  %v658_v17 = vshrl.u32 %v542_v40, 16  ;;  %v1940_v34 = vpop.permute.xlu1 %1939 }
  0xa8   : > { %3499 = vmatpush1.bf16.msra.mxu0 %v11836_v52  ;;  %v541_v52 = vld [vmem:[#allocation2 + $0x78] sm:$0xc0]  ;;  %v981_v42 = vrot.slane %v979_v21, 1 }
  0xa9   : > { %v12915_v39 = vpop.permute.xlu0 %1941  ;;  %3500 = vmatprep.subr.bf16.mxu0 %v16459_v0  ;;  %v650_v12 = vshrl.u32 %v541_v52, 16  ;;  %v653_v30 = vshll.u32 %v541_v52, 16  ;;  %v984_v52 = vrot.slane %v982_v33, 2  ;;  %v1484_v16 = vrot.slane %v1482_v53, 7  ;;  %v864_v53 = vld [vmem:[#allocation2 + $0x98] sm:$0xfe] }
  0xaa   : > { %v660_v21 = vrot.slane %v658_v17, 6  ;;  %v663_v33 = vrot.slane %v661_v25, 7  ;;  %v1827_v25 = vshll.u32 %v1634_v14, 16  ;;  %v991_v54 = vshll.u32 %v864_v53, 16 }
  0xab   : > { %2214 = vmatmul.mubr.bf16.gmra.mrb[4].mxu0 %v1971_v9  ;;  %v12962_v9 = vrot.slane %v1802_v35, 2  ;;  %v973_v35 = vrot.slane %v971_v59, 1  ;;  %v652_v24 = vrot.slane %v650_v12, 6  ;;  %v655_v40 = vrot.slane %v653_v30, 7  ;;  %v11845_v59 = vld [vmem:[%s16450_s1 + $0xe8] sm:$0xff]  }
  0xac   : > { %11460 = vmatprep.mubr.msk.bf16.mxu0 %vm334_vm0, %v12719_v57  ;;  %3501 = vmatpush1.bf16.msra.mxu0 %v11840_v11  ;;  %v1479_v57 = vshrl.u32 %v1311_v26, 16  ;;  %v12964_v11 = vrot.slane %v1807_v36, 1  ;;  %v1633_v26 = vld [vmem:[#allocation2 + $0x140] sm:$0xfe]  ;;  %v976_v36 = vrot.slane %v974_v60, 2  ;;  %v647_v60 = vor.u32 %v12955_v48, %v12953_v46 }
  0xad   : > { %v12959_v56 = vpop.permute.xlu0 %1945  ;;  %3502 = vmatprep.subr.bf16.mxu0 %v16459_v0  ;;  %v1816_v20 = vshrl.u32 %v1633_v26, 16  ;;  %v985_v12 = vor.u32 %v984_v52, %v981_v42  ;;  %v865_v30 = vld [vmem:[#allocation2 + $0xa0] sm:$0x3]  ;;  %v1824_v48 = vshrl.u32 %v1634_v14, 16  ;;  %v16466_v14 = vor.u32 %v12889_v63, %v12887_v41 }
  0xae   : > { %v12974_v43 = vrot.slane %v1479_v57, 6  ;;  %v1819_v57 = vshll.u32 %v1633_v26, 16  ;;  %v977_v51 = vor.u32 %v976_v36, %v973_v35  ;;  %v988_v26 = vshrl.u32 %v864_v53, 16 }
  0xaf   : > { %v12992_v17 = vrot.slane %v1816_v20, 1  ;;  %v16465_v20 = vor.u32 %v12894_v45, %v12891_v61  ;;  %v16468_v36 = vor.u32 %v12908_v13, %v12906_v6  ;;  %v16469_v42 = vor.u32 %v12898_v1, %v12896_v31  ;;  %v543_v6 = vld [vmem:[#allocation2 + $0x90] sm:$0xc0] }
  0xb0   : > { %3503 = vmatpush1.bf16.msra.mxu0 %v11843_v62  ;;  %v1489_v62 = vrot.slane %v1487_v22, 6  ;;  %v1813_v22 = vor.u32 %v1812_v15, %v12964_v11  ;;  %v12999_v11 = vrot.slane %v1819_v57, 2  ;;  %v1313_v15 = vld [vmem:[#allocation2 + $0x138] sm:$0xc0]  ;;  %v999_v61 = vshll.u32 %v865_v30, 16 }
  0xb1   : > { %v12971_v50 = vpop.permute.xlu0 %1949  ;;  %3504 = vmatprep.subr.bf16.mxu0 %v16459_v0  ;;  %v13020_v52 = vsel %vm563_vm2, %v16469_v42, %v16468_v36  ;;  %v13029_v63 = vsel %vm884_vm1, %v977_v51, %v985_v12  ;;  %v1826_v45 = vrot.slane %v1824_v48, 1  ;;  %v13031_v13 = vrot.slane %v988_v26, 1  ;;  %v11848_v42 = vld [vmem:[%s16450_s1 + $0x100] sm:$0xff]  }
  0xb2   : > { %v1493_v46 = vor.u32 %v1492_v27, %v1489_v62  ;;  %v1829_v62 = vrot.slane %v1827_v25, 2  ;;  %v1314_v27 = vld [vmem:[#allocation2 + $0x140] sm:$0x7f]  ;;  %v13033_v31 = vrot.slane %v991_v54, 2  ;;  %v1496_v1 = vshrl.u32 %v1313_v15, 16 }
  0xb3   : > { %2222 = vmatmul.mubr.bf16.gmra.mrb[8].mxu0 %v1975_v10  ;;  %v1485_v10 = vor.u32 %v1484_v16, %v12974_v43  ;;  %v996_v43 = vshrl.u32 %v865_v30, 16  ;;  %v13023_v16 = vsel %vm563_vm2, %v639_v55, %v647_v60  ;;  %v544_v55 = vld [vmem:[#allocation2 + $0x98] sm:$0x7f]  ;;  %v1822_v54 = vor.u32 %v12999_v11, %v12992_v17  ;;  %v866_v11 = vld [vmem:[#allocation2 + $0xb0] sm:$0xfe] }
  0xb4   : > { %11461 = vmatprep.mubr.msk.bf16.mxu0 %vm334_vm0, %v12735_v44  ;;  %3505 = vmatpush1.bf16.msra.mxu0 %v11844_v38  ;;  %v1805_v44 = vor.u32 %v12962_v9, %v12957_v19  ;;  %v656_v38 = vor.u32 %v655_v40, %v652_v24  ;;  %v11846_v19 = vld [vmem:[%s16450_s1 + $0xf0] sm:$0xff]   ;;  %v664_v9 = vor.u32 %v663_v33, %v660_v21  ;;  %v16467_v24 = vmov 0   ;;  %v1635_v33 = vld [vmem:[#allocation2 + $0x158] sm:$0xfe] }
  0xb5   : > { %v12985_v28 = vpop.permute.xlu0 %1953  ;;  %3506 = vmatprep.subr.bf16.mxu0 %v16459_v0  ;;  %v1979_v0 = vsel %vm334_vm0, %v12740_v58, %v1940_v34  ;;  %v13010_v58 = vsel %vm884_vm1, %v16466_v14, %v16465_v20  ;;  %v1499_v40 = vshll.u32 %v1313_v15, 16  ;;  %v998_v21 = vrot.slane %v996_v43, 1 }
  0xb6   : > { %v13026_v41 = vsel %vm884_vm1, %v1805_v44, %v1813_v22  ;;  %v13041_v60 = vsel %vm563_vm2, %v656_v38, %v664_v9  ;;  %v1504_v53 = vshrl.u32 %v1314_v27, 16  ;;  %v1507_v34 = vshll.u32 %v1314_v27, 16  ;;  %v1636_v22 = vld [vmem:[#allocation2 + $0x160] sm:$0x3]  ;;  %v1315_v27 = vld [vmem:[#allocation2 + $0x150] sm:$0xc0] }
  0xb7   : > { %v667_v44 = vshrl.u32 %v543_v6, 16  ;;  %v1830_v51 = vor.u32 %v1829_v62, %v1826_v45  ;;  %v670_v12 = vshll.u32 %v543_v6, 16  ;;  %v675_v30 = vshrl.u32 %v544_v55, 16 }
  0xb8   : > { %3507 = vmatpush1.bf16.msra.mxu0 %v11845_v59  ;;  %v13038_v59 = vsel %vm563_vm2, %v1485_v10, %v1493_v46  ;;  %v678_v10 = vshll.u32 %v544_v55, 16  ;;  %v994_v46 = vor.u32 %v13033_v31, %v13031_v13  ;;  %v13053_v48 = vrot.slane %v1496_v1, 6 }
  0xb9   : > { %v13001_v35 = vpop.permute.xlu0 %1957  ;;  %3508 = vmatprep.subr.bf16.mxu0 %v16467_v24  ;;  %v13055_v25 = vrot.slane %v1499_v40, 7  ;;  %v1833_v38 = vshrl.u32 %v1635_v33, 16  ;;  %v1983_v17 = vsel %vm334_vm0, %v12767_v29, %v12915_v39  ;;  %v1836_v26 = vshll.u32 %v1635_v33, 16  ;;  %v867_v29 = vld [vmem:[#allocation2 + $0xb8] sm:$0x3]  ;;  %v1944_v40 = vpop.permute.xlu1 %1943 }
  0xba   : > { %v1844_v9 = vshll.u32 %v1636_v22, 16  ;;  %v13060_v20 = vrot.slane %v1504_v53, 6  ;;  %v13062_v14 = vrot.slane %v1507_v34, 7  ;;  %v13064_v36 = vrot.slane %v667_v44, 6  ;;  %v1316_v33 = vld [vmem:[#allocation2 + $0x158] sm:$0x7f] }
  0xbb   : > { %2230 = vmatmul.mubr.bf16.gmra.mrb[12].mxu0 %v1979_v0  ;;  %v11847_v0 = vld [vmem:[%s16450_s1 + $0xf8] sm:$0xff]   ;;  %v13074_v45 = vrot.slane %v675_v30, 6  ;;  %v680_v62 = vrot.slane %v678_v10, 7  ;;  %v13077_v6 = vsel %vm884_vm1, %v1822_v54, %v1830_v51  ;;  %v1502_v13 = vor.u32 %v13055_v25, %v13053_v48  ;;  %v545_v30 = vld [vmem:[#allocation2 + $0xa8] sm:$0xc0] }
  0xbc   : > { %11462 = vmatprep.mubr.msk.bf16.mxu0 %vm334_vm0, %v12758_v18  ;;  %3509 = vmatpush1.bf16.msra.mxu0 %v11846_v19  ;;  %v1001_v18 = vrot.slane %v999_v61, 2  ;;  %v1841_v19 = vshrl.u32 %v1636_v22, 16  ;;  %v13072_v61 = vrot.slane %v670_v12, 7  ;;  %v1835_v31 = vrot.slane %v1833_v38, 1  ;;  %v11849_v22 = vld [vmem:[%s16450_s1 + $0x108] sm:$0xff]  }
  0xbd   : > { %v13048_v57 = vpop.permute.xlu0 %1961  ;;  %3510 = vmatprep.subr.bf16.mxu0 %v16467_v24  ;;  %v1005_v1 = vshrl.u32 %v866_v11, 16  ;;  %v1013_v54 = vshrl.u32 %v867_v29, 16  ;;  %v1016_v53 = vshll.u32 %v867_v29, 16  ;;  %v1513_v34 = vshrl.u32 %v1315_v27, 16 }
  0xbe   : > { %v1002_v15 = vor.u32 %v1001_v18, %v998_v21  ;;  %v1843_v55 = vrot.slane %v1841_v19, 1  ;;  %v1008_v21 = vshll.u32 %v866_v11, 16  ;;  %v1516_v44 = vshll.u32 %v1315_v27, 16  ;;  %v1948_v11 = vpop.permute.xlu1 %1947 }
  0xbf   : > { %v673_v51 = vor.u32 %v13072_v61, %v13064_v36  ;;  %v681_v12 = vor.u32 %v680_v62, %v13074_v45  ;;  %v1987_v10 = vsel %vm334_vm0, %v12824_v4, %v1944_v40  ;;  %v13099_v48 = vrot.slane %v1005_v1, 1  ;;  %v11850_v4 = vld [vmem:[%s16450_s1 + $0x110] sm:$0xff]  }
  0xc0   : > { %3511 = vmatpush1.bf16.msra.mxu0 %v11847_v0  ;;  %v1846_v0 = vrot.slane %v1844_v9, 2  ;;  %v1521_v25 = vshrl.u32 %v1316_v33, 16  ;;  %v1524_v38 = vshll.u32 %v1316_v33, 16  ;;  %v1010_v9 = vrot.slane %v1008_v21, 2 }
  0xc1   : > { %v1174_v43 = vpop.permute.xlu0 %1173  ;;  %3512 = vmatprep.subr.bf16.mxu0 %v16467_v24  ;;  %v684_v36 = vshrl.u32 %v545_v30, 16  ;;  %v13119_v27 = vsel %vm334_vm0, %v12928_v49, %v1948_v11  ;;  %v548_v11 = vld [vmem:[#allocation2 + $0xc8] sm:$0x7f] }
  0xc2   : > { %v1207_v39 = vsel %vm334_vm0, %v12770_v37, %v1174_v43  ;;  %v1838_v37 = vrot.slane %v1836_v26, 2  ;;  %v1847_v19 = vor.u32 %v1846_v0, %v1843_v55  ;;  %v1015_v43 = vrot.slane %v1013_v54, 1  ;;  %v1317_v55 = vld [vmem:[#allocation2 + $0x168] sm:$0xc0]  ;;  %v1318_v54 = vld [vmem:[#allocation2 + $0x170] sm:$0x7f] }
  0xc3   : > { %2238 = vmatmul.mubr.bf16.gmra.mrb[16].mxu0 %v1983_v17  ;;  %2487 = vmatmul.mubr.bf16.vlgmr.msra.gmra.mrb[0].mxu1 %v1207_v39  ;;  %v1523_v45 = vrot.slane %v1521_v25, 6  ;;  %v1526_v62 = vrot.slane %v1524_v38, 7  ;;  %v686_v0 = vrot.slane %v684_v36, 6  ;;  %v1533_v38 = vshll.u32 %v1317_v55, 16 }
  0xc4   : > { %11463 = vmatprep.mubr.msk.bf16.mxu0 %vm334_vm0, %v12815_v32  ;;  %11487 = vmatprep.mubr.msk.bf16.mxu1 %vm334_vm0, %v12821_v2  ;;  %v13089_v32 = vsel %vm884_vm1, %v994_v46, %v1002_v15  ;;  %v1510_v2 = vor.u32 %v13062_v14, %v13060_v20  ;;  %v546_v46 = vld [vmem:[#allocation2 + $0xb0] sm:$0x7f]  ;;  %v1839_v26 = vor.u32 %v1838_v37, %v1835_v31  ;;  %v1018_v15 = vrot.slane %v1016_v53, 2  ;;  %v13134_v37 = vld [vmem:[#allocation2 + $0xc8] sm:$0xfe] }
  0xc5   : > { %v1176_v18 = vpop.permute.xlu0 %1175  ;;  %3513 = vmatpush1.bf16.msra.mxu0 %v11848_v42  ;;  %v13103_v20 = vrot.slane %v1513_v34, 6  ;;  %v1518_v14 = vrot.slane %v1516_v44, 7  ;;  %v687_v42 = vshll.u32 %v545_v30, 16  ;;  %v692_v29 = vshrl.u32 %v546_v46, 16 }
  0xc6   : > { %3514 = vmatprep.subr.bf16.mxu0 %v16467_v24  ;;  %v1211_v17 = vsel %vm334_vm0, %v12828_v7, %v1176_v18  ;;  %v695_v39 = vshll.u32 %v546_v46, 16  ;;  %v1991_v7 = vsel %vm334_vm0, %v12837_v8, %v12959_v56  ;;  %v1511_v61 = vsel %vm563_vm2, %v1502_v13, %v1510_v2  ;;  %v1637_v56 = vld [vmem:[#allocation2 + $0x170] sm:$0xfe]  ;;  %v1638_v13 = vld [vmem:[#allocation2 + $0x178] sm:$0x3] }
  0xc7   : > { %v13124_v31 = vsel %vm334_vm0, %v13020_v52, %v12971_v50  ;;  %v13127_v8 = vsel %vm563_vm2, %v673_v51, %v681_v12  ;;  %v1019_v40 = vor.u32 %v1018_v15, %v1015_v43  ;;  %v1519_v49 = vor.u32 %v1518_v14, %v13103_v20  ;;  %v11851_v50 = vld [vmem:[%s16450_s1 + $0x118] sm:$0xff]   ;;  %v1952_v52 = vpop.permute.xlu1 %1951  ;;  %v869_v12 = vld [vmem:[#allocation2 + $0xd0] sm:$0x3]  ;;  %v1639_v20 = vld [vmem:[#allocation2 + $0x188] sm:$0xfe] }
  0xc8   : > { %v689_v21 = vrot.slane %v687_v42, 7  ;;  %v694_v33 = vrot.slane %v692_v29, 6  ;;  %v697_v18 = vrot.slane %v695_v39, 7  ;;  %v1527_v53 = vor.u32 %v1526_v62, %v1523_v45  ;;  %v16470_v14 = vld [vmem:[#allocation3_spill] sm:$0xff] }
  0xc9   : > { %3515 = vmatpush1.bf16.msra.mxu0 %v11849_v22  ;;  %v1178_v1 = vpop.permute.xlu0 %1177  ;;  %v1850_v34 = vshrl.u32 %v1637_v56, 16  ;;  %v1853_v44 = vshll.u32 %v1637_v56, 16  ;;  %v1858_v22 = vshrl.u32 %v1638_v13, 16  ;;  %v1861_v51 = vshll.u32 %v1638_v13, 16 }
  0xca   : > { %3516 = vmatprep.subr.bf16.mxu0 %v16467_v24  ;;  %v1215_v2 = vsel %vm334_vm0, %v12848_v23, %v1178_v1  ;;  %v1022_v30 = vshrl.u32 %v13134_v37, 16  ;;  %v13149_v25 = vsel %vm334_vm0, %v1511_v61, %v12985_v28  ;;  %v1538_v46 = vshrl.u32 %v1318_v54, 16 }
  0xcb   : > { %2246 = vmatmul.mubr.bf16.gmra.mrb[20].mxu0 %v1987_v10  ;;  %2495 = vmatmul.mubr.bf16.gmra.mrb[4].mxu1 %v1211_v17  ;;  %v1530_v10 = vshrl.u32 %v1317_v55, 16  ;;  %v690_v23 = vor.u32 %v689_v21, %v686_v0  ;;  %v1852_v43 = vrot.slane %v1850_v34, 1  ;;  %v1855_v28 = vrot.slane %v1853_v44, 2  ;;  %v16471_v0 = vld [vmem:[#allocation4_spill] sm:$0xff] }
  0xcc   : > { %11464 = vmatprep.mubr.msk.bf16.mxu0 %vm334_vm0, %v12831_v3  ;;  %11488 = vmatprep.mubr.msk.bf16.mxu1 %vm334_vm0, %v12834_v47  ;;  %v13130_v3 = vsel %vm884_vm1, %v1839_v26, %v1847_v19  ;;  %v1011_v47 = vor.u32 %v1010_v9, %v13099_v48  ;;  %v13145_v48 = vsel %vm334_vm0, %v13038_v59, %v1952_v52  ;;  %v1541_v19 = vshll.u32 %v1318_v54, 16  ;;  %v547_v9 = vld [vmem:[#allocation2 + $0xc0] sm:$0xc0] }
  0xcd   : > { %3517 = vmatpush1.bf16.msra.mxu0 %v11850_v4  ;;  %v698_v26 = vor.u32 %v697_v18, %v694_v33  ;;  %v1528_v59 = vsel %vm563_vm2, %v1519_v49, %v1527_v53  ;;  %v1860_v15 = vrot.slane %v1858_v22, 1  ;;  %v1956_v4 = vpop.permute.xlu1 %1955  ;;  %v1863_v36 = vrot.slane %v1861_v51, 2  ;;  %v1180_v61 = vpop.permute.xlu0 %1179 }
  0xce   : > { %3518 = vmatprep.subr.bf16.mxu0 %v16467_v24  ;;  %v13152_v17 = vsel %vm884_vm1, %v1011_v47, %v1019_v40  ;;  %v13160_v42 = vrot.slane %v1022_v30, 1  ;;  %v1025_v29 = vshll.u32 %v13134_v37, 16  ;;  %v1030_v39 = vshrl.u32 %v869_v12, 16  ;;  %v13169_v37 = vld [vmem:[#allocation2 + $0xe0] sm:$0xfe] }
  0xcf   : > { %v1033_v45 = vshll.u32 %v869_v12, 16  ;;  %v1532_v62 = vrot.slane %v1530_v10, 6  ;;  %v1535_v56 = vrot.slane %v1533_v38, 7  ;;  %v1540_v13 = vrot.slane %v1538_v46, 6  ;;  %v871_v10 = vld [vmem:[#allocation2 + $0xe8] sm:$0x3] }
  0xd0   : > { %v1543_v1 = vrot.slane %v1541_v19, 7  ;;  %v701_v47 = vshrl.u32 %v547_v9, 16  ;;  %v704_v40 = vshll.u32 %v547_v9, 16  ;;  %v13164_v49 = vsel %vm334_vm0, %v1528_v59, %v1956_v4  ;;  %v1319_v38 = vld [vmem:[#allocation2 + $0x180] sm:$0xc0] }
  0xd1   : > { %3519 = vmatpush1.bf16.msra.mxu0 %v11851_v50  ;;  %v13167_v55 = vsel %vm563_vm2, %v690_v23, %v698_v26  ;;  %v712_v50 = vshll.u32 %v548_v11, 16  ;;  %v1867_v52 = vshrl.u32 %v1639_v20, 16  ;;  %v1219_v21 = vsel %vm334_vm0, %v16471_v0, %v1180_v61  ;;  %v1320_v9 = vld [vmem:[#allocation2 + $0x188] sm:$0x7f] }
  0xd2   : > { %4948 = vmatprep.subr.bf16.mxu0 %v16467_v24  ;;  %v1870_v33 = vshll.u32 %v1639_v20, 16  ;;  %v1856_v53 = vor.u32 %v1855_v28, %v1852_v43  ;;  %v1027_v34 = vrot.slane %v1025_v29, 2  ;;  %v1032_v44 = vrot.slane %v1030_v39, 1  ;;  %v549_v20 = vld [vmem:[#allocation2 + $0xd8] sm:$0xc0] }
  0xd3   : > { %2254 = vmatmul.mubr.bf16.gmra.mrb[24].mxu0 %v1991_v7  ;;  %2503 = vmatmul.mubr.bf16.gmra.mrb[8].mxu1 %v1215_v2  ;;  %v1640_v7 = vld [vmem:[#allocation2 + $0x190] sm:$0x3]  ;;  %v1035_v22 = vrot.slane %v1033_v45, 2  ;;  %v1864_v2 = vor.u32 %v1863_v36, %v1860_v15  ;;  %v1536_v51 = vor.u32 %v1535_v56, %v1532_v62  ;;  %v1544_v12 = vor.u32 %v1543_v1, %v1540_v13 }
  0xd4   : > { %11465 = vmatprep.mubr.msk.bf16.mxu0 %vm334_vm0, %v12904_v5  ;;  %11489 = vmatprep.mubr.msk.bf16.mxu1 %vm334_vm0, %v16470_v14  ;;  %v709_v5 = vshrl.u32 %v548_v11, 16  ;;  %v1875_v18 = vshrl.u32 %v1640_v7, 16  ;;  %v1878_v54 = vshll.u32 %v1640_v7, 16  ;;  %v703_v30 = vrot.slane %v701_v47, 6  ;;  %v16472_v11 = vld [vmem:[#allocation5_spill] sm:$0xff] }
  0xd5   : > { %v706_v46 = vrot.slane %v704_v40, 7  ;;  %v714_v26 = vrot.slane %v712_v50, 7  ;;  %v1869_v19 = vrot.slane %v1867_v52, 1  ;;  %v1872_v59 = vrot.slane %v1870_v33, 2  ;;  %v13179_v14 = vld [vmem:[#allocation2 + $0xe0] sm:$0x7f] }
  0xd6   : > { %v711_v23 = vrot.slane %v709_v5, 6  ;;  %v1877_v43 = vrot.slane %v1875_v18, 1  ;;  %v1880_v28 = vrot.slane %v1878_v54, 2  ;;  %v1039_v15 = vshrl.u32 %v13169_v37, 16  ;;  %v1641_v50 = vld [vmem:[#allocation2 + $0x1a0] sm:$0xfe] }
  0xd7   : > { %v1028_v4 = vor.u32 %v1027_v34, %v13160_v42  ;;  %v1036_v36 = vor.u32 %v1035_v22, %v1032_v44  ;;  %v1547_v29 = vshrl.u32 %v1319_v38, 16  ;;  %v1550_v39 = vshll.u32 %v1319_v38, 16  ;;  %v1642_v18 = vld [vmem:[#allocation2 + $0x1a8] sm:$0x3]  ;;  %v872_v44 = vld [vmem:[#allocation2 + $0xf8] sm:$0xfe] }
  0xd8   : > { %v13183_v7 = vsel %vm884_vm1, %v1856_v53, %v1864_v2  ;;  %v1545_v61 = vsel %vm563_vm2, %v1536_v51, %v1544_v12  ;;  %v1558_v45 = vshll.u32 %v1320_v9, 16  ;;  %v707_v62 = vor.u32 %v706_v46, %v703_v30  ;;  %v873_v12 = vld [vmem:[#allocation2 + $0x100] sm:$0x3]  ;;  %v1321_v30 = vld [vmem:[#allocation2 + $0x198] sm:$0xc0] }
  0xd9   : > { %v715_v56 = vor.u32 %v714_v26, %v711_v23  ;;  %v1042_v13 = vshll.u32 %v13169_v37, 16  ;;  %v1047_v1 = vshrl.u32 %v871_v10, 16  ;;  %v1873_v40 = vor.u32 %v1872_v59, %v1869_v19  ;;  %v1322_v46 = vld [vmem:[#allocation2 + $0x1a0] sm:$0x7f] }
  0xda   : > { %v1881_v42 = vor.u32 %v1880_v28, %v1877_v43  ;;  %v1050_v5 = vshll.u32 %v871_v10, 16  ;;  %v13190_v52 = vsel %vm884_vm1, %v1028_v4, %v1036_v36  ;;  %v718_v0 = vshrl.u32 %v549_v20, 16 }
  0xdb   : > { %2262 = vmatmul.mubr.bf16.gmra.mrb[28].mxu0 %v13119_v27  ;;  %2511 = vmatmul.mubr.bf16.gmra.mrb[12].mxu1 %v1219_v21  ;;  %v1182_v27 = vpop.permute.xlu0 %1181  ;;  %v721_v21 = vshll.u32 %v549_v20, 16  ;;  %v726_v33 = vshrl.u32 %v13179_v14, 16  ;;  %v1549_v54 = vrot.slane %v1547_v29, 6  ;;  %v1552_v53 = vrot.slane %v1550_v39, 7 }
  0xdc   : > { %11466 = vmatprep.mubr.msk.bf16.mxu0 %vm334_vm0, %v16472_v11  ;;  %11490 = vmatprep.mubr.msk.bf16.mxu1 %vm334_vm0, %v13010_v58  ;;  %v1555_v58 = vshrl.u32 %v1320_v9, 16  ;;  %v1223_v47 = vsel %vm334_vm0, %v13023_v16, %v1182_v27  ;;  %v1560_v37 = vrot.slane %v1558_v45, 7  ;;  %v13196_v16 = vsel %vm334_vm0, %v1545_v61, %v13001_v35 }
  0xdd   : > { %v13199_v22 = vsel %vm563_vm2, %v707_v62, %v715_v56  ;;  %v1041_v2 = vrot.slane %v1039_v15, 1  ;;  %v1044_v51 = vrot.slane %v1042_v13, 2  ;;  %v1049_v10 = vrot.slane %v1047_v1, 1 }
  0xde   : > { %v1557_v34 = vrot.slane %v1555_v58, 6  ;;  %v1052_v38 = vrot.slane %v1050_v5, 2  ;;  %v729_v35 = vshll.u32 %v13179_v14, 16  ;;  %v13209_v26 = vrot.slane %v718_v0, 6  ;;  %v552_v0 = vld [vmem:[#allocation2 + $0xf8] sm:$0x7f] }
  0xdf   : > { %v1184_v23 = vpop.permute.xlu0 %1183  ;;  %v13211_v19 = vrot.slane %v721_v21, 7  ;;  %v13213_v9 = vrot.slane %v726_v33, 6  ;;  %v1884_v11 = vshrl.u32 %v1641_v50, 16  ;;  %v1887_v43 = vshll.u32 %v1641_v50, 16 }
  0xe0   : > { %v1561_v59 = vor.u32 %v1560_v37, %v1557_v34  ;;  %v1895_v28 = vshll.u32 %v1642_v18, 16  ;;  %v1056_v15 = vshrl.u32 %v872_v44, 16  ;;  %v1059_v20 = vshll.u32 %v872_v44, 16  ;;  %v1644_v34 = vld [vmem:[#allocation2 + $0x1c0] sm:$0x3] }
  0xe1   : > { %v1064_v27 = vshrl.u32 %v873_v12, 16  ;;  %v1227_v14 = vsel %vm334_vm0, %v13041_v60, %v1184_v23  ;;  %v1067_v4 = vshll.u32 %v873_v12, 16  ;;  %v1564_v36 = vshrl.u32 %v1321_v30, 16  ;;  %v874_v12 = vld [vmem:[#allocation2 + $0x110] sm:$0xfe] }
  0xe2   : > { %v1567_v29 = vshll.u32 %v1321_v30, 16  ;;  %v1045_v39 = vor.u32 %v1044_v51, %v1041_v2  ;;  %v1053_v61 = vor.u32 %v1052_v38, %v1049_v10  ;;  %v1572_v58 = vshrl.u32 %v1322_v46, 16 }
  0xe3   : > { %2270 = vmatmul.mubr.bf16.gmra.mrb[32].mxu0 %v13124_v31  ;;  %2519 = vmatmul.mubr.bf16.gmra.mrb[16].mxu1 %v1223_v47  ;;  %v13206_v31 = vsel %vm884_vm1, %v1873_v40, %v1881_v42  ;;  %v1575_v45 = vshll.u32 %v1322_v46, 16  ;;  %v731_v56 = vrot.slane %v729_v35, 7  ;;  %v1886_v13 = vrot.slane %v1884_v11, 1  ;;  %v551_v47 = vld [vmem:[#allocation2 + $0xf0] sm:$0xc0]  ;;  %v1960_v40 = vpop.permute.xlu1 %1959 }
  0xe4   : > { %11467 = vmatprep.mubr.msk.bf16.mxu0 %vm334_vm0, %v13026_v41  ;;  %11491 = vmatprep.mubr.msk.bf16.mxu1 %vm334_vm0, %v13029_v63  ;;  %v1553_v41 = vor.u32 %v1552_v53, %v1549_v54  ;;  %v1892_v63 = vshrl.u32 %v1642_v18, 16  ;;  %v1889_v1 = vrot.slane %v1887_v43, 2  ;;  %v1897_v5 = vrot.slane %v1895_v28, 2  ;;  %v1643_v53 = vld [vmem:[#allocation2 + $0x1b8] sm:$0xfe] }
  0xe5   : > { %v1058_v60 = vrot.slane %v1056_v15, 1  ;;  %v1061_v50 = vrot.slane %v1059_v20, 2  ;;  %v1066_v21 = vrot.slane %v1064_v27, 1  ;;  %v1069_v33 = vrot.slane %v1067_v4, 2  ;;  %v1323_v4 = vld [vmem:[#allocation2 + $0x1b0] sm:$0xc0] }
  0xe6   : > { %v1562_v62 = vsel %vm563_vm2, %v1553_v41, %v1561_v59  ;;  %v1894_v42 = vrot.slane %v1892_v63, 1  ;;  %v1566_v18 = vrot.slane %v1564_v36, 6  ;;  %v1569_v54 = vrot.slane %v1567_v29, 7 }
  0xe7   : > { %v13224_v37 = vsel %vm884_vm1, %v1045_v39, %v1053_v61  ;;  %v724_v44 = vor.u32 %v13211_v19, %v13209_v26  ;;  %v1574_v2 = vrot.slane %v1572_v58, 6  ;;  %v1577_v51 = vrot.slane %v1575_v45, 7  ;;  %v875_v19 = vld [vmem:[#allocation2 + $0x118] sm:$0x3] }
  0xe8   : > { %v1890_v30 = vor.u32 %v1889_v1, %v1886_v13  ;;  %v735_v10 = vshrl.u32 %v551_v47, 16  ;;  %v1898_v38 = vor.u32 %v1897_v5, %v1894_v42  ;;  %v738_v35 = vshll.u32 %v551_v47, 16  ;;  %v1324_v61 = vld [vmem:[#allocation2 + $0x1b8] sm:$0x7f]  ;;  %v553_v13 = vld [vmem:[#allocation2 + $0x108] sm:$0xc0] }
  0xe9   : > { %v743_v46 = vshrl.u32 %v552_v0, 16  ;;  %v746_v23 = vshll.u32 %v552_v0, 16  ;;  %v1062_v41 = vor.u32 %v1061_v50, %v1058_v60  ;;  %v1070_v59 = vor.u32 %v1069_v33, %v1066_v21  ;;  %v554_v1 = vld [vmem:[#allocation2 + $0x110] sm:$0x7f] }
  0xea   : > { %v1570_v26 = vor.u32 %v1569_v54, %v1566_v18  ;;  %v1578_v43 = vor.u32 %v1577_v51, %v1574_v2  ;;  %v1901_v63 = vshrl.u32 %v1643_v53, 16  ;;  %v1904_v28 = vshll.u32 %v1643_v53, 16 }
  0xeb   : > { %2278 = vmatmul.mubr.bf16.gmra.mrb[36].mxu0 %v13145_v48  ;;  %2527 = vmatmul.mubr.bf16.gmra.mrb[20].mxu1 %v1227_v14  ;;  %v1186_v48 = vpop.permute.xlu0 %1185  ;;  %v1909_v15 = vshrl.u32 %v1644_v34, 16  ;;  %v1912_v27 = vshll.u32 %v1644_v34, 16  ;;  %v1073_v14 = vshrl.u32 %v874_v12, 16  ;;  %v740_v36 = vrot.slane %v738_v35, 7 }
  0xec   : > { %11468 = vmatprep.mubr.msk.bf16.mxu0 %vm334_vm0, %v13077_v6  ;;  %11492 = vmatprep.mubr.msk.bf16.mxu1 %vm334_vm0, %v13089_v32  ;;  %v13229_v6 = vsel %vm334_vm0, %v1562_v62, %v1960_v40  ;;  %v732_v32 = vor.u32 %v731_v56, %v13213_v9  ;;  %v1231_v11 = vsel %vm334_vm0, %v13127_v8, %v1186_v48  ;;  %v737_v9 = vrot.slane %v735_v10, 6 }
  0xed   : > { %v745_v8 = vrot.slane %v743_v46, 6  ;;  %v748_v29 = vrot.slane %v746_v23, 7  ;;  %v1076_v39 = vshll.u32 %v874_v12, 16  ;;  %v13243_v45 = vsel %vm884_vm1, %v1890_v30, %v1898_v38 }
  0xee   : > { %v13235_v20 = vsel %vm563_vm2, %v724_v44, %v732_v32  ;;  %v13246_v62 = vsel %vm884_vm1, %v1062_v41, %v1070_v59  ;;  %v1084_v56 = vshll.u32 %v875_v19, 16  ;;  %v1579_v47 = vsel %vm563_vm2, %v1570_v26, %v1578_v43  ;;  %v876_v59 = vld [vmem:[#allocation2 + $0x128] sm:$0xfe] }
  0xef   : > { %v1188_v58 = vpop.permute.xlu0 %1187  ;;  %v1903_v40 = vrot.slane %v1901_v63, 1  ;;  %v1906_v42 = vrot.slane %v1904_v28, 2  ;;  %v1911_v5 = vrot.slane %v1909_v15, 1  ;;  %v1914_v60 = vrot.slane %v1912_v27, 2  ;;  %v877_v63 = vld [vmem:[#allocation2 + $0x130] sm:$0x3] }
  0xf0   : > { %v1581_v50 = vshrl.u32 %v1323_v4, 16  ;;  %v1584_v0 = vshll.u32 %v1323_v4, 16  ;;  %v741_v21 = vor.u32 %v740_v36, %v737_v9  ;;  %v749_v33 = vor.u32 %v748_v29, %v745_v8  ;;  %v2936_v28 = vld [vmem:[#allocation2 + $0x98] sm:$0xfe]  ;;  %v2937_v4 = vld [vmem:[#allocation2 + $0xa0] sm:$0x3] }
  0xf1   : > { %v1078_v18 = vrot.slane %v1076_v39, 2  ;;  %v1589_v54 = vshrl.u32 %v1324_v61, 16  ;;  %v1235_v53 = vsel %vm334_vm0, %v13167_v55, %v1188_v58  ;;  %v13253_v48 = vsel %vm334_vm0, %v1579_v47, %v13048_v57  ;;  %v555_v29 = vld [vmem:[#allocation2 + $0x120] sm:$0xc0] }
  0xf2   : > { %v1086_v2 = vrot.slane %v1084_v56, 2  ;;  %v1592_v51 = vshll.u32 %v1324_v61, 16  ;;  %v752_v12 = vshrl.u32 %v553_v13, 16  ;;  %v755_v32 = vshll.u32 %v553_v13, 16  ;;  %v556_v56 = vld [vmem:[#allocation2 + $0x128] sm:$0x7f] }
  0xf3   : > { %2286 = vmatmul.mubr.bf16.gmra.mrb[40].mxu0 %v13149_v25  ;;  %2535 = vmatmul.mubr.bf16.gmra.mrb[24].mxu1 %v1231_v11  ;;  %v1081_v25 = vshrl.u32 %v875_v19, 16  ;;  %v1190_v34 = vpop.permute.xlu0 %1189  ;;  %v760_v30 = vshrl.u32 %v554_v1, 16  ;;  %v1907_v10 = vor.u32 %v1906_v42, %v1903_v40  ;;  %v1915_v38 = vor.u32 %v1914_v60, %v1911_v5  ;;  %v2617_v11 = vld [vmem:[#allocation2 + $0x98] sm:$0x7f] }
  0xf4   : > { %11469 = vmatprep.mubr.msk.bf16.mxu0 %vm334_vm0, %v13130_v3  ;;  %11493 = vmatprep.mubr.msk.bf16.mxu1 %vm334_vm0, %v13152_v17  ;;  %v1075_v3 = vrot.slane %v1073_v14, 1  ;;  %v2616_v17 = vld [vmem:[#allocation2 + $0x90] sm:$0xc0]  ;;  %v13255_v35 = vrot.slane %v1581_v50, 6  ;;  %v13257_v46 = vrot.slane %v1584_v0, 7  ;;  %v1239_v55 = vsel %vm334_vm0, %v13199_v22, %v1190_v34 }
  0xf5   : > { %v1083_v44 = vrot.slane %v1081_v25, 1  ;;  %v750_v57 = vsel %vm563_vm2, %v741_v21, %v749_v33  ;;  %v763_v23 = vshll.u32 %v554_v1, 16  ;;  %v2649_v41 = vshrl.u32 %v2616_v17, 16 }
  0xf6   : > { %v1079_v26 = vor.u32 %v1078_v18, %v1075_v3  ;;  %v13267_v43 = vrot.slane %v1589_v54, 6  ;;  %v13269_v15 = vrot.slane %v1592_v51, 7  ;;  %v13271_v9 = vrot.slane %v752_v12, 6  ;;  %v878_v18 = vld [vmem:[#allocation2 + $0x140] sm:$0xfe] }
  0xf7   : > { %v1087_v19 = vor.u32 %v1086_v2, %v1083_v44  ;;  %v1192_v22 = vpop.permute.xlu0 %1191  ;;  %v13273_v27 = vrot.slane %v755_v32, 7  ;;  %v762_v14 = vrot.slane %v760_v30, 6  ;;  %v2657_v36 = vshrl.u32 %v2617_v11, 16  ;;  %v879_v44 = vld [vmem:[#allocation2 + $0x148] sm:$0x3] }
  0xf8   : > { %v2660_v8 = vshll.u32 %v2617_v11, 16  ;;  %v765_v39 = vrot.slane %v763_v23, 7  ;;  %v2651_v61 = vrot.slane %v2649_v41, 6  ;;  %v1090_v58 = vshrl.u32 %v876_v59, 16  ;;  %v13297_v30 = vld [vmem:[#allocation2 + $0xb0] sm:$0xfe] }
  0xf9   : > { %v1093_v25 = vshll.u32 %v876_v59, 16  ;;  %v1243_v13 = vsel %vm334_vm0, %v13235_v20, %v1192_v22  ;;  %v13283_v1 = vsel %vm884_vm1, %v1079_v26, %v1087_v19  ;;  %v1098_v40 = vshrl.u32 %v877_v63, 16  ;;  %v1964_v19 = vpop.permute.xlu1 %1963 }
  0xfa   : > { %v1595_v5 = vor.u32 %v13269_v15, %v13267_v43  ;;  %v758_v60 = vor.u32 %v13273_v27, %v13271_v9  ;;  %v1101_v3 = vshll.u32 %v877_v63, 16  ;;  %v2969_v50 = vshrl.u32 %v2936_v28, 16 }
  0xfb   : > { %2294 = vmatmul.mubr.bf16.gmra.mrb[44].mxu0 %v13164_v49  ;;  %2543 = vmatmul.mubr.bf16.gmra.mrb[28].mxu1 %v1235_v53  ;;  %v2652_v49 = vshll.u32 %v2616_v17, 16  ;;  %v1194_v42 = vpop.permute.xlu0 %1193  ;;  %v2659_v0 = vrot.slane %v2657_v36, 6  ;;  %v2662_v17 = vrot.slane %v2660_v8, 7  ;;  %v2972_v21 = vshll.u32 %v2936_v28, 16 }
  0xfc   : > { %11470 = vmatprep.mubr.msk.bf16.mxu0 %vm334_vm0, %v13183_v7  ;;  %11494 = vmatprep.mubr.msk.bf16.mxu1 %vm334_vm0, %v13190_v52  ;;  %v13276_v7 = vsel %vm884_vm1, %v1907_v10, %v1915_v38  ;;  %v1587_v52 = vor.u32 %v13257_v46, %v13255_v35  ;;  %v2977_v33 = vshrl.u32 %v2937_v4, 16  ;;  %v766_v20 = vor.u32 %v765_v39, %v762_v14 }
  0xfd   : > { %v2654_v47 = vrot.slane %v2652_v49, 7  ;;  %v2980_v54 = vshll.u32 %v2937_v4, 16  ;;  %v769_v53 = vshrl.u32 %v555_v29, 16  ;;  %v772_v34 = vshll.u32 %v555_v29, 16 }
  0xfe   : > { %v13295_v2 = vsel %vm334_vm0, %v750_v57, %v1194_v42  ;;  %v1092_v51 = vrot.slane %v1090_v58, 1  ;;  %v777_v12 = vshrl.u32 %v556_v56, 16  ;;  %v780_v32 = vshll.u32 %v556_v56, 16  ;;  %v558_v57 = vld [vmem:[#allocation2 + $0x140] sm:$0x7f] }
  0xff   : > { %v1100_v10 = vrot.slane %v1098_v40, 1  ;;  %v1103_v38 = vrot.slane %v1101_v3, 2  ;;  %v2971_v35 = vrot.slane %v2969_v50, 1  ;;  %v2655_v46 = vor.u32 %v2654_v47, %v2651_v61  ;;  %v1196_v29 = vpop.permute.xlu0 %1195  ;;  %v2618_v56 = vld [vmem:[#allocation2 + $0xa8] sm:$0xc0]  ;;  %v3257_v47 = vpop.permute.xlu1 %3256 }
 0x100   : > { %v2974_v23 = vrot.slane %v2972_v21, 2  ;;  %v2979_v11 = vrot.slane %v2977_v33, 1  ;;  %v2982_v41 = vrot.slane %v2980_v54, 2  ;;  %v771_v59 = vrot.slane %v769_v53, 6 }
 0x101   : > { %v1107_v26 = vshrl.u32 %v878_v18, 16  ;;  %v779_v43 = vrot.slane %v777_v12, 6  ;;  %v782_v49 = vrot.slane %v780_v32, 7  ;;  %v1110_v63 = vshll.u32 %v878_v18, 16 }
 0x102   : > { %v1115_v28 = vshrl.u32 %v879_v44, 16  ;;  %v1596_v22 = vsel %vm563_vm2, %v1587_v52, %v1595_v5  ;;  %v767_v15 = vsel %vm563_vm2, %v758_v60, %v766_v20  ;;  %v1118_v9 = vshll.u32 %v879_v44, 16  ;;  %v2619_v5 = vld [vmem:[#allocation2 + $0xb0] sm:$0x7f] }
 0x103   : > { %2302 = vmatmul.mubr.bf16.gmra.mrb[48].mxu0 %v13196_v16  ;;  %2551 = vmatmul.mubr.bf16.gmra.mrb[32].mxu1 %v1239_v55  ;;  %v1095_v16 = vrot.slane %v1093_v25, 2  ;;  %v2663_v55 = vor.u32 %v2662_v17, %v2659_v0  ;;  %v2986_v27 = vshrl.u32 %v13297_v30, 16  ;;  %v1104_v36 = vor.u32 %v1103_v38, %v1100_v10  ;;  %v2939_v25 = vld [vmem:[#allocation2 + $0xb8] sm:$0x3] }
 0x104   : > { %11471 = vmatprep.mubr.msk.bf16.mxu0 %vm334_vm0, %v13206_v31  ;;  %11495 = vmatprep.mubr.msk.bf16.mxu1 %vm334_vm0, %v13224_v37  ;;  %v557_v31 = vld [vmem:[#allocation2 + $0x138] sm:$0xc0]  ;;  %v774_v37 = vrot.slane %v772_v34, 7  ;;  %v2975_v8 = vor.u32 %v2974_v23, %v2971_v35  ;;  %v2983_v39 = vor.u32 %v2982_v41, %v2979_v11  ;;  %v13304_v58 = vrot.slane %v1107_v26, 1  ;;  %v2940_v11 = vld [vmem:[#allocation2 + $0xc8] sm:$0xfe] }
 0x105   : > { %v2664_v14 = vsel %vm563_vm2, %v2655_v46, %v2663_v55  ;;  %v1096_v4 = vor.u32 %v1095_v16, %v1092_v51  ;;  %v786_v52 = vshrl.u32 %v557_v31, 16  ;;  %v783_v40 = vor.u32 %v782_v49, %v779_v43  ;;  %v880_v17 = vld [vmem:[#allocation2 + $0x158] sm:$0xfe]  ;;  %v2941_v43 = vld [vmem:[#allocation2 + $0xd0] sm:$0x3]  ;;  %v1198_v49 = vpop.permute.xlu0 %1197 }
 0x106   : > { %v775_v61 = vor.u32 %v774_v37, %v771_v59  ;;  %v13310_v42 = vrot.slane %v1110_v63, 2  ;;  %v13312_v60 = vrot.slane %v1115_v28, 1  ;;  %v13314_v3 = vrot.slane %v1118_v9, 2  ;;  %v560_v9 = vld [vmem:[#allocation2 + $0x158] sm:$0x7f] }
 0x107   : > { %v13316_v50 = vrot.slane %v2986_v27, 1  ;;  %v2989_v0 = vshll.u32 %v13297_v30, 16  ;;  %v13320_v21 = vsel %vm334_vm0, %v1596_v22, %v1964_v19  ;;  %v2994_v33 = vshrl.u32 %v2939_v25, 16 }
 0x108   : > { %v797_v18 = vshll.u32 %v558_v57, 16  ;;  %v13326_v20 = vsel %vm334_vm0, %v2664_v14, %v3257_v47  ;;  %v13329_v54 = vsel %vm884_vm1, %v1096_v4, %v1104_v36  ;;  %v2997_v53 = vshll.u32 %v2939_v25, 16  ;;  %v2620_v4 = vld [vmem:[#allocation2 + $0xc0] sm:$0xc0] }
 0x109   : > { %v788_v34 = vrot.slane %v786_v52, 6  ;;  %v2666_v12 = vshrl.u32 %v2618_v56, 16  ;;  %v2669_v32 = vshll.u32 %v2618_v56, 16  ;;  %v2984_v30 = vsel %vm884_vm1, %v2975_v8, %v2983_v39 }
 0x10a   : > { %v784_v16 = vsel %vm563_vm2, %v775_v61, %v783_v40  ;;  %v2674_v10 = vshrl.u32 %v2619_v5, 16  ;;  %v2677_v38 = vshll.u32 %v2619_v5, 16  ;;  %v799_v35 = vrot.slane %v797_v18, 7 }
 0x10b   : > { %2310 = vmatmul.mubr.bf16.gmra.mrb[52].mxu0 %v13229_v6  ;;  %2559 = vmatmul.mubr.bf16.gmra.mrb[36].mxu1 %v1243_v13  ;;  %v789_v6 = vshll.u32 %v557_v31, 16  ;;  %v794_v13 = vshrl.u32 %v558_v57, 16  ;;  %v1124_v46 = vshrl.u32 %v880_v17, 16  ;;  %v1127_v55 = vshll.u32 %v880_v17, 16 }
 0x10c   : > { %11472 = vmatprep.mubr.msk.bf16.mxu0 %vm334_vm0, %v13243_v45  ;;  %11496 = vmatprep.mubr.msk.bf16.mxu1 %vm334_vm0, %v13246_v62  ;;  %v881_v45 = vld [vmem:[#allocation2 + $0x160] sm:$0x3]  ;;  %v13323_v62 = vsel %vm334_vm0, %v767_v15, %v1196_v29  ;;  %v2991_v31 = vrot.slane %v2989_v0, 2  ;;  %v2996_v41 = vrot.slane %v2994_v33, 1  ;;  %v2999_v59 = vrot.slane %v2997_v53, 2 }
 0x10d   : > { %v791_v44 = vrot.slane %v789_v6, 7  ;;  %v796_v51 = vrot.slane %v794_v13, 6  ;;  %v1132_v23 = vshrl.u32 %v881_v45, 16  ;;  %v1135_v37 = vshll.u32 %v881_v45, 16  ;;  %v2621_v6 = vld [vmem:[#allocation2 + $0xc8] sm:$0x7f]  ;;  %v1200_v13 = vpop.permute.xlu0 %1199 }
 0x10e   : > { %v1113_v26 = vor.u32 %v13310_v42, %v13304_v58  ;;  %v1121_v57 = vor.u32 %v13314_v3, %v13312_v60  ;;  %v2668_v19 = vrot.slane %v2666_v12, 6  ;;  %v2676_v28 = vrot.slane %v2674_v10, 6  ;;  %v882_v0 = vld [vmem:[#allocation2 + $0x170] sm:$0xfe]  ;;  %v883_v53 = vld [vmem:[#allocation2 + $0x178] sm:$0x3] }
 0x10f   : > { %v792_v63 = vor.u32 %v791_v44, %v788_v34  ;;  %v2679_v22 = vrot.slane %v2677_v38, 7  ;;  %v3003_v15 = vshrl.u32 %v2940_v11, 16  ;;  %v1126_v27 = vrot.slane %v1124_v46, 1 }
 0x110   : > { %v1129_v14 = vrot.slane %v1127_v55, 2  ;;  %v2992_v36 = vor.u32 %v2991_v31, %v13316_v50  ;;  %v3000_v8 = vor.u32 %v2999_v59, %v2996_v41  ;;  %v1137_v29 = vrot.slane %v1135_v37, 2  ;;  %v562_v37 = vld [vmem:[#allocation2 + $0x170] sm:$0x7f] }
 0x111   : > { %v3006_v39 = vshll.u32 %v2940_v11, 16  ;;  %v1255_v61 = vsel %vm334_vm0, %v784_v16, %v1198_v49  ;;  %v3011_v25 = vshrl.u32 %v2941_v43, 16  ;;  %v3014_v52 = vshll.u32 %v2941_v43, 16 }
 0x112   : > { %v2680_v56 = vor.u32 %v2679_v22, %v2676_v28  ;;  %v13345_v47 = vrot.slane %v3003_v15, 1  ;;  %v1122_v5 = vsel %vm884_vm1, %v1113_v26, %v1121_v57  ;;  %v811_v3 = vshrl.u32 %v560_v9, 16 }
 0x113   : > { %2318 = vmatmul.mubr.bf16.gmra.mrb[56].mxu0 %v13253_v48  ;;  %2567 = vmatmul.mubr.bf16.gmra.mrb[40].mxu1 %v13295_v2  ;;  %v2671_v48 = vrot.slane %v2669_v32, 7  ;;  %v559_v2 = vld [vmem:[#allocation2 + $0x150] sm:$0xc0]  ;;  %v814_v50 = vshll.u32 %v560_v9, 16  ;;  %v3001_v17 = vsel %vm884_vm1, %v2992_v36, %v3000_v8  ;;  %v1130_v45 = vor.u32 %v1129_v14, %v1126_v27  ;;  %v2623_v36 = vld [vmem:[#allocation2 + $0xe0] sm:$0x7f] }
 0x114   : > { %11473 = vmatprep.mubr.msk.bf16.mxu0 %vm334_vm0, %v13276_v7  ;;  %11497 = vmatprep.mubr.msk.bf16.mxu1 %vm334_vm0, %v13283_v1  ;;  %v800_v7 = vor.u32 %v799_v35, %v796_v51  ;;  %v1134_v1 = vrot.slane %v1132_v23, 1  ;;  %v803_v40 = vshrl.u32 %v559_v2, 16  ;;  %v806_v42 = vshll.u32 %v559_v2, 16  ;;  %v2943_v35 = vld [vmem:[#allocation2 + $0xe8] sm:$0x3] }
 0x115   : > { %v2672_v58 = vor.u32 %v2671_v48, %v2668_v19  ;;  %v2683_v33 = vshrl.u32 %v2620_v4, 16  ;;  %v2686_v18 = vshll.u32 %v2620_v4, 16  ;;  %v13355_v44 = vrot.slane %v3006_v39, 2  ;;  %v561_v23 = vld [vmem:[#allocation2 + $0x168] sm:$0xc0] }
 0x116   : > { %v801_v60 = vsel %vm563_vm2, %v792_v63, %v800_v7  ;;  %v1138_v34 = vor.u32 %v1137_v29, %v1134_v1  ;;  %v13357_v51 = vrot.slane %v3011_v25, 1  ;;  %v13359_v12 = vrot.slane %v3014_v52, 2  ;;  %v2622_v7 = vld [vmem:[#allocation2 + $0xd8] sm:$0xc0] }
 0x117   : > { %v13362_v32 = vsel %vm334_vm0, %v801_v60, %v1200_v13  ;;  %v2681_v16 = vsel %vm563_vm2, %v2672_v58, %v2680_v56  ;;  %v805_v10 = vrot.slane %v803_v40, 6  ;;  %v808_v38 = vrot.slane %v806_v42, 7  ;;  %v2944_v25 = vld [vmem:[#allocation2 + $0xf8] sm:$0xfe]  ;;  %v2945_v40 = vld [vmem:[#allocation2 + $0x100] sm:$0x3] }
 0x118   : > { %v816_v46 = vrot.slane %v814_v50, 7  ;;  %v2694_v55 = vshll.u32 %v2621_v6, 16  ;;  %v2685_v11 = vrot.slane %v2683_v33, 6  ;;  %v2688_v31 = vrot.slane %v2686_v18, 7  ;;  %v2624_v18 = vld [vmem:[#allocation2 + $0xf0] sm:$0xc0] }
 0x119   : > { %v1141_v41 = vshrl.u32 %v882_v0, 16  ;;  %v1144_v59 = vshll.u32 %v882_v0, 16  ;;  %v1139_v57 = vsel %vm884_vm1, %v1130_v45, %v1138_v34  ;;  %v1149_v19 = vshrl.u32 %v883_v53, 16 }
 0x11a   : > { %v1152_v48 = vshll.u32 %v883_v53, 16  ;;  %v3009_v43 = vor.u32 %v13355_v44, %v13345_v47  ;;  %v3017_v2 = vor.u32 %v13359_v12, %v13357_v51  ;;  %v2696_v22 = vrot.slane %v2694_v55, 7  ;;  %v1202_v55 = vpop.permute.xlu0 %1201 }
 0x11b   : > { %2326 = vmatmul.mubr.bf16.gmra.mrb[60].mxu0 %v13320_v21  ;;  %2575 = vmatmul.mubr.bf16.gmra.mrb[44].mxu1 %v13323_v62  ;;  %v2942_v21 = vld [vmem:[#allocation2 + $0xe0] sm:$0xfe]  ;;  %v3259_v62 = vpop.permute.xlu1 %3258  ;;  %v3028_v15 = vshrl.u32 %v2943_v35, 16  ;;  %v3031_v9 = vshll.u32 %v2943_v35, 16  ;;  %v809_v27 = vor.u32 %v808_v38, %v805_v10  ;;  %v820_v1 = vshrl.u32 %v561_v23, 16 }
 0x11c   : > { %11498 = vmatprep.mubr.msk.bf16.mxu1 %vm334_vm0, %v13329_v54  ;;  %11514 = vmatprep.mubr.msk.bf16.mxu0 %vm334_vm0, %v2984_v30  ;;  %v813_v54 = vrot.slane %v811_v3, 6  ;;  %v2691_v30 = vshrl.u32 %v2621_v6, 16  ;;  %v3294_v26 = vsel %vm334_vm0, %v2681_v16, %v3259_v62  ;;  %v3020_v49 = vshrl.u32 %v2942_v21, 16  ;;  %v2625_v10 = vld [vmem:[#allocation2 + $0xf8] sm:$0x7f] }
 0x11d   : > { %v3023_v63 = vshll.u32 %v2942_v21, 16  ;;  %v823_v4 = vshll.u32 %v561_v23, 16  ;;  %v1143_v8 = vrot.slane %v1141_v41, 1  ;;  %v1146_v29 = vrot.slane %v1144_v59, 2  ;;  %v2946_v59 = vld [vmem:[#allocation2 + $0x110] sm:$0xfe] }
 0x11e   : > { %v2693_v28 = vrot.slane %v2691_v30, 6  ;;  %v817_v14 = vor.u32 %v816_v46, %v813_v54  ;;  %v828_v39 = vshrl.u32 %v562_v37, 16  ;;  %v831_v58 = vshll.u32 %v562_v37, 16 }
 0x11f   : > { %v1151_v52 = vrot.slane %v1149_v19, 1  ;;  %v1154_v56 = vrot.slane %v1152_v48, 2  ;;  %v3022_v47 = vrot.slane %v3020_v49, 1  ;;  %v3030_v6 = vrot.slane %v3028_v15, 1  ;;  %v3261_v30 = vpop.permute.xlu1 %3260 }
 0x120   : > { %v2697_v42 = vor.u32 %v2696_v22, %v2693_v28  ;;  %v3033_v13 = vrot.slane %v3031_v9, 2  ;;  %v822_v60 = vrot.slane %v820_v1, 6  ;;  %v825_v3 = vrot.slane %v823_v4, 7  ;;  %v2626_v22 = vld [vmem:[#allocation2 + $0x108] sm:$0xc0] }
 0x121   : > { %v2700_v50 = vshrl.u32 %v2622_v7, 16  ;;  %v830_v0 = vrot.slane %v828_v39, 6  ;;  %v2708_v45 = vshrl.u32 %v2623_v36, 16  ;;  %v2711_v33 = vshll.u32 %v2623_v36, 16 }
 0x122   : > { %v3018_v53 = vsel %vm884_vm1, %v3009_v43, %v3017_v2  ;;  %v818_v34 = vsel %vm563_vm2, %v809_v27, %v817_v14  ;;  %v3037_v44 = vshrl.u32 %v2944_v25, 16  ;;  %v3040_v51 = vshll.u32 %v2944_v25, 16  ;;  %v2627_v14 = vld [vmem:[#allocation2 + $0x110] sm:$0x7f] }
 0x123   : > { %2583 = vmatmul.mubr.bf16.gmra.mrb[48].mxu1 %v1255_v61  ;;  %3529 = vmatmul.mubr.bf16.vlgmr.msra.gmra.mrb[64].mxu0 %v13326_v20  ;;  %v3025_v61 = vrot.slane %v3023_v63, 2  ;;  %v2689_v20 = vor.u32 %v2688_v31, %v2685_v11  ;;  %v1147_v21 = vor.u32 %v1146_v29, %v1143_v8  ;;  %v3045_v62 = vshrl.u32 %v2945_v40, 16 }
 0x124   : > { %11499 = vmatprep.mubr.msk.bf16.mxu1 %vm334_vm0, %v1122_v5  ;;  %11515 = vmatprep.mubr.msk.bf16.mxu0 %vm334_vm0, %v3001_v17  ;;  %v2703_v5 = vshll.u32 %v2622_v7, 16  ;;  %v833_v17 = vrot.slane %v831_v58, 7  ;;  %v3048_v16 = vshll.u32 %v2945_v40, 16  ;;  %v1155_v38 = vor.u32 %v1154_v56, %v1151_v52  ;;  %v1204_v52 = vpop.permute.xlu0 %1203 }
 0x125   : > { %v2698_v12 = vsel %vm563_vm2, %v2689_v20, %v2697_v42  ;;  %v3026_v35 = vor.u32 %v3025_v61, %v3022_v47  ;;  %v2702_v54 = vrot.slane %v2700_v50, 6  ;;  %v3034_v23 = vor.u32 %v3033_v13, %v3030_v6  ;;  %v2948_v20 = vld [vmem:[#allocation2 + $0x128] sm:$0xfe]  ;;  %v3263_v42 = vpop.permute.xlu1 %3262 }
 0x126   : > { %v2705_v46 = vrot.slane %v2703_v5, 7  ;;  %v826_v11 = vor.u32 %v825_v3, %v822_v60  ;;  %v2710_v31 = vrot.slane %v2708_v45, 6  ;;  %v2713_v41 = vrot.slane %v2711_v33, 7  ;;  %v2949_v3 = vld [vmem:[#allocation2 + $0x130] sm:$0x3] }
 0x127   : > { %v834_v37 = vor.u32 %v833_v17, %v830_v0  ;;  %v3039_v19 = vrot.slane %v3037_v44, 1  ;;  %v3042_v48 = vrot.slane %v3040_v51, 2  ;;  %v3047_v43 = vrot.slane %v3045_v62, 1  ;;  %v2628_v0 = vld [vmem:[#allocation2 + $0x120] sm:$0xc0] }
 0x128   : > { %v3050_v2 = vrot.slane %v3048_v16, 2  ;;  %v1263_v49 = vsel %vm334_vm0, %v818_v34, %v1202_v55  ;;  %v3298_v63 = vsel %vm334_vm0, %v2698_v12, %v3261_v30  ;;  %v2720_v28 = vshll.u32 %v2624_v18, 16 }
 0x129   : > { %v1156_v15 = vsel %vm884_vm1, %v1147_v21, %v1155_v38  ;;  %v2706_v9 = vor.u32 %v2705_v46, %v2702_v54  ;;  %v2714_v7 = vor.u32 %v2713_v41, %v2710_v31  ;;  %v2728_v27 = vshll.u32 %v2625_v10, 16  ;;  %v2950_v38 = vld [vmem:[#allocation2 + $0x140] sm:$0xfe] }
 0x12a   : > { %v3035_v1 = vsel %vm884_vm1, %v3026_v35, %v3034_v23  ;;  %v835_v4 = vsel %vm563_vm2, %v826_v11, %v834_v37  ;;  %v3054_v8 = vshrl.u32 %v2946_v59, 16  ;;  %v3043_v29 = vor.u32 %v3042_v48, %v3039_v19  ;;  %v2951_v11 = vld [vmem:[#allocation2 + $0x148] sm:$0x3] }
 0x12b   : > { %2591 = vmatmul.mubr.bf16.gmra.mrb[52].mxu1 %v13362_v32  ;;  %3537 = vmatmul.mubr.bf16.gmra.mrb[68].mxu0 %v3294_v26  ;;  %v2717_v32 = vshrl.u32 %v2624_v18, 16  ;;  %v2947_v26 = vld [vmem:[#allocation2 + $0x118] sm:$0x3]  ;;  %v3051_v39 = vor.u32 %v3050_v2, %v3047_v43  ;;  %v3057_v58 = vshll.u32 %v2946_v59, 16  ;;  %v2722_v56 = vrot.slane %v2720_v28, 7  ;;  %v3265_v43 = vpop.permute.xlu1 %3264 }
 0x12c   : > { %11500 = vmatprep.mubr.msk.bf16.mxu1 %vm334_vm0, %v1139_v57  ;;  %11516 = vmatprep.mubr.msk.bf16.mxu0 %vm334_vm0, %v3018_v53  ;;  %v2725_v57 = vshrl.u32 %v2625_v10, 16  ;;  %v3062_v25 = vshrl.u32 %v2947_v26, 16  ;;  %v3065_v61 = vshll.u32 %v2947_v26, 16  ;;  %v2734_v40 = vshrl.u32 %v2626_v22, 16  ;;  %v2629_v53 = vld [vmem:[#allocation2 + $0x128] sm:$0x7f] }
 0x12d   : > { %v2719_v36 = vrot.slane %v2717_v32, 6  ;;  %v2715_v6 = vsel %vm563_vm2, %v2706_v9, %v2714_v7  ;;  %v2730_v13 = vrot.slane %v2728_v27, 7  ;;  %v2737_v60 = vshll.u32 %v2626_v22, 16  ;;  %v2630_v59 = vld [vmem:[#allocation2 + $0x138] sm:$0xc0] }
 0x12e   : > { %v2727_v47 = vrot.slane %v2725_v57, 6  ;;  %v2742_v50 = vshrl.u32 %v2627_v14, 16  ;;  %v2745_v5 = vshll.u32 %v2627_v14, 16  ;;  %v1267_v17 = vsel %vm334_vm0, %v835_v4, %v1204_v52  ;;  %v2631_v26 = vld [vmem:[#allocation2 + $0x140] sm:$0x7f] }
 0x12f   : > { %v3056_v45 = vrot.slane %v3054_v8, 1  ;;  %v3059_v33 = vrot.slane %v3057_v58, 2  ;;  %v3064_v18 = vrot.slane %v3062_v25, 1  ;;  %v3302_v34 = vsel %vm334_vm0, %v2715_v6, %v3263_v42  ;;  %v2952_v57 = vld [vmem:[#allocation2 + $0x158] sm:$0xfe] }
 0x130   : > { %v3052_v44 = vsel %vm884_vm1, %v3043_v29, %v3051_v39  ;;  %v3067_v51 = vrot.slane %v3065_v61, 2  ;;  %v2736_v12 = vrot.slane %v2734_v40, 6  ;;  %v2723_v21 = vor.u32 %v2722_v56, %v2719_v36  ;;  %v2953_v27 = vld [vmem:[#allocation2 + $0x160] sm:$0x3]  ;;  %v2632_v61 = vld [vmem:[#allocation2 + $0x150] sm:$0xc0] }
 0x131   : > { %v2731_v62 = vor.u32 %v2730_v13, %v2727_v47  ;;  %v2739_v16 = vrot.slane %v2737_v60, 7  ;;  %v3071_v10 = vshrl.u32 %v2948_v20, 16  ;;  %v2744_v35 = vrot.slane %v2742_v50, 6  ;;  %v2633_v6 = vld [vmem:[#allocation2 + $0x158] sm:$0x7f] }
 0x132   : > { %v2747_v54 = vrot.slane %v2745_v5, 7  ;;  %v3074_v46 = vshll.u32 %v2948_v20, 16  ;;  %v3079_v30 = vshrl.u32 %v2949_v3, 16  ;;  %v3082_v55 = vshll.u32 %v2949_v3, 16  ;;  %v2954_v5 = vld [vmem:[#allocation2 + $0x170] sm:$0xfe] }
 0x133   : > { %2599 = vmatmul.mubr.bf16.gmra.mrb[56].mxu1 %v1263_v49  ;;  %3545 = vmatmul.mubr.bf16.gmra.mrb[72].mxu0 %v3298_v63  ;;  %v2751_v23 = vshrl.u32 %v2628_v0, 16  ;;  %v2754_v31 = vshll.u32 %v2628_v0, 16  ;;  %v2759_v41 = vshrl.u32 %v2629_v53, 16  ;;  %v2732_v37 = vsel %vm563_vm2, %v2723_v21, %v2731_v62 }
 0x134   : > { %11501 = vmatprep.mubr.msk.bf16.mxu1 %vm334_vm0, %v1156_v15  ;;  %11517 = vmatprep.mubr.msk.bf16.mxu0 %vm334_vm0, %v3035_v1  ;;  %v3060_v19 = vor.u32 %v3059_v33, %v3056_v45  ;;  %v3068_v48 = vor.u32 %v3067_v51, %v3064_v18  ;;  %v3073_v32 = vrot.slane %v3071_v10, 1  ;;  %v2740_v2 = vor.u32 %v2739_v16, %v2736_v12  ;;  %v2955_v18 = vld [vmem:[#allocation2 + $0x178] sm:$0x3] }
 0x135   : > { %v2748_v49 = vor.u32 %v2747_v54, %v2744_v35  ;;  %v2762_v63 = vshll.u32 %v2629_v53, 16  ;;  %v3088_v28 = vshrl.u32 %v2950_v38, 16  ;;  %v3076_v22 = vrot.slane %v3074_v46, 2  ;;  %v3267_v53 = vpop.permute.xlu1 %3266 }
 0x136   : > { %v3081_v15 = vrot.slane %v3079_v30, 1  ;;  %v3084_v9 = vrot.slane %v3082_v55, 2  ;;  %v13393_v7 = vrot.slane %v2751_v23, 6  ;;  %v2756_v14 = vrot.slane %v2754_v31, 7  ;;  %v2635_v55 = vld [vmem:[#allocation2 + $0x170] sm:$0x7f] }
 0x137   : > { %v2761_v1 = vrot.slane %v2759_v41, 6  ;;  %v3091_v4 = vshll.u32 %v2950_v38, 16  ;;  %v3096_v36 = vshrl.u32 %v2951_v11, 16  ;;  %v3306_v8 = vsel %vm334_vm0, %v2732_v37, %v3265_v43  ;;  %v2634_v38 = vld [vmem:[#allocation2 + $0x168] sm:$0xc0] }
 0x138   : > { %v3069_v29 = vsel %vm884_vm1, %v3060_v19, %v3068_v48  ;;  %v3099_v39 = vshll.u32 %v2951_v11, 16  ;;  %v2768_v58 = vshrl.u32 %v2630_v59, 16  ;;  %v2764_v25 = vrot.slane %v2762_v63, 7  ;;  %v2956_v23 = vld [vmem:[#allocation2 + $0x188] sm:$0xfe] }
 0x139   : > { %v13397_v52 = vrot.slane %v3088_v28, 1  ;;  %v2771_v56 = vshll.u32 %v2630_v59, 16  ;;  %v2776_v47 = vshrl.u32 %v2631_v26, 16  ;;  %v2749_v40 = vsel %vm563_vm2, %v2740_v2, %v2748_v49  ;;  %v3269_v63 = vpop.permute.xlu1 %3268 }
 0x13a   : > { %v2779_v20 = vshll.u32 %v2631_v26, 16  ;;  %v3105_v42 = vshrl.u32 %v2952_v57, 16  ;;  %v3077_v13 = vor.u32 %v3076_v22, %v3073_v32  ;;  %v3085_v60 = vor.u32 %v3084_v9, %v3081_v15  ;;  %v2957_v15 = vld [vmem:[#allocation2 + $0x190] sm:$0x3] }
 0x13b   : > { %2607 = vmatmul.mubr.bf16.gmra.mrb[60].mxu1 %v1267_v17  ;;  %3553 = vmatmul.mubr.bf16.gmra.mrb[76].mxu0 %v3302_v34  ;;  %v3108_v3 = vshll.u32 %v2952_v57, 16  ;;  %v3113_v50 = vshrl.u32 %v2953_v27, 16  ;;  %v3093_v0 = vrot.slane %v3091_v4, 2  ;;  %v3098_v17 = vrot.slane %v3096_v36, 1 }
 0x13c   : > { %11518 = vmatprep.mubr.msk.bf16.mxu0 %vm334_vm0, %v3052_v44  ;;  %v3101_v45 = vrot.slane %v3099_v39, 2  ;;  %v13401_v33 = vrot.slane %v2768_v58, 6  ;;  %v2757_v34 = vor.u32 %v2756_v14, %v13393_v7  ;;  %v2765_v44 = vor.u32 %v2764_v25, %v2761_v1  ;;  %v2636_v1 = vld [vmem:[#allocation2 + $0x180] sm:$0xc0]  ;;  %v2637_v39 = vld [vmem:[#allocation2 + $0x188] sm:$0x7f] }
 0x13d   : > { %v13404_v51 = vrot.slane %v2771_v56, 7  ;;  %v13406_v12 = vrot.slane %v2776_v47, 6  ;;  %v13408_v21 = vrot.slane %v2779_v20, 7  ;;  %v3116_v62 = vshll.u32 %v2953_v27, 16  ;;  %v2958_v47 = vld [vmem:[#allocation2 + $0x1a0] sm:$0xfe] }
 0x13e   : > { %v2785_v16 = vshrl.u32 %v2632_v61, 16  ;;  %v2788_v10 = vshll.u32 %v2632_v61, 16  ;;  %v13410_v35 = vrot.slane %v3105_v42, 1  ;;  %v13412_v54 = vrot.slane %v3108_v3, 2  ;;  %v2959_v61 = vld [vmem:[#allocation2 + $0x1a8] sm:$0x3] }
 0x13f   : > { %v13414_v46 = vrot.slane %v3113_v50, 1  ;;  %v2793_v30 = vshrl.u32 %v2633_v6, 16  ;;  %v3310_v11 = vsel %vm334_vm0, %v2749_v40, %v3267_v53  ;;  %v3086_v31 = vsel %vm884_vm1, %v3077_v13, %v3085_v60  ;;  %v2638_v13 = vld [vmem:[#allocation2 + $0x198] sm:$0xc0] }
 0x140   : > { %v2796_v41 = vshll.u32 %v2633_v6, 16  ;;  %v3122_v59 = vshrl.u32 %v2954_v5, 16  ;;  %v3094_v37 = vor.u32 %v3093_v0, %v13397_v52  ;;  %v3102_v19 = vor.u32 %v3101_v45, %v3098_v17  ;;  %v2639_v0 = vld [vmem:[#allocation2 + $0x1a0] sm:$0x7f] }
 0x141   : > { %v3125_v48 = vshll.u32 %v2954_v5, 16  ;;  %v3130_v32 = vshrl.u32 %v2955_v18, 16  ;;  %v13419_v26 = vrot.slane %v3116_v62, 2  ;;  %v13421_v43 = vrot.slane %v2785_v16, 6 }
 0x142   : > { %v13423_v2 = vrot.slane %v2788_v10, 7  ;;  %v3133_v49 = vshll.u32 %v2955_v18, 16  ;;  %v2766_v28 = vsel %vm563_vm2, %v2757_v34, %v2765_v44  ;;  %v2802_v57 = vshrl.u32 %v2634_v38, 16  ;;  %v3271_v10 = vpop.permute.xlu1 %3270 }
 0x143   : > { %3561 = vmatmul.mubr.bf16.gmra.mrb[80].mxu0 %v3306_v8  ;;  %v2805_v22 = vshll.u32 %v2634_v38, 16  ;;  %v13427_v9 = vrot.slane %v2793_v30, 6  ;;  %v2810_v7 = vshrl.u32 %v2635_v55, 16  ;;  %v2813_v27 = vshll.u32 %v2635_v55, 16  ;;  %v2960_v30 = vld [vmem:[#allocation2 + $0x1b8] sm:$0xfe] }
 0x144   : > { %11519 = vmatprep.mubr.msk.bf16.mxu0 %vm334_vm0, %v3069_v29  ;;  %v3139_v14 = vshrl.u32 %v2956_v23, 16  ;;  %v13429_v4 = vrot.slane %v2796_v41, 7  ;;  %v13431_v36 = vrot.slane %v3122_v59, 1  ;;  %v13433_v8 = vrot.slane %v3125_v48, 2 }
 0x145   : > { %v13435_v29 = vrot.slane %v3130_v32, 1  ;;  %v3314_v58 = vsel %vm334_vm0, %v2766_v28, %v3269_v63  ;;  %v3103_v25 = vsel %vm884_vm1, %v3094_v37, %v3102_v19  ;;  %v13439_v52 = vrot.slane %v3133_v49, 2  ;;  %v2961_v19 = vld [vmem:[#allocation2 + $0x1c0] sm:$0x3] }
 0x146   : > { %v3142_v56 = vshll.u32 %v2956_v23, 16  ;;  %v2774_v40 = vor.u32 %v13404_v51, %v13401_v33  ;;  %v2782_v20 = vor.u32 %v13408_v21, %v13406_v12  ;;  %v13445_v42 = vrot.slane %v2802_v57, 6 }
 0x147   : > { %v13447_v6 = vrot.slane %v2805_v22, 7  ;;  %v13449_v60 = vrot.slane %v2810_v7, 6  ;;  %v13451_v3 = vrot.slane %v2813_v27, 7  ;;  %v13453_v50 = vrot.slane %v3139_v14, 1 }
 0x148   : > { %v3147_v5 = vshrl.u32 %v2957_v15, 16  ;;  %v3111_v17 = vor.u32 %v13412_v54, %v13410_v35  ;;  %v3119_v45 = vor.u32 %v13419_v26, %v13414_v46  ;;  %v3150_v33 = vshll.u32 %v2957_v15, 16 }
 0x149   : > { %v2819_v18 = vshrl.u32 %v2636_v1, 16  ;;  %v3144_v53 = vrot.slane %v3142_v56, 2  ;;  %v2822_v34 = vshll.u32 %v2636_v1, 16  ;;  %v2827_v44 = vshrl.u32 %v2637_v39, 16  ;;  %v3273_v56 = vpop.permute.xlu1 %3272 }
 0x14a   : > { %v2830_v51 = vshll.u32 %v2637_v39, 16  ;;  %v3156_v12 = vshrl.u32 %v2958_v47, 16  ;;  %v3159_v21 = vshll.u32 %v2958_v47, 16  ;;  %v3164_v62 = vshrl.u32 %v2959_v61, 16 }
 0x14b   : > { %3569 = vmatmul.mubr.bf16.gmra.mrb[84].mxu0 %v3310_v11  ;;  %v3167_v16 = vshll.u32 %v2959_v61, 16  ;;  %v2783_v38 = vsel %vm563_vm2, %v2774_v40, %v2782_v20  ;;  %v2836_v35 = vshrl.u32 %v2638_v13, 16  ;;  %v2839_v54 = vshll.u32 %v2638_v13, 16 }
 0x14c   : > { %11520 = vmatprep.mubr.msk.bf16.mxu0 %vm334_vm0, %v3086_v31  ;;  %v3149_v46 = vrot.slane %v3147_v5, 1  ;;  %v3152_v55 = vrot.slane %v3150_v33, 2  ;;  %v2821_v23 = vrot.slane %v2819_v18, 6  ;;  %v2844_v11 = vshrl.u32 %v2639_v0, 16 }
 0x14d   : > { %v2824_v31 = vrot.slane %v2822_v34, 7  ;;  %v2829_v41 = vrot.slane %v2827_v44, 6  ;;  %v2832_v59 = vrot.slane %v2830_v51, 7  ;;  %v2847_v37 = vshll.u32 %v2639_v0, 16  ;;  %v3275_v20 = vpop.permute.xlu1 %3274 }
 0x14e   : > { %v3318_v48 = vsel %vm334_vm0, %v2783_v38, %v3271_v10  ;;  %v3120_v32 = vsel %vm884_vm1, %v3111_v17, %v3119_v45  ;;  %v3158_v26 = vrot.slane %v3156_v12, 1  ;;  %v3161_v49 = vrot.slane %v3159_v21, 2  ;;  %v2641_v45 = vld [vmem:[#allocation2 + $0x1b8] sm:$0x7f]  ;;  %v2962_v10 = vld [vmem:[#allocation2 + $0x1d0] sm:$0xfe] }
 0x14f   : > { %v3166_v63 = vrot.slane %v3164_v62, 1  ;;  %v3169_v28 = vrot.slane %v3167_v16, 2  ;;  %v2838_v57 = vrot.slane %v2836_v35, 6  ;;  %v2841_v22 = vrot.slane %v2839_v54, 7  ;;  %v2963_v54 = vld [vmem:[#allocation2 + $0x1d8] sm:$0x3] }
 0x150   : > { %v2791_v15 = vor.u32 %v13423_v2, %v13421_v43  ;;  %v2799_v7 = vor.u32 %v13429_v4, %v13427_v9  ;;  %v2846_v27 = vrot.slane %v2844_v11, 6  ;;  %v3173_v14 = vshrl.u32 %v2960_v30, 16 }
 0x151   : > { %v2849_v1 = vrot.slane %v2847_v37, 7  ;;  %v3176_v39 = vshll.u32 %v2960_v30, 16  ;;  %v3128_v61 = vor.u32 %v13433_v8, %v13431_v36  ;;  %v3136_v43 = vor.u32 %v13439_v52, %v13435_v29  ;;  %v2642_v30 = vld [vmem:[#allocation2 + $0x1c8] sm:$0xc0] }
 0x152   : > { %v2800_v47 = vsel %vm563_vm2, %v2791_v15, %v2799_v7  ;;  %v2808_v4 = vor.u32 %v13447_v6, %v13445_v42  ;;  %v2816_v40 = vor.u32 %v13451_v3, %v13449_v60  ;;  %v3145_v36 = vor.u32 %v3144_v53, %v13453_v50  ;;  %v2640_v42 = vld [vmem:[#allocation2 + $0x1b0] sm:$0xc0]  ;;  %v3277_v6 = vpop.permute.xlu1 %3276 }
 0x153   : > { %3577 = vmatmul.mubr.bf16.gmra.mrb[88].mxu0 %v3314_v58  ;;  %v3181_v58 = vshrl.u32 %v2961_v19, 16  ;;  %v3322_v2 = vsel %vm334_vm0, %v2800_v47, %v3273_v56  ;;  %v3137_v9 = vsel %vm884_vm1, %v3128_v61, %v3136_v43  ;;  %v3153_v8 = vor.u32 %v3152_v55, %v3149_v46  ;;  %v2965_v47 = vld [vmem:[#allocation2 + $0x1f0] sm:$0x3] }
 0x154   : > { %11521 = vmatprep.mubr.msk.bf16.mxu0 %vm334_vm0, %v3103_v25  ;;  %v3184_v25 = vshll.u32 %v2961_v19, 16  ;;  %v2817_v13 = vsel %vm563_vm2, %v2808_v4, %v2816_v40  ;;  %v2825_v5 = vor.u32 %v2824_v31, %v2821_v23  ;;  %v2833_v0 = vor.u32 %v2832_v59, %v2829_v41  ;;  %v2643_v31 = vld [vmem:[#allocation2 + $0x1d0] sm:$0x7f] }
 0x155   : > { %v3326_v29 = vsel %vm334_vm0, %v2817_v13, %v3275_v20  ;;  %v3154_v52 = vsel %vm884_vm1, %v3145_v36, %v3153_v8  ;;  %v3162_v3 = vor.u32 %v3161_v49, %v3158_v26  ;;  %v3170_v17 = vor.u32 %v3169_v28, %v3166_v63 }
 0x156   : > { %v2834_v60 = vsel %vm563_vm2, %v2825_v5, %v2833_v0  ;;  %v2842_v33 = vor.u32 %v2841_v22, %v2838_v57  ;;  %v2850_v18 = vor.u32 %v2849_v1, %v2846_v27  ;;  %v3175_v50 = vrot.slane %v3173_v14, 1  ;;  %v3279_v41 = vpop.permute.xlu1 %3278  ;;  %v2964_v14 = vld [vmem:[#allocation2 + $0x1e8] sm:$0xfe] }
 0x157   : > { %v3178_v53 = vrot.slane %v3176_v39, 2  ;;  %v3183_v34 = vrot.slane %v3181_v58, 1  ;;  %v3186_v44 = vrot.slane %v3184_v25, 2  ;;  %v2853_v51 = vshrl.u32 %v2640_v42, 16  ;;  %v2645_v5 = vld [vmem:[#allocation2 + $0x1e8] sm:$0x7f] }
 0x158   : > { %v3330_v12 = vsel %vm334_vm0, %v2834_v60, %v3277_v6  ;;  %v2856_v21 = vshll.u32 %v2640_v42, 16  ;;  %v2861_v62 = vshrl.u32 %v2641_v45, 16  ;;  %v2864_v16 = vshll.u32 %v2641_v45, 16 }
 0x159   : > { %v3171_v38 = vsel %vm884_vm1, %v3162_v3, %v3170_v17  ;;  %v2851_v35 = vsel %vm563_vm2, %v2842_v33, %v2850_v18  ;;  %v3179_v46 = vor.u32 %v3178_v53, %v3175_v50  ;;  %v3187_v55 = vor.u32 %v3186_v44, %v3183_v34 }
 0x15a   : > { %v2855_v23 = vrot.slane %v2853_v51, 6  ;;  %v3190_v11 = vshrl.u32 %v2962_v10, 16  ;;  %v2858_v59 = vrot.slane %v2856_v21, 7  ;;  %v2863_v37 = vrot.slane %v2861_v62, 6  ;;  %v3281_v0 = vpop.permute.xlu1 %3280 }
 0x15b   : > { %3585 = vmatmul.mubr.bf16.gmra.mrb[92].mxu0 %v3318_v48  ;;  %v2866_v19 = vrot.slane %v2864_v16, 7  ;;  %v3193_v48 = vshll.u32 %v2962_v10, 16  ;;  %v3201_v26 = vshll.u32 %v2963_v54, 16  ;;  %v2870_v49 = vshrl.u32 %v2642_v30, 16 }
 0x15c   : > { %11522 = vmatprep.mubr.msk.bf16.mxu0 %vm334_vm0, %v3120_v32  ;;  %v3198_v32 = vshrl.u32 %v2963_v54, 16  ;;  %v2873_v63 = vshll.u32 %v2642_v30, 16  ;;  %v2878_v57 = vshrl.u32 %v2643_v31, 16  ;;  %v2881_v22 = vshll.u32 %v2643_v31, 16  ;;  %v2967_v54 = vld [vmem:[#allocation2 + $0x208] sm:$0x3] }
 0x15d   : > { %v3334_v7 = vsel %vm334_vm0, %v2851_v35, %v3279_v41  ;;  %v3192_v27 = vrot.slane %v3190_v11, 1  ;;  %v3188_v39 = vsel %vm884_vm1, %v3179_v46, %v3187_v55  ;;  %v2859_v58 = vor.u32 %v2858_v59, %v2855_v23  ;;  %v2966_v35 = vld [vmem:[#allocation2 + $0x200] sm:$0xfe] }
 0x15e   : > { %v2867_v25 = vor.u32 %v2866_v19, %v2863_v37  ;;  %v3195_v56 = vrot.slane %v3193_v48, 2  ;;  %v3200_v43 = vrot.slane %v3198_v32, 1  ;;  %v2875_v4 = vrot.slane %v2873_v63, 7  ;;  %v11852_v30 = vld [vmem:[%s16452_s3 + $0x60] sm:$0xff]   ;;  %v3283_v59 = vpop.permute.xlu1 %3282 }
 0x15f   : > { %v2880_v40 = vrot.slane %v2878_v57, 6  ;;  %v2883_v20 = vrot.slane %v2881_v22, 7  ;;  %v3207_v13 = vshrl.u32 %v2964_v14, 16  ;;  %v3210_v36 = vshll.u32 %v2964_v14, 16  ;;  %4668 = vmatpush1.bf16.msra.mxu1 %v11852_v30  ;;  %v2647_v57 = vld [vmem:[#allocation2 + $0x200] sm:$0x7f] }
 0x160   : > { %v3215_v8 = vshrl.u32 %v2965_v47, 16  ;;  %v2868_v42 = vsel %vm563_vm2, %v2859_v58, %v2867_v25  ;;  %v3196_v6 = vor.u32 %v3195_v56, %v3192_v27  ;;  %v2898_v16 = vshll.u32 %v2645_v5, 16  ;;  %4669 = vmatprep.subr.bf16.mxu1 %v16467_v24 }
 0x161   : > { %v2884_v45 = vor.u32 %v2883_v20, %v2880_v40  ;;  %v3209_v33 = vrot.slane %v3207_v13, 1  ;;  %v3212_v18 = vrot.slane %v3210_v36, 2  ;;  %v3338_v62 = vsel %vm334_vm0, %v2868_v42, %v3281_v0 }
 0x162   : > { %v3217_v34 = vrot.slane %v3215_v8, 1  ;;  %v2900_v37 = vrot.slane %v2898_v16, 7  ;;  %v3224_v19 = vshrl.u32 %v2966_v35, 16  ;;  %v3227_v48 = vshll.u32 %v2966_v35, 16  ;;  %v3285_v36 = vpop.permute.xlu1 %3284 }
 0x163   : > { %3593 = vmatmul.mubr.bf16.gmra.mrb[96].mxu0 %v3322_v2  ;;  %v3203_v2 = vrot.slane %v3201_v26, 2  ;;  %v3213_v23 = vor.u32 %v3212_v18, %v3209_v33  ;;  %v3232_v32 = vshrl.u32 %v2967_v54, 16  ;;  %v2646_v26 = vld [vmem:[#allocation2 + $0x1f8] sm:$0xc0] }
 0x164   : > { %11523 = vmatprep.mubr.msk.bf16.mxu0 %vm334_vm0, %v3137_v9  ;;  %v2872_v9 = vrot.slane %v2870_v49, 6  ;;  %v3235_v49 = vshll.u32 %v2967_v54, 16  ;;  %v2904_v14 = vshrl.u32 %v2646_v26, 16  ;;  %v3226_v25 = vrot.slane %v3224_v19, 1 }
 0x165   : > { %v3204_v60 = vor.u32 %v3203_v2, %v3200_v43  ;;  %v3229_v56 = vrot.slane %v3227_v48, 2  ;;  %v2907_v2 = vshll.u32 %v2646_v26, 16 }
 0x166   : > { %v2876_v3 = vor.u32 %v2875_v4, %v2872_v9  ;;  %v3237_v43 = vrot.slane %v3235_v49, 2  ;;  %v2912_v9 = vshrl.u32 %v2647_v57, 16  ;;  %v2915_v4 = vshll.u32 %v2647_v57, 16 }
 0x167   : > { %v3230_v20 = vor.u32 %v3229_v56, %v3226_v25  ;;  %v2906_v13 = vrot.slane %v2904_v14, 6 }
 0x168   : > { %v2885_v46 = vsel %vm563_vm2, %v2876_v3, %v2884_v45 }
 0x16b   : > { %3601 = vmatmul.mubr.bf16.gmra.mrb[100].mxu0 %v3326_v29  ;;  %v3218_v29 = vshll.u32 %v2965_v47, 16  ;;  %v3234_v47 = vrot.slane %v3232_v32, 1  ;;  %v11855_v32 = vld [vmem:[%s16452_s3 + $0x78] sm:$0xff]  }
 0x16c   : > { %11524 = vmatprep.mubr.msk.bf16.mxu0 %vm334_vm0, %v3154_v52  ;;  %v2644_v52 = vld [vmem:[#allocation2 + $0x1e0] sm:$0xc0] }
 0x16d   : > { %v2887_v50 = vshrl.u32 %v2644_v52, 16  ;;  %v3220_v44 = vrot.slane %v3218_v29, 2  ;;  %v2890_v51 = vshll.u32 %v2644_v52, 16  ;;  %v3238_v8 = vor.u32 %v3237_v43, %v3234_v47 }
 0x16e   : > { %v2909_v29 = vrot.slane %v2907_v2, 7  ;;  %v2914_v52 = vrot.slane %v2912_v9, 6 }
 0x16f   : > { %v2889_v55 = vrot.slane %v2887_v50, 6  ;;  %v3221_v11 = vor.u32 %v3220_v44, %v3217_v34  ;;  %v2892_v31 = vrot.slane %v2890_v51, 7  ;;  %v3239_v45 = vsel %vm884_vm1, %v3230_v20, %v3238_v8  ;;  %v11853_v50 = vld [vmem:[%s16452_s3 + $0x68] sm:$0xff]  }
 0x170   : > { %v2910_v33 = vor.u32 %v2909_v29, %v2906_v13  ;;  %4670 = vmatpush1.bf16.msra.mxu1 %v11853_v50 }
 0x171   : > { %v2893_v27 = vor.u32 %v2892_v31, %v2889_v55  ;;  %4671 = vmatprep.subr.bf16.mxu1 %v16467_v24  ;;  %v11854_v55 = vld [vmem:[%s16452_s3 + $0x70] sm:$0xff]  }
 0x173   : > { %3609 = vmatmul.mubr.bf16.gmra.mrb[104].mxu0 %v3330_v12  ;;  %v2895_v12 = vshrl.u32 %v2645_v5, 16  ;;  %v2917_v5 = vrot.slane %v2915_v4, 7 }
 0x174   : > { %11525 = vmatprep.mubr.msk.bf16.mxu0 %vm334_vm0, %v3171_v38  ;;  %v3205_v38 = vsel %vm884_vm1, %v3196_v6, %v3204_v60  ;;  %4672 = vmatpush1.bf16.msra.mxu1 %v11854_v55 }
 0x175   : > { %v2897_v41 = vrot.slane %v2895_v12, 6  ;;  %v2918_v18 = vor.u32 %v2917_v5, %v2914_v52  ;;  %4673 = vmatprep.subr.bf16.mxu1 %v16467_v24 }
 0x176   : > { %v13490_v28 = vpop.f32.mrb[0].mxu0 }
 0x177   : > { %v2209_v15 = vpop.f32.mrb[1].mxu0  ;;  %v2901_v58 = vor.u32 %v2900_v37, %v2897_v41  ;;  %v2919_v34 = vsel %vm563_vm2, %v2910_v33, %v2918_v18 }
 0x178   : > { %v13493_v1 = vpop.f32.mrb[2].mxu0  ;;  %v3342_v15 = vsel %vm334_vm0, %v2885_v46, %v3283_v59  ;;  %4674 = vmatpush1.bf16.msra.mxu1 %v11855_v32 }
 0x179   : > { %v2212_v61 = vpop.f32.mrb[3].mxu0  ;;  %v2902_v40 = vsel %vm563_vm2, %v2893_v27, %v2901_v58  ;;  %4675 = vmatprep.subr.bf16.mxu1 %v16467_v24 }
 0x17a   : > { %v3346_v60 = vsel %vm334_vm0, %v2902_v40, %v3285_v36  ;;  %v11856_v40 = vld [vmem:[%s16452_s3 + $0x80] sm:$0xff]  }
 0x17b   : > { %3617 = vmatmul.mubr.bf16.gmra.mrb[108].mxu0 %v3334_v7  ;;  %v3222_v7 = vsel %vm884_vm1, %v3213_v23, %v3221_v11 }
 0x17c   : > { %11526 = vmatprep.mubr.msk.bf16.mxu0 %vm334_vm0, %v3188_v39  ;;  %4676 = vmatpush1.bf16.msra.mxu1 %v11856_v40 }
 0x17d   : > { %4677 = vmatprep.subr.bf16.mxu1 %v16467_v24 }
 0x17e   : > { %v13498_v17 = vpop.f32.mrb[4].mxu0 }
 0x17f   : > { %v2217_v53 = vpop.f32.mrb[5].mxu0 }
 0x180   : > { %v13500_v21 = vpop.f32.mrb[6].mxu0  ;;  %v3287_v53 = vpop.permute.xlu1 %3286 }
 0x181   : > { %v2220_v10 = vpop.f32.mrb[7].mxu0  ;;  %v3350_v35 = vsel %vm334_vm0, %v2919_v34, %v3287_v53 }
 0x183   : > { %3625 = vmatmul.mubr.bf16.gmra.mrb[112].mxu0 %v3338_v62 }
 0x184   : > { %11527 = vmatprep.mubr.msk.bf16.mxu0 %vm334_vm0, %v3205_v38 }
 0x186   : > { %v13510_v63 = vpop.f32.mrb[8].mxu0 }
 0x187   : > { %v2225_v22 = vpop.f32.mrb[9].mxu0 }
 0x188   : > { %v13514_v39 = vpop.f32.mrb[10].mxu0 }
 0x189   : > { %v2228_v61 = vpop.f32.mrb[11].mxu0 }
 0x18b   : > { %3633 = vmatmul.mubr.bf16.gmra.mrb[116].mxu0 %v3342_v15 }
 0x18c   : > { %11528 = vmatprep.mubr.msk.bf16.mxu0 %vm334_vm0, %v3222_v7 }
 0x18e   : > { %v2231_v0 = vpop.f32.mrb[12].mxu0 }
 0x18f   : > { %v2233_v42 = vpop.f32.mrb[13].mxu0 }
 0x190   : > { %v2234_v6 = vpop.f32.mrb[14].mxu0 }
 0x191   : > { %v2236_v3 = vpop.f32.mrb[15].mxu0 }
 0x193   : > { %3641 = vmatmul.mubr.bf16.gmra.mrb[120].mxu0 %v3346_v60 }
 0x194   : > { %11529 = vmatprep.mubr.msk.bf16.mxu0 %vm334_vm0, %v3239_v45 }
 0x196   : > { %v2239_v44 = vpop.f32.mrb[16].mxu0  ;;  %v2488_v51 = vpop.f32.mrb[0].mxu1 }
 0x197   : > { %v13527_v12 = vadd.f32 %v2488_v51, %v13490_v28  ;;  %v2241_v62 = vpop.f32.mrb[17].mxu0  ;;  %v2490_v16 = vpop.f32.mrb[1].mxu1 }
 0x198   : > { %v2242_v10 = vpop.f32.mrb[18].mxu0  ;;  %v2491_v38 = vpop.f32.mrb[2].mxu1  ;;  %v11858_v62 = vld [vmem:[%s16452_s3 + $0x90] sm:$0xff]  }
 0x199   : > { %v13531_v54 = vadd.f32 %v2491_v38, %v13493_v1  ;;  %v2244_v30 = vpop.f32.mrb[19].mxu0  ;;  %v2493_v46 = vpop.f32.mrb[3].mxu1 }
 0x19b   : > { %3649 = vmatmul.mubr.bf16.gmra.mrb[124].mxu0 %v3350_v35 }
 0x19e   : > { %v2247_v28 = vpop.f32.mrb[20].mxu0  ;;  %v2496_v23 = vpop.f32.mrb[4].mxu1 }
 0x19f   : > { %v13538_v11 = vadd.f32 %v2496_v23, %v13498_v17  ;;  %v2249_v31 = vpop.f32.mrb[21].mxu0  ;;  %v2498_v41 = vpop.f32.mrb[5].mxu1 }
 0x1a0   : > { %v2250_v59 = vpop.f32.mrb[22].mxu0  ;;  %v2499_v1 = vpop.f32.mrb[6].mxu1 }
 0x1a1   : > { %v13541_v37 = vadd.f32 %v2499_v1, %v13500_v21  ;;  %v2252_v19 = vpop.f32.mrb[23].mxu0  ;;  %v2501_v48 = vpop.f32.mrb[7].mxu1 }
 0x1a6   : > { %v2255_v26 = vpop.f32.mrb[24].mxu0  ;;  %v2504_v49 = vpop.f32.mrb[8].mxu1 }
 0x1a7   : > { %v13548_v17 = vadd.f32 %v2504_v49, %v13510_v63  ;;  %v2257_v57 = vpop.f32.mrb[25].mxu0  ;;  %v2506_v22 = vpop.f32.mrb[9].mxu1 }
 0x1a8   : > { %v2258_v15 = vpop.f32.mrb[26].mxu0  ;;  %v2507_v7 = vpop.f32.mrb[10].mxu1 }
 0x1a9   : > { %v13551_v21 = vadd.f32 %v2507_v7, %v13514_v39  ;;  %v2260_v27 = vpop.f32.mrb[27].mxu0  ;;  %v2509_v14 = vpop.f32.mrb[11].mxu1  ;;  %v11859_v7 = vld [vmem:[%s16452_s3 + $0x98] sm:$0xff]  }
 0x1ae   : > { %v2263_v58 = vpop.f32.mrb[28].mxu0  ;;  %v2512_v25 = vpop.f32.mrb[12].mxu1 }
 0x1af   : > { %v13553_v56 = vadd.f32 %v2512_v25, %v2231_v0  ;;  %v2265_v47 = vpop.f32.mrb[29].mxu0  ;;  %v2514_v61 = vpop.f32.mrb[13].mxu1 }
 0x1b0   : > { %v2266_v43 = vpop.f32.mrb[30].mxu0  ;;  %v2515_v2 = vpop.f32.mrb[14].mxu1 }
 0x1b1   : > { %v13555_v9 = vadd.f32 %v2515_v2, %v2234_v6  ;;  %v2268_v63 = vpop.f32.mrb[31].mxu0  ;;  %v2517_v4 = vpop.f32.mrb[15].mxu1  ;;  %v11857_v6 = vld [vmem:[%s16452_s3 + $0x88] sm:$0xff]  }
 0x1b2   : > { %4678 = vmatpush1.bf16.msra.mxu1 %v11857_v6  ;;  %v11860_v4 = vld [vmem:[%s16452_s3 + $0xa0] sm:$0xff]  }
 0x1b3   : > { %4679 = vmatprep.subr.bf16.mxu1 %v16467_v24 }
 0x1b6   : > { %v2271_v39 = vpop.f32.mrb[32].mxu0  ;;  %v2520_v20 = vpop.f32.mrb[16].mxu1  ;;  %4680 = vmatpush1.bf16.msra.mxu1 %v11858_v62 }
 0x1b7   : > { %v13561_v13 = vadd.f32 %v2520_v20, %v2239_v44  ;;  %v2273_v36 = vpop.f32.mrb[33].mxu0  ;;  %v2522_v8 = vpop.f32.mrb[17].mxu1  ;;  %4681 = vmatprep.subr.bf16.mxu1 %v16467_v24 }
 0x1b8   : > { %v2274_v29 = vpop.f32.mrb[34].mxu0  ;;  %v2523_v52 = vpop.f32.mrb[18].mxu1 }
 0x1b9   : > { %v13563_v5 = vadd.f32 %v2523_v52, %v2242_v10  ;;  %v2276_v0 = vpop.f32.mrb[35].mxu0  ;;  %v2525_v42 = vpop.f32.mrb[19].mxu1 }
 0x1ba   : > { %4682 = vmatpush1.bf16.msra.mxu1 %v11859_v7 }
 0x1bb   : > { %4683 = vmatprep.subr.bf16.mxu1 %v16467_v24 }
 0x1be   : > { %v2279_v60 = vpop.f32.mrb[36].mxu0  ;;  %v2528_v3 = vpop.f32.mrb[20].mxu1  ;;  %4684 = vmatpush1.bf16.msra.mxu1 %v11860_v4 }
 0x1bf   : > { %v13569_v45 = vadd.f32 %v2528_v3, %v2247_v28  ;;  %v2281_v33 = vpop.f32.mrb[37].mxu0  ;;  %v2530_v18 = vpop.f32.mrb[21].mxu1  ;;  %4685 = vmatprep.subr.bf16.mxu1 %v16467_v24  ;;  %v11861_v3 = vld [vmem:[%s16452_s3 + $0xa8] sm:$0xff]  }
 0x1c0   : > { %v2282_v50 = vpop.f32.mrb[38].mxu0  ;;  %v2531_v53 = vpop.f32.mrb[22].mxu1 }
 0x1c1   : > { %v13571_v34 = vadd.f32 %v2531_v53, %v2250_v59  ;;  %v2284_v44 = vpop.f32.mrb[39].mxu0  ;;  %v2533_v51 = vpop.f32.mrb[23].mxu1 }
 0x1c2   : > { %4686 = vmatpush1.bf16.msra.mxu1 %v11861_v3 }
 0x1c3   : > { %4687 = vmatprep.subr.bf16.mxu1 %v16467_v24 }
 0x1c6   : > { %v2287_v16 = vpop.f32.mrb[40].mxu0  ;;  %v2536_v10 = vpop.f32.mrb[24].mxu1 }
 0x1c7   : > { %v13577_v38 = vadd.f32 %v2536_v10, %v2255_v26  ;;  %v2289_v35 = vpop.f32.mrb[41].mxu0  ;;  %v2538_v30 = vpop.f32.mrb[25].mxu1 }
 0x1c8   : > { %v2290_v46 = vpop.f32.mrb[42].mxu0  ;;  %v2539_v55 = vpop.f32.mrb[26].mxu1 }
 0x1c9   : > { %v13579_v28 = vadd.f32 %v2539_v55, %v2258_v15  ;;  %v2292_v23 = vpop.f32.mrb[43].mxu0  ;;  %v2541_v31 = vpop.f32.mrb[27].mxu1 }
 0x1ce   : > { %v2295_v41 = vpop.f32.mrb[44].mxu0  ;;  %v2544_v59 = vpop.f32.mrb[28].mxu1 }
 0x1cf   : > { %v13581_v1 = vadd.f32 %v2544_v59, %v2263_v58  ;;  %v2297_v19 = vpop.f32.mrb[45].mxu0  ;;  %v2546_v48 = vpop.f32.mrb[29].mxu1 }
 0x1d0   : > { %v2298_v32 = vpop.f32.mrb[46].mxu0  ;;  %v2547_v49 = vpop.f32.mrb[30].mxu1 }
 0x1d1   : > { %v13583_v57 = vadd.f32 %v2547_v49, %v2266_v43  ;;  %v2300_v26 = vpop.f32.mrb[47].mxu0  ;;  %v2549_v22 = vpop.f32.mrb[31].mxu1 }
 0x1d6   : > { %v2303_v15 = vpop.f32.mrb[48].mxu0  ;;  %v2552_v27 = vpop.f32.mrb[32].mxu1 }
 0x1d7   : > { %v13589_v14 = vadd.f32 %v2552_v27, %v2271_v39  ;;  %v2305_v58 = vpop.f32.mrb[49].mxu0  ;;  %v2554_v25 = vpop.f32.mrb[33].mxu1 }
 0x1d8   : > { %v2306_v47 = vpop.f32.mrb[50].mxu0  ;;  %v2555_v61 = vpop.f32.mrb[34].mxu1 }
 0x1d9   : > { %v13591_v2 = vadd.f32 %v2555_v61, %v2274_v29  ;;  %v2308_v43 = vpop.f32.mrb[51].mxu0  ;;  %v2557_v63 = vpop.f32.mrb[35].mxu1 }
 0x1da   : > { %v11863_v63 = vld [vmem:[%s16452_s3 + $0xb8] sm:$0xff]  }
 0x1de   : > { %v2311_v40 = vpop.f32.mrb[52].mxu0  ;;  %v2560_v20 = vpop.f32.mrb[36].mxu1 }
 0x1df   : > { %v13597_v36 = vadd.f32 %v2560_v20, %v2279_v60  ;;  %v2313_v39 = vpop.f32.mrb[53].mxu0  ;;  %v2562_v8 = vpop.f32.mrb[37].mxu1 }
 0x1e0   : > { %v13599_v52 = vpop.f32.mrb[54].mxu0  ;;  %v2563_v0 = vpop.f32.mrb[38].mxu1 }
 0x1e1   : > { %v13601_v29 = vadd.f32 %v2563_v0, %v2282_v50  ;;  %v2316_v42 = vpop.f32.mrb[55].mxu0  ;;  %v2565_v6 = vpop.f32.mrb[39].mxu1 }
 0x1e6   : > { %v13607_v33 = vpop.f32.mrb[56].mxu0  ;;  %v2568_v60 = vpop.f32.mrb[40].mxu1 }
 0x1e7   : > { %v13609_v18 = vadd.f32 %v2568_v60, %v2287_v16  ;;  %v2321_v53 = vpop.f32.mrb[57].mxu0  ;;  %v2570_v44 = vpop.f32.mrb[41].mxu1 }
 0x1e8   : > { %v13611_v51 = vpop.f32.mrb[58].mxu0  ;;  %v2571_v50 = vpop.f32.mrb[42].mxu1 }
 0x1e9   : > { %v13613_v62 = vadd.f32 %v2571_v50, %v2290_v46  ;;  %v2324_v10 = vpop.f32.mrb[59].mxu0  ;;  %v2573_v35 = vpop.f32.mrb[43].mxu1  ;;  %v11862_v46 = vld [vmem:[%s16452_s3 + $0xb0] sm:$0xff]  }
 0x1ea   : > { %4688 = vmatpush1.bf16.msra.mxu1 %v11862_v46 }
 0x1eb   : > { %4689 = vmatprep.subr.bf16.mxu1 %v16467_v24 }
 0x1ee   : > { %v13615_v30 = vpop.f32.mrb[60].mxu0  ;;  %v2576_v55 = vpop.f32.mrb[44].mxu1  ;;  %4690 = vmatpush1.bf16.msra.mxu1 %v11863_v63 }
 0x1ef   : > { %v13617_v23 = vadd.f32 %v2576_v55, %v2295_v41  ;;  %v2329_v31 = vpop.f32.mrb[61].mxu0  ;;  %v2578_v59 = vpop.f32.mrb[45].mxu1  ;;  %v13630_v41 = vld [vmem:[%s16451_s2] ss:$0 sm:$0xff]  ;;  %5606 = vmatprep.subr.bf16.mxu1 %v16467_v24 }
 0x1f0   : > { %v13619_v19 = vpop.f32.mrb[62].mxu0  ;;  %v2579_v16 = vpop.f32.mrb[46].mxu1 }
 0x1f1   : > { %v13621_v48 = vadd.f32 %v2579_v16, %v2298_v32  ;;  %v2332_v49 = vpop.f32.mrb[63].mxu0  ;;  %v2581_v26 = vpop.f32.mrb[47].mxu1 }
 0x1f2   : > { %v4300_v26 = vld [vmem:[#allocation2 + $0x58] sm:$0x1] }
 0x1f6   : > { %v2584_v22 = vpop.f32.mrb[48].mxu1  ;;  %v3530_v7 = vpop.f32.mrb[64].mxu0 }
 0x1f7   : > { %v13632_v27 = vadd.f32 %v2584_v22, %v2303_v15  ;;  %v3657_v32 = vadd.f32 %v3530_v7, %v13527_v12  ;;  %v2586_v58 = vpop.f32.mrb[49].mxu1  ;;  %v3532_v25 = vpop.f32.mrb[65].mxu0  ;;  %v11864_v12 = vld [vmem:[%s16452_s3] sm:$0xff]  }
 0x1f8   : > { %v2587_v61 = vpop.f32.mrb[50].mxu1  ;;  %v3533_v43 = vpop.f32.mrb[66].mxu0  ;;  %4949 = vmatpush1.bf16.msra.mxu0 %v11864_v12 }
 0x1f9   : > { %v3696_v4 = vadd.f32 %v13630_v41, %v3657_v32  ;;  %v13639_v20 = vadd.f32 %v2587_v61, %v2306_v47  ;;  %v3658_v39 = vadd.f32 %v3533_v43, %v13531_v54  ;;  %v3535_v8 = vpop.f32.mrb[67].mxu0  ;;  %v2589_v0 = vpop.f32.mrb[51].mxu1  ;;  %4950 = vmatprep.subr.bf16.mxu0 %v16467_v24  ;;  %v11866_v32 = vld [vmem:[%s16452_s3 + $0x8] sm:$0xff]   ;;  %v4364_v43 = vrot.slane %v4300_v26, 1 }
 0x1fb   : > { %v3697_v15 = vadd.f32 %v13630_v41, %v3658_v39  ;;  %v3728_v42 = vmax.f32 %v3696_v4, 0.0 }
 0x1fc   : > { %4951 = vmatpush1.bf16.msra.mxu0 %v11866_v32 }
 0x1fd   : > { %v3729_v6 = vmax.f32 %v3697_v15, 0.0  ;;  %4952 = vmatprep.subr.bf16.mxu0 %v16467_v24 }
 0x1fe   : > { %v2592_v47 = vpop.f32.mrb[52].mxu1  ;;  %v3538_v3 = vpop.f32.mrb[68].mxu0 }
 0x1ff   : > { %v3760_v60 = vpack.c.bf16 %v3729_v6, %v3728_v42  ;;  %v13648_v54 = vadd.f32 %v2592_v47, %v2311_v40  ;;  %v3659_v53 = vadd.f32 %v3538_v3, %v13538_v11  ;;  %v2594_v44 = vpop.f32.mrb[53].mxu1  ;;  %v3540_v50 = vpop.f32.mrb[69].mxu0 }
 0x200   : > { %v2595_v10 = vpop.f32.mrb[54].mxu1  ;;  %v3541_v35 = vpop.f32.mrb[70].mxu0 }
 0x201   : > { %3776 = vst.msk [vmem:[#allocation2 + $0x50] sm:$0xff] %vm334_vm0, %v3760_v60  ;;  %v3698_v55 = vadd.f32 %v13630_v41, %v3659_v53  ;;  %v13654_v31 = vadd.f32 %v2595_v10, %v13599_v52  ;;  %v3660_v59 = vadd.f32 %v3541_v35, %v13541_v37  ;;  %v3543_v16 = vpop.f32.mrb[71].mxu0  ;;  %v2597_v49 = vpop.f32.mrb[55].mxu1 }
 0x203   : > { %v3699_v40 = vadd.f32 %v13630_v41, %v3660_v59  ;;  %v3730_v46 = vmax.f32 %v3698_v55, 0.0 }
 0x205   : > { %v3731_v11 = vmax.f32 %v3699_v40, 0.0 }
 0x206   : > { %v2600_v22 = vpop.f32.mrb[56].mxu1  ;;  %v3546_v7 = vpop.f32.mrb[72].mxu0 }
 0x207   : > { %v3761_v58 = vpack.c.bf16 %v3731_v11, %v3730_v46  ;;  %v13662_v25 = vadd.f32 %v2600_v22, %v13607_v33  ;;  %v3661_v52 = vadd.f32 %v3546_v7, %v13548_v17  ;;  %v2602_v37 = vpop.f32.mrb[57].mxu1  ;;  %v3548_v61 = vpop.f32.mrb[73].mxu0 }
 0x208   : > { %v2603_v63 = vpop.f32.mrb[58].mxu1  ;;  %v3549_v4 = vpop.f32.mrb[74].mxu0  ;;  %v13665_v39 = vld [vmem:[#allocation2 + $0x50] sm:$0xff] }
 0x209   : > { %v4299_v8 = vld [vmem:[#allocation2 + $0x50] sm:$0xfe]  ;;  %3777 = vst.msk [vmem:[#allocation2 + $0x68] sm:$0xff] %vm334_vm0, %v3761_v58  ;;  %v3700_v0 = vadd.f32 %v13630_v41, %v3661_v52  ;;  %v13670_v12 = vadd.f32 %v2603_v63, %v13611_v51  ;;  %v3662_v33 = vadd.f32 %v3549_v4, %v13551_v21  ;;  %v3551_v17 = vpop.f32.mrb[75].mxu0  ;;  %4427 = vrot.lane.b32.xlu0 %v13665_v39, %s12293_s26  ;;  %v2605_v42 = vpop.f32.mrb[59].mxu1  ;;  %v11870_v4 = vld [vmem:[%s16452_s3 + $0x18] sm:$0xff]  }
 0x20a   : > { %v4363_v15 = vrot.slane %v4299_v8, 1  ;;  %v11868_v21 = vld [vmem:[%s16452_s3 + $0x10] sm:$0xff]  }
 0x20b   : > { %v3701_v6 = vadd.f32 %v13630_v41, %v3662_v33  ;;  %v3732_v3 = vmax.f32 %v3700_v0, 0.0  ;;  %4953 = vmatpush1.bf16.msra.mxu0 %v11868_v21 }
 0x20c   : > { %v4365_v47 = vsel %vm3986_vm3, %v4363_v15, %v4364_v43  ;;  %4954 = vmatprep.subr.bf16.mxu0 %v16467_v24 }
 0x20d   : > { %11543 = vmatprep.mubr.msk.bf16.mxu1 %vm334_vm0, %v4365_v47  ;;  %v3733_v60 = vmax.f32 %v3701_v6, 0.0 }
 0x20e   : > { %v2608_v51 = vpop.f32.mrb[60].mxu1  ;;  %v3554_v53 = vpop.f32.mrb[76].mxu0 }
 0x20f   : > { %v3762_v44 = vpack.c.bf16 %v3733_v60, %v3732_v3  ;;  %v13683_v50 = vadd.f32 %v2608_v51, %v13615_v30  ;;  %v3663_v10 = vadd.f32 %v3554_v53, %v13553_v56  ;;  %v2610_v35 = vpop.f32.mrb[61].mxu1  ;;  %v3556_v55 = vpop.f32.mrb[77].mxu0  ;;  %4955 = vmatpush1.bf16.msra.mxu0 %v11870_v4 }
 0x210   : > { %v2611_v59 = vpop.f32.mrb[62].mxu1  ;;  %v3557_v16 = vpop.f32.mrb[78].mxu0  ;;  %v13686_v49 = vld [vmem:[#allocation2 + $0x68] sm:$0xff]  ;;  %4956 = vmatprep.subr.bf16.mxu0 %v16467_v24 }
 0x211   : > { %3778 = vst.msk [vmem:[#allocation2 + $0x80] sm:$0xff] %vm334_vm0, %v3762_v44  ;;  %v3702_v40 = vadd.f32 %v13630_v41, %v3663_v10  ;;  %v13691_v26 = vadd.f32 %v2611_v59, %v13619_v19  ;;  %v3664_v46 = vadd.f32 %v3557_v16, %v13555_v9  ;;  %4429 = vrot.lane.b32.xlu1 %v13686_v49, %s12293_s26  ;;  %v3559_v56 = vpop.f32.mrb[79].mxu0  ;;  %v2613_v30 = vpop.f32.mrb[63].mxu1 }
 0x213   : > { %v3703_v11 = vadd.f32 %v13630_v41, %v3664_v46  ;;  %v3734_v22 = vmax.f32 %v3702_v40, 0.0 }
 0x215   : > { %v3735_v7 = vmax.f32 %v3703_v11, 0.0 }
 0x216   : > { %v3562_v32 = vpop.f32.mrb[80].mxu0 }
 0x217   : > { %v3763_v58 = vpack.c.bf16 %v3735_v7, %v3734_v22  ;;  %v3665_v52 = vadd.f32 %v3562_v32, %v13561_v13  ;;  %v3564_v37 = vpop.f32.mrb[81].mxu0  ;;  %v11874_v22 = vld [vmem:[%s16452_s3 + $0x28] sm:$0xff]  }
 0x218   : > { %v3565_v19 = vpop.f32.mrb[82].mxu0  ;;  %v13699_v61 = vld [vmem:[#allocation2 + $0x80] sm:$0xff] }
 0x219   : > { %3779 = vst.msk [vmem:[#allocation2 + $0x98] sm:$0xff] %vm334_vm0, %v3763_v58  ;;  %v3704_v9 = vadd.f32 %v13630_v41, %v3665_v52  ;;  %v3666_v43 = vadd.f32 %v3565_v19, %v13563_v5  ;;  %v3567_v63 = vpop.f32.mrb[83].mxu0  ;;  %4431 = vrot.lane.b32.xlu0 %v13699_v61, %s12293_s26 }
 0x21b   : > { %v3705_v13 = vadd.f32 %v13630_v41, %v3666_v43  ;;  %v3736_v8 = vmax.f32 %v3704_v9, 0.0 }
 0x21d   : > { %v3737_v0 = vmax.f32 %v3705_v13, 0.0 }
 0x21e   : > { %v3570_v33 = vpop.f32.mrb[84].mxu0 }
 0x21f   : > { %v3764_v17 = vpack.c.bf16 %v3737_v0, %v3736_v8  ;;  %v3667_v15 = vadd.f32 %v3570_v33, %v13569_v45  ;;  %v3572_v5 = vpop.f32.mrb[85].mxu0  ;;  %v11872_v45 = vld [vmem:[%s16452_s3 + $0x20] sm:$0xff]  }
 0x220   : > { %v3573_v42 = vpop.f32.mrb[86].mxu0  ;;  %v13712_v6 = vld [vmem:[#allocation2 + $0x98] sm:$0xff]  ;;  %4957 = vmatpush1.bf16.msra.mxu0 %v11872_v45 }
 0x221   : > { %3780 = vst.msk [vmem:[#allocation2 + $0xb0] sm:$0xff] %vm334_vm0, %v3764_v17  ;;  %v3706_v47 = vadd.f32 %v13630_v41, %v3667_v15  ;;  %v3668_v3 = vadd.f32 %v3573_v42, %v13571_v34  ;;  %v3575_v60 = vpop.f32.mrb[87].mxu0  ;;  %4433 = vrot.lane.b32.xlu1 %v13712_v6, %s12293_s26  ;;  %4958 = vmatprep.subr.bf16.mxu0 %v16467_v24  ;;  %v11876_v42 = vld [vmem:[%s16452_s3 + $0x30] sm:$0xff]  }
 0x223   : > { %v3707_v51 = vadd.f32 %v13630_v41, %v3668_v3  ;;  %v3738_v53 = vmax.f32 %v3706_v47, 0.0 }
 0x224   : > { %4959 = vmatpush1.bf16.msra.mxu0 %v11874_v22 }
 0x225   : > { %v3739_v21 = vmax.f32 %v3707_v51, 0.0  ;;  %4960 = vmatprep.subr.bf16.mxu0 %v16467_v24 }
 0x226   : > { %v3578_v44 = vpop.f32.mrb[88].mxu0 }
 0x227   : > { %v3765_v10 = vpack.c.bf16 %v3739_v21, %v3738_v53  ;;  %v3669_v35 = vadd.f32 %v3578_v44, %v13577_v38  ;;  %v3580_v55 = vpop.f32.mrb[89].mxu0 }
 0x228   : > { %v3581_v59 = vpop.f32.mrb[90].mxu0  ;;  %v13724_v16 = vld [vmem:[#allocation2 + $0xb0] sm:$0xff]  ;;  %4961 = vmatpush1.bf16.msra.mxu0 %v11876_v42 }
 0x229   : > { %3781 = vst.msk [vmem:[#allocation2 + $0xc8] sm:$0xff] %vm334_vm0, %v3765_v10  ;;  %v3708_v34 = vadd.f32 %v13630_v41, %v3669_v35  ;;  %v3670_v40 = vadd.f32 %v3581_v59, %v13579_v28  ;;  %v3583_v46 = vpop.f32.mrb[91].mxu0  ;;  %4435 = vrot.lane.b32.xlu0 %v13724_v16, %s12293_s26  ;;  %4962 = vmatprep.subr.bf16.mxu0 %v16467_v24 }
 0x22b   : > { %v3709_v56 = vadd.f32 %v13630_v41, %v3670_v40  ;;  %v3740_v38 = vmax.f32 %v3708_v34, 0.0 }
 0x22d   : > { %v3741_v30 = vmax.f32 %v3709_v56, 0.0 }
 0x22e   : > { %v3586_v11 = vpop.f32.mrb[92].mxu0 }
 0x22f   : > { %v3766_v7 = vpack.c.bf16 %v3741_v30, %v3740_v38  ;;  %v3671_v32 = vadd.f32 %v3586_v11, %v13581_v1  ;;  %v3588_v58 = vpop.f32.mrb[93].mxu0 }
 0x230   : > { %v3589_v28 = vpop.f32.mrb[94].mxu0  ;;  %v13737_v52 = vld [vmem:[#allocation2 + $0xc8] sm:$0xff] }
 0x231   : > { %3782 = vst.msk [vmem:[#allocation2 + $0xe0] sm:$0xff] %vm334_vm0, %v3766_v7  ;;  %v3710_v37 = vadd.f32 %v13630_v41, %v3671_v32  ;;  %v3672_v19 = vadd.f32 %v3589_v28, %v13583_v57  ;;  %v3591_v9 = vpop.f32.mrb[95].mxu0  ;;  %4437 = vrot.lane.b32.xlu1 %v13737_v52, %s12293_s26 }
 0x233   : > { %v3711_v43 = vadd.f32 %v13630_v41, %v3672_v19  ;;  %v3742_v1 = vmax.f32 %v3710_v37, 0.0  ;;  %v11880_v37 = vld [vmem:[%s16452_s3 + $0x40] sm:$0xff]  }
 0x235   : > { %v3743_v63 = vmax.f32 %v3711_v43, 0.0 }
 0x236   : > { %v3594_v4 = vpop.f32.mrb[96].mxu0 }
 0x237   : > { %v3767_v13 = vpack.c.bf16 %v3743_v63, %v3742_v1  ;;  %v3673_v8 = vadd.f32 %v3594_v4, %v13589_v14  ;;  %v3596_v0 = vpop.f32.mrb[97].mxu0 }
 0x238   : > { %v3597_v33 = vpop.f32.mrb[98].mxu0  ;;  %v13747_v17 = vld [vmem:[#allocation2 + $0xe0] sm:$0xff] }
 0x239   : > { %3783 = vst.msk [vmem:[#allocation2 + $0xf8] sm:$0xff] %vm334_vm0, %v3767_v13  ;;  %v3712_v57 = vadd.f32 %v13630_v41, %v3673_v8  ;;  %v3674_v15 = vadd.f32 %v3597_v33, %v13591_v2  ;;  %v3599_v5 = vpop.f32.mrb[99].mxu0  ;;  %4439 = vrot.lane.b32.xlu0 %v13747_v17, %s12293_s26 }
 0x23b   : > { %v3713_v14 = vadd.f32 %v13630_v41, %v3674_v15  ;;  %v3744_v47 = vmax.f32 %v3712_v57, 0.0  ;;  %v11882_v57 = vld [vmem:[%s16452_s3 + $0x48] sm:$0xff]  }
 0x23d   : > { %v3745_v3 = vmax.f32 %v3713_v14, 0.0 }
 0x23e   : > { %v3602_v60 = vpop.f32.mrb[100].mxu0 }
 0x23f   : > { %v3768_v51 = vpack.c.bf16 %v3745_v3, %v3744_v47  ;;  %v3675_v53 = vadd.f32 %v3602_v60, %v13597_v36  ;;  %v3604_v2 = vpop.f32.mrb[101].mxu0  ;;  %v11878_v36 = vld [vmem:[%s16452_s3 + $0x38] sm:$0xff]  }
 0x240   : > { %v3605_v21 = vpop.f32.mrb[102].mxu0  ;;  %v13760_v44 = vld [vmem:[#allocation2 + $0xf8] sm:$0xff]  ;;  %4963 = vmatpush1.bf16.msra.mxu0 %v11878_v36 }
 0x241   : > { %3784 = vst.msk [vmem:[#allocation2 + $0x110] sm:$0xff] %vm334_vm0, %v3768_v51  ;;  %v3714_v45 = vadd.f32 %v13630_v41, %v3675_v53  ;;  %v3676_v10 = vadd.f32 %v3605_v21, %v13601_v29  ;;  %v3607_v35 = vpop.f32.mrb[103].mxu0  ;;  %4441 = vrot.lane.b32.xlu1 %v13760_v44, %s12293_s26  ;;  %4964 = vmatprep.subr.bf16.mxu0 %v16467_v24 }
 0x243   : > { %v3715_v55 = vadd.f32 %v13630_v41, %v3676_v10  ;;  %v3746_v59 = vmax.f32 %v3714_v45, 0.0 }
 0x244   : > { %4965 = vmatpush1.bf16.msra.mxu0 %v11880_v37  ;;  %v11886_v37 = vld [vmem:[%s16452_s3 + $0x58] sm:$0xff]  }
 0x245   : > { %v3747_v34 = vmax.f32 %v3715_v55, 0.0  ;;  %4966 = vmatprep.subr.bf16.mxu0 %v16467_v24 }
 0x246   : > { %v3610_v40 = vpop.f32.mrb[104].mxu0 }
 0x247   : > { %v3769_v46 = vpack.c.bf16 %v3747_v34, %v3746_v59  ;;  %v3677_v56 = vadd.f32 %v3610_v40, %v13609_v18  ;;  %v3612_v38 = vpop.f32.mrb[105].mxu0 }
 0x248   : > { %v3613_v30 = vpop.f32.mrb[106].mxu0  ;;  %v13772_v11 = vld [vmem:[#allocation2 + $0x110] sm:$0xff]  ;;  %4967 = vmatpush1.bf16.msra.mxu0 %v11882_v57 }
 0x249   : > { %3785 = vst.msk [vmem:[#allocation2 + $0x128] sm:$0xff] %vm334_vm0, %v3769_v46  ;;  %v3716_v29 = vadd.f32 %v13630_v41, %v3677_v56  ;;  %v3678_v22 = vadd.f32 %v3613_v30, %v13613_v62  ;;  %v3615_v7 = vpop.f32.mrb[107].mxu0  ;;  %4443 = vrot.lane.b32.xlu0 %v13772_v11, %s12293_s26  ;;  %4968 = vmatprep.subr.bf16.mxu0 %v16467_v24 }
 0x24b   : > { %v3717_v32 = vadd.f32 %v13630_v41, %v3678_v22  ;;  %v3748_v18 = vmax.f32 %v3716_v29, 0.0 }
 0x24d   : > { %v3749_v58 = vmax.f32 %v3717_v32, 0.0 }
 0x24e   : > { %v3618_v28 = vpop.f32.mrb[108].mxu0 }
 0x24f   : > { %v3770_v19 = vpack.c.bf16 %v3749_v58, %v3748_v18  ;;  %v3679_v9 = vadd.f32 %v3618_v28, %v13617_v23  ;;  %v3620_v43 = vpop.f32.mrb[109].mxu0 }
 0x250   : > { %v3621_v62 = vpop.f32.mrb[110].mxu0  ;;  %v13785_v1 = vld [vmem:[#allocation2 + $0x128] sm:$0xff] }
 0x251   : > { %3786 = vst.msk [vmem:[#allocation2 + $0x140] sm:$0xff] %vm334_vm0, %v3770_v19  ;;  %v3718_v63 = vadd.f32 %v13630_v41, %v3679_v9  ;;  %v3680_v4 = vadd.f32 %v3621_v62, %v13621_v48  ;;  %v3623_v13 = vpop.f32.mrb[111].mxu0  ;;  %4445 = vrot.lane.b32.xlu1 %v13785_v1, %s12293_s26  ;;  %v3922_v9 = vld [vmem:[#allocation2 + $0x20] sm:$0xfe] }
 0x253   : > { %v3719_v8 = vadd.f32 %v13630_v41, %v3680_v4  ;;  %v3750_v23 = vmax.f32 %v3718_v63, 0.0  ;;  %v3923_v63 = vld [vmem:[#allocation2 + $0x28] sm:$0x1] }
 0x255   : > { %v3751_v0 = vmax.f32 %v3719_v8, 0.0  ;;  %v3987_v8 = vrot.slane %v3922_v9, 1  ;;  %v4305_v9 = vld [vmem:[#allocation2 + $0x98] sm:$0xfe] }
 0x256   : > { %v3626_v33 = vpop.f32.mrb[112].mxu0 }
 0x257   : > { %v3771_v15 = vpack.c.bf16 %v3751_v0, %v3750_v23  ;;  %v3681_v5 = vadd.f32 %v3626_v33, %v13632_v27  ;;  %v3628_v42 = vpop.f32.mrb[113].mxu0 }
 0x258   : > { %v3629_v48 = vpop.f32.mrb[114].mxu0  ;;  %v13798_v14 = vld [vmem:[#allocation2 + $0x140] sm:$0xff] }
 0x259   : > { %3787 = vst.msk [vmem:[#allocation2 + $0x158] sm:$0xff] %vm334_vm0, %v3771_v15  ;;  %v3720_v47 = vadd.f32 %v13630_v41, %v3681_v5  ;;  %v3682_v3 = vadd.f32 %v3629_v48, %v13639_v20  ;;  %v3631_v60 = vpop.f32.mrb[115].mxu0  ;;  %4447 = vrot.lane.b32.xlu0 %v13798_v14, %s12293_s26  ;;  %v4171_v15 = vld [vmem:[#allocation2 + $0x48] sm:$0x80]  ;;  %v4172_v5 = vld [vmem:[#allocation2 + $0x50] sm:$0x7f] }
 0x25a   : > { %v4302_v60 = vld [vmem:[#allocation2 + $0x70] sm:$0x1] }
 0x25b   : > { %v3721_v51 = vadd.f32 %v13630_v41, %v3682_v3  ;;  %v3752_v27 = vmax.f32 %v3720_v47, 0.0  ;;  %v4301_v3 = vld [vmem:[#allocation2 + $0x68] sm:$0xfe] }
 0x25d   : > { %v3753_v53 = vmax.f32 %v3721_v51, 0.0 }
 0x25e   : > { %v3634_v2 = vpop.f32.mrb[116].mxu0 }
 0x25f   : > { %v3772_v21 = vpack.c.bf16 %v3753_v53, %v3752_v27  ;;  %v3683_v45 = vadd.f32 %v3634_v2, %v13648_v54  ;;  %v3636_v10 = vpop.f32.mrb[117].mxu0  ;;  %v11884_v54 = vld [vmem:[%s16452_s3 + $0x50] sm:$0xff]   ;;  %v4235_v27 = vrot.slane %v4171_v15, 7  ;;  %v4367_v2 = vrot.slane %v4302_v60, 1 }
 0x260   : > { %v3637_v35 = vpop.f32.mrb[118].mxu0  ;;  %v13808_v55 = vld [vmem:[#allocation2 + $0x158] sm:$0xff]  ;;  %4969 = vmatpush1.bf16.msra.mxu0 %v11884_v54  ;;  %v11867_v54 = vld [vmem:[%s16452_s3 + $0xc8] sm:$0xff]   ;;  %v4307_v15 = vld [vmem:[#allocation2 + $0xb0] sm:$0xfe] }
 0x261   : > { %3788 = vst.msk [vmem:[#allocation2 + $0x170] sm:$0xff] %vm334_vm0, %v3772_v21  ;;  %v3722_v20 = vadd.f32 %v13630_v41, %v3683_v45  ;;  %v3684_v59 = vadd.f32 %v3637_v35, %v13654_v31  ;;  %v3639_v34 = vpop.f32.mrb[119].mxu0  ;;  %4449 = vrot.lane.b32.xlu1 %v13808_v55, %s12293_s26  ;;  %4970 = vmatprep.subr.bf16.mxu0 %v16467_v24  ;;  %v11865_v21 = vld [vmem:[%s16452_s3 + $0xc0] sm:$0xff]  }
 0x262   : > { %v3906_v45 = vld [vmem:[#allocation2 + $0x20] sm:$0xff]  ;;  %v4174_v34 = vld [vmem:[#allocation2 + $0x68] sm:$0x7f] }
 0x263   : > { %v3723_v40 = vadd.f32 %v13630_v41, %v3684_v59  ;;  %v3754_v36 = vmax.f32 %v3722_v20, 0.0  ;;  %v4173_v59 = vld [vmem:[#allocation2 + $0x60] sm:$0x80] }
 0x264   : > { %4971 = vmatpush1.bf16.msra.mxu0 %v11886_v37  ;;  %v4176_v37 = vld [vmem:[#allocation2 + $0x80] sm:$0x7f] }
 0x265   : > { %v3755_v46 = vmax.f32 %v3723_v40, 0.0  ;;  %7001 = vmatprep.subr.bf16.mxu0 %v16467_v24 }
 0x266   : > { %v3642_v56 = vpop.f32.mrb[120].mxu0 }
 0x267   : > { %v3773_v38 = vpack.c.bf16 %v3755_v46, %v3754_v36  ;;  %v3685_v30 = vadd.f32 %v3642_v56, %v13662_v25  ;;  %v3644_v29 = vpop.f32.mrb[121].mxu0  ;;  %v4304_v36 = vld [vmem:[#allocation2 + $0x88] sm:$0x1]  ;;  %v3907_v46 = vld [vmem:[#allocation2 + $0x38] sm:$0xff]  ;;  %v4303_v56 = vld [vmem:[#allocation2 + $0x80] sm:$0xfe] }
 0x268   : > { %v3645_v22 = vpop.f32.mrb[122].mxu0  ;;  %v13820_v7 = vld [vmem:[#allocation2 + $0x170] sm:$0xff] }
 0x269   : > { %3789 = vst.msk [vmem:[#allocation2 + $0x188] sm:$0xff] %vm334_vm0, %v3773_v38  ;;  %v3724_v31 = vadd.f32 %v13630_v41, %v3685_v30  ;;  %v3686_v32 = vadd.f32 %v3645_v22, %v13670_v12  ;;  %v3647_v18 = vpop.f32.mrb[123].mxu0  ;;  %4451 = vrot.lane.b32.xlu0 %v13820_v7, %s12293_s26  ;;  %v4238_v38 = vrot.slane %v4173_v59, 7  ;;  %v4239_v30 = vrot.slane %v4174_v34, 7 }
 0x26a   : > { %v4369_v22 = vrot.slane %v4303_v56, 1  ;;  %v4181_v56 = vld [vmem:[#allocation2 + $0xc0] sm:$0x80] }
 0x26b   : > { %v3725_v58 = vadd.f32 %v13630_v41, %v3686_v32  ;;  %v3756_v25 = vmax.f32 %v3724_v31, 0.0  ;;  %v4370_v31 = vrot.slane %v4304_v36, 1  ;;  %v4240_v18 = vsel %vm3857_vm4, %v4238_v38, %v4239_v30  ;;  %v11881_v36 = vld [vmem:[%s16452_s3 + $0x100] sm:$0xff]   ;;  %v4312_v30 = vld [vmem:[#allocation2 + $0xe8] sm:$0x1] }
 0x26c   : > { %v4311_v38 = vld [vmem:[#allocation2 + $0xe0] sm:$0xfe] }
 0x26d   : > { %v3757_v28 = vmax.f32 %v3725_v58, 0.0  ;;  %v11869_v58 = vld [vmem:[%s16452_s3 + $0xd0] sm:$0xff]  }
 0x26e   : > { %v3650_v19 = vpop.f32.mrb[124].mxu0 }
 0x26f   : > { %v3774_v43 = vpack.c.bf16 %v3757_v28, %v3756_v25  ;;  %v3687_v62 = vadd.f32 %v3650_v19, %v13683_v50  ;;  %v3652_v12 = vpop.f32.mrb[125].mxu0  ;;  %v3988_v50 = vrot.slane %v3923_v63, 1  ;;  %v4175_v28 = vld [vmem:[#allocation2 + $0x78] sm:$0x80]  ;;  %v4371_v19 = vsel %vm3986_vm3, %v4369_v22, %v4370_v31 }
 0x270   : > { %v3653_v4 = vpop.f32.mrb[126].mxu0  ;;  %v13833_v13 = vld [vmem:[#allocation2 + $0x188] sm:$0xff]  ;;  %v4242_v12 = vrot.slane %v4176_v37, 7  ;;  %v11871_v63 = vld [vmem:[%s16452_s3 + $0xd8] sm:$0xff]   ;;  %v4250_v22 = vrot.slane %v4181_v56, 7 }
 0x271   : > { %3790 = vst.msk [vmem:[#allocation2 + $0x1a0] sm:$0xff] %vm334_vm0, %v3774_v43  ;;  %v3726_v23 = vadd.f32 %v13630_v41, %v3687_v62  ;;  %v3688_v0 = vadd.f32 %v3653_v4, %v13691_v26  ;;  %v3655_v33 = vpop.f32.mrb[127].mxu0  ;;  %4453 = vrot.lane.b32.xlu1 %v13833_v13, %s12293_s26  ;;  %v3989_v42 = vsel %vm3986_vm3, %v3987_v8, %v3988_v50  ;;  %v4236_v26 = vrot.slane %v4172_v5, 7  ;;  %v4306_v43 = vld [vmem:[#allocation2 + $0xa0] sm:$0x1] }
 0x272   : > { %11571 = vmatprep.mubr.msk.bf16.mxu0 %vm334_vm0, %v3989_v42  ;;  %v4241_v62 = vrot.slane %v4175_v28, 7  ;;  %v4373_v4 = vrot.slane %v4306_v43, 1  ;;  %v4177_v50 = vld [vmem:[#allocation2 + $0x90] sm:$0x80]  ;;  %v4308_v5 = vld [vmem:[#allocation2 + $0xb8] sm:$0x1] }
 0x273   : > { %v3727_v57 = vadd.f32 %v13630_v41, %v3688_v0  ;;  %v3758_v48 = vmax.f32 %v3726_v23, 0.0  ;;  %v4366_v41 = vrot.slane %v4301_v3, 1  ;;  %v4237_v35 = vsel %vm3857_vm4, %v4235_v27, %v4236_v26  ;;  %v11873_v0 = vld [vmem:[%s16452_s3 + $0xe0] sm:$0xff]   ;;  %v11877_v27 = vld [vmem:[%s16452_s3 + $0xf0] sm:$0xff]   ;;  %v4313_v43 = vld [vmem:[#allocation2 + $0xf8] sm:$0xfe] }
 0x274   : > { %v4243_v23 = vsel %vm3857_vm4, %v4241_v62, %v4242_v12  ;;  %v4244_v42 = vrot.slane %v4177_v50, 7  ;;  %v4376_v3 = vrot.slane %v4308_v5, 1  ;;  %v11885_v28 = vld [vmem:[%s16452_s3 + $0x110] sm:$0xff]   ;;  %v4314_v62 = vld [vmem:[#allocation2 + $0x100] sm:$0x1] }
 0x275   : > { %v3759_v47 = vmax.f32 %v3727_v57, 0.0  ;;  %v4368_v40 = vsel %vm3986_vm3, %v4366_v41, %v4367_v2  ;;  %v4178_v57 = vld [vmem:[#allocation2 + $0x98] sm:$0x7f]  ;;  %v4179_v41 = vld [vmem:[#allocation2 + $0xa8] sm:$0x80] }
 0x276   : > { %v4180_v2 = vld [vmem:[#allocation2 + $0xb0] sm:$0x7f]  ;;  %v4186_v50 = vld [vmem:[#allocation2 + $0xf8] sm:$0x7f] }
 0x277   : > { %v3775_v51 = vpack.c.bf16 %v3759_v47, %v3758_v48  ;;  %v4245_v48 = vrot.slane %v4178_v57, 7  ;;  %v11875_v47 = vld [vmem:[%s16452_s3 + $0xe8] sm:$0xff]   ;;  %v4315_v57 = vld [vmem:[#allocation2 + $0x110] sm:$0xfe]  ;;  %v4257_v5 = vrot.slane %v4186_v50, 7 }
 0x278   : > { %v13844_v53 = vld [vmem:[#allocation2 + $0x1a0] sm:$0xff] }
 0x279   : > { %3791 = vst.msk [vmem:[#allocation2 + $0x1b8] sm:$0xff] %vm334_vm0, %v3775_v51  ;;  %4455 = vrot.lane.b32.xlu0 %v13844_v53, %s12293_s26  ;;  %v4246_v51 = vsel %vm3857_vm4, %v4244_v42, %v4245_v48  ;;  %v4387_v42 = vrot.slane %v4315_v57, 1  ;;  %v4326_v57 = vld [vmem:[#allocation2 + $0x190] sm:$0x1] }
 0x27b   : > { %v4428_v10 = vpop.permute.xlu0 %4427 }
 0x27c   : > { %v4461_v20 = vsel %vm334_vm0, %v4237_v35, %v4428_v10  ;;  %v4247_v10 = vrot.slane %v4179_v41, 7  ;;  %v4248_v35 = vrot.slane %v4180_v2, 7 }
 0x27d   : > { %4700 = vmatmul.mubr.bf16.vlgmr.msra.gmra.mrb[64].mxu1 %v4461_v20  ;;  %4051 = vrot.lane.b32.xlu0 %v3906_v45, %s12293_s26  ;;  %v4310_v45 = vld [vmem:[#allocation2 + $0xd0] sm:$0x1]  ;;  %v11879_v20 = vld [vmem:[%s16452_s3 + $0xf8] sm:$0xff]  }
 0x27e   : > { %5607 = vmatpush1.bf16.msra.mxu1 %v11865_v21  ;;  %11544 = vmatprep.mubr.msk.bf16.mxu1 %vm334_vm0, %v4368_v40  ;;  %v4309_v21 = vld [vmem:[#allocation2 + $0xc8] sm:$0xfe]  ;;  %v4379_v59 = vrot.slane %v4310_v45, 1  ;;  %v4249_v40 = vsel %vm3857_vm4, %v4247_v10, %v4248_v35  ;;  %v5236_v45 = vld [vmem:[#allocation2 + $0x1d0] sm:$0xff]  ;;  %v4189_v10 = vld [vmem:[#allocation2 + $0x120] sm:$0x80] }
 0x27f   : > { %5608 = vmatprep.subr.bf16.mxu1 %v16467_v24  ;;  %v4190_v35 = vld [vmem:[#allocation2 + $0x128] sm:$0x7f] }
 0x280   : > { %v13861_v29 = vld [vmem:[#allocation2 + $0x1b8] sm:$0xff] }
 0x281   : > { %4053 = vrot.lane.b32.xlu0 %v3907_v46, %s12293_s26  ;;  %4457 = vrot.lane.b32.xlu1 %v13861_v29, %s12293_s26 }
 0x282   : > { %5609 = vmatpush1.bf16.msra.mxu1 %v11867_v54  ;;  %v4182_v54 = vld [vmem:[#allocation2 + $0xc8] sm:$0x7f] }
 0x283   : > { %v4430_v32 = vpop.permute.xlu1 %4429  ;;  %5610 = vmatprep.subr.bf16.mxu1 %v16467_v24  ;;  %v4251_v31 = vrot.slane %v4182_v54, 7 }
 0x284   : > { %v4465_v25 = vsel %vm334_vm0, %v4240_v18, %v4430_v32  ;;  %v11883_v32 = vld [vmem:[%s16452_s3 + $0x108] sm:$0xff]   ;;  %v4382_v18 = vrot.slane %v4312_v30, 1 }
 0x285   : > { %4708 = vmatmul.mubr.bf16.gmra.mrb[68].mxu1 %v4465_v25  ;;  %4055 = vrot.lane.b32.xlu0 %v13665_v39, %s12293_s26  ;;  %v4372_v39 = vrot.slane %v4305_v9, 1  ;;  %v4252_v25 = vsel %vm3857_vm4, %v4250_v22, %v4251_v31  ;;  %v4184_v9 = vld [vmem:[#allocation2 + $0xe0] sm:$0x7f]  ;;  %v4321_v22 = vld [vmem:[#allocation2 + $0x158] sm:$0xfe] }
 0x286   : > { %5366 = vrot.lane.b32.xlu1 %v13699_v61, %s12293_s26  ;;  %11545 = vmatprep.mubr.msk.bf16.mxu1 %vm334_vm0, %v4371_v19  ;;  %v4183_v19 = vld [vmem:[#allocation2 + $0xd8] sm:$0x80]  ;;  %v4322_v31 = vld [vmem:[#allocation2 + $0x160] sm:$0x1] }
 0x287   : > { %5611 = vmatpush1.bf16.msra.mxu1 %v11869_v58  ;;  %v4253_v12 = vrot.slane %v4183_v19, 7  ;;  %v4193_v19 = vld [vmem:[#allocation2 + $0x150] sm:$0x80] }
 0x288   : > { %5612 = vmatprep.subr.bf16.mxu1 %v16467_v24 }
 0x289   : > { %4057 = vrot.lane.b32.xlu0 %v13686_v49, %s12293_s26  ;;  %v4374_v49 = vsel %vm3986_vm3, %v4372_v39, %v4373_v4  ;;  %v11887_v39 = vld [vmem:[%s16452_s3 + $0x118] sm:$0xff]   ;;  %v4385_v4 = vrot.slane %v4314_v62, 1 }
 0x28a   : > { %5368 = vrot.lane.b32.xlu1 %v13712_v6, %s12293_s26  ;;  %v4324_v62 = vld [vmem:[#allocation2 + $0x178] sm:$0x1] }
 0x28b   : > { %v4432_v8 = vpop.permute.xlu0 %4431  ;;  %5613 = vmatpush1.bf16.msra.mxu1 %v11871_v63  ;;  %v4254_v63 = vrot.slane %v4184_v9, 7  ;;  %v4194_v9 = vld [vmem:[#allocation2 + $0x158] sm:$0x7f] }
 0x28c   : > { %v4469_v33 = vsel %vm334_vm0, %v4243_v23, %v4432_v8  ;;  %5614 = vmatprep.subr.bf16.mxu1 %v16467_v24 }
 0x28d   : > { %4716 = vmatmul.mubr.bf16.gmra.mrb[72].mxu1 %v4469_v33  ;;  %4059 = vrot.lane.b32.xlu0 %v13699_v61, %s12293_s26  ;;  %v4375_v61 = vrot.slane %v4307_v15, 1  ;;  %v4255_v23 = vsel %vm3857_vm4, %v4253_v12, %v4254_v63  ;;  %v4185_v33 = vld [vmem:[#allocation2 + $0xf0] sm:$0x80]  ;;  %v4268_v12 = vrot.slane %v4193_v19, 7  ;;  %v4269_v63 = vrot.slane %v4194_v9, 7 }
 0x28e   : > { %5370 = vrot.lane.b32.xlu1 %v13724_v16, %s12293_s26  ;;  %11546 = vmatprep.mubr.msk.bf16.mxu1 %vm334_vm0, %v4374_v49  ;;  %v4316_v49 = vld [vmem:[#allocation2 + $0x118] sm:$0x1]  ;;  %v4256_v15 = vrot.slane %v4185_v33, 7  ;;  %v4196_v33 = vld [vmem:[#allocation2 + $0x170] sm:$0x7f] }
 0x28f   : > { %5615 = vmatpush1.bf16.msra.mxu1 %v11873_v0  ;;  %v4388_v48 = vrot.slane %v4316_v49, 1  ;;  %v5238_v19 = vld [vmem:[#allocation2 + $0x80] sm:$0xfe]  ;;  %v5239_v9 = vld [vmem:[#allocation2 + $0x88] sm:$0x1] }
 0x290   : > { %5616 = vmatprep.subr.bf16.mxu1 %v16467_v24 }
 0x291   : > { %4061 = vrot.lane.b32.xlu0 %v13712_v6, %s12293_s26  ;;  %v4377_v6 = vsel %vm3986_vm3, %v4375_v61, %v4376_v3  ;;  %v4187_v3 = vld [vmem:[#allocation2 + $0x108] sm:$0x80] }
 0x292   : > { %5372 = vrot.lane.b32.xlu1 %v13737_v52, %s12293_s26 }
 0x293   : > { %v4434_v60 = vpop.permute.xlu1 %4433  ;;  %5617 = vmatpush1.bf16.msra.mxu1 %v11875_v47  ;;  %v4258_v47 = vsel %vm3857_vm4, %v4256_v15, %v4257_v5  ;;  %v4272_v15 = vrot.slane %v4196_v33, 7 }
 0x294   : > { %v4473_v26 = vsel %vm334_vm0, %v4246_v51, %v4434_v60  ;;  %5618 = vmatprep.subr.bf16.mxu1 %v16467_v24  ;;  %v4188_v60 = vld [vmem:[#allocation2 + $0x110] sm:$0x7f]  ;;  %v4389_v51 = vsel %vm3986_vm3, %v4387_v42, %v4388_v48  ;;  %v4403_v42 = vrot.slane %v4326_v57, 1  ;;  %v5110_v57 = vld [vmem:[#allocation2 + $0x78] sm:$0x80] }
 0x295   : > { %4724 = vmatmul.mubr.bf16.gmra.mrb[76].mxu1 %v4473_v26  ;;  %4063 = vrot.lane.b32.xlu0 %v13724_v16, %s12293_s26  ;;  %v4378_v16 = vrot.slane %v4309_v21, 1  ;;  %v4259_v26 = vrot.slane %v4187_v3, 7  ;;  %v4260_v41 = vrot.slane %v4188_v60, 7  ;;  %v4198_v3 = vld [vmem:[#allocation2 + $0x188] sm:$0x7f] }
 0x296   : > { %5374 = vrot.lane.b32.xlu1 %v13747_v17, %s12293_s26  ;;  %11547 = vmatprep.mubr.msk.bf16.mxu1 %vm334_vm0, %v4377_v6 }
 0x297   : > { %5619 = vmatpush1.bf16.msra.mxu1 %v11877_v27  ;;  %v4318_v27 = vld [vmem:[#allocation2 + $0x130] sm:$0x1]  ;;  %v4261_v21 = vsel %vm3857_vm4, %v4259_v26, %v4260_v41  ;;  %v4275_v26 = vrot.slane %v4198_v3, 7  ;;  %v5174_v3 = vrot.slane %v5110_v57, 7 }
 0x298   : > { %5620 = vmatprep.subr.bf16.mxu1 %v16467_v24  ;;  %v4391_v6 = vrot.slane %v4318_v27, 1 }
 0x299   : > { %4065 = vrot.lane.b32.xlu0 %v13737_v52, %s12293_s26  ;;  %v4380_v52 = vsel %vm3986_vm3, %v4378_v16, %v4379_v59  ;;  %v4319_v16 = vld [vmem:[#allocation2 + $0x140] sm:$0xfe]  ;;  %v4262_v59 = vrot.slane %v4189_v10, 7 }
 0x29a   : > { %5376 = vrot.lane.b32.xlu1 %v13760_v44, %s12293_s26 }
 0x29b   : > { %v4436_v34 = vpop.permute.xlu0 %4435  ;;  %5621 = vmatpush1.bf16.msra.mxu1 %v11879_v20 }
 0x29c   : > { %v4477_v46 = vsel %vm334_vm0, %v4249_v40, %v4436_v34  ;;  %5622 = vmatprep.subr.bf16.mxu1 %v16467_v24  ;;  %v4263_v34 = vrot.slane %v4190_v35, 7  ;;  %v4393_v40 = vrot.slane %v4319_v16, 1  ;;  %v4330_v35 = vld [vmem:[#allocation2 + $0x1c0] sm:$0x1]  ;;  %v3793_v16 = vld [vmem:[#allocation2 + $0x18] sm:$0x80] }
 0x29d   : > { %4732 = vmatmul.mubr.bf16.gmra.mrb[80].mxu1 %v4477_v46  ;;  %4067 = vrot.lane.b32.xlu0 %v13747_v17, %s12293_s26  ;;  %v4381_v17 = vrot.slane %v4311_v38, 1  ;;  %v4192_v38 = vld [vmem:[#allocation2 + $0x140] sm:$0x7f] }
 0x29e   : > { %5378 = vrot.lane.b32.xlu1 %v13772_v11, %s12293_s26  ;;  %11548 = vmatprep.mubr.msk.bf16.mxu1 %vm334_vm0, %v4380_v52  ;;  %v4264_v56 = vsel %vm3857_vm4, %v4262_v59, %v4263_v34  ;;  %v4191_v52 = vld [vmem:[#allocation2 + $0x138] sm:$0x80] }
 0x29f   : > { %5623 = vmatpush1.bf16.msra.mxu1 %v11881_v36 }
 0x2a0   : > { %5624 = vmatprep.subr.bf16.mxu1 %v16467_v24 }
 0x2a1   : > { %4069 = vrot.lane.b32.xlu0 %v13760_v44, %s12293_s26  ;;  %v4383_v44 = vsel %vm3986_vm3, %v4381_v17, %v4382_v18  ;;  %v4266_v17 = vrot.slane %v4192_v38, 7  ;;  %v4396_v18 = vrot.slane %v4321_v22, 1 }
 0x2a2   : > { %5380 = vrot.lane.b32.xlu1 %v13785_v1, %s12293_s26 }
 0x2a3   : > { %v4438_v58 = vpop.permute.xlu1 %4437  ;;  %5625 = vmatpush1.bf16.msra.mxu1 %v11883_v32  ;;  %v4265_v32 = vrot.slane %v4191_v52, 7 }
 0x2a4   : > { %v4481_v37 = vsel %vm334_vm0, %v4252_v25, %v4438_v58  ;;  %5626 = vmatprep.subr.bf16.mxu1 %v16467_v24  ;;  %v4397_v58 = vrot.slane %v4322_v31, 1 }
 0x2a5   : > { %4740 = vmatmul.mubr.bf16.gmra.mrb[84].mxu1 %v4481_v37  ;;  %4071 = vrot.lane.b32.xlu0 %v13772_v11, %s12293_s26  ;;  %v4384_v11 = vrot.slane %v4313_v43, 1  ;;  %v4323_v43 = vld [vmem:[#allocation2 + $0x170] sm:$0xfe] }
 0x2a6   : > { %5382 = vrot.lane.b32.xlu1 %v13798_v14, %s12293_s26  ;;  %11549 = vmatprep.mubr.msk.bf16.mxu1 %vm334_vm0, %v4383_v44  ;;  %v4398_v44 = vsel %vm3986_vm3, %v4396_v18, %v4397_v58  ;;  %v3795_v18 = vld [vmem:[#allocation2 + $0x30] sm:$0x80]  ;;  %v3796_v58 = vld [vmem:[#allocation2 + $0x38] sm:$0x7f] }
 0x2a7   : > { %5627 = vmatpush1.bf16.msra.mxu1 %v11885_v28  ;;  %v4267_v28 = vsel %vm3857_vm4, %v4265_v32, %v4266_v17  ;;  %v4202_v17 = vld [vmem:[#allocation2 + $0x1b8] sm:$0x7f] }
 0x2a8   : > { %5628 = vmatprep.subr.bf16.mxu1 %v16467_v24 }
 0x2a9   : > { %4073 = vrot.lane.b32.xlu0 %v13785_v1, %s12293_s26  ;;  %v4386_v1 = vsel %vm3986_vm3, %v4384_v11, %v4385_v4  ;;  %v4400_v11 = vrot.slane %v4324_v62, 1 }
 0x2aa   : > { %5384 = vrot.lane.b32.xlu1 %v13808_v55, %s12293_s26 }
 0x2ab   : > { %v4440_v8 = vpop.permute.xlu0 %4439  ;;  %5629 = vmatpush1.bf16.msra.mxu1 %v11887_v39  ;;  %v4399_v39 = vrot.slane %v4323_v43, 1  ;;  %v4281_v43 = vrot.slane %v4202_v17, 7  ;;  %v3930_v17 = vld [vmem:[#allocation2 + $0x80] sm:$0xfe] }
 0x2ac   : > { %v4485_v0 = vsel %vm334_vm0, %v4255_v23, %v4440_v8  ;;  %7282 = vmatprep.subr.bf16.mxu1 %v16467_v24  ;;  %v4270_v8 = vsel %vm3857_vm4, %v4268_v12, %v4269_v63  ;;  %v3861_v12 = vrot.slane %v3795_v18, 7  ;;  %v3862_v63 = vrot.slane %v3796_v58, 7  ;;  %v3931_v18 = vld [vmem:[#allocation2 + $0x88] sm:$0x1] }
 0x2ad   : > { %4748 = vmatmul.mubr.bf16.gmra.mrb[88].mxu1 %v4485_v0  ;;  %4075 = vrot.lane.b32.xlu0 %v13798_v14, %s12293_s26  ;;  %v4195_v0 = vld [vmem:[#allocation2 + $0x168] sm:$0x80]  ;;  %v4401_v50 = vsel %vm3986_vm3, %v4399_v39, %v4400_v11  ;;  %v5302_v11 = vrot.slane %v5238_v19, 1 }
 0x2ae   : > { %5386 = vrot.lane.b32.xlu1 %v13820_v7, %s12293_s26  ;;  %11550 = vmatprep.mubr.msk.bf16.mxu1 %vm334_vm0, %v4386_v1  ;;  %v4325_v1 = vld [vmem:[#allocation2 + $0x188] sm:$0xfe]  ;;  %v4271_v49 = vrot.slane %v4195_v0, 7 }
 0x2af   : > { %v4402_v5 = vrot.slane %v4325_v1, 1  ;;  %v5114_v19 = vld [vmem:[#allocation2 + $0xa8] sm:$0x80] }
 0x2b1   : > { %4077 = vrot.lane.b32.xlu0 %v13808_v55, %s12293_s26  ;;  %v4317_v55 = vld [vmem:[#allocation2 + $0x128] sm:$0xfe]  ;;  %v4404_v60 = vsel %vm3986_vm3, %v4402_v5, %v4403_v42 }
 0x2b2   : > { %5388 = vrot.lane.b32.xlu1 %v13833_v13, %s12293_s26  ;;  %v4390_v2 = vrot.slane %v4317_v55, 1  ;;  %v4328_v55 = vld [vmem:[#allocation2 + $0x1a8] sm:$0x1] }
 0x2b3   : > { %v4442_v14 = vpop.permute.xlu1 %4441 }
 0x2b4   : > { %v4489_v61 = vsel %vm334_vm0, %v4258_v47, %v4442_v14  ;;  %v4392_v20 = vsel %vm3986_vm3, %v4390_v2, %v4391_v6  ;;  %v4273_v14 = vsel %vm3857_vm4, %v4271_v49, %v4272_v15  ;;  %v4406_v2 = vrot.slane %v4328_v55, 1  ;;  %v5111_v49 = vld [vmem:[#allocation2 + $0x80] sm:$0x7f]  ;;  %v3798_v55 = vld [vmem:[#allocation2 + $0x50] sm:$0x7f] }
 0x2b5   : > { %4756 = vmatmul.mubr.bf16.gmra.mrb[92].mxu1 %v4489_v61  ;;  %4079 = vrot.lane.b32.xlu0 %v13820_v7, %s12293_s26  ;;  %v4197_v61 = vld [vmem:[#allocation2 + $0x180] sm:$0x80] }
 0x2b6   : > { %5390 = vrot.lane.b32.xlu1 %v13844_v53, %s12293_s26  ;;  %11551 = vmatprep.mubr.msk.bf16.mxu1 %vm334_vm0, %v4389_v51  ;;  %v4327_v51 = vld [vmem:[#allocation2 + $0x1a0] sm:$0xfe]  ;;  %v4274_v27 = vrot.slane %v4197_v61, 7  ;;  %v5241_v61 = vld [vmem:[#allocation2 + $0xa0] sm:$0x1] }
 0x2b7   : > { %v4405_v41 = vrot.slane %v4327_v51, 1  ;;  %v3797_v51 = vld [vmem:[#allocation2 + $0x48] sm:$0x80] }
 0x2b9   : > { %4081 = vrot.lane.b32.xlu0 %v13833_v13, %s12293_s26  ;;  %v4320_v13 = vld [vmem:[#allocation2 + $0x148] sm:$0x1]  ;;  %v4407_v10 = vsel %vm3986_vm3, %v4405_v41, %v4406_v2  ;;  %v5306_v2 = vrot.slane %v5241_v61, 1  ;;  %v5116_v61 = vld [vmem:[#allocation2 + $0xc0] sm:$0x80] }
 0x2ba   : > { %5392 = vrot.lane.b32.xlu1 %v13861_v29, %s12293_s26  ;;  %v5237_v29 = vld [vmem:[#allocation2 + $0x1e8] sm:$0xff]  ;;  %v4394_v36 = vrot.slane %v4320_v13, 1  ;;  %v3794_v13 = vld [vmem:[#allocation2 + $0x20] sm:$0x7f] }
 0x2bb   : > { %v4444_v7 = vpop.permute.xlu0 %4443 }
 0x2bc   : > { %v4493_v53 = vsel %vm334_vm0, %v4261_v21, %v4444_v7  ;;  %v4395_v30 = vsel %vm3986_vm3, %v4393_v40, %v4394_v36  ;;  %v4276_v7 = vsel %vm3857_vm4, %v4274_v27, %v4275_v26  ;;  %v3925_v40 = vld [vmem:[#allocation2 + $0x40] sm:$0x1] }
 0x2bd   : > { %4764 = vmatmul.mubr.bf16.gmra.mrb[96].mxu1 %v4493_v53  ;;  %v4200_v53 = vld [vmem:[#allocation2 + $0x1a0] sm:$0x7f]  ;;  %v3991_v31 = vrot.slane %v3925_v40, 1  ;;  %v5243_v40 = vld [vmem:[#allocation2 + $0xb8] sm:$0x1] }
 0x2be   : > { %11552 = vmatprep.mubr.msk.bf16.mxu1 %vm334_vm0, %v4392_v20  ;;  %5394 = vrot.lane.b32.xlu1 %v5236_v45, %s12293_s26  ;;  %v4199_v45 = vld [vmem:[#allocation2 + $0x198] sm:$0x80]  ;;  %v4278_v34 = vrot.slane %v4200_v53, 7  ;;  %v3865_v53 = vrot.slane %v3798_v55, 7 }
 0x2bf   : > { %v4329_v20 = vld [vmem:[#allocation2 + $0x1b8] sm:$0xfe]  ;;  %v4277_v59 = vrot.slane %v4199_v45, 7  ;;  %v3864_v45 = vrot.slane %v3797_v51, 7 }
 0x2c0   : > { %v4408_v36 = vrot.slane %v4329_v20, 1  ;;  %v5113_v20 = vld [vmem:[#allocation2 + $0x98] sm:$0x7f] }
 0x2c1   : > { %v4279_v38 = vsel %vm3857_vm4, %v4277_v59, %v4278_v34 }
 0x2c2   : > { %5396 = vrot.lane.b32.xlu1 %v5237_v29, %s12293_s26  ;;  %v3924_v29 = vld [vmem:[#allocation2 + $0x38] sm:$0xfe] }
 0x2c3   : > { %v4446_v46 = vpop.permute.xlu1 %4445  ;;  %v3990_v22 = vrot.slane %v3924_v29, 1  ;;  %v5242_v29 = vld [vmem:[#allocation2 + $0xb0] sm:$0xfe] }
 0x2c4   : > { %v4497_v54 = vsel %vm334_vm0, %v4264_v56, %v4446_v46  ;;  %v4409_v46 = vrot.slane %v4330_v35, 1  ;;  %v3858_v56 = vrot.slane %v3793_v16, 7  ;;  %v5112_v35 = vld [vmem:[#allocation2 + $0x90] sm:$0x80] }
 0x2c5   : > { %4772 = vmatmul.mubr.bf16.gmra.mrb[100].mxu1 %v4497_v54  ;;  %v3859_v54 = vrot.slane %v3794_v13, 7  ;;  %v3992_v62 = vsel %vm3986_vm3, %v3990_v22, %v3991_v31  ;;  %v5308_v31 = vrot.slane %v5242_v29, 1 }
 0x2c6   : > { %11553 = vmatprep.mubr.msk.bf16.mxu1 %vm334_vm0, %v4395_v30  ;;  %v4201_v30 = vld [vmem:[#allocation2 + $0x1b0] sm:$0x80] }
 0x2cb   : > { %v4448_v25 = vpop.permute.xlu0 %4447 }
 0x2cc   : > { %v4501_v37 = vsel %vm334_vm0, %v4267_v28, %v4448_v25  ;;  %v4410_v25 = vsel %vm3986_vm3, %v4408_v36, %v4409_v46  ;;  %v3860_v28 = vsel %vm3857_vm4, %v3858_v56, %v3859_v54  ;;  %v3866_v36 = vsel %vm3857_vm4, %v3864_v45, %v3865_v53  ;;  %v3803_v45 = vld [vmem:[#allocation2 + $0x90] sm:$0x80]  ;;  %v3804_v53 = vld [vmem:[#allocation2 + $0x98] sm:$0x7f] }
 0x2cd   : > { %4780 = vmatmul.mubr.bf16.gmra.mrb[104].mxu1 %v4501_v37  ;;  %v4280_v37 = vrot.slane %v4201_v30, 7  ;;  %v5177_v46 = vrot.slane %v5112_v35, 7  ;;  %v5178_v56 = vrot.slane %v5113_v20, 7  ;;  %v3873_v29 = vrot.slane %v3803_v45, 7 }
 0x2ce   : > { %11554 = vmatprep.mubr.msk.bf16.mxu1 %vm334_vm0, %v4398_v44 }
 0x2cf   : > { %v4282_v33 = vsel %vm3857_vm4, %v4280_v37, %v4281_v43  ;;  %v5179_v58 = vsel %vm3857_vm4, %v5177_v46, %v5178_v56  ;;  %v5118_v46 = vld [vmem:[#allocation2 + $0xd8] sm:$0x80]  ;;  %v5119_v56 = vld [vmem:[#allocation2 + $0xe0] sm:$0x7f] }
 0x2d3   : > { %v4450_v4 = vpop.permute.xlu1 %4449 }
 0x2d4   : > { %v4505_v23 = vsel %vm334_vm0, %v4270_v8, %v4450_v4  ;;  %v5303_v4 = vrot.slane %v5239_v9, 1  ;;  %v3926_v8 = vld [vmem:[#allocation2 + $0x50] sm:$0xfe] }
 0x2d5   : > { %4788 = vmatmul.mubr.bf16.gmra.mrb[108].mxu1 %v4505_v23  ;;  %v3927_v23 = vld [vmem:[#allocation2 + $0x58] sm:$0x1]  ;;  %v3993_v42 = vrot.slane %v3926_v8, 1  ;;  %v5115_v9 = vld [vmem:[#allocation2 + $0xb0] sm:$0x7f] }
 0x2d6   : > { %11555 = vmatprep.mubr.msk.bf16.mxu1 %vm334_vm0, %v4401_v50  ;;  %v3863_v50 = vsel %vm3857_vm4, %v3861_v12, %v3862_v63  ;;  %v5304_v5 = vsel %vm3986_vm3, %v5302_v11, %v5303_v4  ;;  %v4000_v12 = vrot.slane %v3931_v18, 1  ;;  %v5244_v63 = vld [vmem:[#allocation2 + $0xc8] sm:$0xfe]  ;;  %v5180_v4 = vrot.slane %v5114_v19, 7 }
 0x2d7   : > { %v5181_v8 = vrot.slane %v5115_v9, 7  ;;  %v5311_v57 = vrot.slane %v5244_v63, 1  ;;  %v5187_v18 = vrot.slane %v5119_v56, 7 }
 0x2db   : > { %v4452_v48 = vpop.permute.xlu0 %4451 }
 0x2dc   : > { %v4509_v47 = vsel %vm334_vm0, %v4273_v14, %v4452_v48  ;;  %v3994_v48 = vrot.slane %v3927_v23, 1 }
 0x2dd   : > { %4796 = vmatmul.mubr.bf16.gmra.mrb[112].mxu1 %v4509_v47  ;;  %v5240_v47 = vld [vmem:[#allocation2 + $0x98] sm:$0xfe] }
 0x2de   : > { %11556 = vmatprep.mubr.msk.bf16.mxu1 %vm334_vm0, %v4404_v60  ;;  %v5175_v60 = vrot.slane %v5111_v49, 7  ;;  %v3995_v26 = vsel %vm3986_vm3, %v3993_v42, %v3994_v48  ;;  %v5305_v41 = vrot.slane %v5240_v47, 1  ;;  %v5182_v42 = vsel %vm3857_vm4, %v5180_v4, %v5181_v8  ;;  %v5120_v4 = vld [vmem:[#allocation2 + $0xf0] sm:$0x80]  ;;  %v5121_v8 = vld [vmem:[#allocation2 + $0xf8] sm:$0x7f] }
 0x2e0   : > { %v5307_v13 = vsel %vm3986_vm3, %v5305_v41, %v5306_v2  ;;  %v5247_v41 = vld [vmem:[#allocation2 + $0xe8] sm:$0x1] }
 0x2e3   : > { %v4454_v6 = vpop.permute.xlu1 %4453 }
 0x2e4   : > { %v4513_v21 = vsel %vm334_vm0, %v4276_v7, %v4454_v6  ;;  %v3928_v6 = vld [vmem:[#allocation2 + $0x68] sm:$0xfe]  ;;  %v3929_v7 = vld [vmem:[#allocation2 + $0x70] sm:$0x1] }
 0x2e5   : > { %4804 = vmatmul.mubr.bf16.gmra.mrb[116].mxu1 %v4513_v21  ;;  %v5176_v21 = vsel %vm3857_vm4, %v5174_v3, %v5175_v60  ;;  %v3996_v59 = vrot.slane %v3928_v6, 1  ;;  %v3997_v34 = vrot.slane %v3929_v7, 1  ;;  %v5117_v3 = vld [vmem:[#allocation2 + $0xc8] sm:$0x7f]  ;;  %v5183_v6 = vrot.slane %v5116_v61, 7 }
 0x2e6   : > { %11557 = vmatprep.mubr.msk.bf16.mxu1 %vm334_vm0, %v4407_v10  ;;  %v5184_v7 = vrot.slane %v5117_v3, 7 }
 0x2e7   : > { %v3998_v22 = vsel %vm3986_vm3, %v3996_v59, %v3997_v34  ;;  %v3935_v59 = vld [vmem:[#allocation2 + $0xb8] sm:$0x1] }
 0x2e8   : > { %v5185_v34 = vsel %vm3857_vm4, %v5183_v6, %v5184_v7  ;;  %v5122_v6 = vld [vmem:[#allocation2 + $0x108] sm:$0x80]  ;;  %v5123_v7 = vld [vmem:[#allocation2 + $0x110] sm:$0x7f] }
 0x2eb   : > { %v4456_v52 = vpop.permute.xlu0 %4455 }
 0x2ec   : > { %v4517_v32 = vsel %vm334_vm0, %v4279_v38, %v4456_v52  ;;  %v3799_v52 = vld [vmem:[#allocation2 + $0x60] sm:$0x80]  ;;  %v3800_v38 = vld [vmem:[#allocation2 + $0x68] sm:$0x7f] }
 0x2ed   : > { %4812 = vmatmul.mubr.bf16.gmra.mrb[120].mxu1 %v4517_v32  ;;  %v5309_v32 = vrot.slane %v5243_v40, 1  ;;  %v3874_v40 = vrot.slane %v3804_v53, 7 }
 0x2ee   : > { %11558 = vmatprep.mubr.msk.bf16.mxu1 %vm334_vm0, %v4410_v25  ;;  %v3867_v25 = vrot.slane %v3799_v52, 7 }
 0x2ef   : > { %v4052_v44 = vpop.permute.xlu0 %4051  ;;  %v5310_v43 = vsel %vm3986_vm3, %v5308_v31, %v5309_v32  ;;  %v5249_v31 = vld [vmem:[#allocation2 + $0x100] sm:$0x1]  ;;  %v3875_v32 = vsel %vm3857_vm4, %v3873_v29, %v3874_v40  ;;  %v3809_v29 = vld [vmem:[#allocation2 + $0xd8] sm:$0x80] }
 0x2f0   : > { %v4085_v39 = vsel %vm334_vm0, %v3860_v28, %v4052_v44  ;;  %v3868_v28 = vrot.slane %v3800_v38, 7  ;;  %v3810_v40 = vld [vmem:[#allocation2 + $0xe0] sm:$0x7f] }
 0x2f1   : > { %4981 = vmatmul.mubr.bf16.vlgmr.msra.gmra.mrb[128].mxu0 %v4085_v39  ;;  %v5245_v39 = vld [vmem:[#allocation2 + $0xd0] sm:$0x1] }
 0x2f2   : > { %11572 = vmatprep.mubr.msk.bf16.mxu0 %vm334_vm0, %v3992_v62  ;;  %v3999_v62 = vrot.slane %v3930_v17, 1  ;;  %v3869_v11 = vsel %vm3857_vm4, %v3867_v25, %v3868_v28  ;;  %v5312_v49 = vrot.slane %v5245_v39, 1  ;;  %v5186_v17 = vrot.slane %v5118_v46, 7  ;;  %v3805_v25 = vld [vmem:[#allocation2 + $0xa8] sm:$0x80] }
 0x2f3   : > { %v4458_v0 = vpop.permute.xlu1 %4457  ;;  %v4054_v15 = vpop.permute.xlu0 %4053  ;;  %v3806_v28 = vld [vmem:[#allocation2 + $0xb0] sm:$0x7f]  ;;  %v3876_v63 = vrot.slane %v3805_v25, 7 }
 0x2f4   : > { %v4521_v1 = vsel %vm334_vm0, %v4282_v33, %v4458_v0  ;;  %v4089_v14 = vsel %vm334_vm0, %v3863_v50, %v4054_v15  ;;  %v3801_v0 = vld [vmem:[#allocation2 + $0x78] sm:$0x80]  ;;  %v3802_v33 = vld [vmem:[#allocation2 + $0x80] sm:$0x7f]  ;;  %v5313_v51 = vsel %vm3986_vm3, %v5311_v57, %v5312_v49  ;;  %v3877_v39 = vrot.slane %v3806_v28, 7 }
 0x2f5   : > { %4820 = vmatmul.mubr.bf16.gmra.mrb[124].mxu1 %v4521_v1  ;;  %v4001_v1 = vsel %vm3986_vm3, %v3999_v62, %v4000_v12  ;;  %v3932_v15 = vld [vmem:[#allocation2 + $0x98] sm:$0xfe]  ;;  %v3870_v48 = vrot.slane %v3801_v0, 7  ;;  %v3937_v62 = vld [vmem:[#allocation2 + $0xd0] sm:$0x1]  ;;  %v5188_v12 = vsel %vm3857_vm4, %v5186_v17, %v5187_v18 }
 0x2f6   : > { %11599 = vmatprep.mubr.msk.bf16.mxu1 %vm334_vm0, %v5304_v5  ;;  %v3933_v5 = vld [vmem:[#allocation2 + $0xa0] sm:$0x1]  ;;  %v4002_v55 = vrot.slane %v3932_v15, 1  ;;  %v5251_v57 = vld [vmem:[#allocation2 + $0x118] sm:$0x1]  ;;  %v3878_v49 = vsel %vm3857_vm4, %v3876_v63, %v3877_v39  ;;  %v5189_v15 = vrot.slane %v5120_v4, 7 }
 0x2f7   : > { %v4056_v16 = vpop.permute.xlu0 %4055  ;;  %v5124_v17 = vld [vmem:[#allocation2 + $0x120] sm:$0x80]  ;;  %v5125_v18 = vld [vmem:[#allocation2 + $0x128] sm:$0x7f]  ;;  %v3811_v63 = vld [vmem:[#allocation2 + $0xf0] sm:$0x80] }
 0x2f8   : > { %v5367_v27 = vpop.permute.xlu1 %5366  ;;  %v4093_v54 = vsel %vm334_vm0, %v3866_v36, %v4056_v16  ;;  %v5315_v16 = vrot.slane %v5247_v41, 1  ;;  %v3812_v39 = vld [vmem:[#allocation2 + $0xf8] sm:$0x7f] }
 0x2f9   : > { %4989 = vmatmul.mubr.bf16.gmra.mrb[132].mxu0 %v4089_v14  ;;  %v5400_v10 = vsel %vm334_vm0, %v5176_v21, %v5367_v27  ;;  %v3871_v14 = vrot.slane %v3802_v33, 7  ;;  %v4003_v27 = vrot.slane %v3933_v5, 1  ;;  %v5190_v5 = vrot.slane %v5121_v8, 7 }
 0x2fa   : > { %11573 = vmatprep.mubr.msk.bf16.mxu0 %vm334_vm0, %v3995_v26  ;;  %v5246_v26 = vld [vmem:[#allocation2 + $0xe0] sm:$0xfe] }
 0x2fb   : > { %v4058_v44 = vpop.permute.xlu0 %4057  ;;  %v3872_v2 = vsel %vm3857_vm4, %v3870_v48, %v3871_v14  ;;  %v4004_v35 = vsel %vm3986_vm3, %v4002_v55, %v4003_v27  ;;  %v5314_v20 = vrot.slane %v5246_v26, 1  ;;  %v3807_v48 = vld [vmem:[#allocation2 + $0xc0] sm:$0x80]  ;;  %v3808_v14 = vld [vmem:[#allocation2 + $0xc8] sm:$0x7f]  ;;  %v5191_v27 = vsel %vm3857_vm4, %v5189_v15, %v5190_v5 }
 0x2fc   : > { %v5369_v30 = vpop.permute.xlu1 %5368  ;;  %v4097_v23 = vsel %vm334_vm0, %v3869_v11, %v4058_v44  ;;  %v5318_v44 = vrot.slane %v5249_v31, 1  ;;  %v3939_v55 = vld [vmem:[#allocation2 + $0xe8] sm:$0x1]  ;;  %v3879_v26 = vrot.slane %v3807_v48, 7  ;;  %v3880_v41 = vrot.slane %v3808_v14, 7 }
 0x2fd   : > { %5639 = vmatmul.mubr.bf16.vlgmr.msra.gmra.mrb[128].mxu1 %v5400_v10  ;;  %v5404_v37 = vsel %vm334_vm0, %v5179_v58, %v5369_v30  ;;  %v5316_v52 = vsel %vm3986_vm3, %v5314_v20, %v5315_v16  ;;  %v4006_v30 = vrot.slane %v3935_v59, 1  ;;  %v5253_v20 = vld [vmem:[#allocation2 + $0x130] sm:$0x1]  ;;  %v5193_v59 = vrot.slane %v5123_v7, 7  ;;  %v5126_v15 = vld [vmem:[#allocation2 + $0x138] sm:$0x80] }
 0x2fe   : > { %11600 = vmatprep.mubr.msk.bf16.mxu1 %vm334_vm0, %v5307_v13  ;;  %v3934_v13 = vld [vmem:[#allocation2 + $0xb0] sm:$0xfe]  ;;  %v3881_v16 = vsel %vm3857_vm4, %v3879_v26, %v3880_v41  ;;  %v3883_v31 = vrot.slane %v3810_v40, 7  ;;  %v5127_v5 = vld [vmem:[#allocation2 + $0x140] sm:$0x7f] }
 0x2ff   : > { %v4060_v60 = vpop.permute.xlu0 %4059  ;;  %v4005_v38 = vrot.slane %v3934_v13, 1  ;;  %v5192_v13 = vrot.slane %v5122_v6, 7  ;;  %v3813_v26 = vld [vmem:[#allocation2 + $0x108] sm:$0x80]  ;;  %v3814_v41 = vld [vmem:[#allocation2 + $0x110] sm:$0x7f] }
 0x300   : > { %v5371_v50 = vpop.permute.xlu1 %5370  ;;  %v4101_v21 = vsel %vm334_vm0, %v3872_v2, %v4060_v60  ;;  %v5321_v60 = vrot.slane %v5251_v57, 1  ;;  %v3886_v57 = vrot.slane %v3812_v39, 7 }
 0x301   : > { %4997 = vmatmul.mubr.bf16.gmra.mrb[136].mxu0 %v4093_v54  ;;  %v5408_v47 = vsel %vm334_vm0, %v5182_v42, %v5371_v50  ;;  %v4007_v19 = vsel %vm3986_vm3, %v4005_v38, %v4006_v30  ;;  %v4009_v50 = vrot.slane %v3937_v62, 1  ;;  %v3941_v38 = vld [vmem:[#allocation2 + $0x100] sm:$0x1]  ;;  %v5194_v30 = vsel %vm3857_vm4, %v5192_v13, %v5193_v59  ;;  %v5128_v13 = vld [vmem:[#allocation2 + $0x150] sm:$0x80] }
 0x302   : > { %11574 = vmatprep.mubr.msk.bf16.mxu0 %vm334_vm0, %v3998_v22  ;;  %v5248_v22 = vld [vmem:[#allocation2 + $0xf8] sm:$0xfe]  ;;  %v5196_v62 = vrot.slane %v5125_v18, 7 }
 0x303   : > { %v4062_v54 = vpop.permute.xlu0 %4061  ;;  %v5317_v9 = vrot.slane %v5248_v22, 1  ;;  %v3882_v22 = vrot.slane %v3809_v29, 7  ;;  %v5129_v59 = vld [vmem:[#allocation2 + $0x158] sm:$0x7f] }
 0x304   : > { %v5373_v10 = vpop.permute.xlu1 %5372  ;;  %v4105_v58 = vsel %vm334_vm0, %v3875_v32, %v4062_v54  ;;  %v5324_v54 = vrot.slane %v5253_v20, 1  ;;  %v3889_v20 = vrot.slane %v3814_v41, 7 }
 0x305   : > { %5647 = vmatmul.mubr.bf16.gmra.mrb[132].mxu1 %v5404_v37  ;;  %v5412_v36 = vsel %vm334_vm0, %v5185_v34, %v5373_v10  ;;  %v5319_v0 = vsel %vm3986_vm3, %v5317_v9, %v5318_v44  ;;  %v4012_v10 = vrot.slane %v3939_v55, 1  ;;  %v5255_v9 = vld [vmem:[#allocation2 + $0x148] sm:$0x1]  ;;  %v3884_v44 = vsel %vm3857_vm4, %v3882_v22, %v3883_v31  ;;  %v3815_v22 = vld [vmem:[#allocation2 + $0x120] sm:$0x80] }
 0x306   : > { %11601 = vmatprep.mubr.msk.bf16.mxu1 %vm334_vm0, %v5310_v43  ;;  %v3936_v43 = vld [vmem:[#allocation2 + $0xc8] sm:$0xfe]  ;;  %v5199_v55 = vrot.slane %v5127_v5, 7 }
 0x307   : > { %v4008_v33 = vrot.slane %v3936_v43, 1  ;;  %v5195_v43 = vrot.slane %v5124_v17, 7  ;;  %v3816_v31 = vld [vmem:[#allocation2 + $0x128] sm:$0x7f] }
 0x308   : > { %v5375_v37 = vpop.permute.xlu1 %5374 }
 0x309   : > { %5005 = vmatmul.mubr.bf16.gmra.mrb[140].mxu0 %v4097_v23  ;;  %v5416_v11 = vsel %vm334_vm0, %v5188_v12, %v5375_v37  ;;  %v4064_v23 = vpop.permute.xlu0 %4063  ;;  %v4010_v61 = vsel %vm3986_vm3, %v4008_v33, %v4009_v50  ;;  %v4015_v37 = vrot.slane %v3941_v38, 1  ;;  %v3943_v33 = vld [vmem:[#allocation2 + $0x118] sm:$0x1]  ;;  %v5197_v50 = vsel %vm3857_vm4, %v5195_v43, %v5196_v62  ;;  %v5130_v43 = vld [vmem:[#allocation2 + $0x168] sm:$0x80] }
 0x30a   : > { %11575 = vmatprep.mubr.msk.bf16.mxu0 %vm334_vm0, %v4001_v1  ;;  %v5250_v1 = vld [vmem:[#allocation2 + $0x110] sm:$0xfe]  ;;  %v4109_v42 = vsel %vm334_vm0, %v3878_v49, %v4064_v23  ;;  %v5327_v23 = vrot.slane %v5255_v9, 1  ;;  %v5202_v38 = vrot.slane %v5129_v59, 7  ;;  %v3892_v9 = vrot.slane %v3816_v31, 7 }
 0x30b   : > { %v5320_v3 = vrot.slane %v5250_v1, 1  ;;  %v3885_v1 = vrot.slane %v3811_v63, 7  ;;  %v5131_v62 = vld [vmem:[#allocation2 + $0x170] sm:$0x7f]  ;;  %v5134_v31 = vld [vmem:[#allocation2 + $0x198] sm:$0x80] }
 0x30d   : > { %5655 = vmatmul.mubr.bf16.gmra.mrb[136].mxu1 %v5408_v47  ;;  %v5377_v47 = vpop.permute.xlu1 %5376  ;;  %v5322_v45 = vsel %vm3986_vm3, %v5320_v3, %v5321_v60  ;;  %v5257_v3 = vld [vmem:[#allocation2 + $0x160] sm:$0x1]  ;;  %v3887_v60 = vsel %vm3857_vm4, %v3885_v1, %v3886_v57  ;;  %v3817_v1 = vld [vmem:[#allocation2 + $0x138] sm:$0x80] }
 0x30e   : > { %11602 = vmatprep.mubr.msk.bf16.mxu1 %vm334_vm0, %v5313_v51  ;;  %v3938_v51 = vld [vmem:[#allocation2 + $0xe0] sm:$0xfe]  ;;  %v5420_v2 = vsel %vm334_vm0, %v5191_v27, %v5377_v47  ;;  %v4018_v47 = vrot.slane %v3943_v33, 1  ;;  %v5205_v33 = vrot.slane %v5131_v62, 7 }
 0x30f   : > { %v4011_v53 = vrot.slane %v3938_v51, 1  ;;  %v5198_v51 = vrot.slane %v5126_v15, 7  ;;  %v3818_v57 = vld [vmem:[#allocation2 + $0x140] sm:$0x7f] }
 0x311   : > { %5013 = vmatmul.mubr.bf16.gmra.mrb[144].mxu0 %v4101_v21  ;;  %v4066_v21 = vpop.permute.xlu0 %4065  ;;  %v4013_v46 = vsel %vm3986_vm3, %v4011_v53, %v4012_v10  ;;  %v3945_v53 = vld [vmem:[#allocation2 + $0x130] sm:$0x1]  ;;  %v5200_v10 = vsel %vm3857_vm4, %v5198_v51, %v5199_v55  ;;  %v5132_v51 = vld [vmem:[#allocation2 + $0x180] sm:$0x80]  ;;  %v5133_v55 = vld [vmem:[#allocation2 + $0x188] sm:$0x7f] }
 0x312   : > { %11576 = vmatprep.mubr.msk.bf16.mxu0 %vm334_vm0, %v4004_v35  ;;  %v5252_v35 = vld [vmem:[#allocation2 + $0x128] sm:$0xfe]  ;;  %v4113_v34 = vsel %vm334_vm0, %v3881_v16, %v4066_v21  ;;  %v5330_v21 = vrot.slane %v5257_v3, 1  ;;  %v3895_v3 = vrot.slane %v3818_v57, 7 }
 0x313   : > { %v5323_v56 = vrot.slane %v5252_v35, 1  ;;  %v3888_v35 = vrot.slane %v3813_v26, 7 }
 0x315   : > { %5663 = vmatmul.mubr.bf16.gmra.mrb[140].mxu1 %v5412_v36  ;;  %v5379_v36 = vpop.permute.xlu1 %5378  ;;  %v5325_v25 = vsel %vm3986_vm3, %v5323_v56, %v5324_v54  ;;  %v5259_v56 = vld [vmem:[#allocation2 + $0x178] sm:$0x1]  ;;  %v3890_v54 = vsel %vm3857_vm4, %v3888_v35, %v3889_v20  ;;  %v3819_v20 = vld [vmem:[#allocation2 + $0x150] sm:$0x80] }
 0x316   : > { %11603 = vmatprep.mubr.msk.bf16.mxu1 %vm334_vm0, %v5316_v52  ;;  %v3940_v52 = vld [vmem:[#allocation2 + $0xf8] sm:$0xfe]  ;;  %v5424_v32 = vsel %vm334_vm0, %v5194_v30, %v5379_v36  ;;  %v4021_v36 = vrot.slane %v3945_v53, 1  ;;  %v5208_v53 = vrot.slane %v5133_v55, 7 }
 0x317   : > { %v4014_v28 = vrot.slane %v3940_v52, 1  ;;  %v5201_v52 = vrot.slane %v5128_v13, 7 }
 0x319   : > { %5021 = vmatmul.mubr.bf16.gmra.mrb[148].mxu0 %v4105_v58  ;;  %v4068_v58 = vpop.permute.xlu0 %4067  ;;  %v4016_v4 = vsel %vm3986_vm3, %v4014_v28, %v4015_v37  ;;  %v3947_v28 = vld [vmem:[#allocation2 + $0x148] sm:$0x1]  ;;  %v5203_v37 = vsel %vm3857_vm4, %v5201_v52, %v5202_v38  ;;  %v3897_v38 = vrot.slane %v3819_v20, 7  ;;  %v5139_v20 = vld [vmem:[#allocation2 + $0x1d0] sm:$0x7f] }
 0x31a   : > { %11577 = vmatprep.mubr.msk.bf16.mxu0 %vm334_vm0, %v4007_v19  ;;  %v5254_v19 = vld [vmem:[#allocation2 + $0x140] sm:$0xfe]  ;;  %v4117_v12 = vsel %vm334_vm0, %v3884_v44, %v4068_v58  ;;  %v5333_v58 = vrot.slane %v5259_v56, 1  ;;  %v3951_v56 = vld [vmem:[#allocation2 + $0x178] sm:$0x1] }
 0x31b   : > { %v5326_v8 = vrot.slane %v5254_v19, 1  ;;  %v3891_v19 = vrot.slane %v3815_v22, 7 }
 0x31d   : > { %5671 = vmatmul.mubr.bf16.gmra.mrb[144].mxu1 %v5416_v11  ;;  %v5381_v11 = vpop.permute.xlu1 %5380  ;;  %v5328_v48 = vsel %vm3986_vm3, %v5326_v8, %v5327_v23  ;;  %v5261_v8 = vld [vmem:[#allocation2 + $0x190] sm:$0x1]  ;;  %v3893_v23 = vsel %vm3857_vm4, %v3891_v19, %v3892_v9  ;;  %v5210_v9 = vrot.slane %v5134_v31, 7 }
 0x31e   : > { %11604 = vmatprep.mubr.msk.bf16.mxu1 %vm334_vm0, %v5319_v0  ;;  %v3942_v0 = vld [vmem:[#allocation2 + $0x110] sm:$0xfe]  ;;  %v5428_v49 = vsel %vm334_vm0, %v5197_v50, %v5381_v11  ;;  %v4024_v11 = vrot.slane %v3947_v28, 1  ;;  %v5264_v28 = vld [vmem:[#allocation2 + $0x1b8] sm:$0xfe] }
 0x31f   : > { %v4017_v14 = vrot.slane %v3942_v0, 1  ;;  %v5204_v0 = vrot.slane %v5130_v43, 7  ;;  %v5269_v31 = vld [vmem:[#allocation2 + $0x1f0] sm:$0x1] }
 0x321   : > { %5029 = vmatmul.mubr.bf16.gmra.mrb[152].mxu0 %v4109_v42  ;;  %v4070_v42 = vpop.permute.xlu0 %4069  ;;  %v4019_v6 = vsel %vm3986_vm3, %v4017_v14, %v4018_v47  ;;  %v3949_v14 = vld [vmem:[#allocation2 + $0x160] sm:$0x1]  ;;  %v5206_v47 = vsel %vm3857_vm4, %v5204_v0, %v5205_v33  ;;  %v3952_v33 = vld [vmem:[#allocation2 + $0x188] sm:$0xfe] }
 0x322   : > { %11578 = vmatprep.mubr.msk.bf16.mxu0 %vm334_vm0, %v4010_v61  ;;  %v5256_v61 = vld [vmem:[#allocation2 + $0x158] sm:$0xfe]  ;;  %v4121_v27 = vsel %vm334_vm0, %v3887_v60, %v4070_v42  ;;  %v5336_v42 = vrot.slane %v5261_v8, 1  ;;  %v5341_v8 = vrot.slane %v5264_v28, 1  ;;  %v5348_v28 = vrot.slane %v5269_v31, 1 }
 0x323   : > { %v5329_v7 = vrot.slane %v5256_v61, 1  ;;  %v3894_v61 = vrot.slane %v3817_v1, 7 }
 0x325   : > { %5679 = vmatmul.mubr.bf16.gmra.mrb[148].mxu1 %v5420_v2  ;;  %v5383_v2 = vpop.permute.xlu1 %5382  ;;  %v5331_v29 = vsel %vm3986_vm3, %v5329_v7, %v5330_v21  ;;  %v5263_v7 = vld [vmem:[#allocation2 + $0x1a8] sm:$0x1]  ;;  %v3896_v21 = vsel %vm3857_vm4, %v3894_v61, %v3895_v3  ;;  %v5267_v61 = vld [vmem:[#allocation2 + $0x1d8] sm:$0x1] }
 0x326   : > { %11605 = vmatprep.mubr.msk.bf16.mxu1 %vm334_vm0, %v5322_v45  ;;  %v3944_v45 = vld [vmem:[#allocation2 + $0x128] sm:$0xfe]  ;;  %v5432_v16 = vsel %vm334_vm0, %v5200_v10, %v5383_v2  ;;  %v4027_v2 = vrot.slane %v3949_v14, 1  ;;  %v5137_v14 = vld [vmem:[#allocation2 + $0x1b8] sm:$0x7f] }
 0x327   : > { %v4020_v40 = vrot.slane %v3944_v45, 1  ;;  %v5207_v45 = vrot.slane %v5132_v51, 7  ;;  %v4032_v51 = vrot.slane %v3952_v33, 1 }
 0x329   : > { %5037 = vmatmul.mubr.bf16.gmra.mrb[156].mxu0 %v4113_v34  ;;  %v4072_v34 = vpop.permute.xlu0 %4071  ;;  %v4022_v17 = vsel %vm3986_vm3, %v4020_v40, %v4021_v36  ;;  %v5339_v40 = vrot.slane %v5263_v7, 1  ;;  %v5209_v52 = vsel %vm3857_vm4, %v5207_v45, %v5208_v53 }
 0x32a   : > { %11579 = vmatprep.mubr.msk.bf16.mxu0 %vm334_vm0, %v4013_v46  ;;  %v5258_v46 = vld [vmem:[#allocation2 + $0x170] sm:$0xfe]  ;;  %v4125_v30 = vsel %vm334_vm0, %v3890_v54, %v4072_v34 }
 0x32b   : > { %v5332_v18 = vrot.slane %v5258_v46, 1  ;;  %v3950_v46 = vld [vmem:[#allocation2 + $0x170] sm:$0xfe] }
 0x32d   : > { %5687 = vmatmul.mubr.bf16.gmra.mrb[152].mxu1 %v5424_v32  ;;  %v5385_v32 = vpop.permute.xlu1 %5384  ;;  %v5334_v63 = vsel %vm3986_vm3, %v5332_v18, %v5333_v58  ;;  %v4029_v58 = vrot.slane %v3950_v46, 1 }
 0x32e   : > { %11606 = vmatprep.mubr.msk.bf16.mxu1 %vm334_vm0, %v5325_v25  ;;  %v3946_v25 = vld [vmem:[#allocation2 + $0x140] sm:$0xfe]  ;;  %v5436_v44 = vsel %vm334_vm0, %v5203_v37, %v5385_v32  ;;  %v5265_v37 = vld [vmem:[#allocation2 + $0x1c0] sm:$0x1] }
 0x32f   : > { %v4023_v39 = vrot.slane %v3946_v25, 1  ;;  %v5135_v32 = vld [vmem:[#allocation2 + $0x1a0] sm:$0x7f]  ;;  %v4030_v25 = vrot.slane %v3951_v56, 1 }
 0x331   : > { %5045 = vmatmul.mubr.bf16.gmra.mrb[160].mxu0 %v4117_v12  ;;  %v4074_v12 = vpop.permute.xlu0 %4073  ;;  %v4025_v15 = vsel %vm3986_vm3, %v4023_v39, %v4024_v11 }
 0x332   : > { %11580 = vmatprep.mubr.msk.bf16.mxu0 %vm334_vm0, %v4016_v4  ;;  %v5260_v4 = vld [vmem:[#allocation2 + $0x188] sm:$0xfe]  ;;  %v4129_v50 = vsel %vm334_vm0, %v3893_v23, %v4074_v12  ;;  %v5342_v23 = vrot.slane %v5265_v37, 1 }
 0x333   : > { %v5335_v5 = vrot.slane %v5260_v4, 1  ;;  %v3821_v12 = vld [vmem:[#allocation2 + $0x168] sm:$0x80]  ;;  %v4031_v4 = vsel %vm3986_vm3, %v4029_v58, %v4030_v25 }
 0x335   : > { %5695 = vmatmul.mubr.bf16.gmra.mrb[156].mxu1 %v5428_v49  ;;  %v5387_v49 = vpop.permute.xlu1 %5386  ;;  %v5337_v26 = vsel %vm3986_vm3, %v5335_v5, %v5336_v42  ;;  %v5136_v5 = vld [vmem:[#allocation2 + $0x1b0] sm:$0x80]  ;;  %v11888_v42 = vld [vmem:[%s16454_s5 + $0x60] sm:$0xff]  }
 0x336   : > { %11607 = vmatprep.mubr.msk.bf16.mxu1 %vm334_vm0, %v5328_v48  ;;  %v3948_v48 = vld [vmem:[#allocation2 + $0x158] sm:$0xfe]  ;;  %v5440_v60 = vsel %vm334_vm0, %v5206_v47, %v5387_v49  ;;  %v3900_v49 = vrot.slane %v3821_v12, 7  ;;  %v5266_v47 = vld [vmem:[#allocation2 + $0x1d0] sm:$0xfe]  ;;  %7002 = vmatpush1.bf16.msra.mxu0 %v11888_v42 }
 0x337   : > { %v4026_v41 = vrot.slane %v3948_v48, 1  ;;  %7003 = vmatprep.subr.bf16.mxu0 %v16467_v24  ;;  %v5344_v7 = vrot.slane %v5266_v47, 1  ;;  %v11890_v42 = vld [vmem:[%s16454_s5 + $0x70] sm:$0xff]  }
 0x339   : > { %5053 = vmatmul.mubr.bf16.gmra.mrb[164].mxu0 %v4121_v27  ;;  %v4076_v27 = vpop.permute.xlu0 %4075  ;;  %v5389_v13 = vpop.permute.xlu1 %5388  ;;  %v4028_v34 = vsel %vm3986_vm3, %v4026_v41, %v4027_v2  ;;  %v5214_v2 = vrot.slane %v5137_v14, 7 }
 0x33a   : > { %11581 = vmatprep.mubr.msk.bf16.mxu0 %vm334_vm0, %v4019_v6  ;;  %v5262_v6 = vld [vmem:[#allocation2 + $0x1a0] sm:$0xfe]  ;;  %v4133_v35 = vsel %vm334_vm0, %v3896_v21, %v4076_v27  ;;  %v5444_v22 = vsel %vm334_vm0, %v5209_v52, %v5389_v13  ;;  %v5213_v27 = vrot.slane %v5136_v5, 7  ;;  %v5345_v21 = vrot.slane %v5267_v61, 1 }
 0x33c   : > { %v5215_v56 = vsel %vm3857_vm4, %v5213_v27, %v5214_v2 }
 0x33d   : > { %5703 = vmatmul.mubr.bf16.gmra.mrb[160].mxu1 %v5432_v16  ;;  %v3820_v16 = vld [vmem:[#allocation2 + $0x158] sm:$0x7f]  ;;  %v5391_v39 = vpop.permute.xlu1 %5390 }
 0x33e   : > { %11608 = vmatprep.mubr.msk.bf16.mxu1 %vm334_vm0, %v5331_v29  ;;  %v5338_v29 = vrot.slane %v5262_v6, 1  ;;  %v3824_v6 = vld [vmem:[#allocation2 + $0x188] sm:$0x7f] }
 0x340   : > { %v5340_v18 = vsel %vm3986_vm3, %v5338_v29, %v5339_v40  ;;  %v3904_v40 = vrot.slane %v3824_v6, 7 }
 0x341   : > { %5061 = vmatmul.mubr.bf16.gmra.mrb[168].mxu0 %v4125_v30  ;;  %v3898_v30 = vrot.slane %v3820_v16, 7  ;;  %v5393_v16 = vpop.permute.xlu1 %5392 }
 0x342   : > { %11582 = vmatprep.mubr.msk.bf16.mxu0 %vm334_vm0, %v4022_v17  ;;  %v4078_v17 = vpop.permute.xlu0 %4077 }
 0x343   : > { %v3899_v19 = vsel %vm3857_vm4, %v3897_v38, %v3898_v30  ;;  %v5217_v38 = vrot.slane %v5139_v20, 7  ;;  %v5452_v30 = vsel %vm334_vm0, %v5215_v56, %v5393_v16  ;;  %v11893_v16 = vld [vmem:[%s16454_s5 + $0x88] sm:$0xff]  }
 0x344   : > { %v4137_v62 = vsel %vm334_vm0, %v3899_v19, %v4078_v17 }
 0x345   : > { %5711 = vmatmul.mubr.bf16.gmra.mrb[164].mxu1 %v5436_v44  ;;  %v5211_v44 = vrot.slane %v5135_v32, 7 }
 0x346   : > { %11609 = vmatprep.mubr.msk.bf16.mxu1 %vm334_vm0, %v5334_v63  ;;  %v3822_v63 = vld [vmem:[#allocation2 + $0x170] sm:$0x7f]  ;;  %v4080_v3 = vpop.permute.xlu0 %4079 }
 0x347   : > { %v5212_v57 = vsel %vm3857_vm4, %v5210_v9, %v5211_v44  ;;  %v5140_v9 = vld [vmem:[#allocation2 + $0x1e0] sm:$0x80]  ;;  %v5141_v44 = vld [vmem:[#allocation2 + $0x1e8] sm:$0x7f] }
 0x348   : > { %v5448_v48 = vsel %vm334_vm0, %v5212_v57, %v5391_v39 }
 0x349   : > { %5069 = vmatmul.mubr.bf16.gmra.mrb[172].mxu0 %v4129_v50  ;;  %v3953_v50 = vld [vmem:[#allocation2 + $0x190] sm:$0x1] }
 0x34a   : > { %11583 = vmatprep.mubr.msk.bf16.mxu0 %vm334_vm0, %v4025_v15  ;;  %v3901_v15 = vrot.slane %v3822_v63, 7  ;;  %v4033_v55 = vrot.slane %v3953_v50, 1  ;;  %v4082_v32 = vpop.permute.xlu0 %4081 }
 0x34c   : > { %v3902_v41 = vsel %vm3857_vm4, %v3900_v49, %v3901_v15 }
 0x34d   : > { %5719 = vmatmul.mubr.bf16.gmra.mrb[168].mxu1 %v5440_v60  ;;  %v5343_v60 = vsel %vm3986_vm3, %v5341_v8, %v5342_v23  ;;  %v4141_v53 = vsel %vm334_vm0, %v3902_v41, %v4080_v3  ;;  %v5220_v8 = vrot.slane %v5141_v44, 7  ;;  %v11889_v23 = vld [vmem:[%s16454_s5 + $0x68] sm:$0xff]   ;;  %v11891_v3 = vld [vmem:[%s16454_s5 + $0x78] sm:$0xff]  }
 0x34e   : > { %11610 = vmatprep.mubr.msk.bf16.mxu1 %vm334_vm0, %v5337_v26  ;;  %v3823_v26 = vld [vmem:[#allocation2 + $0x180] sm:$0x80]  ;;  %7004 = vmatpush1.bf16.msra.mxu0 %v11889_v23 }
 0x34f   : > { %v3903_v29 = vrot.slane %v3823_v26, 7  ;;  %7005 = vmatprep.subr.bf16.mxu0 %v16467_v24 }
 0x350   : > { %v14118_v10 = vpop.f32.mrb[64].mxu1 }
 0x351   : > { %v4703_v59 = vpop.f32.mrb[65].mxu1  ;;  %5077 = vmatmul.mubr.bf16.gmra.mrb[176].mxu0 %v4133_v35  ;;  %v5138_v35 = vld [vmem:[#allocation2 + $0x1c8] sm:$0x80]  ;;  %v3905_v17 = vsel %vm3857_vm4, %v3903_v29, %v3904_v40 }
 0x352   : > { %v14122_v36 = vpop.f32.mrb[66].mxu1  ;;  %11584 = vmatprep.mubr.msk.bf16.mxu0 %vm334_vm0, %v4028_v34  ;;  %v4034_v59 = vsel %vm3986_vm3, %v4032_v51, %v4033_v55  ;;  %v5216_v52 = vrot.slane %v5138_v35, 7  ;;  %v4145_v19 = vsel %vm334_vm0, %v3905_v17, %v4082_v32  ;;  %7006 = vmatpush1.bf16.msra.mxu0 %v11890_v42  ;;  %v11895_v17 = vld [vmem:[%s16454_s5 + $0x98] sm:$0xff]  }
 0x353   : > { %v4706_v54 = vpop.f32.mrb[67].mxu1  ;;  %7007 = vmatprep.subr.bf16.mxu0 %v16467_v24 }
 0x354   : > { %v5346_v54 = vsel %vm3986_vm3, %v5344_v7, %v5345_v21  ;;  %v5218_v58 = vsel %vm3857_vm4, %v5216_v52, %v5217_v38  ;;  %v11892_v7 = vld [vmem:[%s16454_s5 + $0x80] sm:$0xff]  }
 0x355   : > { %5727 = vmatmul.mubr.bf16.gmra.mrb[172].mxu1 %v5444_v22  ;;  %v5268_v22 = vld [vmem:[#allocation2 + $0x1e8] sm:$0xfe] }
 0x356   : > { %11611 = vmatprep.mubr.msk.bf16.mxu1 %vm334_vm0, %v5340_v18  ;;  %v5395_v18 = vpop.permute.xlu1 %5394  ;;  %v5347_v25 = vrot.slane %v5268_v22, 1  ;;  %7008 = vmatpush1.bf16.msra.mxu0 %v11891_v3 }
 0x357   : > { %v5456_v63 = vsel %vm334_vm0, %v5218_v58, %v5395_v18  ;;  %7009 = vmatprep.subr.bf16.mxu0 %v16467_v24 }
 0x358   : > { %v14130_v43 = vpop.f32.mrb[68].mxu1 }
 0x359   : > { %v4711_v11 = vpop.f32.mrb[69].mxu1  ;;  %5085 = vmatmul.mubr.bf16.gmra.mrb[180].mxu0 %v4137_v62 }
 0x35a   : > { %v14134_v0 = vpop.f32.mrb[70].mxu1  ;;  %11585 = vmatprep.mubr.msk.bf16.mxu0 %vm334_vm0, %v4031_v4  ;;  %v5349_v11 = vsel %vm3986_vm3, %v5347_v25, %v5348_v28  ;;  %v5219_v4 = vrot.slane %v5140_v9, 7  ;;  %v5397_v33 = vpop.permute.xlu1 %5396  ;;  %7010 = vmatpush1.bf16.msra.mxu0 %v11892_v7 }
 0x35b   : > { %v4714_v1 = vpop.f32.mrb[71].mxu1  ;;  %7011 = vmatprep.subr.bf16.mxu0 %v16467_v24 }
 0x35c   : > { %v5221_v50 = vsel %vm3857_vm4, %v5219_v4, %v5220_v8 }
 0x35d   : > { %5735 = vmatmul.mubr.bf16.gmra.mrb[176].mxu1 %v5448_v48  ;;  %v5460_v15 = vsel %vm334_vm0, %v5221_v50, %v5397_v33 }
 0x35e   : > { %11612 = vmatprep.mubr.msk.bf16.mxu1 %vm334_vm0, %v5343_v60  ;;  %7012 = vmatpush1.bf16.msra.mxu0 %v11893_v16  ;;  %v14264_v16 = vld [vmem:[%s16453_s4] ss:$0 sm:$0xff] }
 0x35f   : > { %7013 = vmatprep.subr.bf16.mxu0 %v16467_v24 }
 0x360   : > { %v14146_v45 = vpop.f32.mrb[72].mxu1 }
 0x361   : > { %v4719_v13 = vpop.f32.mrb[73].mxu1  ;;  %5093 = vmatmul.mubr.bf16.gmra.mrb[184].mxu0 %v4141_v53 }
 0x362   : > { %v14150_v34 = vpop.f32.mrb[74].mxu1  ;;  %11586 = vmatprep.mubr.msk.bf16.mxu0 %vm334_vm0, %v4034_v59 }
 0x363   : > { %v4722_v46 = vpop.f32.mrb[75].mxu1 }
 0x364   : > { %v11894_v46 = vld [vmem:[%s16454_s5 + $0x90] sm:$0xff]  }
 0x365   : > { %5743 = vmatmul.mubr.bf16.gmra.mrb[180].mxu1 %v5452_v30  ;;  %7014 = vmatpush1.bf16.msra.mxu0 %v11894_v46 }
 0x366   : > { %11613 = vmatprep.mubr.msk.bf16.mxu1 %vm334_vm0, %v5346_v54  ;;  %7015 = vmatprep.subr.bf16.mxu0 %v16467_v24 }
 0x368   : > { %v14159_v37 = vpop.f32.mrb[76].mxu1 }
 0x369   : > { %v4727_v62 = vpop.f32.mrb[77].mxu1  ;;  %5101 = vmatmul.mubr.bf16.gmra.mrb[188].mxu0 %v4145_v19  ;;  %v11896_v19 = vld [vmem:[%s16454_s5 + $0xa0] sm:$0xff]  }
 0x36a   : > { %v14162_v12 = vpop.f32.mrb[78].mxu1  ;;  %7016 = vmatpush1.bf16.msra.mxu0 %v11895_v17 }
 0x36b   : > { %v4730_v39 = vpop.f32.mrb[79].mxu1  ;;  %7017 = vmatprep.subr.bf16.mxu0 %v16467_v24 }
 0x36c   : > { %v11897_v39 = vld [vmem:[%s16454_s5 + $0xa8] sm:$0xff]  }
 0x36d   : > { %5751 = vmatmul.mubr.bf16.gmra.mrb[184].mxu1 %v5456_v63 }
 0x36e   : > { %11614 = vmatprep.mubr.msk.bf16.mxu1 %vm334_vm0, %v5349_v11  ;;  %7018 = vmatpush1.bf16.msra.mxu0 %v11896_v19 }
 0x36f   : > { %7019 = vmatprep.subr.bf16.mxu0 %v16467_v24 }
 0x370   : > { %v14172_v1 = vpop.f32.mrb[80].mxu1 }
 0x371   : > { %v4735_v57 = vpop.f32.mrb[81].mxu1 }
 0x372   : > { %v14174_v49 = vpop.f32.mrb[82].mxu1  ;;  %7020 = vmatpush1.bf16.msra.mxu0 %v11897_v39 }
 0x373   : > { %v4738_v5 = vpop.f32.mrb[83].mxu1  ;;  %7021 = vmatprep.subr.bf16.mxu0 %v16467_v24 }
 0x375   : > { %5759 = vmatmul.mubr.bf16.gmra.mrb[188].mxu1 %v5460_v15 }
 0x378   : > { %v14181_v48 = vpop.f32.mrb[84].mxu1 }
 0x379   : > { %v4743_v14 = vpop.f32.mrb[85].mxu1 }
 0x37a   : > { %v14183_v47 = vpop.f32.mrb[86].mxu1 }
 0x37b   : > { %v4746_v61 = vpop.f32.mrb[87].mxu1 }
 0x380   : > { %v14189_v60 = vpop.f32.mrb[88].mxu1 }
 0x381   : > { %v4751_v51 = vpop.f32.mrb[89].mxu1 }
 0x382   : > { %v14191_v55 = vpop.f32.mrb[90].mxu1 }
 0x383   : > { %v4754_v27 = vpop.f32.mrb[91].mxu1 }
 0x384   : > { %v11898_v27 = vld [vmem:[%s16454_s5 + $0xb0] sm:$0xff]  }
 0x385   : > { %7022 = vmatpush1.bf16.msra.mxu0 %v11898_v27 }
 0x386   : > { %7023 = vmatprep.subr.bf16.mxu0 %v16467_v24 }
 0x388   : > { %v14193_v26 = vpop.f32.mrb[92].mxu1 }
 0x389   : > { %v4759_v41 = vpop.f32.mrb[93].mxu1 }
 0x38a   : > { %v14195_v2 = vpop.f32.mrb[94].mxu1 }
 0x38b   : > { %v4762_v6 = vpop.f32.mrb[95].mxu1 }
 0x390   : > { %v14201_v21 = vpop.f32.mrb[96].mxu1 }
 0x391   : > { %v4767_v53 = vpop.f32.mrb[97].mxu1 }
 0x392   : > { %v14203_v35 = vpop.f32.mrb[98].mxu1 }
 0x393   : > { %v4770_v20 = vpop.f32.mrb[99].mxu1 }
 0x398   : > { %v14209_v13 = vpop.f32.mrb[100].mxu1 }
 0x399   : > { %v4775_v59 = vpop.f32.mrb[101].mxu1 }
 0x39a   : > { %v14211_v29 = vpop.f32.mrb[102].mxu1 }
 0x39b   : > { %v4778_v40 = vpop.f32.mrb[103].mxu1 }
 0x3a0   : > { %v14217_v56 = vpop.f32.mrb[104].mxu1 }
 0x3a1   : > { %v4783_v54 = vpop.f32.mrb[105].mxu1 }
 0x3a2   : > { %v14219_v52 = vpop.f32.mrb[106].mxu1 }
 0x3a3   : > { %v4786_v38 = vpop.f32.mrb[107].mxu1 }
 0x3a8   : > { %v14221_v30 = vpop.f32.mrb[108].mxu1 }
 0x3a9   : > { %v4791_v22 = vpop.f32.mrb[109].mxu1 }
 0x3aa   : > { %v14223_v31 = vpop.f32.mrb[110].mxu1  ;;  %v11899_v22 = vld [vmem:[%s16454_s5 + $0xb8] sm:$0xff]  }
 0x3ab   : > { %v4794_v32 = vpop.f32.mrb[111].mxu1  ;;  %7024 = vmatpush1.bf16.msra.mxu0 %v11899_v22 }
 0x3ac   : > { %8052 = vmatprep.subr.bf16.mxu0 %v16467_v24 }
 0x3b0   : > { %v14229_v18 = vpop.f32.mrb[112].mxu1 }
 0x3b1   : > { %v4799_v58 = vpop.f32.mrb[113].mxu1 }
 0x3b2   : > { %v14231_v25 = vpop.f32.mrb[114].mxu1 }
 0x3b3   : > { %v4802_v28 = vpop.f32.mrb[115].mxu1 }
 0x3b4   : > { %v11900_v28 = vld [vmem:[%s16454_s5] sm:$0xff]  }
 0x3b5   : > { %7283 = vmatpush1.bf16.msra.mxu1 %v11900_v28 }
 0x3b6   : > { %7284 = vmatprep.subr.bf16.mxu1 %v16467_v24 }
 0x3b8   : > { %v14237_v9 = vpop.f32.mrb[116].mxu1 }
 0x3b9   : > { %v4807_v44 = vpop.f32.mrb[117].mxu1 }
 0x3ba   : > { %v14239_v62 = vpop.f32.mrb[118].mxu1 }
 0x3bb   : > { %v4810_v63 = vpop.f32.mrb[119].mxu1 }
 0x3c0   : > { %v14245_v11 = vpop.f32.mrb[120].mxu1 }
 0x3c1   : > { %v4815_v4 = vpop.f32.mrb[121].mxu1 }
 0x3c2   : > { %v14247_v8 = vpop.f32.mrb[122].mxu1 }
 0x3c3   : > { %v4818_v23 = vpop.f32.mrb[123].mxu1 }
 0x3c4   : > { %v4982_v33 = vpop.f32.mrb[128].mxu0 }
 0x3c5   : > { %v4983_v50 = vadd.f32 %v4982_v33, %v14118_v10  ;;  %v4984_v57 = vpop.f32.mrb[129].mxu0  ;;  %v14277_v33 = vld [vmem:[#allocation2 + $0x38] sm:$0xff] }
 0x3c6   : > { %v4985_v15 = vpop.f32.mrb[130].mxu0  ;;  %v5944_v27 = vshll.u32 %v14277_v33, 16 }
 0x3c7   : > { %v4986_v5 = vadd.f32 %v4985_v15, %v14122_v36  ;;  %v4987_v42 = vpop.f32.mrb[131].mxu0  ;;  %v5941_v15 = vshrl.u32 %v14277_v33, 16 }
 0x3c8   : > { %v14251_v14 = vpop.f32.mrb[124].mxu1 }
 0x3c9   : > { %v4823_v61 = vpop.f32.mrb[125].mxu1 }
 0x3ca   : > { %v14253_v3 = vpop.f32.mrb[126].mxu1 }
 0x3cb   : > { %v4826_v51 = vpop.f32.mrb[127].mxu1 }
 0x3cc   : > { %v4990_v41 = vpop.f32.mrb[132].mxu0 }
 0x3cd   : > { %v4991_v6 = vadd.f32 %v4990_v41, %v14130_v43  ;;  %v4992_v7 = vpop.f32.mrb[133].mxu0 }
 0x3ce   : > { %v4993_v10 = vpop.f32.mrb[134].mxu0 }
 0x3cf   : > { %v4994_v36 = vadd.f32 %v4993_v10, %v14134_v0  ;;  %v4995_v53 = vpop.f32.mrb[135].mxu0 }
 0x3d0   : > { %v5640_v20 = vpop.f32.mrb[128].mxu1 }
 0x3d1   : > { %v5767_v59 = vadd.f32 %v5640_v20, %v4983_v50  ;;  %v5642_v40 = vpop.f32.mrb[129].mxu1 }
 0x3d2   : > { %v5643_v46 = vpop.f32.mrb[130].mxu1 }
 0x3d3   : > { %v5806_v54 = vadd.f32 %v14264_v16, %v5767_v59  ;;  %v5768_v43 = vadd.f32 %v5643_v46, %v4986_v5  ;;  %v5645_v38 = vpop.f32.mrb[131].mxu1  ;;  %v6617_v59 = vld [vmem:[#allocation2 + $0x58] sm:$0x1] }
 0x3d4   : > { %v4998_v32 = vpop.f32.mrb[136].mxu0  ;;  %v11902_v38 = vld [vmem:[%s16454_s5 + $0x8] sm:$0xff]  }
 0x3d5   : > { %v5807_v0 = vadd.f32 %v14264_v16, %v5768_v43  ;;  %v4999_v17 = vadd.f32 %v4998_v32, %v14146_v45  ;;  %v5000_v58 = vpop.f32.mrb[137].mxu0  ;;  %v5838_v44 = vmax.f32 %v5806_v54, 0.0  ;;  %7285 = vmatpush1.bf16.msra.mxu1 %v11902_v38 }
 0x3d6   : > { %v5001_v19 = vpop.f32.mrb[138].mxu0  ;;  %7286 = vmatprep.subr.bf16.mxu1 %v16467_v24 }
 0x3d7   : > { %v5839_v63 = vmax.f32 %v5807_v0, 0.0  ;;  %v5002_v39 = vadd.f32 %v5001_v19, %v14150_v34  ;;  %v5003_v4 = vpop.f32.mrb[139].mxu0  ;;  %v5943_v34 = vrot.slane %v5941_v15, 7  ;;  %v6636_v0 = vshll.u32 %v6617_v59, 16  ;;  %v11904_v59 = vld [vmem:[%s16454_s5 + $0x10] sm:$0xff]  }
 0x3d8   : > { %v5648_v23 = vpop.f32.mrb[132].mxu1 }
 0x3d9   : > { %v5870_v45 = vpack.c.bf16 %v5839_v63, %v5838_v44  ;;  %v5769_v50 = vadd.f32 %v5648_v23, %v4991_v6  ;;  %v5650_v57 = vpop.f32.mrb[133].mxu1  ;;  %v14290_v53 = vor.u32 %v5944_v27, %v5943_v34  ;;  %7287 = vmatpush1.bf16.msra.mxu1 %v11904_v59 }
 0x3da   : > { %v5651_v5 = vpop.f32.mrb[134].mxu1  ;;  %7288 = vmatprep.subr.bf16.mxu1 %v16467_v24 }
 0x3db   : > { %5886 = vst.msk [vmem:[#allocation2 + $0x50] sm:$0xff] %vm334_vm0, %v5870_v45  ;;  %v5808_v42 = vadd.f32 %v14264_v16, %v5769_v50  ;;  %v5770_v61 = vadd.f32 %v5651_v5, %v4994_v36  ;;  %v5653_v51 = vpop.f32.mrb[135].mxu1  ;;  %v6638_v5 = vrot.slane %v6636_v0, 1 }
 0x3dc   : > { %v5006_v41 = vpop.f32.mrb[140].mxu0 }
 0x3dd   : > { %v5809_v7 = vadd.f32 %v14264_v16, %v5770_v61  ;;  %v5007_v6 = vadd.f32 %v5006_v41, %v14159_v37  ;;  %v5008_v10 = vpop.f32.mrb[141].mxu0  ;;  %v5840_v40 = vmax.f32 %v5808_v42, 0.0 }
 0x3de   : > { %v5009_v20 = vpop.f32.mrb[142].mxu0 }
 0x3df   : > { %v5841_v36 = vmax.f32 %v5809_v7, 0.0  ;;  %v5010_v46 = vadd.f32 %v5009_v20, %v14162_v12  ;;  %v5011_v54 = vpop.f32.mrb[143].mxu0 }
 0x3e0   : > { %v5656_v43 = vpop.f32.mrb[136].mxu1 }
 0x3e1   : > { %v5871_v22 = vpack.c.bf16 %v5841_v36, %v5840_v40  ;;  %v5771_v32 = vadd.f32 %v5656_v43, %v4999_v17  ;;  %v5658_v37 = vpop.f32.mrb[137].mxu1 }
 0x3e2   : > { %v5659_v58 = vpop.f32.mrb[138].mxu1  ;;  %v14296_v28 = vld [vmem:[#allocation2 + $0x50] sm:$0xff] }
 0x3e3   : > { %5887 = vst.msk [vmem:[#allocation2 + $0x68] sm:$0xff] %vm334_vm0, %v5871_v22  ;;  %v5810_v19 = vadd.f32 %v14264_v16, %v5771_v32  ;;  %v5772_v44 = vadd.f32 %v5659_v58, %v5002_v39  ;;  %v5661_v12 = vpop.f32.mrb[139].mxu1  ;;  %v6430_v63 = vshrl.u32 %v14296_v28, 16  ;;  %v6433_v4 = vshll.u32 %v14296_v28, 16  ;;  %6761 = vrot.lane.b32.xlu0 %v14296_v28, %s12293_s26 }
 0x3e4   : > { %v5014_v17 = vpop.f32.mrb[144].mxu0 }
 0x3e5   : > { %v5811_v23 = vadd.f32 %v14264_v16, %v5772_v44  ;;  %v6432_v45 = vrot.slane %v6430_v63, 7  ;;  %v6633_v50 = vrot.slane %v6433_v4, 1  ;;  %v5016_v57 = vpop.f32.mrb[145].mxu0  ;;  %v5842_v42 = vmax.f32 %v5810_v19, 0.0 }
 0x3e6   : > { %v5015_v39 = vadd.f32 %v5014_v17, %v14172_v1  ;;  %v5017_v61 = vpop.f32.mrb[146].mxu0 }
 0x3e7   : > { %v5843_v51 = vmax.f32 %v5811_v23, 0.0  ;;  %v5018_v34 = vadd.f32 %v5017_v61, %v14174_v49  ;;  %v5019_v41 = vpop.f32.mrb[147].mxu0  ;;  %v14308_v7 = vor.u32 %v6633_v50, %v6430_v63  ;;  %v14310_v10 = vor.u32 %v6433_v4, %v6432_v45 }
 0x3e8   : > { %v5664_v20 = vpop.f32.mrb[140].mxu1 }
 0x3e9   : > { %v5872_v40 = vpack.c.bf16 %v5843_v51, %v5842_v42  ;;  %v5773_v36 = vadd.f32 %v5664_v20, %v5007_v6  ;;  %v5666_v54 = vpop.f32.mrb[141].mxu1  ;;  %v6639_v1 = vsel %vm6144_vm5, %v14308_v7, %v6638_v5 }
 0x3ea   : > { %v5667_v43 = vpop.f32.mrb[142].mxu1  ;;  %11628 = vmatprep.mubr.msk.bf16.mxu0 %vm334_vm0, %v6639_v1  ;;  %v14318_v49 = vld [vmem:[#allocation2 + $0x68] sm:$0xff] }
 0x3eb   : > { %5888 = vst.msk [vmem:[#allocation2 + $0x80] sm:$0xff] %vm334_vm0, %v5872_v40  ;;  %v5812_v38 = vadd.f32 %v14264_v16, %v5773_v36  ;;  %v5774_v22 = vadd.f32 %v5667_v43, %v5010_v46  ;;  %6763 = vrot.lane.b32.xlu1 %v14318_v49, %s12293_s26  ;;  %v6442_v6 = vshrl.u32 %v14318_v49, 16  ;;  %v6445_v32 = vshll.u32 %v14318_v49, 16  ;;  %v5669_v37 = vpop.f32.mrb[143].mxu1 }
 0x3ec   : > { %v5022_v0 = vpop.f32.mrb[148].mxu0 }
 0x3ed   : > { %v5813_v58 = vadd.f32 %v14264_v16, %v5774_v22  ;;  %v6444_v19 = vrot.slane %v6442_v6, 7  ;;  %v6640_v44 = vrot.slane %v6445_v32, 1  ;;  %v5024_v12 = vpop.f32.mrb[149].mxu0  ;;  %v5023_v63 = vadd.f32 %v5022_v0, %v14181_v48 }
 0x3ee   : > { %v5025_v4 = vpop.f32.mrb[150].mxu0  ;;  %v5844_v46 = vmax.f32 %v5812_v38, 0.0 }
 0x3ef   : > { %v5845_v17 = vmax.f32 %v5813_v58, 0.0  ;;  %v5026_v23 = vadd.f32 %v5025_v4, %v14183_v47  ;;  %v5027_v45 = vpop.f32.mrb[151].mxu0  ;;  %v14330_v57 = vor.u32 %v6640_v44, %v6442_v6  ;;  %v14332_v5 = vor.u32 %v6445_v32, %v6444_v19 }
 0x3f0   : > { %v5672_v50 = vpop.f32.mrb[144].mxu1 }
 0x3f1   : > { %v5873_v42 = vpack.c.bf16 %v5845_v17, %v5844_v46  ;;  %v5775_v61 = vadd.f32 %v5672_v50, %v5015_v39  ;;  %v5674_v51 = vpop.f32.mrb[145].mxu1  ;;  %v11906_v39 = vld [vmem:[%s16454_s5 + $0x18] sm:$0xff]  }
 0x3f2   : > { %v5675_v41 = vpop.f32.mrb[146].mxu1  ;;  %v14334_v20 = vld [vmem:[#allocation2 + $0x80] sm:$0xff]  ;;  %7289 = vmatpush1.bf16.msra.mxu1 %v11906_v39 }
 0x3f3   : > { %5889 = vst.msk [vmem:[#allocation2 + $0x98] sm:$0xff] %vm334_vm0, %v5873_v42  ;;  %v5814_v48 = vadd.f32 %v14264_v16, %v5775_v61  ;;  %v5776_v59 = vadd.f32 %v5675_v41, %v5018_v34  ;;  %v5677_v40 = vpop.f32.mrb[147].mxu1  ;;  %v6454_v47 = vshrl.u32 %v14334_v20, 16  ;;  %v6457_v36 = vshll.u32 %v14334_v20, 16  ;;  %6765 = vrot.lane.b32.xlu0 %v14334_v20, %s12293_s26  ;;  %7290 = vmatprep.subr.bf16.mxu1 %v16467_v24 }
 0x3f4   : > { %v5030_v54 = vpop.f32.mrb[152].mxu0 }
 0x3f5   : > { %v5815_v1 = vadd.f32 %v14264_v16, %v5776_v59  ;;  %v6456_v43 = vrot.slane %v6454_v47, 7  ;;  %v6647_v38 = vrot.slane %v6457_v36, 1  ;;  %v5032_v22 = vpop.f32.mrb[153].mxu0  ;;  %v5031_v34 = vadd.f32 %v5030_v54, %v14189_v60 }
 0x3f6   : > { %v5033_v6 = vpop.f32.mrb[154].mxu0  ;;  %v5846_v32 = vmax.f32 %v5814_v48, 0.0 }
 0x3f7   : > { %v5847_v37 = vmax.f32 %v5815_v1, 0.0  ;;  %v5034_v0 = vadd.f32 %v5033_v6, %v14191_v55  ;;  %v5035_v58 = vpop.f32.mrb[155].mxu0  ;;  %v14349_v44 = vor.u32 %v6647_v38, %v6454_v47  ;;  %v14351_v12 = vor.u32 %v6457_v36, %v6456_v43  ;;  %v11908_v38 = vld [vmem:[%s16454_s5 + $0x20] sm:$0xff]  }
 0x3f8   : > { %v5680_v19 = vpop.f32.mrb[148].mxu1  ;;  %7291 = vmatpush1.bf16.msra.mxu1 %v11908_v38 }
 0x3f9   : > { %v5874_v4 = vpack.c.bf16 %v5847_v37, %v5846_v32  ;;  %v5777_v46 = vadd.f32 %v5680_v19, %v5023_v63  ;;  %v5682_v17 = vpop.f32.mrb[149].mxu1  ;;  %7292 = vmatprep.subr.bf16.mxu1 %v16467_v24 }
 0x3fa   : > { %v5683_v45 = vpop.f32.mrb[150].mxu1  ;;  %v14353_v50 = vld [vmem:[#allocation2 + $0x98] sm:$0xff] }
 0x3fb   : > { %5890 = vst.msk [vmem:[#allocation2 + $0xb0] sm:$0xff] %vm334_vm0, %v5874_v4  ;;  %v5816_v60 = vadd.f32 %v14264_v16, %v5777_v46  ;;  %v5778_v42 = vadd.f32 %v5683_v45, %v5026_v23  ;;  %v5685_v55 = vpop.f32.mrb[151].mxu1  ;;  %6767 = vrot.lane.b32.xlu1 %v14353_v50, %s12293_s26  ;;  %v6466_v61 = vshrl.u32 %v14353_v50, 16  ;;  %v6469_v51 = vshll.u32 %v14353_v50, 16 }
 0x3fc   : > { %v5038_v41 = vpop.f32.mrb[156].mxu0 }
 0x3fd   : > { %v5817_v63 = vadd.f32 %v14264_v16, %v5778_v42  ;;  %v6468_v48 = vrot.slane %v6466_v61, 7  ;;  %v6654_v59 = vrot.slane %v6469_v51, 1  ;;  %v5040_v40 = vpop.f32.mrb[157].mxu0  ;;  %v5039_v47 = vadd.f32 %v5038_v41, %v14193_v26 }
 0x3fe   : > { %v5041_v36 = vpop.f32.mrb[158].mxu0  ;;  %v5848_v54 = vmax.f32 %v5816_v60, 0.0 }
 0x3ff   : > { %v5849_v39 = vmax.f32 %v5817_v63, 0.0  ;;  %v5042_v23 = vadd.f32 %v5041_v36, %v14195_v2  ;;  %v5043_v1 = vpop.f32.mrb[159].mxu0  ;;  %v14367_v22 = vor.u32 %v6654_v59, %v6466_v61  ;;  %v14369_v6 = vor.u32 %v6469_v51, %v6468_v48  ;;  %v11910_v36 = vld [vmem:[%s16454_s5 + $0x28] sm:$0xff]  }
 0x400   : > { %v5688_v43 = vpop.f32.mrb[152].mxu1  ;;  %7293 = vmatpush1.bf16.msra.mxu1 %v11910_v36 }
 0x401   : > { %v5875_v32 = vpack.c.bf16 %v5849_v39, %v5848_v54  ;;  %v5779_v37 = vadd.f32 %v5688_v43, %v5031_v34  ;;  %v5690_v58 = vpop.f32.mrb[153].mxu1  ;;  %7294 = vmatprep.subr.bf16.mxu1 %v16467_v24 }
 0x402   : > { %v5691_v19 = vpop.f32.mrb[154].mxu1  ;;  %v14371_v26 = vld [vmem:[#allocation2 + $0xb0] sm:$0xff] }
 0x403   : > { %5891 = vst.msk [vmem:[#allocation2 + $0xc8] sm:$0xff] %vm334_vm0, %v5875_v32  ;;  %v5818_v2 = vadd.f32 %v14264_v16, %v5779_v37  ;;  %v5780_v4 = vadd.f32 %v5691_v19, %v5034_v0  ;;  %v5693_v46 = vpop.f32.mrb[155].mxu1  ;;  %v6478_v17 = vshrl.u32 %v14371_v26, 16  ;;  %v6481_v45 = vshll.u32 %v14371_v26, 16  ;;  %6769 = vrot.lane.b32.xlu0 %v14371_v26, %s12293_s26 }
 0x404   : > { %v5046_v34 = vpop.f32.mrb[160].mxu0 }
 0x405   : > { %v5819_v60 = vadd.f32 %v14264_v16, %v5780_v4  ;;  %v6480_v42 = vrot.slane %v6478_v17, 7  ;;  %v6661_v55 = vrot.slane %v6481_v45, 1  ;;  %v5048_v61 = vpop.f32.mrb[161].mxu0  ;;  %v5047_v51 = vadd.f32 %v5046_v34, %v14201_v21 }
 0x406   : > { %v5049_v41 = vpop.f32.mrb[162].mxu0  ;;  %v5850_v0 = vmax.f32 %v5818_v2, 0.0 }
 0x407   : > { %v5851_v63 = vmax.f32 %v5819_v60, 0.0  ;;  %v5050_v48 = vadd.f32 %v5049_v41, %v14203_v35  ;;  %v5051_v59 = vpop.f32.mrb[163].mxu0  ;;  %v14386_v54 = vor.u32 %v6661_v55, %v6478_v17  ;;  %v14388_v39 = vor.u32 %v6481_v45, %v6480_v42 }
 0x408   : > { %v5696_v40 = vpop.f32.mrb[156].mxu1 }
 0x409   : > { %v5876_v1 = vpack.c.bf16 %v5851_v63, %v5850_v0  ;;  %v5781_v43 = vadd.f32 %v5696_v40, %v5039_v47  ;;  %v5698_v38 = vpop.f32.mrb[157].mxu1 }
 0x40a   : > { %v5699_v32 = vpop.f32.mrb[158].mxu1  ;;  %v14390_v21 = vld [vmem:[#allocation2 + $0xc8] sm:$0xff] }
 0x40b   : > { %5892 = vst.msk [vmem:[#allocation2 + $0xe0] sm:$0xff] %vm334_vm0, %v5876_v1  ;;  %v5820_v35 = vadd.f32 %v14264_v16, %v5781_v43  ;;  %v5782_v37 = vadd.f32 %v5699_v32, %v5042_v23  ;;  %v5701_v58 = vpop.f32.mrb[159].mxu1  ;;  %6771 = vrot.lane.b32.xlu1 %v14390_v21, %s12293_s26  ;;  %v6490_v19 = vshrl.u32 %v14390_v21, 16  ;;  %v6493_v2 = vshll.u32 %v14390_v21, 16 }
 0x40c   : > { %v5054_v47 = vpop.f32.mrb[164].mxu0 }
 0x40d   : > { %v5821_v4 = vadd.f32 %v14264_v16, %v5782_v37  ;;  %v6492_v46 = vrot.slane %v6490_v19, 7  ;;  %v6668_v17 = vrot.slane %v6493_v2, 1  ;;  %v5056_v45 = vpop.f32.mrb[165].mxu0  ;;  %v5055_v34 = vadd.f32 %v5054_v47, %v14209_v13 }
 0x40e   : > { %v5057_v60 = vpop.f32.mrb[166].mxu0  ;;  %v5852_v23 = vmax.f32 %v5820_v35, 0.0 }
 0x40f   : > { %v5853_v42 = vmax.f32 %v5821_v4, 0.0  ;;  %v5058_v55 = vadd.f32 %v5057_v60, %v14211_v29  ;;  %v5059_v61 = vpop.f32.mrb[167].mxu0  ;;  %v14402_v0 = vor.u32 %v6668_v17, %v6490_v19  ;;  %v14404_v63 = vor.u32 %v6493_v2, %v6492_v46 }
 0x410   : > { %v5704_v41 = vpop.f32.mrb[160].mxu1 }
 0x411   : > { %v5877_v59 = vpack.c.bf16 %v5853_v42, %v5852_v23  ;;  %v5783_v40 = vadd.f32 %v5704_v41, %v5047_v51  ;;  %v5706_v36 = vpop.f32.mrb[161].mxu1  ;;  %v11912_v51 = vld [vmem:[%s16454_s5 + $0x30] sm:$0xff]  }
 0x412   : > { %v5707_v1 = vpop.f32.mrb[162].mxu1  ;;  %v14406_v43 = vld [vmem:[#allocation2 + $0xe0] sm:$0xff]  ;;  %7295 = vmatpush1.bf16.msra.mxu1 %v11912_v51 }
 0x413   : > { %5893 = vst.msk [vmem:[#allocation2 + $0xf8] sm:$0xff] %vm334_vm0, %v5877_v59  ;;  %v5822_v13 = vadd.f32 %v14264_v16, %v5783_v40  ;;  %v5784_v38 = vadd.f32 %v5707_v1, %v5050_v48  ;;  %v5709_v32 = vpop.f32.mrb[163].mxu1  ;;  %6773 = vrot.lane.b32.xlu0 %v14406_v43, %s12293_s26  ;;  %v6505_v29 = vshll.u32 %v14406_v43, 16  ;;  %v6502_v2 = vshrl.u32 %v14406_v43, 16  ;;  %7296 = vmatprep.subr.bf16.mxu1 %v16467_v24 }
 0x414   : > { %v5062_v35 = vpop.f32.mrb[168].mxu0 }
 0x415   : > { %v5823_v37 = vadd.f32 %v14264_v16, %v5784_v38  ;;  %v6675_v58 = vrot.slane %v6505_v29, 1  ;;  %v5064_v19 = vpop.f32.mrb[169].mxu0  ;;  %v5063_v48 = vadd.f32 %v5062_v35, %v14217_v56  ;;  %v5854_v4 = vmax.f32 %v5822_v13, 0.0 }
 0x416   : > { %v5065_v47 = vpop.f32.mrb[170].mxu0 }
 0x417   : > { %v5855_v46 = vmax.f32 %v5823_v37, 0.0  ;;  %v5066_v17 = vadd.f32 %v5065_v47, %v14219_v52  ;;  %v5067_v45 = vpop.f32.mrb[171].mxu0  ;;  %v14425_v23 = vor.u32 %v6675_v58, %v6502_v2 }
 0x418   : > { %v5712_v60 = vpop.f32.mrb[164].mxu1 }
 0x419   : > { %v5878_v42 = vpack.c.bf16 %v5855_v46, %v5854_v4  ;;  %v5785_v61 = vadd.f32 %v5712_v60, %v5055_v34  ;;  %v5714_v41 = vpop.f32.mrb[165].mxu1 }
 0x41a   : > { %v5715_v59 = vpop.f32.mrb[166].mxu1  ;;  %v14427_v40 = vld [vmem:[#allocation2 + $0xf8] sm:$0xff] }
 0x41b   : > { %5894 = vst.msk [vmem:[#allocation2 + $0x110] sm:$0xff] %vm334_vm0, %v5878_v42  ;;  %v5824_v56 = vadd.f32 %v14264_v16, %v5785_v61  ;;  %v5786_v36 = vadd.f32 %v5715_v59, %v5058_v55  ;;  %v5717_v52 = vpop.f32.mrb[167].mxu1  ;;  %6775 = vrot.lane.b32.xlu1 %v14427_v40, %s12293_s26  ;;  %v11914_v55 = vld [vmem:[%s16454_s5 + $0x38] sm:$0xff]  }
 0x41c   : > { %v5070_v1 = vpop.f32.mrb[172].mxu0  ;;  %7297 = vmatpush1.bf16.msra.mxu1 %v11914_v55 }
 0x41d   : > { %v5825_v13 = vadd.f32 %v14264_v16, %v5786_v36  ;;  %v5072_v38 = vpop.f32.mrb[173].mxu0  ;;  %v5071_v32 = vadd.f32 %v5070_v1, %v14221_v30  ;;  %v5856_v35 = vmax.f32 %v5824_v56, 0.0  ;;  %7298 = vmatprep.subr.bf16.mxu1 %v16467_v24 }
 0x41e   : > { %v5073_v34 = vpop.f32.mrb[174].mxu0 }
 0x41f   : > { %v5857_v51 = vmax.f32 %v5825_v13, 0.0  ;;  %v5074_v37 = vadd.f32 %v5073_v34, %v14223_v31  ;;  %v5075_v58 = vpop.f32.mrb[175].mxu0 }
 0x420   : > { %v5720_v19 = vpop.f32.mrb[168].mxu1 }
 0x421   : > { %v5879_v47 = vpack.c.bf16 %v5857_v51, %v5856_v35  ;;  %v5787_v4 = vadd.f32 %v5720_v19, %v5063_v48  ;;  %v5722_v46 = vpop.f32.mrb[169].mxu1 }
 0x422   : > { %v5723_v45 = vpop.f32.mrb[170].mxu1  ;;  %v14439_v60 = vld [vmem:[#allocation2 + $0x110] sm:$0xff] }
 0x423   : > { %5895 = vst.msk [vmem:[#allocation2 + $0x128] sm:$0xff] %vm334_vm0, %v5879_v47  ;;  %v5826_v30 = vadd.f32 %v14264_v16, %v5787_v4  ;;  %v5788_v42 = vadd.f32 %v5723_v45, %v5066_v17  ;;  %v5725_v61 = vpop.f32.mrb[171].mxu1  ;;  %6777 = vrot.lane.b32.xlu0 %v14439_v60, %s12293_s26  ;;  %v11916_v17 = vld [vmem:[%s16454_s5 + $0x40] sm:$0xff]  }
 0x424   : > { %v5078_v31 = vpop.f32.mrb[176].mxu0  ;;  %7299 = vmatpush1.bf16.msra.mxu1 %v11916_v17 }
 0x425   : > { %v5827_v41 = vadd.f32 %v14264_v16, %v5788_v42  ;;  %v5080_v48 = vpop.f32.mrb[177].mxu0  ;;  %v5079_v59 = vadd.f32 %v5078_v31, %v14229_v18  ;;  %v5858_v36 = vmax.f32 %v5826_v30, 0.0  ;;  %7300 = vmatprep.subr.bf16.mxu1 %v16467_v24 }
 0x426   : > { %v5081_v56 = vpop.f32.mrb[178].mxu0 }
 0x427   : > { %v5859_v52 = vmax.f32 %v5827_v41, 0.0  ;;  %v5082_v1 = vadd.f32 %v5081_v56, %v14231_v25  ;;  %v5083_v13 = vpop.f32.mrb[179].mxu0 }
 0x428   : > { %v5728_v38 = vpop.f32.mrb[172].mxu1 }
 0x429   : > { %v5880_v34 = vpack.c.bf16 %v5859_v52, %v5858_v36  ;;  %v5789_v35 = vadd.f32 %v5728_v38, %v5071_v32  ;;  %v5730_v51 = vpop.f32.mrb[173].mxu1 }
 0x42a   : > { %v5731_v58 = vpop.f32.mrb[174].mxu1  ;;  %v14452_v19 = vld [vmem:[#allocation2 + $0x128] sm:$0xff] }
 0x42b   : > { %5896 = vst.msk [vmem:[#allocation2 + $0x140] sm:$0xff] %vm334_vm0, %v5880_v34  ;;  %v5828_v18 = vadd.f32 %v14264_v16, %v5789_v35  ;;  %v5790_v55 = vadd.f32 %v5731_v58, %v5074_v37  ;;  %v5733_v47 = vpop.f32.mrb[175].mxu1  ;;  %6779 = vrot.lane.b32.xlu1 %v14452_v19, %s12293_s26  ;;  %v11918_v37 = vld [vmem:[%s16454_s5 + $0x48] sm:$0xff]  }
 0x42c   : > { %v5086_v25 = vpop.f32.mrb[180].mxu0  ;;  %7301 = vmatpush1.bf16.msra.mxu1 %v11918_v37 }
 0x42d   : > { %v5829_v4 = vadd.f32 %v14264_v16, %v5790_v55  ;;  %v5088_v32 = vpop.f32.mrb[181].mxu0  ;;  %v5087_v46 = vadd.f32 %v5086_v25, %v14237_v9  ;;  %v5860_v30 = vmax.f32 %v5828_v18, 0.0  ;;  %7302 = vmatprep.subr.bf16.mxu1 %v16467_v24 }
 0x42e   : > { %v5089_v45 = vpop.f32.mrb[182].mxu0 }
 0x42f   : > { %v5861_v42 = vmax.f32 %v5829_v4, 0.0  ;;  %v5090_v61 = vadd.f32 %v5089_v45, %v14239_v62  ;;  %v5091_v31 = vpop.f32.mrb[183].mxu0 }
 0x430   : > { %v5736_v41 = vpop.f32.mrb[176].mxu1 }
 0x431   : > { %v5881_v48 = vpack.c.bf16 %v5861_v42, %v5860_v30  ;;  %v5791_v56 = vadd.f32 %v5736_v41, %v5079_v59  ;;  %v5738_v36 = vpop.f32.mrb[177].mxu1 }
 0x432   : > { %v5739_v52 = vpop.f32.mrb[178].mxu1  ;;  %v14465_v13 = vld [vmem:[#allocation2 + $0x140] sm:$0xff] }
 0x433   : > { %5897 = vst.msk [vmem:[#allocation2 + $0x158] sm:$0xff] %vm334_vm0, %v5881_v48  ;;  %v5830_v9 = vadd.f32 %v14264_v16, %v5791_v56  ;;  %v5792_v38 = vadd.f32 %v5739_v52, %v5082_v1  ;;  %v5741_v17 = vpop.f32.mrb[179].mxu1  ;;  %6781 = vrot.lane.b32.xlu0 %v14465_v13, %s12293_s26 }
 0x434   : > { %v5094_v62 = vpop.f32.mrb[184].mxu0 }
 0x435   : > { %v5831_v34 = vadd.f32 %v14264_v16, %v5792_v38  ;;  %v5096_v59 = vpop.f32.mrb[185].mxu0  ;;  %v5095_v35 = vadd.f32 %v5094_v62, %v14245_v11  ;;  %v5862_v58 = vmax.f32 %v5830_v9, 0.0 }
 0x436   : > { %v5097_v51 = vpop.f32.mrb[186].mxu0 }
 0x437   : > { %v5863_v18 = vmax.f32 %v5831_v34, 0.0  ;;  %v5098_v55 = vadd.f32 %v5097_v51, %v14247_v8  ;;  %v5099_v47 = vpop.f32.mrb[187].mxu0 }
 0x438   : > { %v5744_v25 = vpop.f32.mrb[180].mxu1 }
 0x439   : > { %v5882_v1 = vpack.c.bf16 %v5863_v18, %v5862_v58  ;;  %v5793_v4 = vadd.f32 %v5744_v25, %v5087_v46  ;;  %v5746_v32 = vpop.f32.mrb[181].mxu1 }
 0x43a   : > { %v5747_v45 = vpop.f32.mrb[182].mxu1  ;;  %v14475_v30 = vld [vmem:[#allocation2 + $0x158] sm:$0xff]  ;;  %v6128_v32 = vld [vmem:[#allocation2 + $0x40] sm:$0x1] }
 0x43b   : > { %5898 = vst.msk [vmem:[#allocation2 + $0x170] sm:$0xff] %vm334_vm0, %v5882_v1  ;;  %v5832_v42 = vadd.f32 %v14264_v16, %v5793_v4  ;;  %v5794_v31 = vadd.f32 %v5747_v45, %v5090_v61  ;;  %v5749_v41 = vpop.f32.mrb[183].mxu1  ;;  %6783 = vrot.lane.b32.xlu1 %v14475_v30, %s12293_s26  ;;  %v11920_v61 = vld [vmem:[%s16454_s5 + $0x50] sm:$0xff]   ;;  %v11922_v4 = vld [vmem:[%s16454_s5 + $0x58] sm:$0xff]  }
 0x43c   : > { %v5102_v11 = vpop.f32.mrb[188].mxu0  ;;  %7303 = vmatpush1.bf16.msra.mxu1 %v11920_v61 }
 0x43d   : > { %v5833_v8 = vadd.f32 %v14264_v16, %v5794_v31  ;;  %v5104_v37 = vpop.f32.mrb[189].mxu0  ;;  %v5103_v48 = vadd.f32 %v5102_v11, %v14251_v14  ;;  %v5864_v56 = vmax.f32 %v5832_v42, 0.0  ;;  %7304 = vmatprep.subr.bf16.mxu1 %v16467_v24  ;;  %v6393_v11 = vld [vmem:[#allocation2 + $0x48] sm:$0x80] }
 0x43e   : > { %v5105_v46 = vpop.f32.mrb[190].mxu0 }
 0x43f   : > { %v5865_v36 = vmax.f32 %v5833_v8, 0.0  ;;  %v5106_v52 = vadd.f32 %v5105_v46, %v14253_v3  ;;  %v5107_v9 = vpop.f32.mrb[191].mxu0 }
 0x440   : > { %v5752_v38 = vpop.f32.mrb[184].mxu1  ;;  %7305 = vmatpush1.bf16.msra.mxu1 %v11922_v4 }
 0x441   : > { %v5883_v17 = vpack.c.bf16 %v5865_v36, %v5864_v56  ;;  %v5795_v62 = vadd.f32 %v5752_v38, %v5095_v35  ;;  %v5754_v34 = vpop.f32.mrb[185].mxu1  ;;  %v6145_v35 = vrot.slane %v5944_v27, 1  ;;  %v6148_v27 = vshll.u32 %v6128_v32, 16  ;;  %9764 = vmatprep.subr.bf16.mxu1 %v16467_v24  ;;  %v11903_v32 = vld [vmem:[%s16454_s5 + $0xc8] sm:$0xff]  }
 0x442   : > { %v5755_v59 = vpop.f32.mrb[186].mxu1  ;;  %v14487_v51 = vld [vmem:[#allocation2 + $0x170] sm:$0xff]  ;;  %v6426_v38 = vshrl.u32 %v6393_v11, 16 }
 0x443   : > { %5899 = vst.msk [vmem:[#allocation2 + $0x188] sm:$0xff] %vm334_vm0, %v5883_v17  ;;  %v5834_v14 = vadd.f32 %v14264_v16, %v5795_v62  ;;  %v5796_v58 = vadd.f32 %v5755_v59, %v5098_v55  ;;  %v5757_v18 = vpop.f32.mrb[187].mxu1  ;;  %6785 = vrot.lane.b32.xlu0 %v14487_v51, %s12293_s26  ;;  %v6146_v8 = vor.u32 %v6145_v35, %v5941_v15  ;;  %v6150_v36 = vrot.slane %v6148_v27, 1 }
 0x444   : > { %v6619_v18 = vld [vmem:[#allocation2 + $0x88] sm:$0x1] }
 0x445   : > { %v5835_v3 = vadd.f32 %v14264_v16, %v5796_v58  ;;  %v5866_v47 = vmax.f32 %v5834_v14, 0.0  ;;  %v6151_v15 = vsel %vm6144_vm5, %v6146_v8, %v6150_v36  ;;  %v6395_v14 = vld [vmem:[#allocation2 + $0x60] sm:$0x80]  ;;  %v6650_v4 = vshll.u32 %v6619_v18, 16  ;;  %v11907_v36 = vld [vmem:[%s16454_s5 + $0xd8] sm:$0xff]  }
 0x446   : > { %11656 = vmatprep.mubr.msk.bf16.mxu1 %vm334_vm0, %v6151_v15  ;;  %v11901_v58 = vld [vmem:[%s16454_s5 + $0xc0] sm:$0xff]   ;;  %v6621_v15 = vld [vmem:[#allocation2 + $0xb8] sm:$0x1] }
 0x447   : > { %v5867_v25 = vmax.f32 %v5835_v3, 0.0 }
 0x448   : > { %v5760_v1 = vpop.f32.mrb[188].mxu1 }
 0x449   : > { %v5884_v55 = vpack.c.bf16 %v5867_v25, %v5866_v47  ;;  %v5797_v45 = vadd.f32 %v5760_v1, %v5103_v48  ;;  %v5762_v42 = vpop.f32.mrb[189].mxu1  ;;  %v6618_v48 = vld [vmem:[#allocation2 + $0x70] sm:$0x1]  ;;  %v6438_v47 = vshrl.u32 %v6395_v14, 16 }
 0x44a   : > { %v5763_v31 = vpop.f32.mrb[190].mxu1  ;;  %v14500_v41 = vld [vmem:[#allocation2 + $0x188] sm:$0xff]  ;;  %v6643_v62 = vshll.u32 %v6618_v48, 16  ;;  %v6397_v42 = vld [vmem:[#allocation2 + $0x78] sm:$0x80] }
 0x44b   : > { %5900 = vst.msk [vmem:[#allocation2 + $0x1a0] sm:$0xff] %vm334_vm0, %v5884_v55  ;;  %v5836_v37 = vadd.f32 %v14264_v16, %v5797_v45  ;;  %v5798_v46 = vadd.f32 %v5763_v31, %v5106_v52  ;;  %v5765_v56 = vpop.f32.mrb[191].mxu1  ;;  %6787 = vrot.lane.b32.xlu1 %v14500_v41, %s12293_s26  ;;  %v6428_v52 = vrot.slane %v6426_v38, 7  ;;  %v6440_v55 = vrot.slane %v6438_v47, 7  ;;  %v6620_v31 = vld [vmem:[#allocation2 + $0xa0] sm:$0x1] }
 0x44c   : > { %v6450_v27 = vshrl.u32 %v6397_v42, 16  ;;  %v6657_v56 = vshll.u32 %v6620_v31, 16  ;;  %v6403_v42 = vld [vmem:[#allocation2 + $0xc0] sm:$0x80]  ;;  %v6623_v31 = vld [vmem:[#allocation2 + $0xe8] sm:$0x1] }
 0x44d   : > { %v5837_v9 = vadd.f32 %v14264_v16, %v5798_v46  ;;  %v5868_v61 = vmax.f32 %v5836_v37, 0.0  ;;  %v6645_v16 = vrot.slane %v6643_v62, 1  ;;  %v6436_v3 = vsel %vm5935_vm6, %v6428_v52, %v14310_v10  ;;  %v11905_v37 = vld [vmem:[%s16454_s5 + $0xd0] sm:$0xff]   ;;  %v11909_v62 = vld [vmem:[%s16454_s5 + $0xe0] sm:$0xff]  }
 0x44e   : > { %v6448_v8 = vsel %vm5935_vm6, %v6440_v55, %v14332_v5  ;;  %v6452_v48 = vrot.slane %v6450_v27, 7  ;;  %v6659_v38 = vrot.slane %v6657_v56, 1  ;;  %v6664_v52 = vshll.u32 %v6621_v15, 16  ;;  %v11915_v55 = vld [vmem:[%s16454_s5 + $0xf8] sm:$0xff]   ;;  %v11917_v27 = vld [vmem:[%s16454_s5 + $0x100] sm:$0xff]  }
 0x44f   : > { %v5869_v17 = vmax.f32 %v5837_v9, 0.0  ;;  %v6646_v1 = vsel %vm6144_vm5, %v14330_v57, %v6645_v16  ;;  %v6399_v9 = vld [vmem:[#allocation2 + $0x90] sm:$0x80]  ;;  %v11911_v16 = vld [vmem:[%s16454_s5 + $0xe8] sm:$0xff]   ;;  %v6624_v15 = vld [vmem:[#allocation2 + $0x100] sm:$0x1] }
 0x450   : > { %v6666_v18 = vrot.slane %v6664_v52, 1 }
 0x451   : > { %v5885_v34 = vpack.c.bf16 %v5869_v17, %v5868_v61  ;;  %v6460_v61 = vsel %vm5935_vm6, %v6452_v48, %v14351_v12  ;;  %v6462_v17 = vshrl.u32 %v6399_v9, 16  ;;  %v11919_v48 = vld [vmem:[%s16454_s5 + $0x108] sm:$0xff]   ;;  %v6517_v9 = vshll.u32 %v14427_v40, 16 }
 0x452   : > { %v14512_v59 = vld [vmem:[#allocation2 + $0x1a0] sm:$0xff] }
 0x453   : > { %5901 = vst.msk [vmem:[#allocation2 + $0x1b8] sm:$0xff] %vm334_vm0, %v5885_v34  ;;  %6789 = vrot.lane.b32.xlu0 %v14512_v59, %s12293_s26  ;;  %v6464_v14 = vrot.slane %v6462_v17, 7  ;;  %v6682_v52 = vrot.slane %v6517_v9, 1 }
 0x455   : > { %v6762_v35 = vpop.permute.xlu0 %6761 }
 0x456   : > { %v6795_v25 = vsel %vm334_vm0, %v6436_v3, %v6762_v35  ;;  %v6622_v3 = vld [vmem:[#allocation2 + $0xd0] sm:$0x1]  ;;  %v6472_v35 = vsel %vm5935_vm6, %v6464_v14, %v14369_v6  ;;  %v6685_v14 = vshll.u32 %v6624_v15, 16 }
 0x457   : > { %7034 = vmatmul.mubr.bf16.vlgmr.msra.gmra.mrb[192].mxu0 %v6795_v25  ;;  %6273 = vrot.lane.b32.xlu0 %v14277_v33, %s12293_s26  ;;  %v6652_v33 = vrot.slane %v6650_v4, 1  ;;  %v11913_v25 = vld [vmem:[%s16454_s5 + $0xf0] sm:$0xff]   ;;  %v6671_v4 = vshll.u32 %v6622_v3, 16  ;;  %v11923_v3 = vld [vmem:[%s16454_s5 + $0x118] sm:$0xff]  }
 0x458   : > { %8053 = vmatpush1.bf16.msra.mxu0 %v11901_v58  ;;  %11629 = vmatprep.mubr.msk.bf16.mxu0 %vm334_vm0, %v6646_v1  ;;  %v6401_v58 = vld [vmem:[#allocation2 + $0xa8] sm:$0x80] }
 0x459   : > { %8054 = vmatprep.subr.bf16.mxu0 %v16467_v24  ;;  %v6474_v47 = vshrl.u32 %v6401_v58, 16 }
 0x45a   : > { %v14532_v45 = vld [vmem:[#allocation2 + $0x1b8] sm:$0xff] }
 0x45b   : > { %6275 = vrot.lane.b32.xlu0 %v14296_v28, %s12293_s26  ;;  %6791 = vrot.lane.b32.xlu1 %v14532_v45, %s12293_s26  ;;  %v6653_v28 = vsel %vm6144_vm5, %v14349_v44, %v6652_v33  ;;  %v6673_v33 = vrot.slane %v6671_v4, 1 }
 0x45c   : > { %8055 = vmatpush1.bf16.msra.mxu0 %v11903_v32  ;;  %v6476_v32 = vrot.slane %v6474_v47, 7 }
 0x45d   : > { %v6764_v11 = vpop.permute.xlu1 %6763  ;;  %8056 = vmatprep.subr.bf16.mxu0 %v16467_v24 }
 0x45e   : > { %v6799_v46 = vsel %vm334_vm0, %v6448_v8, %v6764_v11  ;;  %v6484_v11 = vsel %vm5935_vm6, %v6476_v32, %v14388_v39  ;;  %v6486_v8 = vshrl.u32 %v6403_v42, 16 }
 0x45f   : > { %7042 = vmatmul.mubr.bf16.gmra.mrb[196].mxu0 %v6799_v46  ;;  %6277 = vrot.lane.b32.xlu0 %v14318_v49, %s12293_s26  ;;  %v6674_v46 = vsel %vm6144_vm5, %v14402_v0, %v6673_v33  ;;  %v6526_v33 = vshrl.u32 %v14439_v60, 16 }
 0x460   : > { %7812 = vrot.lane.b32.xlu1 %v14318_v49, %s12293_s26  ;;  %11630 = vmatprep.mubr.msk.bf16.mxu0 %vm334_vm0, %v6653_v28  ;;  %v6678_v28 = vshll.u32 %v6623_v31, 16  ;;  %v6488_v56 = vrot.slane %v6486_v8, 7  ;;  %v6541_v8 = vshll.u32 %v14452_v19, 16 }
 0x461   : > { %8057 = vmatpush1.bf16.msra.mxu0 %v11905_v37 }
 0x462   : > { %8058 = vmatprep.subr.bf16.mxu0 %v16467_v24  ;;  %v6496_v17 = vsel %vm5935_vm6, %v6488_v56, %v14404_v63 }
 0x463   : > { %6279 = vrot.lane.b32.xlu0 %v14334_v20, %s12293_s26 }
 0x464   : > { %7814 = vrot.lane.b32.xlu1 %v14334_v20, %s12293_s26  ;;  %v6660_v20 = vsel %vm6144_vm5, %v14367_v22, %v6659_v38  ;;  %v6680_v38 = vrot.slane %v6678_v28, 1  ;;  %v6528_v28 = vrot.slane %v6526_v33, 7 }
 0x465   : > { %v6766_v49 = vpop.permute.xlu0 %6765  ;;  %8059 = vmatpush1.bf16.msra.mxu0 %v11907_v36  ;;  %v6405_v36 = vld [vmem:[#allocation2 + $0xd8] sm:$0x80] }
 0x466   : > { %v6803_v34 = vsel %vm334_vm0, %v6460_v61, %v6766_v49  ;;  %8060 = vmatprep.subr.bf16.mxu0 %v16467_v24  ;;  %v6504_v49 = vrot.slane %v6502_v2, 7  ;;  %v6681_v2 = vsel %vm6144_vm5, %v14425_v23, %v6680_v38 }
 0x467   : > { %7050 = vmatmul.mubr.bf16.gmra.mrb[200].mxu0 %v6803_v34  ;;  %6281 = vrot.lane.b32.xlu0 %v14353_v50, %s12293_s26  ;;  %v11921_v34 = vld [vmem:[%s16454_s5 + $0x110] sm:$0xff]  }
 0x468   : > { %7816 = vrot.lane.b32.xlu1 %v14353_v50, %s12293_s26  ;;  %11631 = vmatprep.mubr.msk.bf16.mxu0 %vm334_vm0, %v6660_v20 }
 0x469   : > { %8061 = vmatpush1.bf16.msra.mxu0 %v11909_v62  ;;  %v6498_v62 = vshrl.u32 %v6405_v36, 16 }
 0x46a   : > { %8062 = vmatprep.subr.bf16.mxu0 %v16467_v24 }
 0x46b   : > { %6283 = vrot.lane.b32.xlu0 %v14371_v26, %s12293_s26  ;;  %v6500_v58 = vrot.slane %v6498_v62, 7  ;;  %v6411_v62 = vld [vmem:[#allocation2 + $0x120] sm:$0x80] }
 0x46c   : > { %7818 = vrot.lane.b32.xlu1 %v14371_v26, %s12293_s26  ;;  %v6667_v26 = vsel %vm6144_vm5, %v14386_v54, %v6666_v18  ;;  %v14646_v18 = vor.u32 %v6505_v29, %v6504_v49  ;;  %v6538_v49 = vshrl.u32 %v14452_v19, 16 }
 0x46d   : > { %v6768_v50 = vpop.permute.xlu1 %6767  ;;  %8063 = vmatpush1.bf16.msra.mxu0 %v11911_v16  ;;  %v6514_v16 = vshrl.u32 %v14427_v40, 16 }
 0x46e   : > { %v6807_v1 = vsel %vm334_vm0, %v6472_v35, %v6768_v50  ;;  %8064 = vmatprep.subr.bf16.mxu0 %v16467_v24  ;;  %v6407_v50 = vld [vmem:[#allocation2 + $0xf0] sm:$0x80]  ;;  %v6529_v35 = vshll.u32 %v14439_v60, 16 }
 0x46f   : > { %7058 = vmatmul.mubr.bf16.gmra.mrb[204].mxu0 %v6807_v1  ;;  %6285 = vrot.lane.b32.xlu0 %v14390_v21, %s12293_s26  ;;  %v14655_v47 = vor.u32 %v6682_v52, %v6514_v16  ;;  %v6516_v29 = vrot.slane %v6514_v16, 7  ;;  %v6508_v1 = vsel %vm5935_vm6, %v6500_v58, %v14646_v18  ;;  %v6534_v58 = vshrl.u32 %v6411_v62, 16 }
 0x470   : > { %7820 = vrot.lane.b32.xlu1 %v14390_v21, %s12293_s26  ;;  %11632 = vmatprep.mubr.msk.bf16.mxu0 %vm334_vm0, %v6667_v26  ;;  %v6510_v26 = vshrl.u32 %v6407_v50, 16  ;;  %v6689_v32 = vrot.slane %v6529_v35, 1 }
 0x471   : > { %8065 = vmatpush1.bf16.msra.mxu0 %v11913_v25 }
 0x472   : > { %8066 = vmatprep.subr.bf16.mxu0 %v16467_v24  ;;  %v6512_v31 = vrot.slane %v6510_v26, 7  ;;  %v6413_v26 = vld [vmem:[#allocation2 + $0x138] sm:$0x80] }
 0x473   : > { %6287 = vrot.lane.b32.xlu0 %v14406_v43, %s12293_s26 }
 0x474   : > { %7822 = vrot.lane.b32.xlu1 %v14406_v43, %s12293_s26  ;;  %v6625_v43 = vld [vmem:[#allocation2 + $0x118] sm:$0x1] }
 0x475   : > { %v6770_v21 = vpop.permute.xlu0 %6769  ;;  %8067 = vmatpush1.bf16.msra.mxu0 %v11915_v55  ;;  %v6692_v42 = vshll.u32 %v6625_v43, 16  ;;  %v6550_v43 = vshrl.u32 %v14465_v13, 16 }
 0x476   : > { %v6811_v37 = vsel %vm334_vm0, %v6484_v11, %v6770_v21  ;;  %8068 = vmatprep.subr.bf16.mxu0 %v16467_v24  ;;  %v14671_v21 = vor.u32 %v6517_v9, %v6516_v29  ;;  %v6409_v11 = vld [vmem:[#allocation2 + $0x108] sm:$0x80]  ;;  %v6696_v9 = vrot.slane %v6541_v8, 1  ;;  %v6536_v29 = vrot.slane %v6534_v58, 7 }
 0x477   : > { %7066 = vmatmul.mubr.bf16.gmra.mrb[208].mxu0 %v6811_v37  ;;  %6289 = vrot.lane.b32.xlu0 %v14427_v40, %s12293_s26  ;;  %v6694_v37 = vrot.slane %v6692_v42, 1  ;;  %v6628_v42 = vld [vmem:[#allocation2 + $0x160] sm:$0x1] }
 0x478   : > { %7824 = vrot.lane.b32.xlu1 %v14427_v40, %s12293_s26  ;;  %11633 = vmatprep.mubr.msk.bf16.mxu0 %vm334_vm0, %v6674_v46  ;;  %v6687_v40 = vrot.slane %v6685_v14, 1  ;;  %v6626_v46 = vld [vmem:[#allocation2 + $0x130] sm:$0x1]  ;;  %v6540_v14 = vrot.slane %v6538_v49, 7 }
 0x479   : > { %8069 = vmatpush1.bf16.msra.mxu0 %v11917_v27  ;;  %v14676_v27 = vor.u32 %v6689_v32, %v6526_v33  ;;  %v6699_v15 = vshll.u32 %v6626_v46, 16  ;;  %v6552_v33 = vrot.slane %v6550_v43, 7 }
 0x47a   : > { %8070 = vmatprep.subr.bf16.mxu0 %v16467_v24  ;;  %v6688_v55 = vsel %vm6144_vm5, %v14655_v47, %v6687_v40 }
 0x47b   : > { %6291 = vrot.lane.b32.xlu0 %v14439_v60, %s12293_s26  ;;  %v6695_v38 = vsel %vm6144_vm5, %v14676_v27, %v6694_v37  ;;  %v6701_v52 = vrot.slane %v6699_v15, 1 }
 0x47c   : > { %7826 = vrot.lane.b32.xlu1 %v14439_v60, %s12293_s26  ;;  %v6520_v60 = vsel %vm5935_vm6, %v6512_v31, %v14671_v21 }
 0x47d   : > { %v6772_v61 = vpop.permute.xlu1 %6771  ;;  %8071 = vmatpush1.bf16.msra.mxu0 %v11919_v48  ;;  %v6522_v48 = vshrl.u32 %v6409_v11, 16  ;;  %v6546_v11 = vshrl.u32 %v6413_v26, 16 }
 0x47e   : > { %v6815_v20 = vsel %vm334_vm0, %v6496_v17, %v6772_v61  ;;  %8072 = vmatprep.subr.bf16.mxu0 %v16467_v24  ;;  %v14691_v17 = vor.u32 %v6529_v35, %v6528_v28  ;;  %v6713_v28 = vshll.u32 %v6628_v42, 16 }
 0x47f   : > { %7074 = vmatmul.mubr.bf16.gmra.mrb[212].mxu0 %v6815_v20  ;;  %6293 = vrot.lane.b32.xlu0 %v14452_v19, %s12293_s26  ;;  %v6524_v61 = vrot.slane %v6522_v48, 7  ;;  %v14696_v20 = vor.u32 %v6696_v9, %v6538_v49  ;;  %v6577_v9 = vshll.u32 %v14487_v51, 16  ;;  %v6629_v49 = vld [vmem:[#allocation2 + $0x178] sm:$0x1] }
 0x480   : > { %7828 = vrot.lane.b32.xlu1 %v14452_v19, %s12293_s26  ;;  %11634 = vmatprep.mubr.msk.bf16.mxu0 %vm334_vm0, %v6681_v2  ;;  %v6627_v2 = vld [vmem:[#allocation2 + $0x148] sm:$0x1]  ;;  %v6715_v15 = vrot.slane %v6713_v28, 1  ;;  %v6601_v28 = vshll.u32 %v14512_v59, 16 }
 0x481   : > { %8073 = vmatpush1.bf16.msra.mxu0 %v11921_v34  ;;  %v6553_v34 = vshll.u32 %v14465_v13, 16  ;;  %v6532_v19 = vsel %vm5935_vm6, %v6524_v61, %v14691_v17  ;;  %v6702_v35 = vsel %vm6144_vm5, %v14696_v20, %v6701_v52  ;;  %v6706_v40 = vshll.u32 %v6627_v2, 16 }
 0x482   : > { %8074 = vmatprep.subr.bf16.mxu0 %v16467_v24 }
 0x483   : > { %6295 = vrot.lane.b32.xlu0 %v14465_v13, %s12293_s26  ;;  %v6703_v50 = vrot.slane %v6553_v34, 1  ;;  %v14725_v48 = vor.u32 %v6553_v34, %v6552_v33  ;;  %v6720_v34 = vshll.u32 %v6629_v49, 16 }
 0x484   : > { %7830 = vrot.lane.b32.xlu1 %v14465_v13, %s12293_s26 }
 0x485   : > { %v6774_v25 = vpop.permute.xlu0 %6773  ;;  %8075 = vmatpush1.bf16.msra.mxu0 %v11923_v3  ;;  %v14714_v32 = vor.u32 %v6703_v50, %v6550_v43  ;;  %v6417_v50 = vld [vmem:[#allocation2 + $0x168] sm:$0x80]  ;;  %v6722_v43 = vrot.slane %v6720_v34, 1  ;;  %v6421_v34 = vld [vmem:[#allocation2 + $0x198] sm:$0x80] }
 0x486   : > { %v6819_v4 = vsel %vm334_vm0, %v6508_v1, %v6774_v25  ;;  %10045 = vmatprep.subr.bf16.mxu0 %v16467_v24  ;;  %v14709_v25 = vor.u32 %v6541_v8, %v6540_v14  ;;  %v14711_v1 = vld [vmem:[#allocation2 + $0x1d0] sm:$0xff]  ;;  %v6570_v33 = vshrl.u32 %v6417_v50, 16 }
 0x487   : > { %7082 = vmatmul.mubr.bf16.gmra.mrb[216].mxu0 %v6819_v4  ;;  %6297 = vrot.lane.b32.xlu0 %v14475_v30, %s12293_s26  ;;  %v6565_v4 = vshll.u32 %v14475_v30, 16 }
 0x488   : > { %7832 = vrot.lane.b32.xlu1 %v14475_v30, %s12293_s26  ;;  %11635 = vmatprep.mubr.msk.bf16.mxu0 %vm334_vm0, %v6688_v55  ;;  %v6708_v55 = vrot.slane %v6706_v40, 1  ;;  %v6544_v13 = vsel %vm5935_vm6, %v6536_v29, %v14709_v25  ;;  %v6630_v29 = vld [vmem:[#allocation2 + $0x190] sm:$0x1] }
 0x489   : > { %v6710_v37 = vrot.slane %v6565_v4, 1 }
 0x48a   : > { %v6709_v46 = vsel %vm6144_vm5, %v14714_v32, %v6708_v55 }
 0x48b   : > { %6299 = vrot.lane.b32.xlu0 %v14487_v51, %s12293_s26 }
 0x48c   : > { %7834 = vrot.lane.b32.xlu1 %v14487_v51, %s12293_s26 }
 0x48d   : > { %v6776_v56 = vpop.permute.xlu1 %6775 }
 0x48e   : > { %v6823_v36 = vsel %vm334_vm0, %v6520_v60, %v6776_v56  ;;  %v6562_v56 = vshrl.u32 %v14475_v30, 16  ;;  %v6548_v60 = vrot.slane %v6546_v11, 7  ;;  %v6586_v11 = vshrl.u32 %v14500_v41, 16 }
 0x48f   : > { %7090 = vmatmul.mubr.bf16.gmra.mrb[220].mxu0 %v6823_v36  ;;  %6301 = vrot.lane.b32.xlu0 %v14500_v41, %s12293_s26  ;;  %v6415_v36 = vld [vmem:[#allocation2 + $0x150] sm:$0x80] }
 0x490   : > { %7836 = vrot.lane.b32.xlu1 %v14500_v41, %s12293_s26  ;;  %11636 = vmatprep.mubr.msk.bf16.mxu0 %vm334_vm0, %v6695_v38  ;;  %v14728_v38 = vor.u32 %v6710_v37, %v6562_v56  ;;  %v6564_v61 = vrot.slane %v6562_v56, 7  ;;  %v6556_v52 = vsel %vm5935_vm6, %v6548_v60, %v14725_v48  ;;  %v6558_v2 = vshrl.u32 %v6415_v36, 16  ;;  %v6631_v36 = vld [vmem:[#allocation2 + $0x1a8] sm:$0x1] }
 0x492   : > { %v6716_v30 = vsel %vm6144_vm5, %v14728_v38, %v6715_v15  ;;  %v6560_v58 = vrot.slane %v6558_v2, 7  ;;  %v6588_v15 = vrot.slane %v6586_v11, 7  ;;  %v6731_v2 = vrot.slane %v6601_v28, 1 }
 0x493   : > { %6303 = vrot.lane.b32.xlu0 %v14512_v59, %s12293_s26 }
 0x494   : > { %7838 = vrot.lane.b32.xlu1 %v14512_v59, %s12293_s26 }
 0x495   : > { %v6778_v16 = vpop.permute.xlu0 %6777 }
 0x496   : > { %v6827_v3 = vsel %vm334_vm0, %v6532_v19, %v6778_v16  ;;  %v6717_v16 = vrot.slane %v6577_v9, 1  ;;  %v6574_v19 = vshrl.u32 %v14487_v51, 16 }
 0x497   : > { %7098 = vmatmul.mubr.bf16.gmra.mrb[224].mxu0 %v6827_v3  ;;  %v14737_v3 = vor.u32 %v6565_v4, %v6564_v61  ;;  %v6727_v4 = vshll.u32 %v6630_v29, 16  ;;  %v5903_v29 = vld [vmem:[#allocation2 + $0x30] sm:$0x80] }
 0x498   : > { %7840 = vrot.lane.b32.xlu1 %v14532_v45, %s12293_s26  ;;  %11637 = vmatprep.mubr.msk.bf16.mxu0 %vm334_vm0, %v6702_v35  ;;  %v6589_v35 = vshll.u32 %v14500_v41, 16  ;;  %v14740_v40 = vor.u32 %v6717_v16, %v6574_v19  ;;  %v6576_v26 = vrot.slane %v6574_v19, 7  ;;  %v6613_v19 = vshll.u32 %v14532_v45, 16 }
 0x499   : > { %v6568_v42 = vsel %vm5935_vm6, %v6560_v58, %v14737_v3  ;;  %v6729_v60 = vrot.slane %v6727_v4, 1  ;;  %v6129_v4 = vld [vmem:[#allocation2 + $0x58] sm:$0x1] }
 0x49a   : > { %v6723_v51 = vsel %vm6144_vm5, %v14740_v40, %v6722_v43  ;;  %v14749_v37 = vor.u32 %v6577_v9, %v6576_v26  ;;  %v6734_v9 = vshll.u32 %v6631_v36, 16  ;;  %v6632_v43 = vld [vmem:[#allocation2 + $0x1c0] sm:$0x1] }
 0x49c   : > { %7842 = vrot.lane.b32.xlu1 %v14711_v1, %s12293_s26  ;;  %v6736_v50 = vrot.slane %v6734_v9, 1 }
 0x49d   : > { %v6780_v31 = vpop.permute.xlu1 %6779 }
 0x49e   : > { %v6831_v8 = vsel %vm334_vm0, %v6544_v13, %v6780_v31  ;;  %v6724_v13 = vrot.slane %v6589_v35, 1 }
 0x49f   : > { %7106 = vmatmul.mubr.bf16.gmra.mrb[228].mxu0 %v6831_v8  ;;  %v6572_v8 = vrot.slane %v6570_v33, 7  ;;  %v6594_v33 = vshrl.u32 %v6421_v34, 16 }
 0x4a0   : > { %11638 = vmatprep.mubr.msk.bf16.mxu0 %vm334_vm0, %v6709_v46  ;;  %v6419_v46 = vld [vmem:[#allocation2 + $0x180] sm:$0x80]  ;;  %v14752_v56 = vor.u32 %v6724_v13, %v6586_v11  ;;  %v6741_v13 = vshll.u32 %v6632_v43, 16  ;;  %v6610_v11 = vshrl.u32 %v14532_v45, 16  ;;  %v6130_v43 = vld [vmem:[#allocation2 + $0x70] sm:$0x1] }
 0x4a1   : > { %v6580_v61 = vsel %vm5935_vm6, %v6572_v8, %v14749_v37  ;;  %v6596_v8 = vrot.slane %v6594_v33, 7 }
 0x4a2   : > { %v6730_v41 = vsel %vm6144_vm5, %v14752_v56, %v6729_v60  ;;  %v6423_v60 = vld [vmem:[#allocation2 + $0x1b0] sm:$0x80] }
 0x4a3   : > { %v6606_v9 = vshrl.u32 %v6423_v60, 16  ;;  %v5907_v60 = vld [vmem:[#allocation2 + $0x60] sm:$0x80] }
 0x4a5   : > { %v6782_v62 = vpop.permute.xlu0 %6781 }
 0x4a6   : > { %v6835_v14 = vsel %vm334_vm0, %v6556_v52, %v6782_v62  ;;  %v6582_v62 = vshrl.u32 %v6419_v46, 16 }
 0x4a7   : > { %7114 = vmatmul.mubr.bf16.gmra.mrb[232].mxu0 %v6835_v14  ;;  %v6598_v14 = vshrl.u32 %v14512_v59, 16  ;;  %v6738_v59 = vrot.slane %v6613_v19, 1 }
 0x4a8   : > { %11639 = vmatprep.mubr.msk.bf16.mxu0 %vm334_vm0, %v6716_v30  ;;  %v6584_v16 = vrot.slane %v6582_v62, 7  ;;  %v14761_v30 = vor.u32 %v6589_v35, %v6588_v15  ;;  %v6743_v15 = vrot.slane %v6741_v13, 1  ;;  %v7668_v62 = vld [vmem:[#allocation2 + $0x70] sm:$0x1]  ;;  %v6162_v13 = vshll.u32 %v6130_v43, 16 }
 0x4a9   : > { %v14764_v58 = vor.u32 %v6731_v2, %v6598_v14  ;;  %v6600_v26 = vrot.slane %v6598_v14, 7  ;;  %v14775_v36 = vor.u32 %v6738_v59, %v6610_v11 }
 0x4ab   : > { %v6737_v35 = vsel %vm6144_vm5, %v14764_v58, %v6736_v50  ;;  %v14773_v46 = vor.u32 %v6601_v28, %v6600_v26  ;;  %v6744_v45 = vsel %vm6144_vm5, %v14775_v36, %v6743_v15  ;;  %v7687_v50 = vshll.u32 %v7668_v62, 16  ;;  %v6131_v62 = vld [vmem:[#allocation2 + $0x88] sm:$0x1] }
 0x4ac   : > { %v6608_v26 = vrot.slane %v6606_v9, 7 }
 0x4ad   : > { %v6784_v55 = vpop.permute.xlu1 %6783 }
 0x4ae   : > { %v6839_v31 = vsel %vm334_vm0, %v6568_v42, %v6784_v55  ;;  %v6592_v42 = vsel %vm5935_vm6, %v6584_v16, %v14761_v30  ;;  %v5905_v16 = vld [vmem:[#allocation2 + $0x48] sm:$0x80] }
 0x4af   : > { %7122 = vmatmul.mubr.bf16.gmra.mrb[236].mxu0 %v6839_v31 }
 0x4b0   : > { %11640 = vmatprep.mubr.msk.bf16.mxu0 %vm334_vm0, %v6723_v51  ;;  %v5937_v51 = vshrl.u32 %v5903_v29, 16 }
 0x4b5   : > { %v6786_v49 = vpop.permute.xlu0 %6785 }
 0x4b6   : > { %v6843_v52 = vsel %vm334_vm0, %v6580_v61, %v6786_v49  ;;  %v5939_v49 = vrot.slane %v5937_v51, 7  ;;  %v6155_v61 = vshll.u32 %v6129_v4, 16 }
 0x4b7   : > { %7130 = vmatmul.mubr.bf16.gmra.mrb[240].mxu0 %v6843_v52  ;;  %v6612_v52 = vrot.slane %v6610_v11, 7 }
 0x4b8   : > { %11641 = vmatprep.mubr.msk.bf16.mxu0 %vm334_vm0, %v6730_v41  ;;  %v6604_v41 = vsel %vm5935_vm6, %v6596_v8, %v14773_v46  ;;  %v5947_v28 = vsel %vm5935_vm6, %v5939_v49, %v14290_v53  ;;  %v6157_v34 = vrot.slane %v6155_v61, 1  ;;  %v7669_v53 = vld [vmem:[#allocation2 + $0x88] sm:$0x1] }
 0x4b9   : > { %v7694_v61 = vshll.u32 %v7669_v53, 16 }
 0x4ba   : > { %v6158_v59 = vsel %vm6144_vm5, %v14308_v7, %v6157_v34  ;;  %v6164_v7 = vrot.slane %v6162_v13, 1  ;;  %v6169_v34 = vshll.u32 %v6131_v62, 16 }
 0x4bd   : > { %v6788_v55 = vpop.permute.xlu1 %6787 }
 0x4be   : > { %v6847_v31 = vsel %vm334_vm0, %v6592_v42, %v6788_v55  ;;  %v14785_v55 = vor.u32 %v6613_v19, %v6612_v52  ;;  %v5949_v42 = vshrl.u32 %v5905_v16, 16 }
 0x4bf   : > { %7138 = vmatmul.mubr.bf16.gmra.mrb[244].mxu0 %v6847_v31  ;;  %v7444_v31 = vld [vmem:[#allocation2 + $0x60] sm:$0x80] }
 0x4c0   : > { %11642 = vmatprep.mubr.msk.bf16.mxu0 %vm334_vm0, %v6737_v35  ;;  %v7689_v35 = vrot.slane %v7687_v50, 1  ;;  %v6616_v4 = vsel %vm5935_vm6, %v6608_v26, %v14785_v55  ;;  %v7477_v11 = vshrl.u32 %v7444_v31, 16  ;;  %v5951_v19 = vrot.slane %v5949_v42, 7  ;;  %v7670_v50 = vld [vmem:[#allocation2 + $0xa0] sm:$0x1] }
 0x4c1   : > { %v5909_v42 = vld [vmem:[#allocation2 + $0x78] sm:$0x80] }
 0x4c2   : > { %v7690_v49 = vsel %vm6144_vm5, %v14330_v57, %v7689_v35  ;;  %v7479_v52 = vrot.slane %v7477_v11, 7  ;;  %v6132_v35 = vld [vmem:[#allocation2 + $0xa0] sm:$0x1] }
 0x4c4   : > { %v7487_v43 = vsel %vm5935_vm6, %v7479_v52, %v14332_v5  ;;  %v5911_v52 = vld [vmem:[#allocation2 + $0x90] sm:$0x80] }
 0x4c5   : > { %v6790_v2 = vpop.permute.xlu0 %6789 }
 0x4c6   : > { %v6851_v14 = vsel %vm334_vm0, %v6604_v41, %v6790_v2  ;;  %v5959_v2 = vsel %vm5935_vm6, %v5951_v19, %v14310_v10  ;;  %v5961_v41 = vshrl.u32 %v5907_v60, 16 }
 0x4c7   : > { %7146 = vmatmul.mubr.bf16.gmra.mrb[248].mxu0 %v6851_v14  ;;  %v7446_v14 = vld [vmem:[#allocation2 + $0x78] sm:$0x80] }
 0x4c8   : > { %11643 = vmatprep.mubr.msk.bf16.mxu0 %vm334_vm0, %v6744_v45  ;;  %v6165_v45 = vsel %vm6144_vm5, %v14330_v57, %v6164_v7  ;;  %v5963_v26 = vrot.slane %v5961_v41, 7  ;;  %v7701_v57 = vshll.u32 %v7670_v50, 16 }
 0x4c9   : > { %v6274_v29 = vpop.permute.xlu0 %6273 }
 0x4ca   : > { %v6307_v33 = vsel %vm334_vm0, %v5947_v28, %v6274_v29  ;;  %v7696_v28 = vrot.slane %v7694_v61, 1  ;;  %v7489_v29 = vshrl.u32 %v7446_v14, 16  ;;  %v5971_v53 = vsel %vm5935_vm6, %v5963_v26, %v14332_v5  ;;  %v6133_v14 = vld [vmem:[#allocation2 + $0xb8] sm:$0x1] }
 0x4cb   : > { %7315 = vmatmul.mubr.bf16.vlgmr.msra.gmra.mrb[192].mxu1 %v6307_v33  ;;  %v7703_v60 = vrot.slane %v7701_v57, 1  ;;  %v5913_v57 = vld [vmem:[#allocation2 + $0xa8] sm:$0x80] }
 0x4cc   : > { %11657 = vmatprep.mubr.msk.bf16.mxu1 %vm334_vm0, %v6158_v59  ;;  %v7697_v31 = vsel %vm6144_vm5, %v14349_v44, %v7696_v28  ;;  %v6171_v59 = vrot.slane %v6169_v34, 1  ;;  %v7491_v13 = vrot.slane %v7489_v29, 7  ;;  %v5985_v28 = vshrl.u32 %v5911_v52, 16  ;;  %v7450_v34 = vld [vmem:[#allocation2 + $0xa8] sm:$0x80] }
 0x4cd   : > { %v6792_v51 = vpop.permute.xlu1 %6791  ;;  %v6276_v15 = vpop.permute.xlu0 %6275  ;;  %v7704_v41 = vsel %vm6144_vm5, %v14367_v22, %v7703_v60 }
 0x4ce   : > { %v6855_v8 = vsel %vm334_vm0, %v6616_v4, %v6792_v51  ;;  %v6311_v9 = vsel %vm334_vm0, %v5959_v2, %v6276_v15  ;;  %v5973_v51 = vshrl.u32 %v5909_v42, 16  ;;  %v7448_v4 = vld [vmem:[#allocation2 + $0x90] sm:$0x80]  ;;  %v6176_v15 = vshll.u32 %v6132_v35, 16  ;;  %v7672_v42 = vld [vmem:[#allocation2 + $0xd0] sm:$0x1] }
 0x4cf   : > { %7154 = vmatmul.mubr.bf16.gmra.mrb[252].mxu0 %v6855_v8  ;;  %v6172_v8 = vsel %vm6144_vm5, %v14349_v44, %v6171_v59  ;;  %v7499_v7 = vsel %vm5935_vm6, %v7491_v13, %v14351_v12  ;;  %v7501_v61 = vshrl.u32 %v7448_v4, 16  ;;  %v5987_v59 = vrot.slane %v5985_v28, 7 }
 0x4d0   : > { %11684 = vmatprep.mubr.msk.bf16.mxu0 %vm334_vm0, %v7690_v49  ;;  %v7671_v49 = vld [vmem:[#allocation2 + $0xb8] sm:$0x1]  ;;  %v5975_v62 = vrot.slane %v5973_v51, 7  ;;  %v6134_v51 = vld [vmem:[#allocation2 + $0xd0] sm:$0x1] }
 0x4d1   : > { %v6278_v33 = vpop.permute.xlu0 %6277  ;;  %v7708_v44 = vshll.u32 %v7671_v49, 16 }
 0x4d2   : > { %v7813_v16 = vpop.permute.xlu1 %7812  ;;  %v6315_v11 = vsel %vm334_vm0, %v5971_v53, %v6278_v33 }
 0x4d3   : > { %7323 = vmatmul.mubr.bf16.gmra.mrb[196].mxu1 %v6311_v9  ;;  %v7846_v10 = vsel %vm334_vm0, %v7487_v43, %v7813_v16  ;;  %v6178_v9 = vrot.slane %v6176_v15, 1  ;;  %v7503_v16 = vrot.slane %v7501_v61, 7  ;;  %v7710_v26 = vrot.slane %v7708_v44, 1 }
 0x4d4   : > { %11658 = vmatprep.mubr.msk.bf16.mxu1 %vm334_vm0, %v6165_v45  ;;  %v5983_v45 = vsel %vm5935_vm6, %v5975_v62, %v14351_v12  ;;  %v6190_v61 = vshll.u32 %v6134_v51, 16  ;;  %v7673_v62 = vld [vmem:[#allocation2 + $0xe8] sm:$0x1] }
 0x4d5   : > { %v6280_v2 = vpop.permute.xlu0 %6279  ;;  %v6179_v29 = vsel %vm6144_vm5, %v14367_v22, %v6178_v9  ;;  %v7511_v33 = vsel %vm5935_vm6, %v7503_v16, %v14369_v6  ;;  %v7711_v13 = vsel %vm6144_vm5, %v14386_v54, %v7710_v26  ;;  %v7715_v22 = vshll.u32 %v7672_v42, 16  ;;  %v6135_v16 = vld [vmem:[#allocation2 + $0xe8] sm:$0x1] }
 0x4d6   : > { %v7815_v19 = vpop.permute.xlu1 %7814  ;;  %v6319_v50 = vsel %vm334_vm0, %v5983_v45, %v6280_v2  ;;  %v6197_v42 = vshll.u32 %v6135_v16, 16 }
 0x4d7   : > { %8085 = vmatmul.mubr.bf16.vlgmr.msra.gmra.mrb[0].mxu0 %v7846_v10  ;;  %v7850_v5 = vsel %vm334_vm0, %v7499_v7, %v7815_v19  ;;  %v6183_v10 = vshll.u32 %v6133_v14, 16  ;;  %v5997_v19 = vshrl.u32 %v5913_v57, 16  ;;  %v7717_v7 = vrot.slane %v7715_v22, 1  ;;  %v5917_v57 = vld [vmem:[#allocation2 + $0xd8] sm:$0x80] }
 0x4d8   : > { %11685 = vmatprep.mubr.msk.bf16.mxu0 %vm334_vm0, %v7697_v31  ;;  %v7513_v31 = vshrl.u32 %v7450_v34, 16  ;;  %v6192_v14 = vrot.slane %v6190_v61, 1  ;;  %v6136_v22 = vld [vmem:[#allocation2 + $0x100] sm:$0x1]  ;;  %v7675_v61 = vld [vmem:[#allocation2 + $0x118] sm:$0x1] }
 0x4d9   : > { %v6282_v35 = vpop.permute.xlu0 %6281  ;;  %v6185_v53 = vrot.slane %v6183_v10, 1  ;;  %v5999_v2 = vrot.slane %v5997_v19, 7  ;;  %v7718_v44 = vsel %vm6144_vm5, %v14402_v0, %v7717_v7  ;;  %v7456_v19 = vld [vmem:[#allocation2 + $0xf0] sm:$0x80]  ;;  %v6204_v7 = vshll.u32 %v6136_v22, 16 }
 0x4da   : > { %v7817_v43 = vpop.permute.xlu1 %7816  ;;  %v7515_v4 = vrot.slane %v7513_v31, 7  ;;  %v6193_v26 = vsel %vm6144_vm5, %v14402_v0, %v6192_v14 }
 0x4db   : > { %7331 = vmatmul.mubr.bf16.gmra.mrb[200].mxu1 %v6315_v11  ;;  %v7854_v12 = vsel %vm334_vm0, %v7511_v33, %v7817_v43  ;;  %v5995_v11 = vsel %vm5935_vm6, %v5987_v59, %v14369_v6  ;;  %v6186_v49 = vsel %vm6144_vm5, %v14386_v54, %v6185_v53  ;;  %v7722_v54 = vshll.u32 %v7673_v62, 16  ;;  %v7674_v33 = vld [vmem:[#allocation2 + $0x100] sm:$0x1] }
 0x4dc   : > { %11659 = vmatprep.mubr.msk.bf16.mxu1 %vm334_vm0, %v6172_v8  ;;  %v7452_v8 = vld [vmem:[#allocation2 + $0xc0] sm:$0x80]  ;;  %v6323_v60 = vsel %vm334_vm0, %v5995_v11, %v6282_v35  ;;  %v6007_v28 = vsel %vm5935_vm6, %v5999_v2, %v14388_v39  ;;  %v6199_v53 = vrot.slane %v6197_v42, 1  ;;  %v7729_v0 = vshll.u32 %v7674_v33, 16  ;;  %v5919_v2 = vld [vmem:[#allocation2 + $0xf0] sm:$0x80] }
 0x4dd   : > { %v7525_v52 = vshrl.u32 %v7452_v8, 16  ;;  %v6284_v9 = vpop.permute.xlu0 %6283  ;;  %v7724_v10 = vrot.slane %v7722_v54, 1  ;;  %v6021_v11 = vshrl.u32 %v5917_v57, 16  ;;  %v6033_v16 = vshrl.u32 %v5919_v2, 16  ;;  %v6138_v57 = vld [vmem:[#allocation2 + $0x130] sm:$0x1] }
 0x4de   : > { %v7819_v15 = vpop.permute.xlu1 %7818  ;;  %v6327_v43 = vsel %vm334_vm0, %v6007_v28, %v6284_v9  ;;  %v6206_v9 = vrot.slane %v6204_v7, 1  ;;  %v5923_v7 = vld [vmem:[#allocation2 + $0x120] sm:$0x80] }
 0x4df   : > { %8093 = vmatmul.mubr.bf16.gmra.mrb[4].mxu0 %v7850_v5  ;;  %v7523_v5 = vsel %vm5935_vm6, %v7515_v4, %v14388_v39  ;;  %v7527_v45 = vrot.slane %v7525_v52, 7  ;;  %v6023_v52 = vrot.slane %v6021_v11, 7  ;;  %v6035_v33 = vrot.slane %v6033_v16, 7  ;;  %v7678_v16 = vld [vmem:[#allocation2 + $0x160] sm:$0x1] }
 0x4e0   : > { %11686 = vmatprep.mubr.msk.bf16.mxu0 %vm334_vm0, %v7704_v41  ;;  %v7858_v6 = vsel %vm334_vm0, %v7523_v5, %v7819_v15  ;;  %v5915_v41 = vld [vmem:[#allocation2 + $0xc0] sm:$0x80]  ;;  %v6200_v15 = vsel %vm6144_vm5, %v14425_v23, %v6199_v53  ;;  %v7549_v5 = vshrl.u32 %v7456_v19, 16  ;;  %v6218_v19 = vshll.u32 %v6138_v57, 16 }
 0x4e1   : > { %v6009_v34 = vshrl.u32 %v5915_v41, 16  ;;  %v7535_v31 = vsel %vm5935_vm6, %v7527_v45, %v14404_v63  ;;  %v6286_v35 = vpop.permute.xlu0 %6285  ;;  %v6031_v54 = vsel %vm5935_vm6, %v6023_v52, %v14646_v18  ;;  %v7458_v45 = vld [vmem:[#allocation2 + $0x108] sm:$0x80]  ;;  %v6139_v52 = vld [vmem:[#allocation2 + $0x148] sm:$0x1] }
 0x4e2   : > { %v7551_v14 = vrot.slane %v7549_v5, 7  ;;  %v7561_v42 = vshrl.u32 %v7458_v45, 16  ;;  %v6220_v5 = vrot.slane %v6218_v19, 1  ;;  %v6141_v19 = vld [vmem:[#allocation2 + $0x178] sm:$0x1] }
 0x4e3   : > { %7339 = vmatmul.mubr.bf16.gmra.mrb[204].mxu1 %v6319_v50  ;;  %v7454_v50 = vld [vmem:[#allocation2 + $0xd8] sm:$0x80] }
 0x4e4   : > { %11660 = vmatprep.mubr.msk.bf16.mxu1 %vm334_vm0, %v6179_v29  ;;  %v7821_v29 = vpop.permute.xlu1 %7820  ;;  %v7537_v59 = vshrl.u32 %v7454_v50, 16  ;;  %v6207_v50 = vsel %vm6144_vm5, %v14655_v47, %v6206_v9 }
 0x4e5   : > { %v7862_v39 = vsel %vm334_vm0, %v7535_v31, %v7821_v29  ;;  %v5921_v31 = vld [vmem:[#allocation2 + $0x108] sm:$0x80] }
 0x4e6   : > { %v7539_v51 = vrot.slane %v7537_v59, 7  ;;  %v6045_v53 = vshrl.u32 %v5921_v31, 16  ;;  %v7464_v31 = vld [vmem:[#allocation2 + $0x150] sm:$0x80] }
 0x4e7   : > { %8101 = vmatmul.mubr.bf16.gmra.mrb[8].mxu0 %v7854_v12  ;;  %v6011_v12 = vrot.slane %v6009_v34, 7 }
 0x4e8   : > { %11687 = vmatprep.mubr.msk.bf16.mxu0 %vm334_vm0, %v7711_v13  ;;  %v7725_v13 = vsel %vm6144_vm5, %v14425_v23, %v7724_v10  ;;  %v7547_v62 = vsel %vm5935_vm6, %v7539_v51, %v14646_v18  ;;  %v7736_v23 = vshll.u32 %v7675_v61, 16  ;;  %v7559_v10 = vsel %vm5935_vm6, %v7551_v14, %v14671_v21 }
 0x4e9   : > { %v6019_v4 = vsel %vm5935_vm6, %v6011_v12, %v14404_v63 }
 0x4ea   : > { %v6331_v8 = vsel %vm334_vm0, %v6019_v4, %v6286_v35  ;;  %v7563_v35 = vrot.slane %v7561_v42, 7 }
 0x4eb   : > { %7347 = vmatmul.mubr.bf16.gmra.mrb[208].mxu1 %v6323_v60  ;;  %v7823_v60 = vpop.permute.xlu1 %7822 }
 0x4ec   : > { %11661 = vmatprep.mubr.msk.bf16.mxu1 %vm334_vm0, %v6186_v49  ;;  %v7731_v49 = vrot.slane %v7729_v0, 1  ;;  %v7866_v63 = vsel %vm334_vm0, %v7547_v62, %v7823_v60  ;;  %v7460_v0 = vld [vmem:[#allocation2 + $0x120] sm:$0x80]  ;;  %v7571_v60 = vsel %vm5935_vm6, %v7563_v35, %v14691_v17  ;;  %v7679_v35 = vld [vmem:[#allocation2 + $0x178] sm:$0x1] }
 0x4ee   : > { %v7732_v41 = vsel %vm6144_vm5, %v14655_v47, %v7731_v49  ;;  %v6047_v49 = vrot.slane %v6045_v53, 7  ;;  %v7597_v53 = vshrl.u32 %v7464_v31, 16 }
 0x4ef   : > { %8109 = vmatmul.mubr.bf16.gmra.mrb[12].mxu0 %v7858_v6  ;;  %v6288_v6 = vpop.permute.xlu0 %6287  ;;  %v7825_v34 = vpop.permute.xlu1 %7824 }
 0x4f0   : > { %11688 = vmatprep.mubr.msk.bf16.mxu0 %vm334_vm0, %v7718_v44  ;;  %v6137_v44 = vld [vmem:[#allocation2 + $0x118] sm:$0x1]  ;;  %v6335_v28 = vsel %vm334_vm0, %v6031_v54, %v6288_v6  ;;  %v7870_v18 = vsel %vm334_vm0, %v7559_v10, %v7825_v34  ;;  %v6055_v2 = vsel %vm5935_vm6, %v6047_v49, %v14691_v17  ;;  %v6057_v6 = vshrl.u32 %v5923_v7, 16  ;;  %v6140_v10 = vld [vmem:[#allocation2 + $0x160] sm:$0x1] }
 0x4f1   : > { %v6211_v29 = vshll.u32 %v6137_v44, 16  ;;  %v6221_v44 = vsel %vm6144_vm5, %v14696_v20, %v6220_v5  ;;  %v6225_v54 = vshll.u32 %v6139_v52, 16  ;;  %v6232_v57 = vshll.u32 %v6140_v10, 16  ;;  %v7466_v49 = vld [vmem:[#allocation2 + $0x168] sm:$0x80] }
 0x4f2   : > { %v6059_v34 = vrot.slane %v6057_v6, 7  ;;  %v6239_v5 = vshll.u32 %v6141_v19, 16  ;;  %v5929_v6 = vld [vmem:[#allocation2 + $0x168] sm:$0x80]  ;;  %v7681_v10 = vld [vmem:[#allocation2 + $0x1a8] sm:$0x1] }
 0x4f3   : > { %7355 = vmatmul.mubr.bf16.gmra.mrb[212].mxu1 %v6327_v43  ;;  %v7738_v43 = vrot.slane %v7736_v23, 1  ;;  %v6290_v59 = vpop.permute.xlu0 %6289  ;;  %v7827_v51 = vpop.permute.xlu1 %7826 }
 0x4f4   : > { %11662 = vmatprep.mubr.msk.bf16.mxu1 %vm334_vm0, %v6193_v26  ;;  %v7676_v26 = vld [vmem:[#allocation2 + $0x130] sm:$0x1] }
 0x4f5   : > { %v7739_v12 = vsel %vm6144_vm5, %v14676_v27, %v7738_v43  ;;  %v7743_v47 = vshll.u32 %v7676_v26, 16  ;;  %v6227_v26 = vrot.slane %v6225_v54, 1 }
 0x4f7   : > { %8117 = vmatmul.mubr.bf16.gmra.mrb[16].mxu0 %v7862_v39  ;;  %v6213_v39 = vrot.slane %v6211_v29, 1  ;;  %v7745_v11 = vrot.slane %v7743_v47, 1  ;;  %v6292_v61 = vpop.permute.xlu0 %6291  ;;  %v7829_v23 = vpop.permute.xlu1 %7828 }
 0x4f8   : > { %11689 = vmatprep.mubr.msk.bf16.mxu0 %vm334_vm0, %v7725_v13  ;;  %v6043_v13 = vsel %vm5935_vm6, %v6035_v33, %v14671_v21  ;;  %v7874_v21 = vsel %vm334_vm0, %v7571_v60, %v7827_v51  ;;  %v6343_v9 = vsel %vm334_vm0, %v6055_v2, %v6292_v61  ;;  %v6067_v33 = vsel %vm5935_vm6, %v6059_v34, %v14709_v25 }
 0x4f9   : > { %v6339_v22 = vsel %vm334_vm0, %v6043_v13, %v6290_v59  ;;  %v6214_v4 = vsel %vm6144_vm5, %v14676_v27, %v6213_v39  ;;  %v7746_v62 = vsel %vm6144_vm5, %v14696_v20, %v7745_v11  ;;  %v7757_v20 = vshll.u32 %v7678_v16, 16 }
 0x4fa   : > { %v6228_v39 = vsel %vm6144_vm5, %v14714_v32, %v6227_v26  ;;  %v6234_v11 = vrot.slane %v6232_v57, 1  ;;  %v6093_v16 = vshrl.u32 %v5929_v6, 16  ;;  %v6143_v57 = vld [vmem:[#allocation2 + $0x1a8] sm:$0x1] }
 0x4fb   : > { %7363 = vmatmul.mubr.bf16.gmra.mrb[216].mxu1 %v6331_v8  ;;  %v7677_v8 = vld [vmem:[#allocation2 + $0x148] sm:$0x1]  ;;  %v6294_v43 = vpop.permute.xlu0 %6293  ;;  %v7759_v47 = vrot.slane %v7757_v20, 1  ;;  %v6253_v19 = vshll.u32 %v6143_v57, 16 }
 0x4fc   : > { %11663 = vmatprep.mubr.msk.bf16.mxu1 %vm334_vm0, %v6200_v15  ;;  %v7573_v15 = vshrl.u32 %v7460_v0, 16  ;;  %v7750_v27 = vshll.u32 %v7677_v8, 16  ;;  %v6347_v59 = vsel %vm334_vm0, %v6067_v33, %v6294_v43  ;;  %v7599_v8 = vrot.slane %v7597_v53, 7 }
 0x4fd   : > { %v6235_v61 = vsel %vm6144_vm5, %v14728_v38, %v6234_v11 }
 0x4fe   : > { %v7752_v14 = vrot.slane %v7750_v27, 1  ;;  %v7680_v27 = vld [vmem:[#allocation2 + $0x190] sm:$0x1]  ;;  %v7607_v52 = vsel %vm5935_vm6, %v7599_v8, %v14737_v3 }
 0x4ff   : > { %8125 = vmatmul.mubr.bf16.gmra.mrb[20].mxu0 %v7866_v63  ;;  %v7575_v63 = vrot.slane %v7573_v15, 7  ;;  %v6296_v51 = vpop.permute.xlu0 %6295 }
 0x500   : > { %11690 = vmatprep.mubr.msk.bf16.mxu0 %vm334_vm0, %v7732_v41  ;;  %v7462_v41 = vld [vmem:[#allocation2 + $0x138] sm:$0x80]  ;;  %v7753_v29 = vsel %vm6144_vm5, %v14714_v32, %v7752_v14  ;;  %v7764_v32 = vshll.u32 %v7679_v35, 16 }
 0x501   : > { %v7583_v45 = vsel %vm5935_vm6, %v7575_v63, %v14709_v25  ;;  %v7609_v63 = vshrl.u32 %v7466_v49, 16 }
 0x502   : > { %v7878_v17 = vsel %vm334_vm0, %v7583_v45, %v7829_v23  ;;  %v6241_v23 = vrot.slane %v6239_v5, 1  ;;  %v7468_v45 = vld [vmem:[#allocation2 + $0x180] sm:$0x80]  ;;  %v6255_v5 = vrot.slane %v6253_v19, 1 }
 0x503   : > { %7371 = vmatmul.mubr.bf16.gmra.mrb[220].mxu1 %v6335_v28  ;;  %v7585_v28 = vshrl.u32 %v7462_v41, 16  ;;  %v6298_v41 = vpop.permute.xlu0 %6297  ;;  %v7611_v14 = vrot.slane %v7609_v63, 7  ;;  %v7664_v63 = vshll.u32 %v14711_v1, 16 }
 0x504   : > { %11664 = vmatprep.mubr.msk.bf16.mxu1 %vm334_vm0, %v6207_v50  ;;  %v5925_v50 = vld [vmem:[#allocation2 + $0x138] sm:$0x80]  ;;  %v6242_v43 = vsel %vm6144_vm5, %v14740_v40, %v6241_v23  ;;  %v7683_v23 = vld [vmem:[#allocation2 + $0x1d8] sm:$0x1] }
 0x505   : > { %v7587_v42 = vrot.slane %v7585_v28, 7 }
 0x507   : > { %8133 = vmatmul.mubr.bf16.gmra.mrb[24].mxu0 %v7870_v18  ;;  %v6069_v18 = vshrl.u32 %v5925_v50, 16  ;;  %v7595_v13 = vsel %vm5935_vm6, %v7587_v42, %v14725_v48  ;;  %v7621_v42 = vshrl.u32 %v7468_v45, 16 }
 0x508   : > { %11691 = vmatprep.mubr.msk.bf16.mxu0 %vm334_vm0, %v7739_v12  ;;  %v7831_v12 = vpop.permute.xlu1 %7830 }
 0x509   : > { %v6071_v0 = vrot.slane %v6069_v18, 7  ;;  %v7882_v25 = vsel %vm334_vm0, %v7595_v13, %v7831_v12  ;;  %v6095_v18 = vrot.slane %v6093_v16, 7  ;;  %v6300_v12 = vpop.permute.xlu0 %6299  ;;  %v7623_v35 = vrot.slane %v7621_v42, 7 }
 0x50b   : > { %7379 = vmatmul.mubr.bf16.gmra.mrb[224].mxu1 %v6339_v22  ;;  %v5927_v22 = vld [vmem:[#allocation2 + $0x150] sm:$0x80]  ;;  %v6079_v60 = vsel %vm5935_vm6, %v6071_v0, %v14725_v48  ;;  %v6103_v13 = vsel %vm5935_vm6, %v6095_v18, %v14749_v37  ;;  %v7470_v0 = vld [vmem:[#allocation2 + $0x198] sm:$0x80] }
 0x50c   : > { %11665 = vmatprep.mubr.msk.bf16.mxu1 %vm334_vm0, %v6214_v4  ;;  %v7760_v4 = vsel %vm6144_vm5, %v14728_v38, %v7759_v47  ;;  %v6081_v15 = vshrl.u32 %v5927_v22, 16  ;;  %v7833_v7 = vpop.permute.xlu1 %7832  ;;  %v7771_v38 = vshll.u32 %v7680_v27, 16  ;;  %v7778_v47 = vshll.u32 %v7681_v10, 16  ;;  %v7474_v10 = vld [vmem:[#allocation2 + $0x1c8] sm:$0x80] }
 0x50d   : > { %v7886_v48 = vsel %vm334_vm0, %v7607_v52, %v7833_v7  ;;  %v6359_v22 = vsel %vm334_vm0, %v6103_v13, %v6300_v12  ;;  %v5933_v7 = vld [vmem:[#allocation2 + $0x198] sm:$0x80] }
 0x50e   : > { %v6083_v2 = vrot.slane %v6081_v15, 7  ;;  %v7633_v15 = vshrl.u32 %v7470_v0, 16  ;;  %v6117_v52 = vshrl.u32 %v5933_v7, 16 }
 0x50f   : > { %8141 = vmatmul.mubr.bf16.gmra.mrb[28].mxu0 %v7874_v21  ;;  %v6351_v21 = vsel %vm334_vm0, %v6079_v60, %v6296_v51  ;;  %v7682_v60 = vld [vmem:[#allocation2 + $0x1c0] sm:$0x1] }
 0x510   : > { %11692 = vmatprep.mubr.msk.bf16.mxu0 %vm334_vm0, %v7746_v62  ;;  %v7766_v62 = vrot.slane %v7764_v32, 1  ;;  %v6091_v54 = vsel %vm5935_vm6, %v6083_v2, %v14737_v3  ;;  %v7619_v3 = vsel %vm5935_vm6, %v7611_v14, %v14749_v37  ;;  %v7780_v32 = vrot.slane %v7778_v47, 1 }
 0x511   : > { %v6355_v34 = vsel %vm334_vm0, %v6091_v54, %v6298_v41  ;;  %v7631_v37 = vsel %vm5935_vm6, %v7623_v35, %v14761_v30  ;;  %v7785_v27 = vshll.u32 %v7682_v60, 16  ;;  %v7635_v2 = vrot.slane %v7633_v15, 7 }
 0x512   : > { %v6256_v14 = vsel %vm6144_vm5, %v14764_v58, %v6255_v5 }
 0x513   : > { %7387 = vmatmul.mubr.bf16.gmra.mrb[228].mxu1 %v6343_v9  ;;  %v7767_v9 = vsel %vm6144_vm5, %v14740_v40, %v7766_v62  ;;  %v6302_v62 = vpop.permute.xlu0 %6301  ;;  %v7787_v54 = vrot.slane %v7785_v27, 1 }
 0x514   : > { %11666 = vmatprep.mubr.msk.bf16.mxu1 %vm334_vm0, %v6221_v44  ;;  %v6142_v44 = vld [vmem:[#allocation2 + $0x190] sm:$0x1] }
 0x515   : > { %v6246_v26 = vshll.u32 %v6142_v44, 16 }
 0x517   : > { %8149 = vmatmul.mubr.bf16.gmra.mrb[32].mxu0 %v7878_v17  ;;  %v7835_v17 = vpop.permute.xlu1 %7834 }
 0x518   : > { %11693 = vmatprep.mubr.msk.bf16.mxu0 %vm334_vm0, %v7753_v29  ;;  %v7773_v29 = vrot.slane %v7771_v38, 1  ;;  %v7890_v31 = vsel %vm334_vm0, %v7619_v3, %v7835_v17  ;;  %v7789_v17 = vrot.slane %v7664_v63, 1  ;;  %v6304_v3 = vpop.permute.xlu0 %6303 }
 0x51a   : > { %v7774_v40 = vsel %vm6144_vm5, %v14752_v56, %v7773_v29  ;;  %v7792_v29 = vshll.u32 %v7683_v23, 16 }
 0x51b   : > { %7395 = vmatmul.mubr.bf16.gmra.mrb[232].mxu1 %v6347_v59  ;;  %v5931_v59 = vld [vmem:[#allocation2 + $0x180] sm:$0x80]  ;;  %v7837_v51 = vpop.permute.xlu1 %7836 }
 0x51c   : > { %11667 = vmatprep.mubr.msk.bf16.mxu1 %vm334_vm0, %v6228_v39  ;;  %v6248_v39 = vrot.slane %v6246_v26, 1  ;;  %v6105_v53 = vshrl.u32 %v5931_v59, 16  ;;  %v7794_v59 = vrot.slane %v7792_v29, 1 }
 0x51e   : > { %v6249_v11 = vsel %vm6144_vm5, %v14752_v56, %v6248_v39  ;;  %v7781_v56 = vsel %vm6144_vm5, %v14764_v58, %v7780_v32  ;;  %v7788_v58 = vsel %vm6144_vm5, %v14775_v36, %v7787_v54 }
 0x51f   : > { %8157 = vmatmul.mubr.bf16.gmra.mrb[36].mxu0 %v7882_v25  ;;  %v7839_v38 = vpop.permute.xlu1 %7838 }
 0x520   : > { %11694 = vmatprep.mubr.msk.bf16.mxu0 %vm334_vm0, %v7760_v4 }
 0x523   : > { %7403 = vmatmul.mubr.bf16.gmra.mrb[236].mxu1 %v6351_v21  ;;  %v6107_v21 = vrot.slane %v6105_v53, 7  ;;  %v7841_v39 = vpop.permute.xlu1 %7840 }
 0x524   : > { %11668 = vmatprep.mubr.msk.bf16.mxu1 %vm334_vm0, %v6235_v61  ;;  %v7894_v61 = vsel %vm334_vm0, %v7631_v37, %v7837_v51 }
 0x525   : > { %v6115_v6 = vsel %vm5935_vm6, %v6107_v21, %v14761_v30  ;;  %v7661_v30 = vshrl.u32 %v14711_v1, 16 }
 0x527   : > { %8165 = vmatmul.mubr.bf16.gmra.mrb[40].mxu0 %v7886_v48  ;;  %v7472_v48 = vld [vmem:[#allocation2 + $0x1b0] sm:$0x80]  ;;  %v7790_v18 = vor.u32 %v7789_v17, %v7661_v30  ;;  %v7843_v51 = vpop.permute.xlu1 %7842 }
 0x528   : > { %11695 = vmatprep.mubr.msk.bf16.mxu0 %vm334_vm0, %v7767_v9  ;;  %v6363_v9 = vsel %vm334_vm0, %v6115_v6, %v6302_v62  ;;  %v7645_v16 = vshrl.u32 %v7472_v48, 16 }
 0x52a   : > { %v14931_v28 = vpop.f32.mrb[192].mxu0  ;;  %v7647_v42 = vrot.slane %v7645_v16, 7 }
 0x52b   : > { %v7037_v50 = vpop.f32.mrb[193].mxu0  ;;  %7411 = vmatmul.mubr.bf16.gmra.mrb[240].mxu1 %v6355_v34  ;;  %v6119_v34 = vrot.slane %v6117_v52, 7 }
 0x52c   : > { %v14936_v20 = vpop.f32.mrb[194].mxu0  ;;  %11669 = vmatprep.mubr.msk.bf16.mxu1 %vm334_vm0, %v6242_v43  ;;  %v7643_v50 = vsel %vm5935_vm6, %v7635_v2, %v14773_v46  ;;  %v7655_v35 = vsel %vm5935_vm6, %v7647_v42, %v14785_v55 }
 0x52d   : > { %v7040_v33 = vpop.f32.mrb[195].mxu0  ;;  %v7898_v26 = vsel %vm334_vm0, %v7643_v50, %v7839_v38  ;;  %v6127_v1 = vsel %vm5935_vm6, %v6119_v34, %v14773_v46  ;;  %v7795_v46 = vsel %vm6144_vm5, %v7790_v18, %v7794_v59  ;;  %v7902_v0 = vsel %vm334_vm0, %v7655_v35, %v7841_v39 }
 0x52e   : > { %v7663_v33 = vrot.slane %v7661_v30, 7 }
 0x52f   : > { %8173 = vmatmul.mubr.bf16.gmra.mrb[44].mxu0 %v7890_v31  ;;  %v7657_v31 = vshrl.u32 %v7474_v10, 16 }
 0x530   : > { %11696 = vmatprep.mubr.msk.bf16.mxu0 %vm334_vm0, %v7774_v40  ;;  %v6367_v40 = vsel %vm334_vm0, %v6127_v1, %v6304_v3  ;;  %v7666_v36 = vor.u32 %v7664_v63, %v7663_v33 }
 0x531   : > { %v7659_v53 = vrot.slane %v7657_v31, 7 }
 0x532   : > { %v14947_v25 = vpop.f32.mrb[196].mxu0 }
 0x533   : > { %v7045_v4 = vpop.f32.mrb[197].mxu0  ;;  %7419 = vmatmul.mubr.bf16.gmra.mrb[244].mxu1 %v6359_v22  ;;  %v7667_v22 = vsel %vm5935_vm6, %v7659_v53, %v7666_v36 }
 0x534   : > { %v14952_v8 = vpop.f32.mrb[198].mxu0  ;;  %11670 = vmatprep.mubr.msk.bf16.mxu1 %vm334_vm0, %v6249_v11  ;;  %v7906_v19 = vsel %vm334_vm0, %v7667_v22, %v7843_v51 }
 0x535   : > { %v7048_v49 = vpop.f32.mrb[199].mxu0 }
 0x537   : > { %8181 = vmatmul.mubr.bf16.gmra.mrb[48].mxu0 %v7894_v61 }
 0x538   : > { %11697 = vmatprep.mubr.msk.bf16.mxu0 %vm334_vm0, %v7781_v56 }
 0x53a   : > { %v14964_v41 = vpop.f32.mrb[200].mxu0 }
 0x53b   : > { %v7053_v44 = vpop.f32.mrb[201].mxu0  ;;  %7427 = vmatmul.mubr.bf16.gmra.mrb[248].mxu1 %v6363_v9 }
 0x53c   : > { %v14969_v45 = vpop.f32.mrb[202].mxu0  ;;  %11671 = vmatprep.mubr.msk.bf16.mxu1 %vm334_vm0, %v6256_v14 }
 0x53d   : > { %v7056_v43 = vpop.f32.mrb[203].mxu0 }
 0x53f   : > { %8189 = vmatmul.mubr.bf16.gmra.mrb[52].mxu0 %v7898_v26 }
 0x540   : > { %11698 = vmatprep.mubr.msk.bf16.mxu0 %vm334_vm0, %v7788_v58 }
 0x542   : > { %v14981_v12 = vpop.f32.mrb[204].mxu0 }
 0x543   : > { %v7061_v47 = vpop.f32.mrb[205].mxu0  ;;  %7435 = vmatmul.mubr.bf16.gmra.mrb[252].mxu1 %v6367_v40 }
 0x544   : > { %v14984_v57 = vpop.f32.mrb[206].mxu0 }
 0x545   : > { %v7064_v13 = vpop.f32.mrb[207].mxu0 }
 0x547   : > { %8197 = vmatmul.mubr.bf16.gmra.mrb[56].mxu0 %v7902_v0 }
 0x548   : > { %11699 = vmatprep.mubr.msk.bf16.mxu0 %vm334_vm0, %v7795_v46 }
 0x54a   : > { %v14992_v4 = vpop.f32.mrb[208].mxu0 }
 0x54b   : > { %v7069_v11 = vpop.f32.mrb[209].mxu0 }
 0x54c   : > { %v14994_v32 = vpop.f32.mrb[210].mxu0 }
 0x54d   : > { %v7072_v55 = vpop.f32.mrb[211].mxu0 }
 0x54f   : > { %8205 = vmatmul.mubr.bf16.gmra.mrb[60].mxu0 %v7906_v19 }
 0x552   : > { %v14997_v60 = vpop.f32.mrb[212].mxu0 }
 0x553   : > { %v7077_v37 = vpop.f32.mrb[213].mxu0 }
 0x554   : > { %v14999_v15 = vpop.f32.mrb[214].mxu0 }
 0x555   : > { %v7080_v49 = vpop.f32.mrb[215].mxu0 }
 0x55a   : > { %v15001_v21 = vpop.f32.mrb[216].mxu0 }
 0x55b   : > { %v7085_v7 = vpop.f32.mrb[217].mxu0 }
 0x55c   : > { %v15003_v61 = vpop.f32.mrb[218].mxu0 }
 0x55d   : > { %v7088_v62 = vpop.f32.mrb[219].mxu0 }
 0x562   : > { %v15005_v56 = vpop.f32.mrb[220].mxu0 }
 0x563   : > { %v7093_v5 = vpop.f32.mrb[221].mxu0 }
 0x564   : > { %v15007_v27 = vpop.f32.mrb[222].mxu0 }
 0x565   : > { %v7096_v52 = vpop.f32.mrb[223].mxu0 }
 0x56a   : > { %v15009_v63 = vpop.f32.mrb[224].mxu0 }
 0x56b   : > { %v7101_v2 = vpop.f32.mrb[225].mxu0 }
 0x56c   : > { %v15011_v48 = vpop.f32.mrb[226].mxu0 }
 0x56d   : > { %v7104_v6 = vpop.f32.mrb[227].mxu0 }
 0x572   : > { %v15013_v9 = vpop.f32.mrb[228].mxu0 }
 0x573   : > { %v7109_v23 = vpop.f32.mrb[229].mxu0 }
 0x574   : > { %v15015_v38 = vpop.f32.mrb[230].mxu0 }
 0x575   : > { %v7112_v44 = vpop.f32.mrb[231].mxu0 }
 0x57a   : > { %v15017_v14 = vpop.f32.mrb[232].mxu0 }
 0x57b   : > { %v7117_v54 = vpop.f32.mrb[233].mxu0 }
 0x57c   : > { %v15019_v16 = vpop.f32.mrb[234].mxu0 }
 0x57d   : > { %v7120_v34 = vpop.f32.mrb[235].mxu0 }
 0x582   : > { %v15021_v30 = vpop.f32.mrb[236].mxu0 }
 0x583   : > { %v7125_v17 = vpop.f32.mrb[237].mxu0 }
 0x584   : > { %v15023_v50 = vpop.f32.mrb[238].mxu0 }
 0x585   : > { %v7128_v43 = vpop.f32.mrb[239].mxu0 }
 0x58a   : > { %v15025_v29 = vpop.f32.mrb[240].mxu0 }
 0x58b   : > { %v7133_v26 = vpop.f32.mrb[241].mxu0 }
 0x58c   : > { %v15027_v10 = vpop.f32.mrb[242].mxu0 }
 0x58d   : > { %v7136_v3 = vpop.f32.mrb[243].mxu0 }
 0x592   : > { %v15029_v58 = vpop.f32.mrb[244].mxu0 }
 0x593   : > { %v7141_v42 = vpop.f32.mrb[245].mxu0 }
 0x594   : > { %v15031_v1 = vpop.f32.mrb[246].mxu0 }
 0x595   : > { %v7144_v33 = vpop.f32.mrb[247].mxu0 }
 0x59a   : > { %v15033_v18 = vpop.f32.mrb[248].mxu0 }
 0x59b   : > { %v7149_v31 = vpop.f32.mrb[249].mxu0 }
 0x59c   : > { %v15035_v59 = vpop.f32.mrb[250].mxu0 }
 0x59d   : > { %v7152_v40 = vpop.f32.mrb[251].mxu0 }
 0x59e   : > { %v7316_v39 = vpop.f32.mrb[192].mxu1 }
 0x59f   : > { %v7317_v47 = vadd.f32 %v7316_v39, %v14931_v28  ;;  %v7318_v36 = vpop.f32.mrb[193].mxu1 }
 0x5a0   : > { %v7319_v35 = vpop.f32.mrb[194].mxu1 }
 0x5a1   : > { %v7320_v13 = vadd.f32 %v7319_v35, %v14936_v20  ;;  %v7321_v53 = vpop.f32.mrb[195].mxu1  ;;  %v15048_v20 = vld [vmem:[%s16455_s6] ss:$0 sm:$0xff] }
 0x5a2   : > { %v15039_v46 = vpop.f32.mrb[252].mxu0 }
 0x5a3   : > { %v7157_v0 = vpop.f32.mrb[253].mxu0 }
 0x5a4   : > { %v15041_v22 = vpop.f32.mrb[254].mxu0 }
 0x5a5   : > { %v7160_v51 = vpop.f32.mrb[255].mxu0 }
 0x5a6   : > { %v7324_v11 = vpop.f32.mrb[196].mxu1 }
 0x5a7   : > { %v7325_v19 = vadd.f32 %v7324_v11, %v14947_v25  ;;  %v7326_v55 = vpop.f32.mrb[197].mxu1 }
 0x5a8   : > { %v7327_v37 = vpop.f32.mrb[198].mxu1 }
 0x5a9   : > { %v7328_v49 = vadd.f32 %v7327_v37, %v14952_v8  ;;  %v7329_v7 = vpop.f32.mrb[199].mxu1 }
 0x5aa   : > { %v8086_v28 = vpop.f32.mrb[0].mxu0 }
 0x5ab   : > { %v8213_v62 = vadd.f32 %v8086_v28, %v7317_v47  ;;  %v8088_v5 = vpop.f32.mrb[1].mxu0 }
 0x5ac   : > { %v8089_v52 = vpop.f32.mrb[2].mxu0 }
 0x5ad   : > { %v15051_v2 = vadd.f32 %v15048_v20, %v8213_v62  ;;  %v8214_v6 = vadd.f32 %v8089_v52, %v7320_v13  ;;  %v8091_v23 = vpop.f32.mrb[3].mxu0 }
 0x5ae   : > { %v7332_v25 = vpop.f32.mrb[200].mxu1 }
 0x5af   : > { %11960 = vtanh.f32 %v15051_v2  ;;  %v15055_v8 = vadd.f32 %v15048_v20, %v8214_v6  ;;  %v7333_v44 = vadd.f32 %v7332_v25, %v14964_v41  ;;  %v7334_v54 = vpop.f32.mrb[201].mxu1 }
 0x5b0   : > { %v7335_v34 = vpop.f32.mrb[202].mxu1 }
 0x5b1   : > { %11962 = vtanh.f32 %v15055_v8  ;;  %v7336_v17 = vadd.f32 %v7335_v34, %v14969_v45  ;;  %v7337_v43 = vpop.f32.mrb[203].mxu1 }
 0x5b2   : > { %v8094_v26 = vpop.f32.mrb[4].mxu0 }
 0x5b3   : > { %v8215_v3 = vadd.f32 %v8094_v26, %v7325_v19  ;;  %v8096_v42 = vpop.f32.mrb[5].mxu0 }
 0x5b4   : > { %v8097_v33 = vpop.f32.mrb[6].mxu0 }
 0x5b5   : > { %v15061_v31 = vadd.f32 %v15048_v20, %v8215_v3  ;;  %v8216_v40 = vadd.f32 %v8097_v33, %v7328_v49  ;;  %v8099_v39 = vpop.f32.mrb[7].mxu0 }
 0x5b6   : > { %v7340_v47 = vpop.f32.mrb[204].mxu1 }
 0x5b7   : > { %11964 = vtanh.f32 %v15061_v31  ;;  %v15065_v41 = vadd.f32 %v15048_v20, %v8216_v40  ;;  %v7341_v36 = vadd.f32 %v7340_v47, %v14981_v12  ;;  %v7342_v35 = vpop.f32.mrb[205].mxu1 }
 0x5b8   : > { %v7343_v45 = vpop.f32.mrb[206].mxu1 }
 0x5b9   : > { %v11961_v13 = vpop.eup %11960  ;;  %11966 = vtanh.f32 %v15065_v41  ;;  %v7344_v53 = vadd.f32 %v7343_v45, %v14984_v57  ;;  %v7345_v0 = vpop.f32.mrb[207].mxu1 }
 0x5ba   : > { %v8102_v51 = vpop.f32.mrb[8].mxu0  ;;  %8508 = vrot.lane.b32.xlu0 %v11961_v13, %s12293_s26 }
 0x5bb   : > { %v11963_v11 = vpop.eup %11962  ;;  %v8217_v19 = vadd.f32 %v8102_v51, %v7333_v44  ;;  %v8104_v55 = vpop.f32.mrb[9].mxu0 }
 0x5bc   : > { %8510 = vrot.lane.b32.xlu1 %v11963_v11, %s12293_s26  ;;  %v8105_v37 = vpop.f32.mrb[10].mxu0 }
 0x5bd   : > { %v15073_v49 = vadd.f32 %v15048_v20, %v8217_v19  ;;  %v8218_v12 = vadd.f32 %v8105_v37, %v7336_v17  ;;  %v8107_v7 = vpop.f32.mrb[11].mxu0 }
 0x5be   : > { %v7348_v28 = vpop.f32.mrb[208].mxu1 }
 0x5bf   : > { %11968 = vtanh.f32 %v15073_v49  ;;  %v15077_v57 = vadd.f32 %v15048_v20, %v8218_v12  ;;  %v7349_v62 = vadd.f32 %v7348_v28, %v14992_v4  ;;  %v7350_v5 = vpop.f32.mrb[209].mxu1 }
 0x5c0   : > { %v7351_v52 = vpop.f32.mrb[210].mxu1 }
 0x5c1   : > { %v11965_v6 = vpop.eup %11964  ;;  %11970 = vtanh.f32 %v15077_v57  ;;  %v7352_v23 = vadd.f32 %v7351_v52, %v14994_v32  ;;  %v7353_v25 = vpop.f32.mrb[211].mxu1 }
 0x5c2   : > { %v8110_v44 = vpop.f32.mrb[12].mxu0  ;;  %8512 = vrot.lane.b32.xlu0 %v11965_v6, %s12293_s26 }
 0x5c3   : > { %v11967_v54 = vpop.eup %11966  ;;  %v8219_v34 = vadd.f32 %v8110_v44, %v7341_v36  ;;  %v8112_v17 = vpop.f32.mrb[13].mxu0 }
 0x5c4   : > { %8514 = vrot.lane.b32.xlu1 %v11967_v54, %s12293_s26  ;;  %v8113_v43 = vpop.f32.mrb[14].mxu0 }
 0x5c5   : > { %v15085_v26 = vadd.f32 %v15048_v20, %v8219_v34  ;;  %v8220_v4 = vadd.f32 %v8113_v43, %v7344_v53  ;;  %v8115_v3 = vpop.f32.mrb[15].mxu0 }
 0x5c6   : > { %v7356_v42 = vpop.f32.mrb[212].mxu1 }
 0x5c7   : > { %11972 = vtanh.f32 %v15085_v26  ;;  %v15089_v32 = vadd.f32 %v15048_v20, %v8220_v4  ;;  %v7357_v33 = vadd.f32 %v7356_v42, %v14997_v60  ;;  %v7358_v40 = vpop.f32.mrb[213].mxu1 }
 0x5c8   : > { %v7359_v39 = vpop.f32.mrb[214].mxu1 }
 0x5c9   : > { %v11969_v47 = vpop.eup %11968  ;;  %11974 = vtanh.f32 %v15089_v32  ;;  %v7360_v36 = vadd.f32 %v7359_v39, %v14999_v15  ;;  %v7361_v35 = vpop.f32.mrb[215].mxu1 }
 0x5ca   : > { %v8118_v45 = vpop.f32.mrb[16].mxu0  ;;  %8516 = vrot.lane.b32.xlu0 %v11969_v47, %s12293_s26 }
 0x5cb   : > { %v11971_v13 = vpop.eup %11970  ;;  %v8221_v53 = vadd.f32 %v8118_v45, %v7349_v62  ;;  %v8120_v0 = vpop.f32.mrb[17].mxu0 }
 0x5cc   : > { %8518 = vrot.lane.b32.xlu1 %v11971_v13, %s12293_s26  ;;  %v8121_v51 = vpop.f32.mrb[18].mxu0 }
 0x5cd   : > { %v15097_v11 = vadd.f32 %v15048_v20, %v8221_v53  ;;  %v8222_v60 = vadd.f32 %v8121_v51, %v7352_v23  ;;  %v8123_v19 = vpop.f32.mrb[19].mxu0 }
 0x5ce   : > { %v7364_v55 = vpop.f32.mrb[216].mxu1 }
 0x5cf   : > { %11976 = vtanh.f32 %v15097_v11  ;;  %v15101_v15 = vadd.f32 %v15048_v20, %v8222_v60  ;;  %v7365_v37 = vadd.f32 %v7364_v55, %v15001_v21  ;;  %v7366_v12 = vpop.f32.mrb[217].mxu1 }
 0x5d0   : > { %v7367_v7 = vpop.f32.mrb[218].mxu1 }
 0x5d1   : > { %v11973_v28 = vpop.eup %11972  ;;  %11978 = vtanh.f32 %v15101_v15  ;;  %v7368_v62 = vadd.f32 %v7367_v7, %v15003_v61  ;;  %v7369_v5 = vpop.f32.mrb[219].mxu1 }
 0x5d2   : > { %v8126_v52 = vpop.f32.mrb[20].mxu0  ;;  %8520 = vrot.lane.b32.xlu0 %v11973_v28, %s12293_s26 }
 0x5d3   : > { %v11975_v6 = vpop.eup %11974  ;;  %v8223_v23 = vadd.f32 %v8126_v52, %v7357_v33  ;;  %v8128_v25 = vpop.f32.mrb[21].mxu0 }
 0x5d4   : > { %8522 = vrot.lane.b32.xlu1 %v11975_v6, %s12293_s26  ;;  %v8129_v44 = vpop.f32.mrb[22].mxu0 }
 0x5d5   : > { %v15109_v54 = vadd.f32 %v15048_v20, %v8223_v23  ;;  %v8224_v21 = vadd.f32 %v8129_v44, %v7360_v36  ;;  %v8131_v34 = vpop.f32.mrb[23].mxu0 }
 0x5d6   : > { %v7372_v17 = vpop.f32.mrb[220].mxu1 }
 0x5d7   : > { %11980 = vtanh.f32 %v15109_v54  ;;  %v15113_v61 = vadd.f32 %v15048_v20, %v8224_v21  ;;  %v7373_v43 = vadd.f32 %v7372_v17, %v15005_v56  ;;  %v7374_v4 = vpop.f32.mrb[221].mxu1 }
 0x5d8   : > { %v7375_v3 = vpop.f32.mrb[222].mxu1 }
 0x5d9   : > { %v11977_v42 = vpop.eup %11976  ;;  %11982 = vtanh.f32 %v15113_v61  ;;  %v7376_v33 = vadd.f32 %v7375_v3, %v15007_v27  ;;  %v7377_v40 = vpop.f32.mrb[223].mxu1 }
 0x5da   : > { %v8134_v39 = vpop.f32.mrb[24].mxu0  ;;  %8524 = vrot.lane.b32.xlu0 %v11977_v42, %s12293_s26 }
 0x5db   : > { %v11979_v47 = vpop.eup %11978  ;;  %v8225_v36 = vadd.f32 %v8134_v39, %v7365_v37  ;;  %v8136_v35 = vpop.f32.mrb[25].mxu0  ;;  %v11924_v39 = vld [vmem:[%s16456_s7 + $0x60] sm:$0xff]  }
 0x5dc   : > { %8526 = vrot.lane.b32.xlu1 %v11979_v47, %s12293_s26  ;;  %v8137_v45 = vpop.f32.mrb[26].mxu0  ;;  %9765 = vmatpush1.bf16.msra.mxu1 %v11924_v39 }
 0x5dd   : > { %v15121_v13 = vadd.f32 %v15048_v20, %v8225_v36  ;;  %v8226_v56 = vadd.f32 %v8137_v45, %v7368_v62  ;;  %v8139_v53 = vpop.f32.mrb[27].mxu0  ;;  %9766 = vmatprep.subr.bf16.mxu1 %v16467_v24 }
 0x5de   : > { %v7380_v0 = vpop.f32.mrb[224].mxu1 }
 0x5df   : > { %11984 = vtanh.f32 %v15121_v13  ;;  %v15125_v27 = vadd.f32 %v15048_v20, %v8226_v56  ;;  %v7381_v51 = vadd.f32 %v7380_v0, %v15009_v63  ;;  %v7382_v60 = vpop.f32.mrb[225].mxu1 }
 0x5e0   : > { %v7383_v19 = vpop.f32.mrb[226].mxu1 }
 0x5e1   : > { %v11981_v55 = vpop.eup %11980  ;;  %11986 = vtanh.f32 %v15125_v27  ;;  %v7384_v37 = vadd.f32 %v7383_v19, %v15011_v48  ;;  %v7385_v12 = vpop.f32.mrb[227].mxu1 }
 0x5e2   : > { %v8142_v7 = vpop.f32.mrb[28].mxu0  ;;  %8528 = vrot.lane.b32.xlu0 %v11981_v55, %s12293_s26 }
 0x5e3   : > { %v11983_v28 = vpop.eup %11982  ;;  %v8227_v62 = vadd.f32 %v8142_v7, %v7373_v43  ;;  %v8144_v5 = vpop.f32.mrb[29].mxu0 }
 0x5e4   : > { %8530 = vrot.lane.b32.xlu1 %v11983_v28, %s12293_s26  ;;  %v8145_v52 = vpop.f32.mrb[30].mxu0 }
 0x5e5   : > { %v15133_v6 = vadd.f32 %v15048_v20, %v8227_v62  ;;  %v8228_v63 = vadd.f32 %v8145_v52, %v7376_v33  ;;  %v8147_v23 = vpop.f32.mrb[31].mxu0 }
 0x5e6   : > { %v7388_v25 = vpop.f32.mrb[228].mxu1  ;;  %v11925_v23 = vld [vmem:[%s16456_s7 + $0x68] sm:$0xff]  }
 0x5e7   : > { %11988 = vtanh.f32 %v15133_v6  ;;  %v15137_v48 = vadd.f32 %v15048_v20, %v8228_v63  ;;  %v7389_v44 = vadd.f32 %v7388_v25, %v15013_v9  ;;  %v7390_v21 = vpop.f32.mrb[229].mxu1  ;;  %9767 = vmatpush1.bf16.msra.mxu1 %v11925_v23 }
 0x5e8   : > { %v7391_v34 = vpop.f32.mrb[230].mxu1  ;;  %9768 = vmatprep.subr.bf16.mxu1 %v16467_v24 }
 0x5e9   : > { %v11985_v17 = vpop.eup %11984  ;;  %11990 = vtanh.f32 %v15137_v48  ;;  %v7392_v43 = vadd.f32 %v7391_v34, %v15015_v38  ;;  %v7393_v4 = vpop.f32.mrb[231].mxu1 }
 0x5ea   : > { %v8150_v3 = vpop.f32.mrb[32].mxu0  ;;  %8532 = vrot.lane.b32.xlu0 %v11985_v17, %s12293_s26 }
 0x5eb   : > { %v11987_v42 = vpop.eup %11986  ;;  %v8229_v33 = vadd.f32 %v8150_v3, %v7381_v51  ;;  %v8152_v40 = vpop.f32.mrb[33].mxu0 }
 0x5ec   : > { %v8153_v47 = vpop.f32.mrb[34].mxu0  ;;  %8534 = vrot.lane.b32.xlu1 %v11987_v42, %s12293_s26 }
 0x5ed   : > { %v15148_v9 = vadd.f32 %v15048_v20, %v8229_v33  ;;  %v8230_v36 = vadd.f32 %v8153_v47, %v7384_v37  ;;  %v8155_v35 = vpop.f32.mrb[35].mxu0  ;;  %v11926_v47 = vld [vmem:[%s16456_s7 + $0x70] sm:$0xff]  }
 0x5ee   : > { %v7396_v38 = vpop.f32.mrb[232].mxu1  ;;  %9769 = vmatpush1.bf16.msra.mxu1 %v11926_v47  ;;  %v8286_v47 = vsub.f32 0.0, %v15061_v31 }
 0x5ef   : > { %11992 = vtanh.f32 %v15148_v9  ;;  %v15153_v45 = vadd.f32 %v15048_v20, %v8230_v36  ;;  %v7397_v56 = vadd.f32 %v7396_v38, %v15017_v14  ;;  %v7398_v53 = vpop.f32.mrb[233].mxu1  ;;  %9770 = vmatprep.subr.bf16.mxu1 %v16467_v24 }
 0x5f0   : > { %v7399_v0 = vpop.f32.mrb[234].mxu1  ;;  %v11927_v53 = vld [vmem:[%s16456_s7 + $0x78] sm:$0xff]  }
 0x5f1   : > { %v11989_v51 = vpop.eup %11988  ;;  %11994 = vtanh.f32 %v15153_v45  ;;  %v7400_v60 = vadd.f32 %v7399_v0, %v15019_v16  ;;  %v7401_v19 = vpop.f32.mrb[235].mxu1 }
 0x5f2   : > { %v8158_v55 = vpop.f32.mrb[36].mxu0  ;;  %8536 = vrot.lane.b32.xlu0 %v11989_v51, %s12293_s26  ;;  %9771 = vmatpush1.bf16.msra.mxu1 %v11927_v53 }
 0x5f3   : > { %v11991_v37 = vpop.eup %11990  ;;  %v8231_v12 = vadd.f32 %v8158_v55, %v7389_v44  ;;  %v8160_v7 = vpop.f32.mrb[37].mxu0  ;;  %9772 = vmatprep.subr.bf16.mxu1 %v16467_v24 }
 0x5f4   : > { %v8161_v28 = vpop.f32.mrb[38].mxu0  ;;  %8538 = vrot.lane.b32.xlu1 %v11991_v37, %s12293_s26 }
 0x5f5   : > { %v15161_v62 = vadd.f32 %v15048_v20, %v8231_v12  ;;  %v15163_v14 = vadd.f32 %v8161_v28, %v7392_v43  ;;  %v8163_v5 = vpop.f32.mrb[39].mxu0 }
 0x5f6   : > { %v7404_v52 = vpop.f32.mrb[236].mxu1 }
 0x5f7   : > { %11996 = vtanh.f32 %v15161_v62  ;;  %v7405_v16 = vadd.f32 %v7404_v52, %v15021_v30  ;;  %v7406_v63 = vpop.f32.mrb[237].mxu1 }
 0x5f8   : > { %v7407_v25 = vpop.f32.mrb[238].mxu1  ;;  %v8284_v63 = vsub.f32 0.0, %v15051_v2 }
 0x5f9   : > { %v11993_v44 = vpop.eup %11992  ;;  %v7408_v21 = vadd.f32 %v7407_v25, %v15023_v50  ;;  %v7409_v34 = vpop.f32.mrb[239].mxu1  ;;  %v8285_v25 = vsub.f32 0.0, %v15055_v8 }
 0x5fa   : > { %v8166_v17 = vpop.f32.mrb[40].mxu0  ;;  %8540 = vrot.lane.b32.xlu0 %v11993_v44, %s12293_s26 }
 0x5fb   : > { %v11995_v43 = vpop.eup %11994  ;;  %v15173_v4 = vadd.f32 %v8166_v17, %v7397_v56  ;;  %v8168_v30 = vpop.f32.mrb[41].mxu0  ;;  %v11930_v17 = vld [vmem:[%s16456_s7 + $0x90] sm:$0xff]   ;;  %v8318_v2 = vmul.f32 1.442695, %v8285_v25 }
 0x5fc   : > { %v8169_v3 = vpop.f32.mrb[42].mxu0  ;;  %8542 = vrot.lane.b32.xlu1 %v11995_v43, %s12293_s26  ;;  %v8316_v43 = vmul.f32 1.442695, %v8284_v63 }
 0x5fd   : > { %v15176_v42 = vadd.f32 %v8169_v3, %v7400_v60  ;;  %v8171_v33 = vpop.f32.mrb[43].mxu0 }
 0x5fe   : > { %v7412_v40 = vpop.f32.mrb[240].mxu1  ;;  %11998 = vpow2.f32 %v8316_v43  ;;  %v8290_v43 = vsub.f32 0.0, %v15085_v26 }
 0x5ff   : > { %v7413_v50 = vadd.f32 %v7412_v40, %v15025_v29  ;;  %v7414_v39 = vpop.f32.mrb[241].mxu1  ;;  %12000 = vpow2.f32 %v8318_v2  ;;  %v8291_v2 = vsub.f32 0.0, %v15089_v32 }
 0x600   : > { %v7415_v36 = vpop.f32.mrb[242].mxu1  ;;  %v11931_v39 = vld [vmem:[%s16456_s7 + $0x98] sm:$0xff]  }
 0x601   : > { %v11997_v35 = vpop.eup %11996  ;;  %v7416_v38 = vadd.f32 %v7415_v36, %v15027_v10  ;;  %v7417_v56 = vpop.f32.mrb[243].mxu1  ;;  %v11928_v10 = vld [vmem:[%s16456_s7 + $0x80] sm:$0xff]  }
 0x602   : > { %v8174_v0 = vpop.f32.mrb[44].mxu0  ;;  %8544 = vrot.lane.b32.xlu1 %v11997_v35, %s12293_s26  ;;  %9773 = vmatpush1.bf16.msra.mxu1 %v11928_v10  ;;  %v8287_v35 = vsub.f32 0.0, %v15065_v41 }
 0x603   : > { %v15188_v29 = vadd.f32 %v8174_v0, %v7405_v16  ;;  %v8176_v51 = vpop.f32.mrb[45].mxu0  ;;  %v11929_v16 = vld [vmem:[%s16456_s7 + $0x88] sm:$0xff]   ;;  %9774 = vmatprep.subr.bf16.mxu1 %v16467_v24  ;;  %v11932_v0 = vld [vmem:[%s16456_s7 + $0xa0] sm:$0xff]  }
 0x604   : > { %v8177_v60 = vpop.f32.mrb[46].mxu0  ;;  %v8320_v51 = vmul.f32 1.442695, %v8286_v47 }
 0x605   : > { %v15190_v19 = vadd.f32 %v8177_v60, %v7408_v21  ;;  %v8179_v55 = vpop.f32.mrb[47].mxu0  ;;  %v8322_v60 = vmul.f32 1.442695, %v8287_v35  ;;  %v8330_v35 = vmul.f32 1.442695, %v8291_v2 }
 0x606   : > { %v7420_v37 = vpop.f32.mrb[244].mxu1  ;;  %9775 = vmatpush1.bf16.msra.mxu1 %v11929_v16  ;;  %12002 = vpow2.f32 %v8320_v51 }
 0x607   : > { %v7421_v12 = vadd.f32 %v7420_v37, %v15029_v58  ;;  %v7422_v7 = vpop.f32.mrb[245].mxu1  ;;  %9776 = vmatprep.subr.bf16.mxu1 %v16467_v24  ;;  %v8288_v37 = vsub.f32 0.0, %v15073_v49  ;;  %12004 = vpow2.f32 %v8322_v60 }
 0x608   : > { %v7423_v28 = vpop.f32.mrb[246].mxu1  ;;  %v11999_v63 = vpop.eup %11998 }
 0x609   : > { %v7424_v5 = vadd.f32 %v7423_v28, %v15031_v1  ;;  %v7425_v52 = vpop.f32.mrb[247].mxu1  ;;  %v11933_v28 = vld [vmem:[%s16456_s7 + $0xa8] sm:$0xff]  }
 0x60a   : > { %v8182_v23 = vpop.f32.mrb[48].mxu0  ;;  %9777 = vmatpush1.bf16.msra.mxu1 %v11930_v17 }
 0x60b   : > { %v15204_v44 = vadd.f32 %v8182_v23, %v7413_v50  ;;  %v8184_v58 = vpop.f32.mrb[49].mxu0  ;;  %9778 = vmatprep.subr.bf16.mxu1 %v16467_v24  ;;  %v12001_v23 = vpop.eup %12000 }
 0x60c   : > { %v8185_v21 = vpop.f32.mrb[50].mxu0  ;;  %v8381_v17 = vadd.f32 1.0, %v12001_v23  ;;  %v15267_v23 = vadd.f32 %v15048_v20, %v15173_v4 }
 0x60d   : > { %v15206_v34 = vadd.f32 %v8185_v21, %v7416_v38  ;;  %v8187_v1 = vpop.f32.mrb[51].mxu0  ;;  %v11934_v21 = vld [vmem:[%s16456_s7 + $0xb0] sm:$0xff]  }
 0x60e   : > { %v7428_v30 = vpop.f32.mrb[248].mxu1  ;;  %9779 = vmatpush1.bf16.msra.mxu1 %v11931_v39  ;;  %v8380_v1 = vadd.f32 1.0, %v11999_v63 }
 0x60f   : > { %v7429_v3 = vadd.f32 %v7428_v30, %v15033_v18  ;;  %v7430_v8 = vpop.f32.mrb[249].mxu1  ;;  %9780 = vmatprep.subr.bf16.mxu1 %v16467_v24  ;;  %v11935_v30 = vld [vmem:[%s16456_s7 + $0xb8] sm:$0xff]  }
 0x610   : > { %v7431_v33 = vpop.f32.mrb[250].mxu1 }
 0x611   : > { %v7432_v40 = vadd.f32 %v7431_v33, %v15035_v59  ;;  %v7433_v50 = vpop.f32.mrb[251].mxu1 }
 0x612   : > { %v8190_v36 = vpop.f32.mrb[52].mxu0  ;;  %9781 = vmatpush1.bf16.msra.mxu1 %v11932_v0  ;;  %v8328_v50 = vmul.f32 1.442695, %v8290_v43 }
 0x613   : > { %v15220_v18 = vadd.f32 %v8190_v36, %v7421_v12  ;;  %v8192_v38 = vpop.f32.mrb[53].mxu0  ;;  %9782 = vmatprep.subr.bf16.mxu1 %v16467_v24 }
 0x614   : > { %v8193_v56 = vpop.f32.mrb[54].mxu0 }
 0x615   : > { %v15222_v59 = vadd.f32 %v8193_v56, %v7424_v5  ;;  %v8195_v53 = vpop.f32.mrb[55].mxu0  ;;  %v8289_v5 = vsub.f32 0.0, %v15077_v57  ;;  %v8292_v56 = vsub.f32 0.0, %v15097_v11  ;;  %v15260_v11 = vadd.f32 %v15048_v20, %v15163_v14 }
 0x616   : > { %v7436_v31 = vpop.f32.mrb[252].mxu1  ;;  %9783 = vmatpush1.bf16.msra.mxu1 %v11933_v28  ;;  %v8293_v53 = vsub.f32 0.0, %v15101_v15 }
 0x617   : > { %v7437_v55 = vadd.f32 %v7436_v31, %v15039_v46  ;;  %v7438_v41 = vpop.f32.mrb[253].mxu1  ;;  %v8326_v57 = vmul.f32 1.442695, %v8289_v5  ;;  %9784 = vmatprep.subr.bf16.mxu1 %v16467_v24  ;;  %v8332_v31 = vmul.f32 1.442695, %v8292_v56 }
 0x618   : > { %v7439_v10 = vpop.f32.mrb[254].mxu1  ;;  %v8334_v41 = vmul.f32 1.442695, %v8293_v53 }
 0x619   : > { %v7440_v12 = vadd.f32 %v7439_v10, %v15041_v22  ;;  %v7441_v7 = vpop.f32.mrb[255].mxu1  ;;  %v8324_v22 = vmul.f32 1.442695, %v8288_v37 }
 0x61a   : > { %v8198_v52 = vpop.f32.mrb[56].mxu0  ;;  %9785 = vmatpush1.bf16.msra.mxu1 %v11934_v21 }
 0x61b   : > { %v15236_v46 = vadd.f32 %v8198_v52, %v7429_v3  ;;  %v8200_v16 = vpop.f32.mrb[57].mxu0  ;;  %12006 = vpow2.f32 %v8324_v22  ;;  %9786 = vmatprep.subr.bf16.mxu1 %v16467_v24 }
 0x61c   : > { %v8201_v49 = vpop.f32.mrb[58].mxu0  ;;  %12008 = vpow2.f32 %v8326_v57 }
 0x61d   : > { %v15238_v25 = vadd.f32 %v8201_v49, %v7432_v40  ;;  %v8203_v58 = vpop.f32.mrb[59].mxu0  ;;  %12010 = vrcp.f32 %v8380_v1  ;;  %v12003_v40 = vpop.eup %12002  ;;  %v8295_v49 = vsub.f32 0.0, %v15113_v61  ;;  %v8296_v1 = vsub.f32 0.0, %v15121_v13  ;;  %v9380_v61 = vld [vmem:[#allocation2 + $0x58] sm:$0x1] }
 0x61e   : > { %12012 = vrcp.f32 %v8381_v17  ;;  %v12005_v39 = vpop.eup %12004  ;;  %9787 = vmatpush1.bf16.msra.mxu1 %v11935_v30  ;;  %v8382_v32 = vadd.f32 1.0, %v12003_v40 }
 0x61f   : > { %10814 = vmatprep.subr.bf16.mxu1 %v16467_v24  ;;  %v8383_v38 = vadd.f32 1.0, %v12005_v39  ;;  %12014 = vpow2.f32 %v8328_v50  ;;  %v8338_v57 = vmul.f32 1.442695, %v8295_v49  ;;  %v8340_v50 = vmul.f32 1.442695, %v8296_v1 }
 0x620   : > { %12016 = vpow2.f32 %v8330_v35 }
 0x621   : > { %12018 = vrcp.f32 %v8382_v32 }
 0x622   : > { %v8206_v3 = vpop.f32.mrb[60].mxu0  ;;  %12020 = vrcp.f32 %v8383_v38 }
 0x623   : > { %v15250_v8 = vadd.f32 %v8206_v3, %v7437_v55  ;;  %v8208_v33 = vpop.f32.mrb[61].mxu0  ;;  %12022 = vpow2.f32 %v8332_v31  ;;  %v15273_v3 = vadd.f32 %v15048_v20, %v15176_v42  ;;  %v15281_v42 = vadd.f32 %v15048_v20, %v15188_v29 }
 0x624   : > { %v8209_v26 = vpop.f32.mrb[62].mxu0  ;;  %12024 = vpow2.f32 %v8334_v41  ;;  %v9399_v33 = vshll.u32 %v9380_v61, 16 }
 0x625   : > { %v15252_v47 = vadd.f32 %v8209_v26, %v7440_v12  ;;  %v8211_v36 = vpop.f32.mrb[63].mxu0  ;;  %v12007_v0 = vpop.eup %12006  ;;  %v8294_v12 = vsub.f32 0.0, %v15109_v54  ;;  %v8297_v26 = vsub.f32 0.0, %v15125_v27 }
 0x626   : > { %v12009_v51 = vpop.eup %12008  ;;  %v8384_v37 = vadd.f32 1.0, %v12007_v0 }
 0x627   : > { %v12011_v55 = vpop.eup %12010  ;;  %v8385_v28 = vadd.f32 1.0, %v12009_v51  ;;  %v8336_v63 = vmul.f32 1.442695, %v8294_v12  ;;  %v9401_v51 = vrot.slane %v9399_v33, 1 }
 0x628   : > { %v12013_v10 = vpop.eup %12012  ;;  %12026 = vrcp.f32 %v8384_v37 }
 0x629   : > { %v12015_v16 = vpop.eup %12014  ;;  %12028 = vrcp.f32 %v8385_v28  ;;  %v15291_v28 = vadd.f32 %v15048_v20, %v15190_v19 }
 0x62a   : > { %v12017_v54 = vpop.eup %12016  ;;  %12030 = vtanh.f32 %v15260_v11  ;;  %v8386_v58 = vadd.f32 1.0, %v12015_v16 }
 0x62b   : > { %v12019_v14 = vpop.eup %12018  ;;  %12032 = vpow2.f32 %v8336_v63  ;;  %v8387_v43 = vadd.f32 1.0, %v12017_v54  ;;  %v8299_v63 = vsub.f32 0.0, %v15137_v48  ;;  %v15307_v48 = vadd.f32 %v15048_v20, %v15204_v44 }
 0x62c   : > { %v8509_v60 = vpop.permute.xlu0 %8508  ;;  %v12021_v21 = vpop.eup %12020  ;;  %12034 = vtanh.f32 %v15267_v23  ;;  %v8300_v44 = vsub.f32 0.0, %v15148_v9  ;;  %v15326_v9 = vadd.f32 %v15048_v20, %v15220_v18 }
 0x62d   : > { %v8604_v5 = vmul.f32 %v12011_v55, %v8509_v60  ;;  %12036 = vrcp.f32 %v8386_v58  ;;  %v12023_v40 = vpop.eup %12022  ;;  %v8342_v55 = vmul.f32 1.442695, %v8297_v26 }
 0x62e   : > { %v8511_v7 = vpop.permute.xlu1 %8510  ;;  %12038 = vpow2.f32 %v8338_v57  ;;  %v12025_v39 = vpop.eup %12024  ;;  %v8388_v53 = vadd.f32 1.0, %v12023_v40  ;;  %v8346_v57 = vmul.f32 1.442695, %v8299_v63  ;;  %v8301_v40 = vsub.f32 0.0, %v15153_v45 }
 0x62f   : > { %v8605_v52 = vmul.f32 %v12013_v10, %v8511_v7  ;;  %12040 = vrcp.f32 %v8387_v43  ;;  %v8389_v60 = vadd.f32 1.0, %v12025_v39 }
 0x630   : > { %12042 = vtanh.f32 %v15273_v3 }
 0x631   : > { %v8636_v15 = vpack.c.bf16 %v8605_v52, %v8604_v5  ;;  %12044 = vpow2.f32 %v8340_v50  ;;  %v8298_v5 = vsub.f32 0.0, %v15133_v6 }
 0x632   : > { %v12027_v32 = vpop.eup %12026  ;;  %12046 = vtanh.f32 %v15281_v42 }
 0x633   : > { %8652 = vst.msk [vmem:[#allocation2 + $0x50] sm:$0xff] %vm334_vm0, %v8636_v15  ;;  %v12029_v56 = vpop.eup %12028  ;;  %12048 = vrcp.f32 %v8388_v53  ;;  %v8344_v58 = vmul.f32 1.442695, %v8298_v5 }
 0x634   : > { %v8513_v22 = vpop.permute.xlu0 %8512  ;;  %v12031_v31 = vpop.eup %12030  ;;  %12050 = vpow2.f32 %v8342_v55 }
 0x635   : > { %v8606_v30 = vmul.f32 %v12019_v14, %v8513_v22  ;;  %v12033_v29 = vpop.eup %12032  ;;  %12052 = vrcp.f32 %v8389_v60 }
 0x636   : > { %v8515_v17 = vpop.permute.xlu1 %8514  ;;  %v12035_v16 = vpop.eup %12034  ;;  %v8390_v22 = vadd.f32 1.0, %v12033_v29  ;;  %12054 = vtanh.f32 %v15291_v28 }
 0x637   : > { %v8607_v2 = vmul.f32 %v12021_v21, %v8515_v17  ;;  %v12037_v54 = vpop.eup %12036 }
 0x638   : > { %v12039_v6 = vpop.eup %12038  ;;  %12056 = vrcp.f32 %v8390_v22 }
 0x639   : > { %v8637_v4 = vpack.c.bf16 %v8607_v2, %v8606_v30  ;;  %v12041_v14 = vpop.eup %12040  ;;  %v8391_v17 = vadd.f32 1.0, %v12039_v6  ;;  %12058 = vtanh.f32 %v15307_v48  ;;  %v15313_v2 = vadd.f32 %v15048_v20, %v15206_v34 }
 0x63a   : > { %v9157_v13 = vld [vmem:[#allocation2 + $0x50] sm:$0xff]  ;;  %v12043_v21 = vpop.eup %12042  ;;  %12060 = vpow2.f32 %v8344_v58 }
 0x63b   : > { %8653 = vst.msk [vmem:[#allocation2 + $0x68] sm:$0xff] %vm334_vm0, %v8637_v4  ;;  %v9193_v36 = vshrl.u32 %v9157_v13, 16  ;;  %v9196_v35 = vshll.u32 %v9157_v13, 16  ;;  %9524 = vrot.lane.b32.xlu0 %v9157_v13, %s12293_s26  ;;  %v12045_v30 = vpop.eup %12044  ;;  %12062 = vpow2.f32 %v8346_v57 }
 0x63c   : > { %v8517_v38 = vpop.permute.xlu0 %8516  ;;  %v12047_v33 = vpop.eup %12046  ;;  %12064 = vrcp.f32 %v8391_v17  ;;  %v8392_v13 = vadd.f32 1.0, %v12045_v30 }
 0x63d   : > { %v9195_v27 = vrot.slane %v9193_v36, 7  ;;  %v9396_v0 = vrot.slane %v9196_v35, 1  ;;  %v8608_v12 = vmul.f32 %v12027_v32, %v8517_v38  ;;  %v12049_v26 = vpop.eup %12048  ;;  %12066 = vtanh.f32 %v15313_v2 }
 0x63e   : > { %v8519_v41 = vpop.permute.xlu1 %8518  ;;  %v12051_v34 = vpop.eup %12050  ;;  %v8350_v32 = vmul.f32 1.442695, %v8301_v40  ;;  %12068 = vrcp.f32 %v8392_v13 }
 0x63f   : > { %v15283_v10 = vor.u32 %v9196_v35, %v9195_v27  ;;  %v15285_v37 = vor.u32 %v9396_v0, %v9193_v36  ;;  %v8609_v7 = vmul.f32 %v12029_v56, %v8519_v41  ;;  %8546 = vrot.lane.b32.xlu0 %v12031_v31, %s12293_s26  ;;  %v12053_v39 = vpop.eup %12052  ;;  %v8348_v36 = vmul.f32 1.442695, %v8300_v44 }
 0x640   : > { %v12055_v35 = vpop.eup %12054  ;;  %v8393_v56 = vadd.f32 1.0, %v12051_v34  ;;  %12070 = vtanh.f32 %v15326_v9  ;;  %v15332_v0 = vadd.f32 %v15048_v20, %v15222_v59  ;;  %v15343_v59 = vadd.f32 %v15048_v20, %v15236_v46 }
 0x641   : > { %v8638_v52 = vpack.c.bf16 %v8609_v7, %v8608_v12  ;;  %v9402_v15 = vsel %vm6144_vm5, %v15285_v37, %v9401_v51  ;;  %12072 = vpow2.f32 %v8348_v36 }
 0x642   : > { %11713 = vmatprep.mubr.msk.bf16.mxu1 %vm334_vm0, %v9402_v15  ;;  %v15298_v49 = vld [vmem:[#allocation2 + $0x68] sm:$0xff]  ;;  %v12057_v18 = vpop.eup %12056  ;;  %12074 = vpow2.f32 %v8350_v32 }
 0x643   : > { %8654 = vst.msk [vmem:[#allocation2 + $0x80] sm:$0xff] %vm334_vm0, %v8638_v52  ;;  %9526 = vrot.lane.b32.xlu1 %v15298_v49, %s12293_s26  ;;  %8548 = vrot.lane.b32.xlu0 %v12035_v16, %s12293_s26  ;;  %v12059_v31 = vpop.eup %12058  ;;  %12076 = vrcp.f32 %v8393_v56  ;;  %v11936_v56 = vld [vmem:[%s16456_s7] sm:$0xff]  }
 0x644   : > { %v8521_v19 = vpop.permute.xlu0 %8520  ;;  %v12061_v55 = vpop.eup %12060  ;;  %12078 = vtanh.f32 %v15332_v0  ;;  %10046 = vmatpush1.bf16.msra.mxu0 %v11936_v56 }
 0x645   : > { %v8610_v61 = vmul.f32 %v12037_v54, %v8521_v19  ;;  %v12063_v41 = vpop.eup %12062  ;;  %v8394_v5 = vadd.f32 1.0, %v12061_v55  ;;  %12080 = vtanh.f32 %v15343_v59  ;;  %v15349_v54 = vadd.f32 %v15048_v20, %v15238_v25  ;;  %10047 = vmatprep.subr.bf16.mxu0 %v16467_v24 }
 0x646   : > { %v8523_v1 = vpop.permute.xlu1 %8522  ;;  %v12065_v7 = vpop.eup %12064  ;;  %v8395_v15 = vadd.f32 1.0, %v12063_v41  ;;  %v15360_v25 = vadd.f32 %v15048_v20, %v15250_v8 }
 0x647   : > { %v8611_v43 = vmul.f32 %v12041_v14, %v8523_v1  ;;  %8550 = vrot.lane.b32.xlu1 %v12043_v21, %s12293_s26  ;;  %v12067_v29 = vpop.eup %12066  ;;  %12082 = vrcp.f32 %v8394_v5 }
 0x648   : > { %v12069_v22 = vpop.eup %12068  ;;  %12084 = vrcp.f32 %v8395_v15 }
 0x649   : > { %v8639_v4 = vpack.c.bf16 %v8611_v43, %v8610_v61  ;;  %12086 = vtanh.f32 %v15349_v54 }
 0x64a   : > { %v15317_v50 = vld [vmem:[#allocation2 + $0x80] sm:$0xff]  ;;  %v12071_v46 = vpop.eup %12070  ;;  %12088 = vtanh.f32 %v15360_v25 }
 0x64b   : > { %8655 = vst.msk [vmem:[#allocation2 + $0x98] sm:$0xff] %vm334_vm0, %v8639_v4  ;;  %8552 = vrot.lane.b32.xlu1 %v12047_v33, %s12293_s26  ;;  %9528 = vrot.lane.b32.xlu0 %v15317_v50, %s12293_s26  ;;  %v12073_v14 = vpop.eup %12072  ;;  %v12280_v4 = vld [vmem:[%s16455_s6] ss:$0 sm:$0xff] }
 0x64c   : > { %v8525_v45 = vpop.permute.xlu0 %8524  ;;  %v12075_v58 = vpop.eup %12074  ;;  %v8396_v17 = vadd.f32 1.0, %v12073_v14  ;;  %v15368_v33 = vadd.f32 %v12280_v4, %v15252_v47  ;;  %v8302_v14 = vsub.f32 0.0, %v15161_v62  ;;  %v11946_v62 = vld [vmem:[%s16456_s7 + $0x28] sm:$0xff]  }
 0x64d   : > { %v8612_v53 = vmul.f32 %v12049_v26, %v8525_v45  ;;  %v12077_v57 = vpop.eup %12076  ;;  %v8397_v43 = vadd.f32 1.0, %v12075_v58  ;;  %v8303_v58 = vsub.f32 0.0, %v15260_v11  ;;  %v8306_v11 = vsub.f32 0.0, %v15281_v42 }
 0x64e   : > { %v8527_v38 = vpop.permute.xlu1 %8526  ;;  %v12079_v1 = vpop.eup %12078  ;;  %12090 = vrcp.f32 %v8396_v17  ;;  %v8304_v17 = vsub.f32 0.0, %v15267_v23 }
 0x64f   : > { %v8613_v27 = vmul.f32 %v12053_v39, %v8527_v38  ;;  %8554 = vrot.lane.b32.xlu0 %v12055_v35, %s12293_s26  ;;  %v12081_v8 = vpop.eup %12080  ;;  %12092 = vrcp.f32 %v8397_v43  ;;  %v8360_v4 = vmul.f32 1.442695, %v8306_v11 }
 0x650   : > { %12094 = vtanh.f32 %v15368_v33  ;;  %v8356_v43 = vmul.f32 1.442695, %v8304_v17 }
 0x651   : > { %v8640_v51 = vpack.c.bf16 %v8613_v27, %v8612_v53  ;;  %v12083_v26 = vpop.eup %12082  ;;  %v15387_v53 = vld [vmem:[#allocation2 + $0x38] sm:$0xff] }
 0x652   : > { %v15334_v60 = vld [vmem:[#allocation2 + $0x98] sm:$0xff]  ;;  %v12085_v34 = vpop.eup %12084 }
 0x653   : > { %8656 = vst.msk [vmem:[#allocation2 + $0xb0] sm:$0xff] %vm334_vm0, %v8640_v51  ;;  %9530 = vrot.lane.b32.xlu1 %v15334_v60, %s12293_s26  ;;  %8556 = vrot.lane.b32.xlu0 %v12059_v31, %s12293_s26  ;;  %v12087_v47 = vpop.eup %12086  ;;  %v8705_v51 = vshrl.u32 %v15387_v53, 16 }
 0x654   : > { %v8529_v12 = vpop.permute.xlu0 %8528  ;;  %v12089_v32 = vpop.eup %12088 }
 0x655   : > { %v8614_v16 = vmul.f32 %v12057_v18, %v8529_v12  ;;  %v8707_v12 = vrot.slane %v8705_v51, 7 }
 0x656   : > { %v8531_v52 = vpop.permute.xlu1 %8530 }
 0x657   : > { %v8615_v63 = vmul.f32 %v12065_v7, %v8531_v52  ;;  %8558 = vrot.lane.b32.xlu1 %v12067_v29, %s12293_s26  ;;  %v8708_v7 = vshll.u32 %v15387_v53, 16 }
 0x658   : > { %v12091_v27 = vpop.eup %12090 }
 0x659   : > { %v8641_v6 = vpack.c.bf16 %v8615_v63, %v8614_v16  ;;  %v12093_v31 = vpop.eup %12092  ;;  %v15397_v52 = vor.u32 %v8708_v7, %v8707_v12  ;;  %v11938_v63 = vld [vmem:[%s16456_s7 + $0x8] sm:$0xff]  }
 0x65a   : > { %v15351_v19 = vld [vmem:[#allocation2 + $0xb0] sm:$0xff]  ;;  %v12095_v55 = vpop.eup %12094  ;;  %10048 = vmatpush1.bf16.msra.mxu0 %v11938_v63  ;;  %v9382_v63 = vld [vmem:[#allocation2 + $0x88] sm:$0x1] }
 0x65b   : > { %8657 = vst.msk [vmem:[#allocation2 + $0xc8] sm:$0xff] %vm334_vm0, %v8641_v6  ;;  %8560 = vrot.lane.b32.xlu1 %v12071_v46, %s12293_s26  ;;  %9532 = vrot.lane.b32.xlu0 %v15351_v19, %s12293_s26  ;;  %v11940_v6 = vld [vmem:[%s16456_s7 + $0x10] sm:$0xff]   ;;  %v11942_v46 = vld [vmem:[%s16456_s7 + $0x18] sm:$0xff]  }
 0x65c   : > { %v8533_v21 = vpop.permute.xlu0 %8532  ;;  %10049 = vmatprep.subr.bf16.mxu0 %v16467_v24 }
 0x65d   : > { %v8616_v30 = vmul.f32 %v12069_v22, %v8533_v21  ;;  %v8352_v21 = vmul.f32 1.442695, %v8302_v14 }
 0x65e   : > { %v8535_v61 = vpop.permute.xlu1 %8534  ;;  %10050 = vmatpush1.bf16.msra.mxu0 %v11940_v6  ;;  %v11937_v6 = vld [vmem:[%s16456_s7 + $0xc0] sm:$0xff]  }
 0x65f   : > { %v8617_v44 = vmul.f32 %v12077_v57, %v8535_v61  ;;  %8562 = vrot.lane.b32.xlu0 %v12079_v1, %s12293_s26  ;;  %10051 = vmatprep.subr.bf16.mxu0 %v16467_v24  ;;  %v8354_v57 = vmul.f32 1.442695, %v8303_v58  ;;  %v11944_v1 = vld [vmem:[%s16456_s7 + $0x20] sm:$0xff]   ;;  %12096 = vpow2.f32 %v8352_v21  ;;  %v8305_v61 = vsub.f32 0.0, %v15273_v3 }
 0x661   : > { %v8642_v20 = vpack.c.bf16 %v8617_v44, %v8616_v30  ;;  %12098 = vpow2.f32 %v8354_v57  ;;  %v8358_v30 = vmul.f32 1.442695, %v8305_v61  ;;  %v8307_v44 = vsub.f32 0.0, %v15291_v28  ;;  %v11948_v28 = vld [vmem:[%s16456_s7 + $0x30] sm:$0xff]  }
 0x662   : > { %v15370_v40 = vld [vmem:[#allocation2 + $0xc8] sm:$0xff]  ;;  %10052 = vmatpush1.bf16.msra.mxu0 %v11942_v46  ;;  %12100 = vpow2.f32 %v8356_v43 }
 0x663   : > { %8658 = vst.msk [vmem:[#allocation2 + $0xe0] sm:$0xff] %vm334_vm0, %v8642_v20  ;;  %9534 = vrot.lane.b32.xlu1 %v15370_v40, %s12293_s26  ;;  %8564 = vrot.lane.b32.xlu0 %v12081_v8, %s12293_s26  ;;  %12102 = vpow2.f32 %v8358_v30  ;;  %v8362_v8 = vmul.f32 1.442695, %v8307_v44 }
 0x664   : > { %v8537_v13 = vpop.permute.xlu0 %8536  ;;  %10053 = vmatprep.subr.bf16.mxu0 %v16467_v24  ;;  %12104 = vpow2.f32 %v8360_v4  ;;  %v9217_v4 = vshrl.u32 %v15317_v50, 16 }
 0x665   : > { %v8618_v39 = vmul.f32 %v12083_v26, %v8537_v13  ;;  %v9156_v26 = vld [vmem:[#allocation2 + $0x48] sm:$0x80] }
 0x666   : > { %v8539_v45 = vpop.permute.xlu1 %8538  ;;  %10054 = vmatpush1.bf16.msra.mxu0 %v11944_v1  ;;  %v9189_v42 = vshrl.u32 %v9156_v26, 16  ;;  %v9413_v1 = vshll.u32 %v9382_v63, 16  ;;  %v9160_v26 = vld [vmem:[#allocation2 + $0x78] sm:$0x80] }
 0x667   : > { %v8619_v36 = vmul.f32 %v12085_v34, %v8539_v45  ;;  %8566 = vrot.lane.b32.xlu1 %v12087_v47, %s12293_s26  ;;  %10055 = vmatprep.subr.bf16.mxu0 %v16467_v24  ;;  %v8308_v34 = vsub.f32 0.0, %v15307_v48  ;;  %v9208_v47 = vshll.u32 %v15298_v49, 16  ;;  %v9381_v45 = vld [vmem:[#allocation2 + $0x70] sm:$0x1] }
 0x669   : > { %v8643_v35 = vpack.c.bf16 %v8619_v36, %v8618_v39  ;;  %v12097_v23 = vpop.eup %12096  ;;  %v8309_v36 = vsub.f32 0.0, %v15313_v2  ;;  %v8364_v56 = vmul.f32 1.442695, %v8308_v34  ;;  %v9158_v2 = vld [vmem:[#allocation2 + $0x60] sm:$0x80] }
 0x66a   : > { %v15378_v38 = vld [vmem:[#allocation2 + $0xe0] sm:$0xff]  ;;  %10056 = vmatpush1.bf16.msra.mxu0 %v11946_v62  ;;  %v8398_v20 = vadd.f32 1.0, %v12097_v23  ;;  %v9201_v58 = vshrl.u32 %v9158_v2, 16 }
 0x66b   : > { %8659 = vst.msk [vmem:[#allocation2 + $0xf8] sm:$0xff] %vm334_vm0, %v8643_v35  ;;  %8568 = vrot.lane.b32.xlu1 %v12089_v32, %s12293_s26  ;;  %9536 = vrot.lane.b32.xlu0 %v15378_v38, %s12293_s26  ;;  %v12099_v3 = vpop.eup %12098  ;;  %v9406_v35 = vshll.u32 %v9381_v45, 16 }
 0x66c   : > { %v8541_v18 = vpop.permute.xlu0 %8540  ;;  %10057 = vmatprep.subr.bf16.mxu0 %v16467_v24  ;;  %v8399_v13 = vadd.f32 1.0, %v12099_v3  ;;  %12106 = vrcp.f32 %v8398_v20  ;;  %v12101_v39 = vpop.eup %12100 }
 0x66d   : > { %v8620_v29 = vmul.f32 %v12091_v27, %v8541_v18  ;;  %12108 = vpow2.f32 %v8362_v8  ;;  %v12103_v32 = vpop.eup %12102  ;;  %v9403_v27 = vrot.slane %v9208_v47, 1  ;;  %v8400_v48 = vadd.f32 1.0, %v12101_v39 }
 0x66e   : > { %v8543_v41 = vpop.permute.xlu1 %8542  ;;  %12110 = vrcp.f32 %v8399_v13  ;;  %10058 = vmatpush1.bf16.msra.mxu0 %v11948_v28  ;;  %v9205_v18 = vshrl.u32 %v15298_v49, 16  ;;  %v9408_v12 = vrot.slane %v9406_v35, 1  ;;  %v12105_v21 = vpop.eup %12104  ;;  %v9203_v8 = vrot.slane %v9201_v58, 7 }
 0x66f   : > { %v8621_v5 = vmul.f32 %v12093_v31, %v8543_v41  ;;  %8570 = vrot.lane.b32.xlu0 %v12095_v55, %s12293_s26  ;;  %v9191_v31 = vrot.slane %v9189_v42, 7  ;;  %10059 = vmatprep.subr.bf16.mxu0 %v16467_v24  ;;  %v8401_v55 = vadd.f32 1.0, %v12103_v32  ;;  %v8366_v41 = vmul.f32 1.442695, %v8309_v36 }
 0x670   : > { %12112 = vpow2.f32 %v8364_v56  ;;  %v9207_v49 = vrot.slane %v9205_v18, 7  ;;  %v8402_v44 = vadd.f32 1.0, %v12105_v21  ;;  %v9415_v42 = vrot.slane %v9413_v1, 1  ;;  %v9383_v56 = vld [vmem:[#allocation2 + $0xa0] sm:$0x1] }
 0x671   : > { %v8644_v15 = vpack.c.bf16 %v8621_v5, %v8620_v29  ;;  %v8310_v29 = vsub.f32 0.0, %v15326_v9  ;;  %v15443_v5 = vor.u32 %v9403_v27, %v9205_v18  ;;  %12114 = vrcp.f32 %v8400_v48  ;;  %v11941_v27 = vld [vmem:[%s16456_s7 + $0xd0] sm:$0xff]  }
 0x672   : > { %v15399_v16 = vld [vmem:[#allocation2 + $0xf8] sm:$0xff]  ;;  %v9199_v46 = vsel %vm5935_vm6, %v9191_v31, %v15283_v10  ;;  %12116 = vpow2.f32 %v8366_v41  ;;  %v8311_v9 = vsub.f32 0.0, %v15332_v0  ;;  %v11939_v0 = vld [vmem:[%s16456_s7 + $0xc8] sm:$0xff]   ;;  %v15461_v3 = vor.u32 %v9208_v47, %v9207_v49 }
 0x673   : > { %8660 = vst.msk [vmem:[#allocation2 + $0x110] sm:$0xff] %vm334_vm0, %v8644_v15  ;;  %9538 = vrot.lane.b32.xlu1 %v15399_v16, %s12293_s26  ;;  %v9220_v15 = vshll.u32 %v15317_v50, 16  ;;  %12118 = vrcp.f32 %v8401_v55  ;;  %v8368_v61 = vmul.f32 1.442695, %v8310_v29  ;;  %v9409_v62 = vsel %vm6144_vm5, %v15443_v5, %v9408_v12  ;;  %v11950_v47 = vld [vmem:[%s16456_s7 + $0x38] sm:$0xff]  }
 0x674   : > { %v8545_v30 = vpop.permute.xlu1 %8544  ;;  %v8370_v13 = vmul.f32 1.442695, %v8311_v9  ;;  %v9232_v35 = vshll.u32 %v15334_v60, 16  ;;  %v9213_v32 = vshrl.u32 %v9160_v26, 16  ;;  %v8312_v18 = vsub.f32 0.0, %v15343_v59  ;;  %10060 = vmatpush1.bf16.msra.mxu0 %v11950_v47  ;;  %v11945_v26 = vld [vmem:[%s16456_s7 + $0xe0] sm:$0xff]  }
 0x675   : > { %v9410_v43 = vrot.slane %v9220_v15, 1  ;;  %12120 = vpow2.f32 %v8368_v61  ;;  %v9219_v31 = vrot.slane %v9217_v4, 7  ;;  %v9211_v55 = vsel %vm5935_vm6, %v9203_v8, %v15461_v3  ;;  %10061 = vmatprep.subr.bf16.mxu0 %v16467_v24  ;;  %v9162_v61 = vld [vmem:[#allocation2 + $0x90] sm:$0x80]  ;;  %v9384_v8 = vld [vmem:[#allocation2 + $0xb8] sm:$0x1] }
 0x676   : > { %v12107_v17 = vpop.eup %12106  ;;  %12122 = vrcp.f32 %v8402_v44  ;;  %v8313_v12 = vsub.f32 0.0, %v15349_v54  ;;  %v9417_v59 = vrot.slane %v9232_v35, 1  ;;  %v9420_v49 = vshll.u32 %v9383_v56, 16  ;;  %v11943_v54 = vld [vmem:[%s16456_s7 + $0xd8] sm:$0xff]  }
 0x677   : > { %v12109_v11 = vpop.eup %12108  ;;  %v8622_v34 = vmul.f32 %v12107_v17, %v8545_v30  ;;  %v15465_v36 = vor.u32 %v9410_v43, %v9217_v4  ;;  %12124 = vpow2.f32 %v8370_v13  ;;  %v8372_v21 = vmul.f32 1.442695, %v8312_v18 }
 0x678   : > { %v12111_v23 = vpop.eup %12110  ;;  %v8403_v39 = vadd.f32 1.0, %v12109_v11  ;;  %v15492_v9 = vor.u32 %v9220_v15, %v9219_v31  ;;  %v9215_v17 = vrot.slane %v9213_v32, 7  ;;  %v8374_v43 = vmul.f32 1.442695, %v8313_v12  ;;  %v11952_v15 = vld [vmem:[%s16456_s7 + $0x40] sm:$0xff]  }
 0x679   : > { %v9422_v44 = vrot.slane %v9420_v49, 1  ;;  %10062 = vmatpush1.bf16.msra.mxu0 %v11952_v15  ;;  %v9427_v18 = vshll.u32 %v9384_v8, 16 }
 0x67a   : > { %v15408_v22 = vld [vmem:[#allocation2 + $0x110] sm:$0xff]  ;;  %v12113_v48 = vpop.eup %12112  ;;  %12126 = vrcp.f32 %v8403_v39  ;;  %10063 = vmatprep.subr.bf16.mxu0 %v16467_v24 }
 0x67b   : > { %9540 = vrot.lane.b32.xlu0 %v15408_v22, %s12293_s26  ;;  %v12115_v29 = vpop.eup %12114 }
 0x6ad   : > { %v9525_v14 = vpop.permute.xlu0 %9524 }
 0x6ae   : > { %v9558_v57 = vsel %vm334_vm0, %v9199_v46, %v9525_v14  ;;  %v12117_v46 = vpop.eup %12116  ;;  %v8404_v14 = vadd.f32 1.0, %v12113_v48 }
 0x6af   : > { %9797 = vmatmul.mubr.bf16.vlgmr.msra.gmra.mrb[0].mxu1 %v9558_v57  ;;  %v12119_v58 = vpop.eup %12118  ;;  %v9229_v57 = vshrl.u32 %v15334_v60, 16  ;;  %v8405_v11 = vadd.f32 1.0, %v12117_v46 }
 0x6b0   : > { %11714 = vmatprep.mubr.msk.bf16.mxu1 %vm334_vm0, %v9409_v62  ;;  %10815 = vmatpush1.bf16.msra.mxu1 %v11937_v6  ;;  %v9416_v6 = vsel %vm6144_vm5, %v15465_v36, %v9415_v42  ;;  %12128 = vrcp.f32 %v8404_v14  ;;  %v12121_v13 = vpop.eup %12120  ;;  %v9223_v42 = vsel %vm5935_vm6, %v9215_v17, %v15492_v9 }
 0x6b1   : > { %v8547_v20 = vpop.permute.xlu0 %8546  ;;  %10816 = vmatprep.subr.bf16.mxu1 %v16467_v24  ;;  %12130 = vpow2.f32 %v8372_v21  ;;  %v12123_v56 = vpop.eup %12122 }
 0x6b2   : > { %v8623_v45 = vmul.f32 %v12111_v23, %v8547_v20  ;;  %v9244_v23 = vshll.u32 %v15351_v19, 16  ;;  %v9225_v20 = vshrl.u32 %v9162_v61, 16  ;;  %12132 = vpow2.f32 %v8374_v43  ;;  %v12125_v31 = vpop.eup %12124  ;;  %v11954_v43 = vld [vmem:[%s16456_s7 + $0x48] sm:$0xff]  }
 0x6b3   : > { %12134 = vrcp.f32 %v8405_v11  ;;  %v9429_v61 = vrot.slane %v9427_v18, 1  ;;  %v11949_v11 = vld [vmem:[%s16456_s7 + $0xf0] sm:$0xff]   ;;  %10064 = vmatpush1.bf16.msra.mxu0 %v11954_v43 }
 0x6b4   : > { %v8645_v28 = vpack.c.bf16 %v8623_v45, %v8622_v34  ;;  %10817 = vmatpush1.bf16.msra.mxu1 %v11939_v0  ;;  %v15496_v0 = vor.u32 %v9417_v59, %v9229_v57  ;;  %v8314_v34 = vsub.f32 0.0, %v15360_v25  ;;  %v9231_v45 = vrot.slane %v9229_v57, 7  ;;  %v9164_v57 = vld [vmem:[#allocation2 + $0xa8] sm:$0x80]  ;;  %10065 = vmatprep.subr.bf16.mxu0 %v16467_v24 }
 0x6b5   : > { %v9527_v41 = vpop.permute.xlu1 %9526  ;;  %10818 = vmatprep.subr.bf16.mxu1 %v16467_v24  ;;  %v8549_v63 = vpop.permute.xlu0 %8548  ;;  %v9227_v46 = vrot.slane %v9225_v20, 7  ;;  %v9237_v8 = vshrl.u32 %v9164_v57, 16 }
 0x6b6   : > { %8661 = vst.msk [vmem:[#allocation2 + $0x128] sm:$0xff] %vm334_vm0, %v8645_v28  ;;  %v9562_v2 = vsel %vm334_vm0, %v9211_v55, %v9527_v41  ;;  %v8624_v30 = vmul.f32 %v12115_v29, %v8549_v63  ;;  %v8315_v28 = vsub.f32 0.0, %v15368_v33  ;;  %v9423_v33 = vsel %vm6144_vm5, %v15496_v0, %v9422_v44  ;;  %v12127_v29 = vpop.eup %12126 }
 0x6b7   : > { %9805 = vmatmul.mubr.bf16.gmra.mrb[4].mxu1 %v9562_v2  ;;  %v8406_v55 = vadd.f32 1.0, %v12121_v13  ;;  %v11947_v2 = vld [vmem:[%s16456_s7 + $0xe8] sm:$0xff]   ;;  %v8376_v59 = vmul.f32 1.442695, %v8314_v34  ;;  %v15531_v63 = vor.u32 %v9232_v35, %v9231_v45  ;;  %v9256_v35 = vshll.u32 %v15370_v40, 16 }
 0x6b8   : > { %11715 = vmatprep.mubr.msk.bf16.mxu1 %vm334_vm0, %v9416_v6  ;;  %10819 = vmatpush1.bf16.msra.mxu1 %v11941_v27  ;;  %v9424_v27 = vrot.slane %v9244_v23, 1  ;;  %v9241_v6 = vshrl.u32 %v15351_v19, 16  ;;  %v8378_v14 = vmul.f32 1.442695, %v8315_v28 }
 0x6b9   : > { %v8551_v1 = vpop.permute.xlu1 %8550  ;;  %10820 = vmatprep.subr.bf16.mxu1 %v16467_v24  ;;  %12136 = vrcp.f32 %v8406_v55  ;;  %v9235_v15 = vsel %vm5935_vm6, %v9227_v46, %v15531_v63  ;;  %v9431_v45 = vrot.slane %v9256_v35, 1 }
 0x6ba   : > { %v8625_v62 = vmul.f32 %v12119_v58, %v8551_v1  ;;  %v8407_v1 = vadd.f32 1.0, %v12125_v31  ;;  %v15539_v17 = vor.u32 %v9424_v27, %v9241_v6  ;;  %12138 = vpow2.f32 %v8376_v59 }
 0x6bb   : > { %v9243_v44 = vrot.slane %v9241_v6, 7  ;;  %12140 = vpow2.f32 %v8378_v14  ;;  %v9239_v31 = vrot.slane %v9237_v8, 7 }
 0x6bc   : > { %v8646_v4 = vpack.c.bf16 %v8625_v62, %v8624_v30  ;;  %10821 = vmatpush1.bf16.msra.mxu1 %v11943_v54  ;;  %v9385_v62 = vld [vmem:[#allocation2 + $0xd0] sm:$0x1]  ;;  %12142 = vrcp.f32 %v8407_v1 }
 0x6bd   : > { %v9529_v39 = vpop.permute.xlu0 %9528  ;;  %v15508_v47 = vld [vmem:[#allocation2 + $0x128] sm:$0xff]  ;;  %10822 = vmatprep.subr.bf16.mxu1 %v16467_v24  ;;  %v8553_v48 = vpop.permute.xlu1 %8552  ;;  %v9434_v28 = vshll.u32 %v9385_v62, 16 }
 0x6be   : > { %8662 = vst.msk [vmem:[#allocation2 + $0x140] sm:$0xff] %vm334_vm0, %v8646_v4  ;;  %v9566_v32 = vsel %vm334_vm0, %v9223_v42, %v9529_v39  ;;  %9542 = vrot.lane.b32.xlu1 %v15508_v47, %s12293_s26  ;;  %v9301_v25 = vshrl.u32 %v15508_v47, 16  ;;  %v9304_v12 = vshll.u32 %v15508_v47, 16  ;;  %v8626_v54 = vmul.f32 %v12123_v56, %v8553_v48  ;;  %v11951_v56 = vld [vmem:[%s16456_s7 + $0xf8] sm:$0xff]  }
 0x6bf   : > { %9813 = vmatmul.mubr.bf16.gmra.mrb[8].mxu1 %v9566_v32  ;;  %v9430_v39 = vsel %vm6144_vm5, %v15539_v17, %v9429_v61  ;;  %v15568_v48 = vor.u32 %v9244_v23, %v9243_v44  ;;  %v9436_v46 = vrot.slane %v9434_v28, 1  ;;  %v11953_v23 = vld [vmem:[%s16456_s7 + $0x100] sm:$0xff]  }
 0x6c0   : > { %v9303_v41 = vrot.slane %v9301_v25, 7  ;;  %11716 = vmatprep.mubr.msk.bf16.mxu1 %vm334_vm0, %v9423_v33  ;;  %10823 = vmatpush1.bf16.msra.mxu1 %v11945_v26  ;;  %v12129_v26 = vpop.eup %12128  ;;  %v9253_v33 = vshrl.u32 %v15370_v40, 16 }
 0x6c1   : > { %v8555_v49 = vpop.permute.xlu0 %8554  ;;  %10824 = vmatprep.subr.bf16.mxu1 %v16467_v24  ;;  %v12131_v34 = vpop.eup %12130  ;;  %v9247_v57 = vsel %vm5935_vm6, %v9239_v31, %v15568_v48 }
 0x6c2   : > { %v15537_v58 = vor.u32 %v9304_v12, %v9303_v41  ;;  %v8627_v21 = vmul.f32 %v12127_v29, %v8555_v49  ;;  %v12133_v32 = vpop.eup %12132  ;;  %v8408_v55 = vadd.f32 1.0, %v12131_v34  ;;  %v9166_v29 = vld [vmem:[#allocation2 + $0xc0] sm:$0x80]  ;;  %v15572_v6 = vor.u32 %v9431_v45, %v9253_v33 }
 0x6c3   : > { %v12135_v27 = vpop.eup %12134  ;;  %v8409_v59 = vadd.f32 1.0, %v12133_v32  ;;  %v9268_v49 = vshll.u32 %v15378_v38, 16  ;;  %v9249_v43 = vshrl.u32 %v9166_v29, 16  ;;  %v9387_v29 = vld [vmem:[#allocation2 + $0x100] sm:$0x1] }
 0x6c4   : > { %v8647_v30 = vpack.c.bf16 %v8627_v21, %v8626_v54  ;;  %10825 = vmatpush1.bf16.msra.mxu1 %v11947_v2  ;;  %v9386_v54 = vld [vmem:[#allocation2 + $0xe8] sm:$0x1]  ;;  %v9255_v21 = vrot.slane %v9253_v33, 7  ;;  %12144 = vrcp.f32 %v8408_v55  ;;  %v9168_v33 = vld [vmem:[#allocation2 + $0xd8] sm:$0x80]  ;;  %v9280_v55 = vshll.u32 %v15399_v16, 16 }
 0x6c5   : > { %v9531_v4 = vpop.permute.xlu1 %9530  ;;  %v15550_v20 = vld [vmem:[#allocation2 + $0x140] sm:$0xff]  ;;  %10826 = vmatprep.subr.bf16.mxu1 %v16467_v24  ;;  %v8557_v42 = vpop.permute.xlu0 %8556  ;;  %12146 = vrcp.f32 %v8409_v59  ;;  %v9438_v44 = vrot.slane %v9268_v49, 1  ;;  %v9441_v8 = vshll.u32 %v9386_v54, 16  ;;  %v9251_v28 = vrot.slane %v9249_v43, 7  ;;  %v11957_v59 = vld [vmem:[%s16456_s7 + $0x110] sm:$0xff]  }
 0x6c6   : > { %8663 = vst.msk [vmem:[#allocation2 + $0x158] sm:$0xff] %vm334_vm0, %v8647_v30  ;;  %v9570_v13 = vsel %vm334_vm0, %v9235_v15, %v9531_v4  ;;  %9544 = vrot.lane.b32.xlu0 %v15550_v20, %s12293_s26  ;;  %v8628_v41 = vmul.f32 %v12129_v26, %v8557_v42  ;;  %v12137_v30 = vpop.eup %12136  ;;  %v9437_v4 = vsel %vm6144_vm5, %v15572_v6, %v9436_v46  ;;  %v9265_v42 = vshrl.u32 %v15378_v38, 16 }
 0x6c7   : > { %9821 = vmatmul.mubr.bf16.gmra.mrb[12].mxu1 %v9570_v13  ;;  %v11955_v13 = vld [vmem:[%s16456_s7 + $0x108] sm:$0xff]   ;;  %v15597_v45 = vor.u32 %v9256_v35, %v9255_v21  ;;  %v11956_v35 = vld [vmem:[%s16456_s7 + $0x50] sm:$0xff]   ;;  %v9261_v21 = vshrl.u32 %v9168_v33, 16 }
 0x6c8   : > { %11717 = vmatprep.mubr.msk.bf16.mxu1 %vm334_vm0, %v9430_v39  ;;  %10827 = vmatpush1.bf16.msra.mxu1 %v11949_v11  ;;  %v12139_v11 = vpop.eup %12138  ;;  %v15601_v31 = vor.u32 %v9438_v44, %v9265_v42  ;;  %v9267_v46 = vrot.slane %v9265_v42, 7 }
 0x6c9   : > { %v8559_v18 = vpop.permute.xlu1 %8558  ;;  %10828 = vmatprep.subr.bf16.mxu1 %v16467_v24  ;;  %v12141_v26 = vpop.eup %12140  ;;  %v8410_v32 = vadd.f32 1.0, %v12139_v11  ;;  %10066 = vmatpush1.bf16.msra.mxu0 %v11956_v35 }
 0x6ca   : > { %v8629_v2 = vmul.f32 %v12135_v27, %v8559_v18  ;;  %v12143_v34 = vpop.eup %12142  ;;  %v8411_v18 = vadd.f32 1.0, %v12141_v26  ;;  %10067 = vmatprep.subr.bf16.mxu0 %v16467_v24  ;;  %v9263_v26 = vrot.slane %v9261_v21, 7 }
 0x6cb   : > { %12148 = vrcp.f32 %v8410_v32  ;;  %v9292_v32 = vshll.u32 %v15408_v22, 16 }
 0x6cc   : > { %v8648_v14 = vpack.c.bf16 %v8629_v2, %v8628_v41  ;;  %10829 = vmatpush1.bf16.msra.mxu1 %v11951_v56  ;;  %v9443_v41 = vrot.slane %v9441_v8, 1  ;;  %12150 = vrcp.f32 %v8411_v18 }
 0x6cd   : > { %v9533_v1 = vpop.permute.xlu0 %9532  ;;  %v15580_v61 = vld [vmem:[#allocation2 + $0x158] sm:$0xff]  ;;  %10830 = vmatprep.subr.bf16.mxu1 %v16467_v24  ;;  %v8561_v15 = vpop.permute.xlu1 %8560 }
 0x6ce   : > { %8664 = vst.msk [vmem:[#allocation2 + $0x170] sm:$0xff] %vm334_vm0, %v8648_v14  ;;  %v9574_v62 = vsel %vm334_vm0, %v9247_v57, %v9533_v1  ;;  %9546 = vrot.lane.b32.xlu1 %v15580_v61, %s12293_s26  ;;  %v8630_v56 = vmul.f32 %v12137_v30, %v8561_v15  ;;  %v9259_v14 = vsel %vm5935_vm6, %v9251_v28, %v15597_v45  ;;  %v9445_v1 = vrot.slane %v9280_v55, 1  ;;  %v12145_v11 = vpop.eup %12144 }
 0x6cf   : > { %9829 = vmatmul.mubr.bf16.gmra.mrb[16].mxu1 %v9574_v62  ;;  %v9444_v30 = vsel %vm6144_vm5, %v15601_v31, %v9443_v41  ;;  %v9448_v62 = vshll.u32 %v9387_v29, 16  ;;  %v12147_v44 = vpop.eup %12146  ;;  %v15627_v15 = vor.u32 %v9268_v49, %v9267_v46  ;;  %v11958_v49 = vld [vmem:[%s16456_s7 + $0x58] sm:$0xff]  }
 0x6d0   : > { %11718 = vmatprep.mubr.msk.bf16.mxu1 %vm334_vm0, %v9437_v4  ;;  %10831 = vmatpush1.bf16.msra.mxu1 %v11953_v23  ;;  %v9277_v4 = vshrl.u32 %v15399_v16, 16  ;;  %v9388_v41 = vld [vmem:[#allocation2 + $0x118] sm:$0x1] }
 0x6d1   : > { %v8563_v39 = vpop.permute.xlu0 %8562  ;;  %10832 = vmatprep.subr.bf16.mxu1 %v16467_v24  ;;  %10068 = vmatpush1.bf16.msra.mxu0 %v11958_v49  ;;  %v9389_v49 = vld [vmem:[#allocation2 + $0x130] sm:$0x1] }
 0x6d2   : > { %v8631_v27 = vmul.f32 %v12143_v34, %v8563_v39  ;;  %v8908_v34 = vrot.slane %v8708_v7, 1  ;;  %v15633_v28 = vor.u32 %v9445_v1, %v9277_v4  ;;  %v9279_v35 = vrot.slane %v9277_v4, 7 }
 0x6d4   : > { %v8649_v2 = vpack.c.bf16 %v8631_v27, %v8630_v56  ;;  %10833 = vmatpush1.bf16.msra.mxu1 %v11955_v13  ;;  %v9170_v13 = vld [vmem:[#allocation2 + $0xf0] sm:$0x80]  ;;  %v9450_v56 = vrot.slane %v9448_v62, 1  ;;  %v8892_v27 = vld [vmem:[#allocation2 + $0x40] sm:$0x1]  ;;  %v8909_v29 = vor.u32 %v8908_v34, %v8705_v51  ;;  %v11959_v51 = vld [vmem:[%s16456_s7 + $0x118] sm:$0xff]   ;;  %v15657_v62 = vor.u32 %v9280_v55, %v9279_v35 }
 0x6d5   : > { %v9535_v54 = vpop.permute.xlu1 %9534  ;;  %v15612_v23 = vld [vmem:[#allocation2 + $0x170] sm:$0xff]  ;;  %10834 = vmatprep.subr.bf16.mxu1 %v16467_v24  ;;  %v8565_v43 = vpop.permute.xlu0 %8564  ;;  %v9273_v18 = vshrl.u32 %v9170_v13, 16  ;;  %v9172_v34 = vld [vmem:[#allocation2 + $0x108] sm:$0x80] }
 0x6d6   : > { %8665 = vst.msk [vmem:[#allocation2 + $0x188] sm:$0xff] %vm334_vm0, %v8649_v2  ;;  %v9578_v57 = vsel %vm334_vm0, %v9259_v14, %v9535_v54  ;;  %9548 = vrot.lane.b32.xlu0 %v15612_v23, %s12293_s26  ;;  %v8632_v42 = vmul.f32 %v12145_v11, %v8565_v43  ;;  %v9452_v14 = vrot.slane %v9292_v32, 1  ;;  %v9451_v21 = vsel %vm6144_vm5, %v15633_v28, %v9450_v56  ;;  %v12149_v43 = vpop.eup %12148 }
 0x6d7   : > { %9837 = vmatmul.mubr.bf16.gmra.mrb[20].mxu1 %v9578_v57  ;;  %v9455_v57 = vshll.u32 %v9388_v41, 16  ;;  %v9289_v11 = vshrl.u32 %v15408_v22, 16  ;;  %v9275_v4 = vrot.slane %v9273_v18, 7  ;;  %v9285_v18 = vshrl.u32 %v9172_v34, 16 }
 0x6d8   : > { %11719 = vmatprep.mubr.msk.bf16.mxu1 %vm334_vm0, %v9444_v30  ;;  %10835 = vmatpush1.bf16.msra.mxu1 %v11957_v59  ;;  %v8911_v59 = vshll.u32 %v8892_v27, 16  ;;  %v12151_v30 = vpop.eup %12150 }
 0x6d9   : > { %v8567_v8 = vpop.permute.xlu1 %8566  ;;  %10836 = vmatprep.subr.bf16.mxu1 %v16467_v24  ;;  %v9271_v24 = vsel %vm5935_vm6, %v9263_v26, %v15627_v15  ;;  %v9291_v27 = vrot.slane %v9289_v11, 7 }
 0x6da   : > { %v8633_v39 = vmul.f32 %v12147_v44, %v8567_v8  ;;  %v8913_v1 = vrot.slane %v8911_v59, 1 }
 0x6db   : > { %v15677_v59 = vor.u32 %v9292_v32, %v9291_v27  ;;  %v12283_v32 = vld [vmem:[#allocation2 + $0x80] sm:$0xff] }
 0x6dc   : > { %v8650_v33 = vpack.c.bf16 %v8633_v39, %v8632_v42  ;;  %v8914_v8 = vsel %vm6144_vm5, %v8909_v29, %v8913_v1  ;;  %10837 = vmatpush1.bf16.msra.mxu1 %v11959_v51  ;;  %v15662_v42 = vor.u32 %v9452_v14, %v9289_v11  ;;  %v9457_v39 = vrot.slane %v9455_v57, 1  ;;  %v12281_v51 = vld [vmem:[#allocation2 + $0x50] sm:$0xff] }
 0x6dd   : > { %v9537_v2 = vpop.permute.xlu0 %9536  ;;  %v15641_v7 = vld [vmem:[#allocation2 + $0x188] sm:$0xff]  ;;  %v8569_v54 = vpop.permute.xlu1 %8568  ;;  %11741 = vmatprep.mubr.msk.bf16.mxu0 %vm334_vm0, %v8914_v8  ;;  %v9462_v29 = vshll.u32 %v9389_v49, 16  ;;  %v9391_v8 = vld [vmem:[#allocation2 + $0x160] sm:$0x1] }
 0x6de   : > { %8666 = vst.msk [vmem:[#allocation2 + $0x1a0] sm:$0xff] %vm334_vm0, %v8650_v33  ;;  %v9582_v46 = vsel %vm334_vm0, %v9271_v24, %v9537_v2  ;;  %9550 = vrot.lane.b32.xlu1 %v15641_v7, %s12293_s26  ;;  %v8634_v26 = vmul.f32 %v12149_v43, %v8569_v54  ;;  %v9283_v33 = vsel %vm5935_vm6, %v9275_v4, %v15657_v62  ;;  %v9459_v2 = vrot.slane %v9304_v12, 1 }
 0x6df   : > { %9845 = vmatmul.mubr.bf16.gmra.mrb[24].mxu1 %v9582_v46  ;;  %v9458_v24 = vsel %vm6144_vm5, %v15662_v42, %v9457_v39  ;;  %v9287_v46 = vrot.slane %v9285_v18, 7  ;;  %v9464_v54 = vrot.slane %v9462_v29, 1  ;;  %v9476_v27 = vshll.u32 %v9391_v8, 16 }
 0x6e0   : > { %11720 = vmatprep.mubr.msk.bf16.mxu1 %vm334_vm0, %v9451_v21  ;;  %v15683_v14 = vor.u32 %v9459_v2, %v9301_v25  ;;  %v12282_v25 = vld [vmem:[#allocation2 + $0x68] sm:$0xff] }
 0x6e1   : > { %v8571_v44 = vpop.permute.xlu0 %8570  ;;  %v9295_v12 = vsel %vm5935_vm6, %v9287_v46, %v15677_v59  ;;  %v9478_v29 = vrot.slane %v9476_v27, 1  ;;  %v9392_v46 = vld [vmem:[#allocation2 + $0x178] sm:$0x1] }
 0x6e2   : > { %v8635_v13 = vmul.f32 %v12151_v30, %v8571_v44  ;;  %v9176_v30 = vld [vmem:[#allocation2 + $0x138] sm:$0x80]  ;;  %v9328_v44 = vshll.u32 %v15580_v61, 16 }
 0x6e3   : > { %v9309_v39 = vshrl.u32 %v9176_v30, 16 }
 0x6e4   : > { %v8651_v56 = vpack.c.bf16 %v8635_v13, %v8634_v26 }
 0x6e5   : > { %v9539_v55 = vpop.permute.xlu1 %9538  ;;  %v15666_v41 = vld [vmem:[#allocation2 + $0x1a0] sm:$0xff]  ;;  %v9311_v18 = vrot.slane %v9309_v39, 7  ;;  %v9349_v39 = vshrl.u32 %v15641_v7, 16 }
 0x6e6   : > { %8667 = vst.msk [vmem:[#allocation2 + $0x1b8] sm:$0xff] %vm334_vm0, %v8651_v56  ;;  %v9586_v35 = vsel %vm334_vm0, %v9283_v33, %v9539_v55  ;;  %9552 = vrot.lane.b32.xlu0 %v15666_v41, %s12293_s26  ;;  %v9325_v33 = vshrl.u32 %v15580_v61, 16  ;;  %v9364_v27 = vshll.u32 %v15666_v41, 16 }
 0x6e7   : > { %9853 = vmatmul.mubr.bf16.gmra.mrb[28].mxu1 %v9586_v35  ;;  %v9178_v35 = vld [vmem:[#allocation2 + $0x150] sm:$0x80] }
 0x6e8   : > { %11721 = vmatprep.mubr.msk.bf16.mxu1 %vm334_vm0, %v9458_v24  ;;  %v9340_v24 = vshll.u32 %v15612_v23, 16 }
 0x6ea   : > { %9036 = vrot.lane.b32.xlu0 %v15387_v53, %s12293_s26  ;;  %v9465_v53 = vsel %vm6144_vm5, %v15683_v14, %v9464_v54  ;;  %v9327_v54 = vrot.slane %v9325_v33, 7 }
 0x6ed   : > { %v9541_v21 = vpop.permute.xlu0 %9540  ;;  %v15687_v57 = vld [vmem:[#allocation2 + $0x1b8] sm:$0xff] }
 0x6ee   : > { %v9590_v1 = vsel %vm334_vm0, %v9295_v12, %v9541_v21  ;;  %9038 = vrot.lane.b32.xlu0 %v12281_v51, %s12293_s26  ;;  %9554 = vrot.lane.b32.xlu1 %v15687_v57, %s12293_s26 }
 0x6ef   : > { %9861 = vmatmul.mubr.bf16.gmra.mrb[32].mxu1 %v9590_v1  ;;  %v9321_v1 = vshrl.u32 %v9178_v35, 16  ;;  %v9351_v35 = vrot.slane %v9349_v39, 7 }
 0x6f0   : > { %11722 = vmatprep.mubr.msk.bf16.mxu1 %vm334_vm0, %v9465_v53  ;;  %v9480_v53 = vrot.slane %v9340_v24, 1 }
 0x6f2   : > { %9040 = vrot.lane.b32.xlu0 %v12282_v25, %s12293_s26  ;;  %10574 = vrot.lane.b32.xlu1 %v12282_v25, %s12293_s26  ;;  %v9483_v25 = vshll.u32 %v9392_v46, 16 }
 0x6f6   : > { %9042 = vrot.lane.b32.xlu0 %v15317_v50, %s12293_s26  ;;  %10576 = vrot.lane.b32.xlu1 %v12283_v32, %s12293_s26  ;;  %v9174_v50 = vld [vmem:[#allocation2 + $0x120] sm:$0x80]  ;;  %v15778_v32 = vor.u32 %v9328_v44, %v9327_v54 }
 0x6fa   : > { %9044 = vrot.lane.b32.xlu0 %v15334_v60, %s12293_s26  ;;  %10578 = vrot.lane.b32.xlu1 %v15334_v60, %s12293_s26  ;;  %v9316_v60 = vshll.u32 %v15550_v20, 16 }
 0x6fe   : > { %9046 = vrot.lane.b32.xlu0 %v15351_v19, %s12293_s26  ;;  %10580 = vrot.lane.b32.xlu1 %v15351_v19, %s12293_s26  ;;  %v9390_v19 = vld [vmem:[#allocation2 + $0x148] sm:$0x1] }
 0x702   : > { %9048 = vrot.lane.b32.xlu0 %v15370_v40, %s12293_s26  ;;  %10582 = vrot.lane.b32.xlu1 %v15370_v40, %s12293_s26  ;;  %v9297_v40 = vshrl.u32 %v9174_v50, 16  ;;  %v9337_v50 = vshrl.u32 %v15612_v23, 16 }
 0x704   : > { %v9299_v43 = vrot.slane %v9297_v40, 7  ;;  %v15781_v40 = vor.u32 %v9480_v53, %v9337_v50 }
 0x706   : > { %10584 = vrot.lane.b32.xlu1 %v15378_v38, %s12293_s26  ;;  %9050 = vrot.lane.b32.xlu0 %v15378_v38, %s12293_s26  ;;  %v9466_v38 = vrot.slane %v9316_v60, 1  ;;  %v9307_v34 = vsel %vm5935_vm6, %v9299_v43, %v15537_v58  ;;  %v9339_v43 = vrot.slane %v9337_v50, 7  ;;  %v9376_v50 = vshll.u32 %v15687_v57, 16 }
 0x70a   : > { %10586 = vrot.lane.b32.xlu1 %v15399_v16, %s12293_s26  ;;  %9052 = vrot.lane.b32.xlu0 %v15399_v16, %s12293_s26  ;;  %v9469_v16 = vshll.u32 %v9390_v19, 16  ;;  %v9180_v19 = vld [vmem:[#allocation2 + $0x168] sm:$0x80] }
 0x70b   : > { %v9333_v8 = vshrl.u32 %v9180_v19, 16  ;;  %v9395_v19 = vld [vmem:[#allocation2 + $0x1c0] sm:$0x1] }
 0x70c   : > { %v9471_v4 = vrot.slane %v9469_v16, 1  ;;  %v9485_v16 = vrot.slane %v9483_v25, 1 }
 0x70e   : > { %10588 = vrot.lane.b32.xlu1 %v15408_v22, %s12293_s26  ;;  %9054 = vrot.lane.b32.xlu0 %v15408_v22, %s12293_s26  ;;  %v15752_v22 = vld [vmem:[#allocation2 + $0x1d0] sm:$0xff] }
 0x712   : > { %10590 = vrot.lane.b32.xlu1 %v15508_v47, %s12293_s26  ;;  %9056 = vrot.lane.b32.xlu0 %v15508_v47, %s12293_s26  ;;  %v9313_v47 = vshrl.u32 %v15550_v20, 16 }
 0x714   : > { %v15755_v11 = vor.u32 %v9466_v38, %v9313_v47  ;;  %v9315_v26 = vrot.slane %v9313_v47, 7  ;;  %v9352_v38 = vshll.u32 %v15641_v7, 16  ;;  %v9393_v47 = vld [vmem:[#allocation2 + $0x190] sm:$0x1] }
 0x716   : > { %10592 = vrot.lane.b32.xlu1 %v15550_v20, %s12293_s26  ;;  %9058 = vrot.lane.b32.xlu0 %v15550_v20, %s12293_s26  ;;  %v9473_v20 = vrot.slane %v9328_v44, 1  ;;  %v9472_v49 = vsel %vm6144_vm5, %v15755_v11, %v9471_v4  ;;  %v15766_v55 = vor.u32 %v9316_v60, %v9315_v26  ;;  %v9323_v60 = vrot.slane %v9321_v1, 7 }
 0x717   : > { %v9487_v44 = vrot.slane %v9352_v38, 1  ;;  %v15802_v1 = vor.u32 %v9352_v38, %v9351_v35 }
 0x718   : > { %v15769_v2 = vor.u32 %v9473_v20, %v9325_v33  ;;  %v9319_v12 = vsel %vm5935_vm6, %v9311_v18, %v15766_v55  ;;  %v9331_v4 = vsel %vm5935_vm6, %v9323_v60, %v15778_v32  ;;  %v9182_v20 = vld [vmem:[#allocation2 + $0x180] sm:$0x80]  ;;  %v9394_v18 = vld [vmem:[#allocation2 + $0x1a8] sm:$0x1] }
 0x719   : > { %v9345_v54 = vshrl.u32 %v9182_v20, 16  ;;  %v9186_v20 = vld [vmem:[#allocation2 + $0x1b0] sm:$0x80] }
 0x71a   : > { %10594 = vrot.lane.b32.xlu1 %v15580_v61, %s12293_s26  ;;  %9060 = vrot.lane.b32.xlu0 %v15580_v61, %s12293_s26  ;;  %v9479_v61 = vsel %vm6144_vm5, %v15769_v2, %v9478_v29 }
 0x71b   : > { %v9347_v53 = vrot.slane %v9345_v54, 7 }
 0x71e   : > { %10596 = vrot.lane.b32.xlu1 %v15612_v23, %s12293_s26  ;;  %9062 = vrot.lane.b32.xlu0 %v15612_v23, %s12293_s26  ;;  %v9486_v23 = vsel %vm6144_vm5, %v15781_v40, %v9485_v16  ;;  %v8668_v16 = vld [vmem:[#allocation2 + $0x30] sm:$0x80] }
 0x722   : > { %10598 = vrot.lane.b32.xlu1 %v15641_v7, %s12293_s26  ;;  %9064 = vrot.lane.b32.xlu0 %v15641_v7, %s12293_s26 }
 0x726   : > { %10600 = vrot.lane.b32.xlu1 %v15666_v41, %s12293_s26  ;;  %9066 = vrot.lane.b32.xlu0 %v15666_v41, %s12293_s26 }
 0x72a   : > { %10602 = vrot.lane.b32.xlu1 %v15687_v57, %s12293_s26 }
 0x72e   : > { %10604 = vrot.lane.b32.xlu1 %v15752_v22, %s12293_s26 }
 0x730   : > { %v9543_v13 = vpop.permute.xlu1 %9542 }
 0x731   : > { %v9594_v56 = vsel %vm334_vm0, %v9307_v34, %v9543_v13  ;;  %v9490_v13 = vshll.u32 %v9393_v47, 16  ;;  %v15790_v34 = vor.u32 %v9340_v24, %v9339_v43  ;;  %v9494_v24 = vrot.slane %v9364_v27, 1 }
 0x732   : > { %9869 = vmatmul.mubr.bf16.gmra.mrb[36].mxu1 %v9594_v56  ;;  %v9335_v56 = vrot.slane %v9333_v8, 7  ;;  %v9501_v8 = vrot.slane %v9376_v50, 1 }
 0x733   : > { %11723 = vmatprep.mubr.msk.bf16.mxu1 %vm334_vm0, %v9472_v49  ;;  %v15793_v49 = vor.u32 %v9487_v44, %v9349_v39  ;;  %v9492_v33 = vrot.slane %v9490_v13, 1  ;;  %v8701_v44 = vshrl.u32 %v8668_v16, 16  ;;  %v9373_v39 = vshrl.u32 %v15687_v57, 16 }
 0x734   : > { %v9343_v29 = vsel %vm5935_vm6, %v9335_v56, %v15790_v34 }
 0x735   : > { %v9493_v7 = vsel %vm6144_vm5, %v15793_v49, %v9492_v33  ;;  %v15817_v33 = vor.u32 %v9501_v8, %v9373_v39  ;;  %v8703_v35 = vrot.slane %v8701_v44, 7  ;;  %v9375_v54 = vrot.slane %v9373_v39, 7 }
 0x738   : > { %v9545_v21 = vpop.permute.xlu0 %9544 }
 0x739   : > { %v9598_v51 = vsel %vm334_vm0, %v9319_v12, %v9545_v21  ;;  %v9497_v21 = vshll.u32 %v9394_v18, 16 }
 0x73a   : > { %9877 = vmatmul.mubr.bf16.gmra.mrb[40].mxu1 %v9598_v51  ;;  %v9361_v51 = vshrl.u32 %v15666_v41, 16 }
 0x73b   : > { %11724 = vmatprep.mubr.msk.bf16.mxu1 %vm334_vm0, %v9479_v61  ;;  %v9184_v61 = vld [vmem:[#allocation2 + $0x198] sm:$0x80]  ;;  %v9499_v60 = vrot.slane %v9497_v21, 1 }
 0x73c   : > { %v15805_v25 = vor.u32 %v9494_v24, %v9361_v51  ;;  %v9363_v47 = vrot.slane %v9361_v51, 7  ;;  %v8711_v51 = vsel %vm5935_vm6, %v8703_v35, %v15397_v52  ;;  %v10431_v52 = vld [vmem:[#allocation2 + $0x88] sm:$0x1] }
 0x73d   : > { %v10456_v35 = vshll.u32 %v10431_v52, 16 }
 0x73e   : > { %v9500_v41 = vsel %vm6144_vm5, %v15805_v25, %v9499_v60  ;;  %v15814_v13 = vor.u32 %v9364_v27, %v9363_v47  ;;  %v8670_v27 = vld [vmem:[#allocation2 + $0x48] sm:$0x80]  ;;  %v8894_v60 = vld [vmem:[#allocation2 + $0x70] sm:$0x1] }
 0x740   : > { %v9547_v30 = vpop.permute.xlu1 %9546 }
 0x741   : > { %v9602_v26 = vsel %vm334_vm0, %v9331_v4, %v9547_v30  ;;  %v9355_v30 = vsel %vm5935_vm6, %v9347_v53, %v15802_v1  ;;  %v9357_v4 = vshrl.u32 %v9184_v61, 16 }
 0x742   : > { %9885 = vmatmul.mubr.bf16.gmra.mrb[44].mxu1 %v9602_v26  ;;  %v9504_v26 = vshll.u32 %v9395_v19, 16  ;;  %v15827_v19 = vor.u32 %v9376_v50, %v9375_v54 }
 0x743   : > { %11725 = vmatprep.mubr.msk.bf16.mxu1 %vm334_vm0, %v9486_v23  ;;  %v8893_v23 = vld [vmem:[#allocation2 + $0x58] sm:$0x1]  ;;  %v9359_v56 = vrot.slane %v9357_v4, 7  ;;  %v10206_v4 = vld [vmem:[#allocation2 + $0x60] sm:$0x80] }
 0x744   : > { %v9506_v18 = vrot.slane %v9504_v26, 1 }
 0x746   : > { %v9507_v57 = vsel %vm6144_vm5, %v15817_v33, %v9506_v18 }
 0x748   : > { %v9549_v46 = vpop.permute.xlu0 %9548 }
 0x749   : > { %v9606_v12 = vsel %vm334_vm0, %v9343_v29, %v9549_v46  ;;  %v8918_v29 = vshll.u32 %v8893_v23, 16  ;;  %v10430_v46 = vld [vmem:[#allocation2 + $0x70] sm:$0x1]  ;;  %v10239_v23 = vshrl.u32 %v10206_v4, 16 }
 0x74a   : > { %9893 = vmatmul.mubr.bf16.gmra.mrb[48].mxu1 %v9606_v12  ;;  %v9367_v12 = vsel %vm5935_vm6, %v9359_v56, %v15814_v13  ;;  %v10449_v61 = vshll.u32 %v10430_v46, 16  ;;  %v8672_v56 = vld [vmem:[#allocation2 + $0x60] sm:$0x80] }
 0x74b   : > { %11726 = vmatprep.mubr.msk.bf16.mxu1 %vm334_vm0, %v9493_v7  ;;  %v9369_v7 = vshrl.u32 %v9186_v20, 16  ;;  %v8920_v53 = vrot.slane %v8918_v29, 1  ;;  %v8895_v29 = vld [vmem:[#allocation2 + $0x88] sm:$0x1]  ;;  %v10241_v54 = vrot.slane %v10239_v23, 7 }
 0x74c   : > { %v10451_v8 = vrot.slane %v10449_v61, 1 }
 0x74d   : > { %v9371_v47 = vrot.slane %v9369_v7, 7  ;;  %v10208_v7 = vld [vmem:[#allocation2 + $0x78] sm:$0x80]  ;;  %v10249_v61 = vsel %vm5935_vm6, %v10241_v54, %v15461_v3 }
 0x74e   : > { %v10452_v18 = vsel %vm6144_vm5, %v15443_v5, %v10451_v8 }
 0x74f   : > { %v9379_v50 = vsel %vm5935_vm6, %v9371_v47, %v15827_v19  ;;  %v8674_v47 = vld [vmem:[#allocation2 + $0x78] sm:$0x80] }
 0x750   : > { %v9551_v43 = vpop.permute.xlu1 %9550  ;;  %v8737_v52 = vshrl.u32 %v8674_v47, 16 }
 0x751   : > { %v9610_v38 = vsel %vm334_vm0, %v9355_v30, %v9551_v43  ;;  %v8713_v43 = vshrl.u32 %v8670_v27, 16 }
 0x752   : > { %9901 = vmatmul.mubr.bf16.gmra.mrb[52].mxu1 %v9610_v38  ;;  %v8921_v38 = vsel %vm6144_vm5, %v15285_v37, %v8920_v53  ;;  %v10432_v53 = vld [vmem:[#allocation2 + $0xa0] sm:$0x1] }
 0x753   : > { %11727 = vmatprep.mubr.msk.bf16.mxu1 %vm334_vm0, %v9500_v41  ;;  %v8925_v41 = vshll.u32 %v8894_v60, 16  ;;  %v8715_v44 = vrot.slane %v8713_v43, 7 }
 0x755   : > { %v8927_v37 = vrot.slane %v8925_v41, 1  ;;  %v8723_v46 = vsel %vm5935_vm6, %v8715_v44, %v15283_v10  ;;  %v10251_v10 = vshrl.u32 %v10208_v7, 16 }
 0x757   : > { %v8928_v27 = vsel %vm6144_vm5, %v15443_v5, %v8927_v37  ;;  %v10463_v5 = vshll.u32 %v10432_v53, 16  ;;  %v10253_v41 = vrot.slane %v10251_v10, 7  ;;  %v8739_v37 = vrot.slane %v8737_v52, 7 }
 0x758   : > { %v9553_v24 = vpop.permute.xlu0 %9552 }
 0x759   : > { %v9614_v21 = vsel %vm334_vm0, %v9367_v12, %v9553_v24  ;;  %v8725_v12 = vshrl.u32 %v8672_v56, 16  ;;  %v8747_v7 = vsel %vm5935_vm6, %v8739_v37, %v15492_v9  ;;  %v10435_v37 = vld [vmem:[#allocation2 + $0xe8] sm:$0x1] }
 0x75a   : > { %9909 = vmatmul.mubr.bf16.gmra.mrb[56].mxu1 %v9614_v21 }
 0x75b   : > { %11728 = vmatprep.mubr.msk.bf16.mxu1 %vm334_vm0, %v9507_v57  ;;  %v10458_v57 = vrot.slane %v10456_v35, 1  ;;  %v8727_v60 = vrot.slane %v8725_v12, 7 }
 0x75c   : > { %v9037_v16 = vpop.permute.xlu0 %9036 }
 0x75d   : > { %v9070_v30 = vsel %vm334_vm0, %v8711_v51, %v9037_v16  ;;  %v8932_v51 = vshll.u32 %v8895_v29, 16  ;;  %v8735_v8 = vsel %vm5935_vm6, %v8727_v60, %v15461_v3  ;;  %v8676_v29 = vld [vmem:[#allocation2 + $0x90] sm:$0x80] }
 0x75e   : > { %10078 = vmatmul.mubr.bf16.vlgmr.msra.gmra.mrb[64].mxu0 %v9070_v30  ;;  %v10459_v30 = vsel %vm6144_vm5, %v15465_v36, %v10458_v57 }
 0x75f   : > { %11742 = vmatprep.mubr.msk.bf16.mxu0 %vm334_vm0, %v8921_v38  ;;  %v8934_v4 = vrot.slane %v8932_v51, 1  ;;  %v8896_v38 = vld [vmem:[#allocation2 + $0xa0] sm:$0x1]  ;;  %v10212_v51 = vld [vmem:[#allocation2 + $0xa8] sm:$0x80] }
 0x760   : > { %v9555_v26 = vpop.permute.xlu1 %9554  ;;  %v9039_v20 = vpop.permute.xlu0 %9038  ;;  %v8939_v56 = vshll.u32 %v8896_v38, 16 }
 0x761   : > { %v9618_v39 = vsel %vm334_vm0, %v9379_v50, %v9555_v26  ;;  %v9074_v24 = vsel %vm334_vm0, %v8723_v46, %v9039_v20  ;;  %v10210_v50 = vld [vmem:[#allocation2 + $0x90] sm:$0x80]  ;;  %v8935_v23 = vsel %vm6144_vm5, %v15465_v36, %v8934_v4  ;;  %v10433_v20 = vld [vmem:[#allocation2 + $0xb8] sm:$0x1]  ;;  %v8678_v4 = vld [vmem:[#allocation2 + $0xa8] sm:$0x80] }
 0x762   : > { %9917 = vmatmul.mubr.bf16.gmra.mrb[60].mxu1 %v9618_v39  ;;  %v10465_v39 = vrot.slane %v10463_v5, 1  ;;  %v10263_v3 = vshrl.u32 %v10210_v50, 16  ;;  %v8941_v12 = vrot.slane %v8939_v56, 1  ;;  %v10470_v36 = vshll.u32 %v10433_v20, 16 }
 0x763   : > { %11769 = vmatprep.mubr.msk.bf16.mxu1 %vm334_vm0, %v10452_v18  ;;  %v10261_v18 = vsel %vm5935_vm6, %v10253_v41, %v15492_v9  ;;  %v10275_v9 = vshrl.u32 %v10212_v51, 16  ;;  %v8898_v41 = vld [vmem:[#allocation2 + $0xd0] sm:$0x1]  ;;  %v8761_v50 = vshrl.u32 %v8678_v4, 16 }
 0x764   : > { %v10575_v21 = vpop.permute.xlu1 %10574  ;;  %v9041_v43 = vpop.permute.xlu0 %9040  ;;  %v10466_v54 = vsel %vm6144_vm5, %v15496_v0, %v10465_v39  ;;  %v10472_v60 = vrot.slane %v10470_v36, 1 }
 0x765   : > { %v10608_v16 = vsel %vm334_vm0, %v10249_v61, %v10575_v21  ;;  %v9078_v26 = vsel %vm334_vm0, %v8735_v8, %v9041_v43  ;;  %v10265_v21 = vrot.slane %v10263_v3, 7  ;;  %v8942_v61 = vsel %vm6144_vm5, %v15496_v0, %v8941_v12 }
 0x766   : > { %10086 = vmatmul.mubr.bf16.gmra.mrb[68].mxu0 %v9074_v24  ;;  %v8897_v24 = vld [vmem:[#allocation2 + $0xb8] sm:$0x1]  ;;  %v10473_v38 = vsel %vm6144_vm5, %v15539_v17, %v10472_v60  ;;  %v10216_v60 = vld [vmem:[#allocation2 + $0xd8] sm:$0x80] }
 0x767   : > { %11743 = vmatprep.mubr.msk.bf16.mxu0 %vm334_vm0, %v8928_v27  ;;  %v8749_v27 = vshrl.u32 %v8676_v29, 16  ;;  %v8946_v10 = vshll.u32 %v8897_v24, 16  ;;  %v10273_v47 = vsel %vm5935_vm6, %v10265_v21, %v15531_v63  ;;  %v10484_v24 = vshll.u32 %v10435_v37, 16  ;;  %v8899_v21 = vld [vmem:[#allocation2 + $0xe8] sm:$0x1] }
 0x768   : > { %v10577_v44 = vpop.permute.xlu1 %10576  ;;  %v9043_v46 = vpop.permute.xlu0 %9042  ;;  %v10218_v37 = vld [vmem:[#allocation2 + $0xf0] sm:$0x80] }
 0x769   : > { %v10612_v35 = vsel %vm334_vm0, %v10261_v18, %v10577_v44  ;;  %v9082_v57 = vsel %vm334_vm0, %v8747_v7, %v9043_v46  ;;  %v8751_v43 = vrot.slane %v8749_v27, 7  ;;  %v8948_v8 = vrot.slane %v8946_v10, 1  ;;  %v8680_v46 = vld [vmem:[#allocation2 + $0xc0] sm:$0x80] }
 0x76a   : > { %10847 = vmatmul.mubr.bf16.vlgmr.msra.gmra.mrb[64].mxu1 %v10608_v16  ;;  %v10434_v16 = vld [vmem:[#allocation2 + $0xd0] sm:$0x1]  ;;  %v8953_v18 = vshll.u32 %v8898_v41, 16  ;;  %v8773_v51 = vshrl.u32 %v8680_v46, 16 }
 0x76b   : > { %11770 = vmatprep.mubr.msk.bf16.mxu1 %vm334_vm0, %v10459_v30  ;;  %v10477_v0 = vshll.u32 %v10434_v16, 16  ;;  %v8759_v52 = vsel %vm5935_vm6, %v8751_v43, %v15531_v63  ;;  %v8949_v56 = vsel %vm6144_vm5, %v15539_v17, %v8948_v8  ;;  %v10486_v43 = vrot.slane %v10484_v24, 1  ;;  %v8682_v8 = vld [vmem:[#allocation2 + $0xd8] sm:$0x80] }
 0x76c   : > { %v10579_v53 = vpop.permute.xlu1 %10578  ;;  %v9045_v5 = vpop.permute.xlu0 %9044  ;;  %v8955_v36 = vrot.slane %v8953_v18, 1  ;;  %v8775_v4 = vrot.slane %v8773_v51, 7 }
 0x76d   : > { %v10616_v30 = vsel %vm334_vm0, %v10273_v47, %v10579_v53  ;;  %v9086_v44 = vsel %vm334_vm0, %v8759_v52, %v9045_v5  ;;  %v10479_v20 = vrot.slane %v10477_v0, 1  ;;  %v10299_v5 = vshrl.u32 %v10216_v60, 16  ;;  %v8901_v60 = vld [vmem:[#allocation2 + $0x118] sm:$0x1] }
 0x76e   : > { %10094 = vmatmul.mubr.bf16.gmra.mrb[72].mxu0 %v9078_v26  ;;  %v10277_v26 = vrot.slane %v10275_v9, 7  ;;  %v8956_v47 = vsel %vm6144_vm5, %v15572_v6, %v8955_v36  ;;  %v8960_v9 = vshll.u32 %v8899_v21, 16  ;;  %v10311_v36 = vshrl.u32 %v10218_v37, 16  ;;  %v8902_v37 = vld [vmem:[#allocation2 + $0x130] sm:$0x1] }
 0x76f   : > { %11744 = vmatprep.mubr.msk.bf16.mxu0 %vm334_vm0, %v8935_v23  ;;  %v10214_v23 = vld [vmem:[#allocation2 + $0xc0] sm:$0x80]  ;;  %v10480_v17 = vsel %vm6144_vm5, %v15572_v6, %v10479_v20  ;;  %v10487_v6 = vsel %vm6144_vm5, %v15601_v31, %v10486_v43 }
 0x770   : > { %v10581_v39 = vpop.permute.xlu1 %10580  ;;  %v10285_v3 = vsel %vm5935_vm6, %v10277_v26, %v15568_v48  ;;  %v10287_v63 = vshrl.u32 %v10214_v23, 16  ;;  %v8962_v52 = vrot.slane %v8960_v9, 1  ;;  %v8783_v23 = vsel %vm5935_vm6, %v8775_v4, %v15597_v45 }
 0x771   : > { %v10620_v29 = vsel %vm334_vm0, %v10285_v3, %v10581_v39  ;;  %v10301_v39 = vrot.slane %v10299_v5, 7 }
 0x772   : > { %10855 = vmatmul.mubr.bf16.gmra.mrb[68].mxu1 %v10612_v35  ;;  %v8763_v35 = vrot.slane %v8761_v50, 7 }
 0x773   : > { %11771 = vmatprep.mubr.msk.bf16.mxu1 %vm334_vm0, %v10466_v54  ;;  %v9047_v54 = vpop.permute.xlu0 %9046 }
 0x774   : > { %v8771_v27 = vsel %vm5935_vm6, %v8763_v35, %v15568_v48  ;;  %v10583_v16 = vpop.permute.xlu1 %10582 }
 0x776   : > { %10102 = vmatmul.mubr.bf16.gmra.mrb[76].mxu0 %v9082_v57  ;;  %v10289_v57 = vrot.slane %v10287_v63, 7  ;;  %v8963_v63 = vsel %vm6144_vm5, %v15601_v31, %v8962_v52 }
 0x777   : > { %11745 = vmatprep.mubr.msk.bf16.mxu0 %vm334_vm0, %v8942_v61  ;;  %v9090_v61 = vsel %vm334_vm0, %v8771_v27, %v9047_v54  ;;  %v9049_v0 = vpop.permute.xlu0 %9048  ;;  %v10437_v54 = vld [vmem:[#allocation2 + $0x118] sm:$0x1] }
 0x778   : > { %v10297_v48 = vsel %vm5935_vm6, %v10289_v57, %v15597_v45  ;;  %v9094_v18 = vsel %vm334_vm0, %v8783_v23, %v9049_v0  ;;  %v10585_v35 = vpop.permute.xlu1 %10584  ;;  %v10309_v45 = vsel %vm5935_vm6, %v10301_v39, %v15627_v15  ;;  %v10498_v51 = vshll.u32 %v10437_v54, 16  ;;  %v10438_v0 = vld [vmem:[#allocation2 + $0x130] sm:$0x1]  ;;  %v10222_v54 = vld [vmem:[#allocation2 + $0x120] sm:$0x80] }
 0x779   : > { %v10628_v24 = vsel %vm334_vm0, %v10309_v45, %v10585_v35 }
 0x77a   : > { %10863 = vmatmul.mubr.bf16.gmra.mrb[72].mxu1 %v10616_v30  ;;  %v10436_v30 = vld [vmem:[#allocation2 + $0x100] sm:$0x1] }
 0x77b   : > { %11772 = vmatprep.mubr.msk.bf16.mxu1 %vm334_vm0, %v10473_v38  ;;  %v10624_v38 = vsel %vm334_vm0, %v10297_v48, %v10583_v16  ;;  %v10491_v26 = vshll.u32 %v10436_v30, 16  ;;  %v9051_v21 = vpop.permute.xlu0 %9050  ;;  %v10313_v16 = vrot.slane %v10311_v36, 7  ;;  %v10220_v30 = vld [vmem:[#allocation2 + $0x108] sm:$0x80] }
 0x77c   : > { %v10587_v4 = vpop.permute.xlu1 %10586  ;;  %v10323_v52 = vshrl.u32 %v10220_v30, 16  ;;  %v8903_v30 = vld [vmem:[#allocation2 + $0x148] sm:$0x1] }
 0x77e   : > { %10110 = vmatmul.mubr.bf16.gmra.mrb[80].mxu0 %v9086_v44  ;;  %v8900_v44 = vld [vmem:[#allocation2 + $0x100] sm:$0x1]  ;;  %v10325_v35 = vrot.slane %v10323_v52, 7 }
 0x77f   : > { %11746 = vmatprep.mubr.msk.bf16.mxu0 %vm334_vm0, %v8949_v56  ;;  %v8785_v56 = vshrl.u32 %v8682_v8, 16  ;;  %v8967_v46 = vshll.u32 %v8900_v44, 16  ;;  %v8974_v8 = vshll.u32 %v8901_v60, 16  ;;  %v9053_v44 = vpop.permute.xlu0 %9052 }
 0x781   : > { %v8969_v57 = vrot.slane %v8967_v46, 1  ;;  %v8976_v39 = vrot.slane %v8974_v8, 1 }
 0x782   : > { %v15884_v12 = vpop.f32.mrb[0].mxu1  ;;  %10871 = vmatmul.mubr.bf16.gmra.mrb[76].mxu1 %v10620_v29  ;;  %v10493_v29 = vrot.slane %v10491_v26, 1 }
 0x783   : > { %v9800_v7 = vpop.f32.mrb[1].mxu1  ;;  %11773 = vmatprep.mubr.msk.bf16.mxu1 %vm334_vm0, %v10480_v17  ;;  %v8787_v17 = vrot.slane %v8785_v56, 7  ;;  %v8970_v5 = vsel %vm6144_vm5, %v15633_v28, %v8969_v57  ;;  %v10505_v56 = vshll.u32 %v10438_v0, 16  ;;  %v8977_v36 = vsel %vm6144_vm5, %v15662_v42, %v8976_v39  ;;  %v9055_v60 = vpop.permute.xlu0 %9054  ;;  %v10224_v0 = vld [vmem:[#allocation2 + $0x138] sm:$0x80] }
 0x784   : > { %v15891_v53 = vpop.f32.mrb[2].mxu1  ;;  %v8684_v7 = vld [vmem:[#allocation2 + $0xf0] sm:$0x80]  ;;  %v10494_v31 = vsel %vm6144_vm5, %v15633_v28, %v10493_v29  ;;  %v10335_v57 = vshrl.u32 %v10222_v54, 16  ;;  %v10347_v39 = vshrl.u32 %v10224_v0, 16 }
 0x785   : > { %v9803_v10 = vpop.f32.mrb[3].mxu1  ;;  %v8904_v54 = vld [vmem:[#allocation2 + $0x160] sm:$0x1]  ;;  %v8905_v0 = vld [vmem:[#allocation2 + $0x178] sm:$0x1] }
 0x786   : > { %10118 = vmatmul.mubr.bf16.gmra.mrb[84].mxu0 %v9090_v61  ;;  %v8795_v10 = vsel %vm5935_vm6, %v8787_v17, %v15627_v15  ;;  %v10321_v15 = vsel %vm5935_vm6, %v10313_v16, %v15657_v62  ;;  %v10589_v17 = vpop.permute.xlu1 %10588 }
 0x787   : > { %11747 = vmatprep.mubr.msk.bf16.mxu0 %vm334_vm0, %v8956_v47  ;;  %v8797_v47 = vshrl.u32 %v8684_v7, 16  ;;  %v9098_v9 = vsel %vm334_vm0, %v8795_v10, %v9051_v21  ;;  %v10632_v26 = vsel %vm334_vm0, %v10321_v15, %v10587_v4  ;;  %v8981_v7 = vshll.u32 %v8902_v37, 16  ;;  %v10439_v21 = vld [vmem:[#allocation2 + $0x148] sm:$0x1]  ;;  %v9057_v37 = vpop.permute.xlu0 %9056 }
 0x788   : > { %v10337_v4 = vrot.slane %v10335_v57, 7 }
 0x789   : > { %v8983_v16 = vrot.slane %v8981_v7, 1 }
 0x78a   : > { %v15900_v41 = vpop.f32.mrb[4].mxu1  ;;  %10879 = vmatmul.mubr.bf16.gmra.mrb[80].mxu1 %v10624_v38  ;;  %v10500_v38 = vrot.slane %v10498_v51, 1 }
 0x78b   : > { %v9808_v50 = vpop.f32.mrb[5].mxu1  ;;  %11774 = vmatprep.mubr.msk.bf16.mxu1 %vm334_vm0, %v10487_v6  ;;  %v8799_v6 = vrot.slane %v8797_v47, 7  ;;  %v10512_v47 = vshll.u32 %v10439_v21, 16  ;;  %v8984_v52 = vsel %vm6144_vm5, %v15683_v14, %v8983_v16  ;;  %v10226_v21 = vld [vmem:[#allocation2 + $0x150] sm:$0x80] }
 0x78c   : > { %v15907_v20 = vpop.f32.mrb[6].mxu1  ;;  %v8686_v50 = vld [vmem:[#allocation2 + $0x108] sm:$0x80]  ;;  %v10501_v28 = vsel %vm6144_vm5, %v15662_v42, %v10500_v38  ;;  %v10359_v16 = vshrl.u32 %v10226_v21, 16  ;;  %v8906_v21 = vld [vmem:[#allocation2 + $0x190] sm:$0x1] }
 0x78d   : > { %v9811_v3 = vpop.f32.mrb[7].mxu1 }
 0x78e   : > { %10126 = vmatmul.mubr.bf16.gmra.mrb[88].mxu0 %v9094_v18  ;;  %v8807_v3 = vsel %vm5935_vm6, %v8799_v6, %v15657_v62  ;;  %v10333_v62 = vsel %vm5935_vm6, %v10325_v35, %v15677_v59  ;;  %v10591_v6 = vpop.permute.xlu1 %10590 }
 0x78f   : > { %11748 = vmatprep.mubr.msk.bf16.mxu0 %vm334_vm0, %v8963_v63  ;;  %v8809_v63 = vshrl.u32 %v8686_v50, 16  ;;  %v9102_v46 = vsel %vm334_vm0, %v8807_v3, %v9053_v44  ;;  %v10636_v51 = vsel %vm334_vm0, %v10333_v62, %v10589_v17  ;;  %v8988_v50 = vshll.u32 %v8903_v30, 16  ;;  %v10440_v44 = vld [vmem:[#allocation2 + $0x160] sm:$0x1]  ;;  %v9059_v30 = vpop.permute.xlu0 %9058 }
 0x790   : > { %v10349_v17 = vrot.slane %v10347_v39, 7 }
 0x791   : > { %v8990_v35 = vrot.slane %v8988_v50, 1 }
 0x792   : > { %v15916_v27 = vpop.f32.mrb[8].mxu1  ;;  %10887 = vmatmul.mubr.bf16.gmra.mrb[84].mxu1 %v10628_v24  ;;  %v10507_v24 = vrot.slane %v10505_v56, 1 }
 0x793   : > { %v9816_v61 = vpop.f32.mrb[9].mxu1  ;;  %11775 = vmatprep.mubr.msk.bf16.mxu1 %vm334_vm0, %v10494_v31  ;;  %v8811_v31 = vrot.slane %v8809_v63, 7  ;;  %v10519_v63 = vshll.u32 %v10440_v44, 16  ;;  %v8991_v57 = vsel %vm6144_vm5, %v15755_v11, %v8990_v35  ;;  %v10228_v44 = vld [vmem:[#allocation2 + $0x168] sm:$0x80] }
 0x794   : > { %v15923_v43 = vpop.f32.mrb[10].mxu1  ;;  %v8688_v61 = vld [vmem:[#allocation2 + $0x120] sm:$0x80]  ;;  %v10508_v42 = vsel %vm6144_vm5, %v15683_v14, %v10507_v24  ;;  %v10371_v35 = vshrl.u32 %v10228_v44, 16  ;;  %v8907_v44 = vld [vmem:[#allocation2 + $0x1a8] sm:$0x1] }
 0x795   : > { %v9819_v48 = vpop.f32.mrb[11].mxu1 }
 0x796   : > { %10134 = vmatmul.mubr.bf16.gmra.mrb[92].mxu0 %v9098_v9  ;;  %v8819_v48 = vsel %vm5935_vm6, %v8811_v31, %v15677_v59  ;;  %v10345_v59 = vsel %vm5935_vm6, %v10337_v4, %v15537_v58  ;;  %v10593_v31 = vpop.permute.xlu1 %10592 }
 0x797   : > { %11749 = vmatprep.mubr.msk.bf16.mxu0 %vm334_vm0, %v8970_v5  ;;  %v8821_v5 = vshrl.u32 %v8688_v61, 16  ;;  %v9106_v8 = vsel %vm334_vm0, %v8819_v48, %v9055_v60  ;;  %v10640_v56 = vsel %vm334_vm0, %v10345_v59, %v10591_v6  ;;  %v8995_v61 = vshll.u32 %v8904_v54, 16  ;;  %v10441_v60 = vld [vmem:[#allocation2 + $0x178] sm:$0x1]  ;;  %v9061_v54 = vpop.permute.xlu0 %9060 }
 0x798   : > { %v10361_v6 = vrot.slane %v10359_v16, 7 }
 0x799   : > { %v8997_v4 = vrot.slane %v8995_v61, 1 }
 0x79a   : > { %v15932_v23 = vpop.f32.mrb[12].mxu1  ;;  %10895 = vmatmul.mubr.bf16.gmra.mrb[88].mxu1 %v10632_v26  ;;  %v10514_v26 = vrot.slane %v10512_v47, 1 }
 0x79b   : > { %v9824_v18 = vpop.f32.mrb[13].mxu1  ;;  %11776 = vmatprep.mubr.msk.bf16.mxu1 %vm334_vm0, %v10501_v28  ;;  %v8823_v28 = vrot.slane %v8821_v5, 7  ;;  %v10526_v5 = vshll.u32 %v10441_v60, 16  ;;  %v8998_v39 = vsel %vm6144_vm5, %v15769_v2, %v8997_v4  ;;  %v10230_v60 = vld [vmem:[#allocation2 + $0x180] sm:$0x80] }
 0x79c   : > { %v15939_v29 = vpop.f32.mrb[14].mxu1  ;;  %v8690_v18 = vld [vmem:[#allocation2 + $0x138] sm:$0x80]  ;;  %v10515_v14 = vsel %vm6144_vm5, %v15755_v11, %v10514_v26  ;;  %v10383_v4 = vshrl.u32 %v10230_v60, 16 }
 0x79d   : > { %v9827_v45 = vpop.f32.mrb[15].mxu1 }
 0x79e   : > { %10142 = vmatmul.mubr.bf16.gmra.mrb[96].mxu0 %v9102_v46  ;;  %v8831_v45 = vsel %vm5935_vm6, %v8823_v28, %v15537_v58  ;;  %v10357_v58 = vsel %vm5935_vm6, %v10349_v17, %v15766_v55  ;;  %v10595_v28 = vpop.permute.xlu1 %10594 }
 0x79f   : > { %11750 = vmatprep.mubr.msk.bf16.mxu0 %vm334_vm0, %v8977_v36  ;;  %v8833_v36 = vshrl.u32 %v8690_v18, 16  ;;  %v9110_v7 = vsel %vm334_vm0, %v8831_v45, %v9057_v37  ;;  %v10644_v47 = vsel %vm334_vm0, %v10357_v58, %v10593_v31  ;;  %v9002_v18 = vshll.u32 %v8905_v0, 16  ;;  %v10442_v37 = vld [vmem:[#allocation2 + $0x190] sm:$0x1]  ;;  %v9063_v0 = vpop.permute.xlu0 %9062 }
 0x7a0   : > { %v10373_v31 = vrot.slane %v10371_v35, 7 }
 0x7a1   : > { %v9004_v17 = vrot.slane %v9002_v18, 1 }
 0x7a2   : > { %v15948_v10 = vpop.f32.mrb[16].mxu1  ;;  %10903 = vmatmul.mubr.bf16.gmra.mrb[92].mxu1 %v10636_v51  ;;  %v10521_v51 = vrot.slane %v10519_v63, 1 }
 0x7a3   : > { %v9832_v9 = vpop.f32.mrb[17].mxu1  ;;  %11777 = vmatprep.mubr.msk.bf16.mxu1 %vm334_vm0, %v10508_v42  ;;  %v8835_v42 = vrot.slane %v8833_v36, 7  ;;  %v10533_v36 = vshll.u32 %v10442_v37, 16  ;;  %v9005_v16 = vsel %vm6144_vm5, %v15781_v40, %v9004_v17  ;;  %v10232_v37 = vld [vmem:[#allocation2 + $0x198] sm:$0x80] }
 0x7a4   : > { %v15955_v38 = vpop.f32.mrb[18].mxu1  ;;  %v8692_v9 = vld [vmem:[#allocation2 + $0x150] sm:$0x80]  ;;  %v10522_v11 = vsel %vm6144_vm5, %v15769_v2, %v10521_v51  ;;  %v10395_v17 = vshrl.u32 %v10232_v37, 16 }
 0x7a5   : > { %v9835_v15 = vpop.f32.mrb[19].mxu1 }
 0x7a6   : > { %10150 = vmatmul.mubr.bf16.gmra.mrb[100].mxu0 %v9106_v8  ;;  %v8843_v15 = vsel %vm5935_vm6, %v8835_v42, %v15766_v55  ;;  %v10369_v55 = vsel %vm5935_vm6, %v10361_v6, %v15778_v32  ;;  %v10597_v42 = vpop.permute.xlu1 %10596 }
 0x7a7   : > { %11751 = vmatprep.mubr.msk.bf16.mxu0 %vm334_vm0, %v8984_v52  ;;  %v8845_v52 = vshrl.u32 %v8692_v9, 16  ;;  %v9114_v50 = vsel %vm334_vm0, %v8843_v15, %v9059_v30  ;;  %v10648_v63 = vsel %vm334_vm0, %v10369_v55, %v10595_v28  ;;  %v9009_v9 = vshll.u32 %v8906_v21, 16  ;;  %v10443_v30 = vld [vmem:[#allocation2 + $0x1a8] sm:$0x1]  ;;  %v9065_v21 = vpop.permute.xlu0 %9064 }
 0x7a8   : > { %v10385_v28 = vrot.slane %v10383_v4, 7 }
 0x7a9   : > { %v9011_v6 = vrot.slane %v9009_v9, 1 }
 0x7aa   : > { %v15964_v3 = vpop.f32.mrb[20].mxu1  ;;  %10911 = vmatmul.mubr.bf16.gmra.mrb[96].mxu1 %v10640_v56  ;;  %v10528_v56 = vrot.slane %v10526_v5, 1 }
 0x7ab   : > { %v9840_v46 = vpop.f32.mrb[21].mxu1  ;;  %11778 = vmatprep.mubr.msk.bf16.mxu1 %vm334_vm0, %v10515_v14  ;;  %v8847_v14 = vrot.slane %v8845_v52, 7  ;;  %v10540_v52 = vshll.u32 %v10443_v30, 16  ;;  %v9012_v35 = vsel %vm6144_vm5, %v15793_v49, %v9011_v6  ;;  %v10236_v6 = vld [vmem:[#allocation2 + $0x1c8] sm:$0x80] }
 0x7ac   : > { %v15971_v24 = vpop.f32.mrb[22].mxu1  ;;  %v8694_v46 = vld [vmem:[#allocation2 + $0x168] sm:$0x80]  ;;  %v10529_v2 = vsel %vm6144_vm5, %v15781_v40, %v10528_v56 }
 0x7ad   : > { %v9843_v62 = vpop.f32.mrb[23].mxu1 }
 0x7ae   : > { %10158 = vmatmul.mubr.bf16.gmra.mrb[104].mxu0 %v9110_v7  ;;  %v8855_v62 = vsel %vm5935_vm6, %v8847_v14, %v15778_v32  ;;  %v10381_v32 = vsel %vm5935_vm6, %v10373_v31, %v15790_v34  ;;  %v10599_v14 = vpop.permute.xlu1 %10598 }
 0x7af   : > { %11752 = vmatprep.mubr.msk.bf16.mxu0 %vm334_vm0, %v8991_v57  ;;  %v8857_v57 = vshrl.u32 %v8694_v46, 16  ;;  %v9118_v61 = vsel %vm334_vm0, %v8855_v62, %v9061_v54  ;;  %v10652_v5 = vsel %vm334_vm0, %v10381_v32, %v10597_v42  ;;  %v9016_v46 = vshll.u32 %v8907_v44, 16  ;;  %v10444_v54 = vld [vmem:[#allocation2 + $0x1c0] sm:$0x1]  ;;  %v10234_v42 = vld [vmem:[#allocation2 + $0x1b0] sm:$0x80] }
 0x7b0   : > { %v10407_v4 = vshrl.u32 %v10234_v42, 16 }
 0x7b1   : > { %v9018_v31 = vrot.slane %v9016_v46, 1 }
 0x7b2   : > { %v15980_v48 = vpop.f32.mrb[24].mxu1  ;;  %10919 = vmatmul.mubr.bf16.gmra.mrb[100].mxu1 %v10644_v47  ;;  %v10535_v47 = vrot.slane %v10533_v36, 1  ;;  %v8698_v36 = vld [vmem:[#allocation2 + $0x198] sm:$0x80]  ;;  %v10601_v9 = vpop.permute.xlu1 %10600  ;;  %v10409_v44 = vrot.slane %v10407_v4, 7 }
 0x7b3   : > { %v9848_v8 = vpop.f32.mrb[25].mxu1  ;;  %11779 = vmatprep.mubr.msk.bf16.mxu1 %vm334_vm0, %v10522_v11  ;;  %v8859_v11 = vrot.slane %v8857_v57, 7  ;;  %v8881_v57 = vshrl.u32 %v8698_v36, 16  ;;  %v9019_v30 = vsel %vm6144_vm5, %v15805_v25, %v9018_v31 }
 0x7b4   : > { %v15987_v26 = vpop.f32.mrb[26].mxu1  ;;  %v8696_v8 = vld [vmem:[#allocation2 + $0x180] sm:$0x80]  ;;  %v10536_v40 = vsel %vm6144_vm5, %v15793_v49, %v10535_v47  ;;  %v10547_v49 = vshll.u32 %v10444_v54, 16  ;;  %v10445_v47 = vld [vmem:[#allocation2 + $0x1d8] sm:$0x1] }
 0x7b5   : > { %v9851_v59 = vpop.f32.mrb[27].mxu1 }
 0x7b6   : > { %10166 = vmatmul.mubr.bf16.gmra.mrb[108].mxu0 %v9114_v50  ;;  %v8867_v59 = vsel %vm5935_vm6, %v8859_v11, %v15790_v34  ;;  %v10393_v34 = vsel %vm5935_vm6, %v10385_v28, %v15802_v1  ;;  %v10549_v32 = vrot.slane %v10547_v49, 1  ;;  %v8883_v11 = vrot.slane %v8881_v57, 7  ;;  %v10603_v37 = vpop.permute.xlu1 %10602 }
 0x7b7   : > { %11753 = vmatprep.mubr.msk.bf16.mxu0 %vm334_vm0, %v8998_v39  ;;  %v8869_v39 = vshrl.u32 %v8696_v8, 16  ;;  %v9122_v18 = vsel %vm334_vm0, %v8867_v59, %v9063_v0  ;;  %v10554_v0 = vshll.u32 %v10445_v47, 16  ;;  %v10419_v28 = vshrl.u32 %v10236_v6, 16 }
 0x7ba   : > { %v15996_v45 = vpop.f32.mrb[28].mxu1  ;;  %10927 = vmatmul.mubr.bf16.gmra.mrb[104].mxu1 %v10648_v63  ;;  %v10542_v63 = vrot.slane %v10540_v52, 1  ;;  %v9067_v52 = vpop.permute.xlu0 %9066 }
 0x7bb   : > { %v9856_v7 = vpop.f32.mrb[29].mxu1  ;;  %11780 = vmatprep.mubr.msk.bf16.mxu1 %vm334_vm0, %v10529_v2  ;;  %v8871_v2 = vrot.slane %v8869_v39, 7  ;;  %v10556_v39 = vrot.slane %v10554_v0, 1  ;;  %v10605_v46 = vpop.permute.xlu1 %10604 }
 0x7bc   : > { %v16003_v51 = vpop.f32.mrb[30].mxu1  ;;  %v10656_v7 = vsel %vm334_vm0, %v10393_v34, %v10599_v14  ;;  %v10543_v62 = vsel %vm6144_vm5, %v15805_v25, %v10542_v63  ;;  %v10550_v25 = vsel %vm6144_vm5, %v15817_v33, %v10549_v32  ;;  %v10417_v14 = vsel %vm5935_vm6, %v10409_v44, %v15827_v19 }
 0x7bd   : > { %v9859_v58 = vpop.f32.mrb[31].mxu1  ;;  %v8879_v60 = vsel %vm5935_vm6, %v8871_v2, %v15802_v1 }
 0x7be   : > { %10174 = vmatmul.mubr.bf16.gmra.mrb[112].mxu0 %v9118_v61  ;;  %v10426_v61 = vshll.u32 %v15752_v22, 16  ;;  %v10397_v58 = vrot.slane %v10395_v17, 7 }
 0x7bf   : > { %11754 = vmatprep.mubr.msk.bf16.mxu0 %vm334_vm0, %v9005_v16  ;;  %v9126_v16 = vsel %vm334_vm0, %v8879_v60, %v9065_v21 }
 0x7c0   : > { %v10551_v8 = vrot.slane %v10426_v61, 1  ;;  %v10405_v1 = vsel %vm5935_vm6, %v10397_v58, %v15814_v13 }
 0x7c2   : > { %v16012_v15 = vpop.f32.mrb[32].mxu1  ;;  %10935 = vmatmul.mubr.bf16.gmra.mrb[108].mxu1 %v10652_v5  ;;  %v10423_v5 = vshrl.u32 %v15752_v22, 16 }
 0x7c3   : > { %v9864_v50 = vpop.f32.mrb[33].mxu1  ;;  %11781 = vmatprep.mubr.msk.bf16.mxu1 %vm334_vm0, %v10536_v40  ;;  %v10660_v40 = vsel %vm334_vm0, %v10405_v1, %v10601_v9 }
 0x7c4   : > { %v16019_v56 = vpop.f32.mrb[34].mxu1  ;;  %v8891_v50 = vsel %vm5935_vm6, %v8883_v11, %v15814_v13  ;;  %v10425_v22 = vrot.slane %v10423_v5, 7  ;;  %v10552_v59 = vor.u32 %v10551_v8, %v10423_v5  ;;  %v10664_v13 = vsel %vm334_vm0, %v10417_v14, %v10603_v37 }
 0x7c5   : > { %v9867_v55 = vpop.f32.mrb[35].mxu1 }
 0x7c6   : > { %10182 = vmatmul.mubr.bf16.gmra.mrb[116].mxu0 %v9122_v18  ;;  %v9130_v18 = vsel %vm334_vm0, %v8891_v50, %v9067_v52  ;;  %v10428_v55 = vor.u32 %v10426_v61, %v10425_v22  ;;  %v10557_v33 = vsel %vm6144_vm5, %v10552_v59, %v10556_v39 }
 0x7c7   : > { %11755 = vmatprep.mubr.msk.bf16.mxu0 %vm334_vm0, %v9012_v35  ;;  %v10421_v35 = vrot.slane %v10419_v28, 7 }
 0x7c9   : > { %v10429_v63 = vsel %vm5935_vm6, %v10421_v35, %v10428_v55 }
 0x7ca   : > { %10943 = vmatmul.mubr.bf16.gmra.mrb[112].mxu1 %v10656_v7  ;;  %v10668_v54 = vsel %vm334_vm0, %v10429_v63, %v10605_v46 }
 0x7cb   : > { %11782 = vmatprep.mubr.msk.bf16.mxu1 %vm334_vm0, %v10543_v62 }
 0x7ce   : > { %10190 = vmatmul.mubr.bf16.gmra.mrb[120].mxu0 %v9126_v16 }
 0x7cf   : > { %11756 = vmatprep.mubr.msk.bf16.mxu0 %vm334_vm0, %v9019_v30 }
 0x7d2   : > { %10951 = vmatmul.mubr.bf16.gmra.mrb[116].mxu1 %v10660_v40 }
 0x7d3   : > { %11783 = vmatprep.mubr.msk.bf16.mxu1 %vm334_vm0, %v10550_v25 }
 0x7d6   : > { %10198 = vmatmul.mubr.bf16.gmra.mrb[124].mxu0 %v9130_v18 }
 0x7da   : > { %10959 = vmatmul.mubr.bf16.gmra.mrb[120].mxu1 %v10664_v13 }
 0x7db   : > { %11784 = vmatprep.mubr.msk.bf16.mxu1 %vm334_vm0, %v10557_v33 }
 0x7e2   : > { %10967 = vmatmul.mubr.bf16.gmra.mrb[124].mxu1 %v10668_v54 }
 0x805   : > { %v16055_v34 = vpop.f32.mrb[36].mxu1 }
 0x806   : > { %v9872_v2 = vpop.f32.mrb[37].mxu1 }
 0x807   : > { %v16057_v17 = vpop.f32.mrb[38].mxu1 }
 0x808   : > { %v9875_v19 = vpop.f32.mrb[39].mxu1 }
 0x80d   : > { %v16059_v36 = vpop.f32.mrb[40].mxu1 }
 0x80e   : > { %v9880_v7 = vpop.f32.mrb[41].mxu1 }
 0x80f   : > { %v16061_v21 = vpop.f32.mrb[42].mxu1 }
 0x810   : > { %v9883_v62 = vpop.f32.mrb[43].mxu1 }
 0x815   : > { %v16063_v31 = vpop.f32.mrb[44].mxu1 }
 0x816   : > { %v9888_v49 = vpop.f32.mrb[45].mxu1 }
 0x817   : > { %v16065_v57 = vpop.f32.mrb[46].mxu1 }
 0x818   : > { %v9891_v61 = vpop.f32.mrb[47].mxu1 }
 0x81d   : > { %v16067_v60 = vpop.f32.mrb[48].mxu1 }
 0x81e   : > { %v9896_v58 = vpop.f32.mrb[49].mxu1 }
 0x81f   : > { %v16069_v42 = vpop.f32.mrb[50].mxu1 }
 0x820   : > { %v9899_v16 = vpop.f32.mrb[51].mxu1 }
 0x825   : > { %v16071_v47 = vpop.f32.mrb[52].mxu1 }
 0x826   : > { %v9904_v9 = vpop.f32.mrb[53].mxu1 }
 0x827   : > { %v16073_v30 = vpop.f32.mrb[54].mxu1 }
 0x828   : > { %v9907_v32 = vpop.f32.mrb[55].mxu1 }
 0x82d   : > { %v16075_v11 = vpop.f32.mrb[56].mxu1 }
 0x82e   : > { %v9912_v4 = vpop.f32.mrb[57].mxu1 }
 0x82f   : > { %v16077_v5 = vpop.f32.mrb[58].mxu1 }
 0x830   : > { %v9915_v8 = vpop.f32.mrb[59].mxu1 }
 0x831   : > { %v10079_v1 = vpop.f32.mrb[64].mxu0 }
 0x832   : > { %v10080_v0 = vadd.f32 %v10079_v1, %v15884_v12  ;;  %v10081_v40 = vpop.f32.mrb[65].mxu0 }
 0x833   : > { %v10082_v6 = vpop.f32.mrb[66].mxu0 }
 0x834   : > { %v10083_v52 = vadd.f32 %v10082_v6, %v15891_v53  ;;  %v10084_v25 = vpop.f32.mrb[67].mxu0  ;;  %v16090_v53 = vld [vmem:[%s16457_s8] ss:$0 sm:$0xff] }
 0x835   : > { %v16081_v50 = vpop.f32.mrb[60].mxu1 }
 0x836   : > { %v9920_v44 = vpop.f32.mrb[61].mxu1 }
 0x837   : > { %v16083_v22 = vpop.f32.mrb[62].mxu1 }
 0x838   : > { %v9923_v59 = vpop.f32.mrb[63].mxu1 }
 0x839   : > { %v10087_v28 = vpop.f32.mrb[68].mxu0 }
 0x83a   : > { %v10088_v39 = vadd.f32 %v10087_v28, %v15900_v41  ;;  %v10089_v18 = vpop.f32.mrb[69].mxu0 }
 0x83b   : > { %v10090_v37 = vpop.f32.mrb[70].mxu0 }
 0x83c   : > { %v10091_v55 = vadd.f32 %v10090_v37, %v15907_v20  ;;  %v10092_v14 = vpop.f32.mrb[71].mxu0 }
 0x83d   : > { %v10848_v12 = vpop.f32.mrb[64].mxu1 }
 0x83e   : > { %v10975_v35 = vadd.f32 %v10848_v12, %v10080_v0  ;;  %v10850_v33 = vpop.f32.mrb[65].mxu1 }
 0x83f   : > { %v10851_v13 = vpop.f32.mrb[66].mxu1 }
 0x840   : > { %v16093_v63 = vadd.f32 %v16090_v53, %v10975_v35  ;;  %v10976_v46 = vadd.f32 %v10851_v13, %v10083_v52  ;;  %v10853_v54 = vpop.f32.mrb[67].mxu1 }
 0x841   : > { %v10095_v41 = vpop.f32.mrb[72].mxu0 }
 0x842   : > { %v16096_v2 = vadd.f32 %v16090_v53, %v10976_v46  ;;  %v10096_v20 = vadd.f32 %v10095_v41, %v15916_v27  ;;  %v10097_v19 = vpop.f32.mrb[73].mxu0  ;;  %11046 = vmax.xlane.f32.xlu0 %v16093_v63 }
 0x843   : > { %v10098_v7 = vpop.f32.mrb[74].mxu0 }
 0x844   : > { %v10099_v62 = vadd.f32 %v10098_v7, %v15923_v43  ;;  %v10100_v49 = vpop.f32.mrb[75].mxu0  ;;  %11048 = vmax.xlane.f32.xlu1 %v16096_v2 }
 0x845   : > { %v10856_v61 = vpop.f32.mrb[68].mxu1 }
 0x846   : > { %v10977_v58 = vadd.f32 %v10856_v61, %v10088_v39  ;;  %v10858_v16 = vpop.f32.mrb[69].mxu1 }
 0x847   : > { %v10859_v9 = vpop.f32.mrb[70].mxu1 }
 0x848   : > { %v16103_v32 = vadd.f32 %v16090_v53, %v10977_v58  ;;  %v10978_v4 = vadd.f32 %v10859_v9, %v10091_v55  ;;  %v10861_v8 = vpop.f32.mrb[71].mxu1 }
 0x849   : > { %v10103_v1 = vpop.f32.mrb[76].mxu0 }
 0x84a   : > { %v10104_v27 = vadd.f32 %v10103_v1, %v15932_v23  ;;  %v10105_v0 = vpop.f32.mrb[77].mxu0  ;;  %11050 = vmax.xlane.f32.xlu0 %v16103_v32  ;;  %v16108_v43 = vadd.f32 %v16090_v53, %v10978_v4 }
 0x84b   : > { %v10106_v40 = vpop.f32.mrb[78].mxu0 }
 0x84c   : > { %v10107_v6 = vadd.f32 %v10106_v40, %v15939_v29  ;;  %v10108_v52 = vpop.f32.mrb[79].mxu0 }
 0x84d   : > { %v10864_v25 = vpop.f32.mrb[72].mxu1 }
 0x84e   : > { %v10979_v44 = vadd.f32 %v10864_v25, %v10096_v20  ;;  %v10866_v59 = vpop.f32.mrb[73].mxu1  ;;  %11052 = vmax.xlane.f32.xlu0 %v16108_v43 }
 0x84f   : > { %v10867_v28 = vpop.f32.mrb[74].mxu1 }
 0x850   : > { %v16113_v39 = vadd.f32 %v16090_v53, %v10979_v44  ;;  %v10980_v23 = vadd.f32 %v10867_v28, %v10099_v62  ;;  %v10869_v18 = vpop.f32.mrb[75].mxu1 }
 0x851   : > { %v10111_v37 = vpop.f32.mrb[80].mxu0 }
 0x852   : > { %v16116_v55 = vadd.f32 %v16090_v53, %v10980_v23  ;;  %v10112_v14 = vadd.f32 %v10111_v37, %v15948_v10  ;;  %v10113_v12 = vpop.f32.mrb[81].mxu0  ;;  %11054 = vmax.xlane.f32.xlu1 %v16113_v39 }
 0x853   : > { %v10114_v29 = vpop.f32.mrb[82].mxu0 }
 0x854   : > { %v10115_v35 = vadd.f32 %v10114_v29, %v15955_v38  ;;  %v10116_v33 = vpop.f32.mrb[83].mxu0  ;;  %11056 = vmax.xlane.f32.xlu0 %v16116_v55 }
 0x855   : > { %v10872_v13 = vpop.f32.mrb[76].mxu1 }
 0x856   : > { %v10981_v46 = vadd.f32 %v10872_v13, %v10104_v27  ;;  %v10874_v54 = vpop.f32.mrb[77].mxu1 }
 0x857   : > { %v10875_v41 = vpop.f32.mrb[78].mxu1 }
 0x858   : > { %v16123_v20 = vadd.f32 %v16090_v53, %v10981_v46  ;;  %v10982_v19 = vadd.f32 %v10875_v41, %v10107_v6  ;;  %v10877_v7 = vpop.f32.mrb[79].mxu1 }
 0x859   : > { %v10119_v62 = vpop.f32.mrb[84].mxu0 }
 0x85a   : > { %v16126_v10 = vadd.f32 %v16090_v53, %v10982_v19  ;;  %v10120_v49 = vadd.f32 %v10119_v62, %v15964_v3  ;;  %v10121_v61 = vpop.f32.mrb[85].mxu0  ;;  %11058 = vmax.xlane.f32.xlu1 %v16123_v20 }
 0x85b   : > { %v10122_v38 = vpop.f32.mrb[86].mxu0 }
 0x85c   : > { %v10123_v58 = vadd.f32 %v10122_v38, %v15971_v24  ;;  %v10124_v16 = vpop.f32.mrb[87].mxu0  ;;  %11060 = vmax.xlane.f32.xlu0 %v16126_v10 }
 0x85d   : > { %v10880_v9 = vpop.f32.mrb[80].mxu1 }
 0x85e   : > { %v10983_v4 = vadd.f32 %v10880_v9, %v10112_v14  ;;  %v10882_v8 = vpop.f32.mrb[81].mxu1 }
 0x85f   : > { %v10883_v1 = vpop.f32.mrb[82].mxu1 }
 0x860   : > { %v16133_v27 = vadd.f32 %v16090_v53, %v10983_v4  ;;  %v10984_v0 = vadd.f32 %v10883_v1, %v10115_v35  ;;  %v10885_v40 = vpop.f32.mrb[83].mxu1 }
 0x861   : > { %v10127_v6 = vpop.f32.mrb[88].mxu0 }
 0x862   : > { %v16136_v3 = vadd.f32 %v16090_v53, %v10984_v0  ;;  %v10128_v52 = vadd.f32 %v10127_v6, %v15980_v48  ;;  %v10129_v25 = vpop.f32.mrb[89].mxu0  ;;  %11062 = vmax.xlane.f32.xlu1 %v16133_v27 }
 0x863   : > { %v10130_v24 = vpop.f32.mrb[90].mxu0 }
 0x864   : > { %v10131_v44 = vadd.f32 %v10130_v24, %v15987_v26  ;;  %v10132_v59 = vpop.f32.mrb[91].mxu0  ;;  %11064 = vmax.xlane.f32.xlu0 %v16136_v3 }
 0x865   : > { %v10888_v28 = vpop.f32.mrb[84].mxu1 }
 0x866   : > { %v10985_v23 = vadd.f32 %v10888_v28, %v10120_v49  ;;  %v10890_v18 = vpop.f32.mrb[85].mxu1 }
 0x867   : > { %v10891_v37 = vpop.f32.mrb[86].mxu1 }
 0x868   : > { %v16143_v14 = vadd.f32 %v16090_v53, %v10985_v23  ;;  %v10986_v12 = vadd.f32 %v10891_v37, %v10123_v58  ;;  %v10893_v29 = vpop.f32.mrb[87].mxu1 }
 0x869   : > { %v10135_v35 = vpop.f32.mrb[92].mxu0 }
 0x86a   : > { %v16146_v48 = vadd.f32 %v16090_v53, %v10986_v12  ;;  %v10136_v33 = vadd.f32 %v10135_v35, %v15996_v45  ;;  %11066 = vmax.xlane.f32.xlu1 %v16143_v14  ;;  %v10137_v26 = vpop.f32.mrb[93].mxu0 }
 0x86b   : > { %v10138_v13 = vpop.f32.mrb[94].mxu0 }
 0x86c   : > { %v10139_v46 = vadd.f32 %v10138_v13, %v16003_v51  ;;  %11068 = vmax.xlane.f32.xlu0 %v16146_v48  ;;  %v10140_v54 = vpop.f32.mrb[95].mxu0 }
 0x86d   : > { %v10896_v41 = vpop.f32.mrb[88].mxu1 }
 0x86e   : > { %v10987_v19 = vadd.f32 %v10896_v41, %v10128_v52  ;;  %v10898_v7 = vpop.f32.mrb[89].mxu1 }
 0x86f   : > { %v10899_v62 = vpop.f32.mrb[90].mxu1 }
 0x870   : > { %v16153_v49 = vadd.f32 %v16090_v53, %v10987_v19  ;;  %v10988_v61 = vadd.f32 %v10899_v62, %v10131_v44  ;;  %v10901_v38 = vpop.f32.mrb[91].mxu1 }
 0x871   : > { %v10143_v58 = vpop.f32.mrb[96].mxu0 }
 0x872   : > { %v16156_v45 = vadd.f32 %v16090_v53, %v10988_v61  ;;  %v10144_v16 = vadd.f32 %v10143_v58, %v16012_v15  ;;  %11070 = vmax.xlane.f32.xlu1 %v16153_v49  ;;  %v10145_v51 = vpop.f32.mrb[97].mxu0 }
 0x873   : > { %v10146_v9 = vpop.f32.mrb[98].mxu0 }
 0x874   : > { %v10147_v4 = vadd.f32 %v10146_v9, %v16019_v56  ;;  %11072 = vmax.xlane.f32.xlu0 %v16156_v45  ;;  %v10148_v8 = vpop.f32.mrb[99].mxu0 }
 0x875   : > { %v10904_v1 = vpop.f32.mrb[92].mxu1 }
 0x876   : > { %v10989_v0 = vadd.f32 %v10904_v1, %v10136_v33  ;;  %v10906_v40 = vpop.f32.mrb[93].mxu1 }
 0x877   : > { %v10907_v6 = vpop.f32.mrb[94].mxu1 }
 0x878   : > { %v16163_v52 = vadd.f32 %v16090_v53, %v10989_v0  ;;  %v10990_v25 = vadd.f32 %v10907_v6, %v10139_v46  ;;  %v10909_v24 = vpop.f32.mrb[95].mxu1 }
 0x879   : > { %v10151_v44 = vpop.f32.mrb[100].mxu0 }
 0x87a   : > { %v16166_v15 = vadd.f32 %v16090_v53, %v10990_v25  ;;  %v10152_v59 = vadd.f32 %v10151_v44, %v16055_v34  ;;  %v10153_v28 = vpop.f32.mrb[101].mxu0  ;;  %11074 = vmax.xlane.f32.xlu1 %v16163_v52 }
 0x87b   : > { %v10154_v56 = vpop.f32.mrb[102].mxu0 }
 0x87c   : > { %v10155_v23 = vadd.f32 %v10154_v56, %v16057_v17  ;;  %v10156_v18 = vpop.f32.mrb[103].mxu0  ;;  %11076 = vmax.xlane.f32.xlu0 %v16166_v15 }
 0x87d   : > { %v10912_v37 = vpop.f32.mrb[96].mxu1 }
 0x87e   : > { %v10991_v12 = vadd.f32 %v10912_v37, %v10144_v16  ;;  %v10914_v29 = vpop.f32.mrb[97].mxu1 }
 0x87f   : > { %v10915_v35 = vpop.f32.mrb[98].mxu1 }
 0x880   : > { %v16173_v33 = vadd.f32 %v16090_v53, %v10991_v12  ;;  %v10992_v26 = vadd.f32 %v10915_v35, %v10147_v4  ;;  %v10917_v13 = vpop.f32.mrb[99].mxu1 }
 0x881   : > { %v10159_v46 = vpop.f32.mrb[104].mxu0 }
 0x882   : > { %v16176_v34 = vadd.f32 %v16090_v53, %v10992_v26  ;;  %v10160_v54 = vadd.f32 %v10159_v46, %v16059_v36  ;;  %v10161_v41 = vpop.f32.mrb[105].mxu0  ;;  %11078 = vmax.xlane.f32.xlu1 %v16173_v33 }
 0x883   : > { %v10162_v17 = vpop.f32.mrb[106].mxu0 }
 0x884   : > { %v10163_v19 = vadd.f32 %v10162_v17, %v16061_v21  ;;  %v10164_v7 = vpop.f32.mrb[107].mxu0  ;;  %11080 = vmax.xlane.f32.xlu0 %v16176_v34 }
 0x885   : > { %v10920_v62 = vpop.f32.mrb[100].mxu1 }
 0x886   : > { %v10993_v61 = vadd.f32 %v10920_v62, %v10152_v59  ;;  %v10922_v38 = vpop.f32.mrb[101].mxu1 }
 0x887   : > { %v10923_v58 = vpop.f32.mrb[102].mxu1 }
 0x888   : > { %v16183_v16 = vadd.f32 %v16090_v53, %v10993_v61  ;;  %v10994_v51 = vadd.f32 %v10923_v58, %v10155_v23  ;;  %v10925_v9 = vpop.f32.mrb[103].mxu1 }
 0x889   : > { %v10167_v4 = vpop.f32.mrb[108].mxu0 }
 0x88a   : > { %v16186_v36 = vadd.f32 %v16090_v53, %v10994_v51  ;;  %v10168_v8 = vadd.f32 %v10167_v4, %v16063_v31  ;;  %v10169_v1 = vpop.f32.mrb[109].mxu0  ;;  %11082 = vmax.xlane.f32.xlu1 %v16183_v16 }
 0x88b   : > { %v10170_v21 = vpop.f32.mrb[110].mxu0 }
 0x88c   : > { %v10171_v0 = vadd.f32 %v10170_v21, %v16065_v57  ;;  %v10172_v40 = vpop.f32.mrb[111].mxu0  ;;  %11084 = vmax.xlane.f32.xlu0 %v16186_v36 }
 0x88d   : > { %v10928_v6 = vpop.f32.mrb[104].mxu1 }
 0x88e   : > { %v10995_v25 = vadd.f32 %v10928_v6, %v10160_v54  ;;  %v10930_v24 = vpop.f32.mrb[105].mxu1 }
 0x88f   : > { %v10931_v44 = vpop.f32.mrb[106].mxu1 }
 0x890   : > { %v16193_v59 = vadd.f32 %v16090_v53, %v10995_v25  ;;  %v10996_v28 = vadd.f32 %v10931_v44, %v10163_v19  ;;  %v10933_v56 = vpop.f32.mrb[107].mxu1 }
 0x891   : > { %v10175_v23 = vpop.f32.mrb[112].mxu0 }
 0x892   : > { %v16196_v31 = vadd.f32 %v16090_v53, %v10996_v28  ;;  %v10176_v18 = vadd.f32 %v10175_v23, %v16067_v60  ;;  %v10177_v37 = vpop.f32.mrb[113].mxu0  ;;  %11086 = vmax.xlane.f32.xlu1 %v16193_v59 }
 0x893   : > { %v10178_v57 = vpop.f32.mrb[114].mxu0 }
 0x894   : > { %v10179_v12 = vadd.f32 %v10178_v57, %v16069_v42  ;;  %v10180_v29 = vpop.f32.mrb[115].mxu0  ;;  %11088 = vmax.xlane.f32.xlu0 %v16196_v31 }
 0x895   : > { %v10936_v35 = vpop.f32.mrb[108].mxu1 }
 0x896   : > { %v10997_v26 = vadd.f32 %v10936_v35, %v10168_v8  ;;  %v10938_v13 = vpop.f32.mrb[109].mxu1 }
 0x897   : > { %v10939_v46 = vpop.f32.mrb[110].mxu1 }
 0x898   : > { %v16203_v54 = vadd.f32 %v16090_v53, %v10997_v26  ;;  %v10998_v41 = vadd.f32 %v10939_v46, %v10171_v0  ;;  %v10941_v17 = vpop.f32.mrb[111].mxu1 }
 0x899   : > { %v10183_v19 = vpop.f32.mrb[116].mxu0 }
 0x89a   : > { %v16206_v60 = vadd.f32 %v16090_v53, %v10998_v41  ;;  %v10184_v7 = vadd.f32 %v10183_v19, %v16071_v47  ;;  %v10185_v62 = vpop.f32.mrb[117].mxu0  ;;  %11090 = vmax.xlane.f32.xlu1 %v16203_v54 }
 0x89b   : > { %v10186_v42 = vpop.f32.mrb[118].mxu0 }
 0x89c   : > { %v10187_v61 = vadd.f32 %v10186_v42, %v16073_v30  ;;  %v10188_v38 = vpop.f32.mrb[119].mxu0  ;;  %11092 = vmax.xlane.f32.xlu0 %v16206_v60 }
 0x89d   : > { %v10944_v58 = vpop.f32.mrb[112].mxu1 }
 0x89e   : > { %v10999_v51 = vadd.f32 %v10944_v58, %v10176_v18  ;;  %v10946_v9 = vpop.f32.mrb[113].mxu1 }
 0x89f   : > { %v10947_v4 = vpop.f32.mrb[114].mxu1 }
 0x8a0   : > { %v16213_v8 = vadd.f32 %v16090_v53, %v10999_v51  ;;  %v11000_v1 = vadd.f32 %v10947_v4, %v10179_v12  ;;  %v10949_v21 = vpop.f32.mrb[115].mxu1 }
 0x8a1   : > { %v10191_v0 = vpop.f32.mrb[120].mxu0 }
 0x8a2   : > { %v16216_v47 = vadd.f32 %v16090_v53, %v11000_v1  ;;  %v10192_v40 = vadd.f32 %v10191_v0, %v16075_v11  ;;  %v10193_v6 = vpop.f32.mrb[121].mxu0  ;;  %11094 = vmax.xlane.f32.xlu1 %v16213_v8 }
 0x8a3   : > { %v10194_v30 = vpop.f32.mrb[122].mxu0 }
 0x8a4   : > { %v10195_v25 = vadd.f32 %v10194_v30, %v16077_v5  ;;  %v10196_v24 = vpop.f32.mrb[123].mxu0  ;;  %11096 = vmax.xlane.f32.xlu0 %v16216_v47 }
 0x8a5   : > { %v10952_v44 = vpop.f32.mrb[116].mxu1 }
 0x8a6   : > { %v11001_v28 = vadd.f32 %v10952_v44, %v10184_v7  ;;  %v10954_v56 = vpop.f32.mrb[117].mxu1 }
 0x8a7   : > { %v10955_v23 = vpop.f32.mrb[118].mxu1 }
 0x8a8   : > { %v16223_v18 = vadd.f32 %v16090_v53, %v11001_v28  ;;  %v11002_v37 = vadd.f32 %v10955_v23, %v10187_v61  ;;  %v10957_v57 = vpop.f32.mrb[119].mxu1 }
 0x8a9   : > { %v10199_v12 = vpop.f32.mrb[124].mxu0 }
 0x8aa   : > { %v16226_v11 = vadd.f32 %v16090_v53, %v11002_v37  ;;  %v10200_v29 = vadd.f32 %v10199_v12, %v16081_v50  ;;  %v10201_v35 = vpop.f32.mrb[125].mxu0  ;;  %11098 = vmax.xlane.f32.xlu1 %v16223_v18 }
 0x8ab   : > { %v10202_v5 = vpop.f32.mrb[126].mxu0 }
 0x8ac   : > { %v10203_v26 = vadd.f32 %v10202_v5, %v16083_v22  ;;  %v10204_v13 = vpop.f32.mrb[127].mxu0  ;;  %11100 = vmax.xlane.f32.xlu0 %v16226_v11 }
 0x8ad   : > { %v10960_v46 = vpop.f32.mrb[120].mxu1 }
 0x8ae   : > { %v11003_v41 = vadd.f32 %v10960_v46, %v10192_v40  ;;  %v10962_v17 = vpop.f32.mrb[121].mxu1 }
 0x8af   : > { %v10963_v19 = vpop.f32.mrb[122].mxu1 }
 0x8b0   : > { %v16233_v7 = vadd.f32 %v16090_v53, %v11003_v41  ;;  %v11004_v62 = vadd.f32 %v10963_v19, %v10195_v25  ;;  %v10965_v42 = vpop.f32.mrb[123].mxu1 }
 0x8b2   : > { %v16236_v50 = vadd.f32 %v16090_v53, %v11004_v62  ;;  %11102 = vmax.xlane.f32.xlu1 %v16233_v7 }
 0x8b4   : > { %11104 = vmax.xlane.f32.xlu0 %v16236_v50 }
 0x8b5   : > { %v10968_v22 = vpop.f32.mrb[124].mxu1 }
 0x8b6   : > { %v11005_v61 = vadd.f32 %v10968_v22, %v10200_v29  ;;  %v10970_v38 = vpop.f32.mrb[125].mxu1 }
 0x8b7   : > { %v10971_v58 = vpop.f32.mrb[126].mxu1 }
 0x8b8   : > { %v16241_v51 = vadd.f32 %v16090_v53, %v11005_v61  ;;  %v11006_v9 = vadd.f32 %v10971_v58, %v10203_v26  ;;  %v10973_v4 = vpop.f32.mrb[127].mxu1 }
 0x8ba   : > { %v16244_v1 = vadd.f32 %v16090_v53, %v11006_v9  ;;  %11106 = vmax.xlane.f32.xlu1 %v16241_v51 }
 0x8bc   : > { %11108 = vmax.xlane.f32.xlu0 %v16244_v1 }
 0x8cf   : > { %v11047_v21 = vpop.xlane.xlu0 %11046 }
 0x8d0   : > { %v11110_v0 = vsub.f32 %v16093_v63, %v11047_v21 }
 0x8d1   : > { %v11049_v40 = vpop.xlane.xlu1 %11048 }
 0x8d2   : > { %v11142_v6 = vmul.f32 1.442695, %v11110_v0  ;;  %v11111_v30 = vsub.f32 %v16096_v2, %v11049_v40 }
 0x8d4   : > { %12152 = vpow2.f32 %v11142_v6  ;;  %v11144_v25 = vmul.f32 1.442695, %v11111_v30 }
 0x8d6   : > { %12154 = vpow2.f32 %v11144_v25 }
 0x8d7   : > { %v11051_v24 = vpop.xlane.xlu0 %11050 }
 0x8d8   : > { %v11112_v44 = vsub.f32 %v16103_v32, %v11051_v24 }
 0x8da   : > { %v11146_v28 = vmul.f32 1.442695, %v11112_v44 }
 0x8db   : > { %v11053_v53 = vpop.xlane.xlu0 %11052 }
 0x8dc   : > { %12156 = vpow2.f32 %v11146_v28  ;;  %v11113_v56 = vsub.f32 %v16108_v43, %v11053_v53 }
 0x8de   : > { %v16252_v23 = vpop.eup %12152  ;;  %v11148_v37 = vmul.f32 1.442695, %v11113_v56 }
 0x8df   : > { %v11055_v57 = vpop.xlane.xlu1 %11054  ;;  %11206 = vadd.xlane.f32.xlu1 %v16252_v23 }
 0x8e0   : > { %v16255_v63 = vpop.eup %12154  ;;  %12158 = vpow2.f32 %v11148_v37  ;;  %v11114_v2 = vsub.f32 %v16113_v39, %v11055_v57 }
 0x8e1   : > { %v11057_v12 = vpop.xlane.xlu0 %11056  ;;  %11208 = vadd.xlane.f32.xlu0 %v16255_v63 }
 0x8e2   : > { %v11150_v32 = vmul.f32 1.442695, %v11114_v2  ;;  %v11115_v29 = vsub.f32 %v16116_v55, %v11057_v12 }
 0x8e4   : > { %12160 = vpow2.f32 %v11150_v32  ;;  %v11152_v35 = vmul.f32 1.442695, %v11115_v29 }
 0x8e6   : > { %v16260_v43 = vpop.eup %12156  ;;  %12162 = vpow2.f32 %v11152_v35 }
 0x8e7   : > { %v11059_v5 = vpop.xlane.xlu1 %11058  ;;  %11210 = vadd.xlane.f32.xlu1 %v16260_v43 }
 0x8e8   : > { %v11116_v26 = vsub.f32 %v16123_v20, %v11059_v5 }
 0x8e9   : > { %v11061_v13 = vpop.xlane.xlu0 %11060 }
 0x8ea   : > { %v16264_v46 = vpop.eup %12158  ;;  %v11154_v39 = vmul.f32 1.442695, %v11116_v26  ;;  %v11117_v41 = vsub.f32 %v16126_v10, %v11061_v13 }
 0x8eb   : > { %11212 = vadd.xlane.f32.xlu0 %v16264_v46 }
 0x8ec   : > { %12164 = vpow2.f32 %v11154_v39  ;;  %v11156_v55 = vmul.f32 1.442695, %v11117_v41 }
 0x8ee   : > { %v16268_v17 = vpop.eup %12160  ;;  %12166 = vpow2.f32 %v11156_v55 }
 0x8ef   : > { %v11063_v19 = vpop.xlane.xlu1 %11062  ;;  %11214 = vadd.xlane.f32.xlu1 %v16268_v17 }
 0x8f0   : > { %v16271_v62 = vpop.eup %12162  ;;  %v11118_v20 = vsub.f32 %v16133_v27, %v11063_v19 }
 0x8f1   : > { %v11065_v42 = vpop.xlane.xlu0 %11064  ;;  %11216 = vadd.xlane.f32.xlu0 %v16271_v62 }
 0x8f2   : > { %v11158_v22 = vmul.f32 1.442695, %v11118_v20  ;;  %v11119_v10 = vsub.f32 %v16136_v3, %v11065_v42 }
 0x8f4   : > { %12168 = vpow2.f32 %v11158_v22  ;;  %v11160_v61 = vmul.f32 1.442695, %v11119_v10 }
 0x8f6   : > { %v16276_v38 = vpop.eup %12164  ;;  %12170 = vpow2.f32 %v11160_v61 }
 0x8f7   : > { %v11067_v58 = vpop.xlane.xlu1 %11066  ;;  %11218 = vadd.xlane.f32.xlu1 %v16276_v38 }
 0x8f8   : > { %v16279_v9 = vpop.eup %12166  ;;  %v11120_v4 = vsub.f32 %v16143_v14, %v11067_v58 }
 0x8f9   : > { %v11069_v21 = vpop.xlane.xlu0 %11068  ;;  %11220 = vadd.xlane.f32.xlu0 %v16279_v9 }
 0x8fa   : > { %v11162_v27 = vmul.f32 1.442695, %v11120_v4  ;;  %v11121_v0 = vsub.f32 %v16146_v48, %v11069_v21 }
 0x8fc   : > { %12172 = vpow2.f32 %v11162_v27  ;;  %v11164_v3 = vmul.f32 1.442695, %v11121_v0 }
 0x8fe   : > { %v16284_v40 = vpop.eup %12168  ;;  %12174 = vpow2.f32 %v11164_v3 }
 0x8ff   : > { %v11071_v6 = vpop.xlane.xlu1 %11070  ;;  %11222 = vadd.xlane.f32.xlu1 %v16284_v40 }
 0x900   : > { %v16287_v30 = vpop.eup %12170  ;;  %v11122_v25 = vsub.f32 %v16153_v49, %v11071_v6 }
 0x901   : > { %v11073_v24 = vpop.xlane.xlu0 %11072  ;;  %11224 = vadd.xlane.f32.xlu0 %v16287_v30 }
 0x902   : > { %v11166_v14 = vmul.f32 1.442695, %v11122_v25  ;;  %v11123_v44 = vsub.f32 %v16156_v45, %v11073_v24 }
 0x904   : > { %12176 = vpow2.f32 %v11166_v14  ;;  %v11168_v48 = vmul.f32 1.442695, %v11123_v44 }
 0x906   : > { %v16292_v28 = vpop.eup %12172  ;;  %12178 = vpow2.f32 %v11168_v48 }
 0x907   : > { %11226 = vadd.xlane.f32.xlu1 %v16292_v28  ;;  %v11075_v53 = vpop.xlane.xlu1 %11074 }
 0x908   : > { %v16295_v56 = vpop.eup %12174  ;;  %v11124_v37 = vsub.f32 %v16163_v52, %v11075_v53 }
 0x909   : > { %11228 = vadd.xlane.f32.xlu0 %v16295_v56  ;;  %v11077_v49 = vpop.xlane.xlu0 %11076 }
 0x90a   : > { %v11170_v57 = vmul.f32 1.442695, %v11124_v37  ;;  %v11125_v2 = vsub.f32 %v16166_v15, %v11077_v49 }
 0x90c   : > { %12180 = vpow2.f32 %v11170_v57  ;;  %v11172_v45 = vmul.f32 1.442695, %v11125_v2 }
 0x90e   : > { %v16300_v12 = vpop.eup %12176  ;;  %12182 = vpow2.f32 %v11172_v45 }
 0x90f   : > { %11230 = vadd.xlane.f32.xlu1 %v16300_v12  ;;  %v11079_v32 = vpop.xlane.xlu1 %11078 }
 0x910   : > { %v16303_v29 = vpop.eup %12178  ;;  %v11126_v35 = vsub.f32 %v16173_v33, %v11079_v32 }
 0x911   : > { %11232 = vadd.xlane.f32.xlu0 %v16303_v29  ;;  %v11081_v52 = vpop.xlane.xlu0 %11080 }
 0x912   : > { %v11174_v5 = vmul.f32 1.442695, %v11126_v35  ;;  %v11127_v26 = vsub.f32 %v16176_v34, %v11081_v52 }
 0x914   : > { %12184 = vpow2.f32 %v11174_v5  ;;  %v11176_v15 = vmul.f32 1.442695, %v11127_v26 }
 0x916   : > { %v16308_v13 = vpop.eup %12180  ;;  %12186 = vpow2.f32 %v11176_v15 }
 0x917   : > { %11234 = vadd.xlane.f32.xlu1 %v16308_v13  ;;  %v11083_v39 = vpop.xlane.xlu1 %11082 }
 0x918   : > { %v16311_v41 = vpop.eup %12182  ;;  %v11128_v55 = vsub.f32 %v16183_v16, %v11083_v39 }
 0x919   : > { %11236 = vadd.xlane.f32.xlu0 %v16311_v41  ;;  %v11085_v33 = vpop.xlane.xlu0 %11084 }
 0x91a   : > { %v11178_v19 = vmul.f32 1.442695, %v11128_v55  ;;  %v11129_v20 = vsub.f32 %v16186_v36, %v11085_v33 }
 0x91c   : > { %12188 = vpow2.f32 %v11178_v19  ;;  %v11180_v34 = vmul.f32 1.442695, %v11129_v20 }
 0x91e   : > { %v16316_v42 = vpop.eup %12184  ;;  %12190 = vpow2.f32 %v11180_v34 }
 0x91f   : > { %11238 = vadd.xlane.f32.xlu1 %v16316_v42  ;;  %v11087_v22 = vpop.xlane.xlu1 %11086 }
 0x920   : > { %v16319_v10 = vpop.eup %12186  ;;  %v11130_v61 = vsub.f32 %v16193_v59, %v11087_v22 }
 0x921   : > { %11240 = vadd.xlane.f32.xlu0 %v16319_v10  ;;  %v11089_v16 = vpop.xlane.xlu0 %11088 }
 0x922   : > { %v11182_v58 = vmul.f32 1.442695, %v11130_v61  ;;  %v11131_v4 = vsub.f32 %v16196_v31, %v11089_v16 }
 0x924   : > { %12192 = vpow2.f32 %v11182_v58  ;;  %v11184_v36 = vmul.f32 1.442695, %v11131_v4 }
 0x926   : > { %v16324_v21 = vpop.eup %12188  ;;  %12194 = vpow2.f32 %v11184_v36 }
 0x927   : > { %11242 = vadd.xlane.f32.xlu1 %v16324_v21  ;;  %v11091_v27 = vpop.xlane.xlu1 %11090 }
 0x928   : > { %v16327_v0 = vpop.eup %12190  ;;  %v11132_v3 = vsub.f32 %v16203_v54, %v11091_v27 }
 0x929   : > { %11244 = vadd.xlane.f32.xlu0 %v16327_v0  ;;  %v11093_v59 = vpop.xlane.xlu0 %11092 }
 0x92a   : > { %v11186_v6 = vmul.f32 1.442695, %v11132_v3  ;;  %v11133_v25 = vsub.f32 %v16206_v60, %v11093_v59 }
 0x92c   : > { %12196 = vpow2.f32 %v11186_v6  ;;  %v11188_v31 = vmul.f32 1.442695, %v11133_v25 }
 0x92e   : > { %v16332_v24 = vpop.eup %12192  ;;  %12198 = vpow2.f32 %v11188_v31 }
 0x92f   : > { %11246 = vadd.xlane.f32.xlu1 %v16332_v24  ;;  %v11095_v14 = vpop.xlane.xlu1 %11094 }
 0x930   : > { %v16335_v44 = vpop.eup %12194  ;;  %v11134_v48 = vsub.f32 %v16213_v8, %v11095_v14 }
 0x931   : > { %11248 = vadd.xlane.f32.xlu0 %v16335_v44  ;;  %v11097_v54 = vpop.xlane.xlu0 %11096 }
 0x932   : > { %v11190_v53 = vmul.f32 1.442695, %v11134_v48  ;;  %v11135_v37 = vsub.f32 %v16216_v47, %v11097_v54 }
 0x934   : > { %12200 = vpow2.f32 %v11190_v53  ;;  %v11192_v60 = vmul.f32 1.442695, %v11135_v37 }
 0x936   : > { %v16340_v49 = vpop.eup %12196  ;;  %12202 = vpow2.f32 %v11192_v60 }
 0x937   : > { %11250 = vadd.xlane.f32.xlu1 %v16340_v49  ;;  %v11099_v57 = vpop.xlane.xlu1 %11098 }
 0x938   : > { %v16343_v2 = vpop.eup %12198  ;;  %v11136_v45 = vsub.f32 %v16223_v18, %v11099_v57 }
 0x939   : > { %11252 = vadd.xlane.f32.xlu0 %v16343_v2  ;;  %v11101_v8 = vpop.xlane.xlu0 %11100 }
 0x93a   : > { %v11194_v32 = vmul.f32 1.442695, %v11136_v45  ;;  %v11137_v35 = vsub.f32 %v16226_v11, %v11101_v8 }
 0x93c   : > { %12204 = vpow2.f32 %v11194_v32  ;;  %v11196_v47 = vmul.f32 1.442695, %v11137_v35 }
 0x93e   : > { %v16348_v52 = vpop.eup %12200  ;;  %12206 = vpow2.f32 %v11196_v47 }
 0x93f   : > { %11254 = vadd.xlane.f32.xlu1 %v16348_v52  ;;  %v11103_v5 = vpop.xlane.xlu1 %11102 }
 0x940   : > { %v16351_v26 = vpop.eup %12202  ;;  %v11138_v15 = vsub.f32 %v16233_v7, %v11103_v5 }
 0x941   : > { %11256 = vadd.xlane.f32.xlu0 %v16351_v26  ;;  %v11105_v18 = vpop.xlane.xlu0 %11104 }
 0x942   : > { %v11198_v39 = vmul.f32 1.442695, %v11138_v15  ;;  %v11139_v55 = vsub.f32 %v16236_v50, %v11105_v18 }
 0x944   : > { %12208 = vpow2.f32 %v11198_v39  ;;  %v11200_v11 = vmul.f32 1.442695, %v11139_v55 }
 0x946   : > { %v16356_v33 = vpop.eup %12204  ;;  %12210 = vpow2.f32 %v11200_v11 }
 0x947   : > { %11258 = vadd.xlane.f32.xlu1 %v16356_v33  ;;  %v11107_v19 = vpop.xlane.xlu1 %11106 }
 0x948   : > { %v16359_v20 = vpop.eup %12206  ;;  %v11140_v34 = vsub.f32 %v16241_v51, %v11107_v19 }
 0x949   : > { %11260 = vadd.xlane.f32.xlu0 %v16359_v20  ;;  %v11109_v7 = vpop.xlane.xlu0 %11108 }
 0x94a   : > { %v11202_v22 = vmul.f32 1.442695, %v11140_v34  ;;  %v11141_v61 = vsub.f32 %v16244_v1, %v11109_v7 }
 0x94c   : > { %12212 = vpow2.f32 %v11202_v22  ;;  %v11204_v50 = vmul.f32 1.442695, %v11141_v61 }
 0x94e   : > { %v16364_v16 = vpop.eup %12208  ;;  %12214 = vpow2.f32 %v11204_v50 }
 0x94f   : > { %11262 = vadd.xlane.f32.xlu1 %v16364_v16 }
 0x950   : > { %v16367_v58 = vpop.eup %12210 }
 0x951   : > { %11264 = vadd.xlane.f32.xlu0 %v16367_v58 }
 0x956   : > { %v16370_v4 = vpop.eup %12212 }
 0x957   : > { %11266 = vadd.xlane.f32.xlu1 %v16370_v4 }
 0x958   : > { %v16373_v51 = vpop.eup %12214 }
 0x959   : > { %11268 = vadd.xlane.f32.xlu0 %v16373_v51 }
 0x96c   : > { %v11207_v1 = vpop.xlane.xlu1 %11206 }
 0x96d   : > { %12216 = vrcp.f32 %v11207_v1 }
 0x96e   : > { %v11209_v36 = vpop.xlane.xlu0 %11208 }
 0x96f   : > { %12218 = vrcp.f32 %v11209_v36 }
 0x974   : > { %v11211_v27 = vpop.xlane.xlu1 %11210 }
 0x975   : > { %12220 = vrcp.f32 %v11211_v27 }
 0x977   : > { %v12217_v3 = vpop.eup %12216 }
 0x978   : > { %v11271_v59 = vmul.f32 %v12217_v3, %v16252_v23  ;;  %v11213_v6 = vpop.xlane.xlu0 %11212 }
 0x979   : > { %v12219_v25 = vpop.eup %12218  ;;  %12222 = vrcp.f32 %v11213_v6 }
 0x97a   : > { %11334 = vst [vmem:[%s16380_s11] sm:$0xff] %v11271_v59  ;;  %v11273_v31 = vmul.f32 %v12219_v25, %v16255_v63 }
 0x97c   : > { %11335 = vst [vmem:[%s16380_s11 + $0x8] sm:$0xff] %v11273_v31  ;;  %v11215_v14 = vpop.xlane.xlu1 %11214 }
 0x97d   : > { %12224 = vrcp.f32 %v11215_v14 }
 0x97e   : > { %v11217_v48 = vpop.xlane.xlu0 %11216 }
 0x97f   : > { %v12221_v54 = vpop.eup %12220  ;;  %12226 = vrcp.f32 %v11217_v48 }
 0x980   : > { %v11275_v53 = vmul.f32 %v12221_v54, %v16260_v43 }
 0x982   : > { %11336 = vst [vmem:[%s16380_s11 + $0x10] sm:$0xff] %v11275_v53 }
 0x983   : > { %v12223_v37 = vpop.eup %12222 }
 0x984   : > { %v11277_v23 = vmul.f32 %v12223_v37, %v16264_v46  ;;  %v11219_v60 = vpop.xlane.xlu1 %11218 }
 0x985   : > { %12228 = vrcp.f32 %v11219_v60 }
 0x986   : > { %11337 = vst [vmem:[%s16380_s11 + $0x18] sm:$0xff] %v11277_v23  ;;  %v11221_v57 = vpop.xlane.xlu0 %11220 }
 0x987   : > { %v12225_v63 = vpop.eup %12224  ;;  %12230 = vrcp.f32 %v11221_v57 }
 0x988   : > { %v11279_v45 = vmul.f32 %v12225_v63, %v16268_v17 }
 0x989   : > { %v12227_v8 = vpop.eup %12226 }
 0x98a   : > { %11338 = vst [vmem:[%s16380_s11 + $0x20] sm:$0xff] %v11279_v45  ;;  %v11281_v32 = vmul.f32 %v12227_v8, %v16271_v62 }
 0x98c   : > { %11339 = vst [vmem:[%s16380_s11 + $0x28] sm:$0xff] %v11281_v32  ;;  %v11223_v43 = vpop.xlane.xlu1 %11222 }
 0x98d   : > { %12232 = vrcp.f32 %v11223_v43 }
 0x98e   : > { %v11225_v35 = vpop.xlane.xlu0 %11224 }
 0x98f   : > { %v12229_v46 = vpop.eup %12228  ;;  %12234 = vrcp.f32 %v11225_v35 }
 0x990   : > { %v11283_v47 = vmul.f32 %v12229_v46, %v16276_v38 }
 0x991   : > { %v12231_v5 = vpop.eup %12230 }
 0x992   : > { %11340 = vst [vmem:[%s16380_s11 + $0x30] sm:$0xff] %v11283_v47  ;;  %v11285_v15 = vmul.f32 %v12231_v5, %v16279_v9 }
 0x994   : > { %11341 = vst [vmem:[%s16380_s11 + $0x38] sm:$0xff] %v11285_v15  ;;  %v11227_v17 = vpop.xlane.xlu1 %11226 }
 0x995   : > { %12236 = vrcp.f32 %v11227_v17 }
 0x996   : > { %v11229_v18 = vpop.xlane.xlu0 %11228 }
 0x997   : > { %v12233_v62 = vpop.eup %12232  ;;  %12238 = vrcp.f32 %v11229_v18 }
 0x998   : > { %v11287_v39 = vmul.f32 %v12233_v62, %v16284_v40 }
 0x999   : > { %v12235_v55 = vpop.eup %12234 }
 0x99a   : > { %11342 = vst [vmem:[%s16380_s11 + $0x40] sm:$0xff] %v11287_v39  ;;  %v11289_v11 = vmul.f32 %v12235_v55, %v16287_v30 }
 0x99c   : > { %11343 = vst [vmem:[%s16380_s11 + $0x48] sm:$0xff] %v11289_v11  ;;  %v11231_v38 = vpop.xlane.xlu1 %11230 }
 0x99d   : > { %12240 = vrcp.f32 %v11231_v38 }
 0x99e   : > { %v11233_v19 = vpop.xlane.xlu0 %11232 }
 0x99f   : > { %v12237_v9 = vpop.eup %12236  ;;  %12242 = vrcp.f32 %v11233_v19 }
 0x9a0   : > { %v11291_v34 = vmul.f32 %v12237_v9, %v16292_v28 }
 0x9a1   : > { %v12239_v7 = vpop.eup %12238 }
 0x9a2   : > { %11344 = vst [vmem:[%s16380_s11 + $0x50] sm:$0xff] %v11291_v34  ;;  %v11293_v22 = vmul.f32 %v12239_v7, %v16295_v56 }
 0x9a4   : > { %11345 = vst [vmem:[%s16380_s11 + $0x58] sm:$0xff] %v11293_v22  ;;  %v11235_v40 = vpop.xlane.xlu1 %11234 }
 0x9a5   : > { %12244 = vrcp.f32 %v11235_v40 }
 0x9a6   : > { %v11237_v61 = vpop.xlane.xlu0 %11236 }
 0x9a7   : > { %v12241_v30 = vpop.eup %12240  ;;  %12246 = vrcp.f32 %v11237_v61 }
 0x9a8   : > { %v11295_v50 = vmul.f32 %v12241_v30, %v16300_v12 }
 0x9a9   : > { %v12243_v1 = vpop.eup %12242 }
 0x9aa   : > { %11346 = vst [vmem:[%s16380_s11 + $0x60] sm:$0xff] %v11295_v50  ;;  %v11297_v36 = vmul.f32 %v12243_v1, %v16303_v29 }
 0x9ac   : > { %11347 = vst [vmem:[%s16380_s11 + $0x68] sm:$0xff] %v11297_v36  ;;  %v11239_v28 = vpop.xlane.xlu1 %11238 }
 0x9ad   : > { %12248 = vrcp.f32 %v11239_v28 }
 0x9ae   : > { %v11241_v27 = vpop.xlane.xlu0 %11240 }
 0x9af   : > { %v12245_v56 = vpop.eup %12244  ;;  %12250 = vrcp.f32 %v11241_v27 }
 0x9b0   : > { %v11299_v3 = vmul.f32 %v12245_v56, %v16308_v13 }
 0x9b1   : > { %v12247_v59 = vpop.eup %12246 }
 0x9b2   : > { %11348 = vst [vmem:[%s16380_s11 + $0x70] sm:$0xff] %v11299_v3  ;;  %v11301_v6 = vmul.f32 %v12247_v59, %v16311_v41 }
 0x9b4   : > { %11349 = vst [vmem:[%s16380_s11 + $0x78] sm:$0xff] %v11301_v6  ;;  %v11243_v12 = vpop.xlane.xlu1 %11242 }
 0x9b5   : > { %12252 = vrcp.f32 %v11243_v12 }
 0x9b6   : > { %v11245_v25 = vpop.xlane.xlu0 %11244 }
 0x9b7   : > { %v12249_v29 = vpop.eup %12248  ;;  %12254 = vrcp.f32 %v11245_v25 }
 0x9b8   : > { %v11303_v31 = vmul.f32 %v12249_v29, %v16316_v42 }
 0x9b9   : > { %v12251_v14 = vpop.eup %12250 }
 0x9ba   : > { %11350 = vst [vmem:[%s16380_s11 + $0x80] sm:$0xff] %v11303_v31  ;;  %v11305_v48 = vmul.f32 %v12251_v14, %v16319_v10 }
 0x9bc   : > { %11351 = vst [vmem:[%s16380_s11 + $0x88] sm:$0xff] %v11305_v48  ;;  %v11247_v13 = vpop.xlane.xlu1 %11246 }
 0x9bd   : > { %12256 = vrcp.f32 %v11247_v13 }
 0x9be   : > { %v11249_v54 = vpop.xlane.xlu0 %11248 }
 0x9bf   : > { %v12253_v41 = vpop.eup %12252  ;;  %12258 = vrcp.f32 %v11249_v54 }
 0x9c0   : > { %v11307_v53 = vmul.f32 %v12253_v41, %v16324_v21 }
 0x9c1   : > { %v12255_v37 = vpop.eup %12254 }
 0x9c2   : > { %11352 = vst [vmem:[%s16380_s11 + $0x90] sm:$0xff] %v11307_v53  ;;  %v11309_v23 = vmul.f32 %v12255_v37, %v16327_v0 }
 0x9c4   : > { %11353 = vst [vmem:[%s16380_s11 + $0x98] sm:$0xff] %v11309_v23  ;;  %v11251_v42 = vpop.xlane.xlu1 %11250 }
 0x9c5   : > { %12260 = vrcp.f32 %v11251_v42 }
 0x9c6   : > { %v11253_v60 = vpop.xlane.xlu0 %11252 }
 0x9c7   : > { %v12257_v10 = vpop.eup %12256  ;;  %12262 = vrcp.f32 %v11253_v60 }
 0x9c8   : > { %v11311_v57 = vmul.f32 %v12257_v10, %v16332_v24 }
 0x9c9   : > { %v12259_v63 = vpop.eup %12258 }
 0x9ca   : > { %11354 = vst [vmem:[%s16380_s11 + $0xa0] sm:$0xff] %v11311_v57  ;;  %v11313_v45 = vmul.f32 %v12259_v63, %v16335_v44 }
 0x9cc   : > { %11355 = vst [vmem:[%s16380_s11 + $0xa8] sm:$0xff] %v11313_v45  ;;  %v11255_v21 = vpop.xlane.xlu1 %11254 }
 0x9cd   : > { %12264 = vrcp.f32 %v11255_v21 }
 0x9ce   : > { %v11257_v8 = vpop.xlane.xlu0 %11256 }
 0x9cf   : > { %v12261_v0 = vpop.eup %12260  ;;  %12266 = vrcp.f32 %v11257_v8 }
 0x9d0   : > { %v11315_v32 = vmul.f32 %v12261_v0, %v16340_v49 }
 0x9d1   : > { %v12263_v43 = vpop.eup %12262 }
 0x9d2   : > { %11356 = vst [vmem:[%s16380_s11 + $0xb0] sm:$0xff] %v11315_v32  ;;  %v11317_v35 = vmul.f32 %v12263_v43, %v16343_v2 }
 0x9d4   : > { %11357 = vst [vmem:[%s16380_s11 + $0xb8] sm:$0xff] %v11317_v35  ;;  %v11259_v24 = vpop.xlane.xlu1 %11258 }
 0x9d5   : > { %12268 = vrcp.f32 %v11259_v24 }
 0x9d6   : > { %v11261_v46 = vpop.xlane.xlu0 %11260 }
 0x9d7   : > { %v12265_v44 = vpop.eup %12264  ;;  %12270 = vrcp.f32 %v11261_v46 }
 0x9d8   : > { %v11319_v47 = vmul.f32 %v12265_v44, %v16348_v52 }
 0x9d9   : > { %v12267_v5 = vpop.eup %12266 }
 0x9da   : > { %11358 = vst [vmem:[%s16380_s11 + $0xc0] sm:$0xff] %v11319_v47  ;;  %v11321_v15 = vmul.f32 %v12267_v5, %v16351_v26 }
 0x9dc   : > { %11359 = vst [vmem:[%s16380_s11 + $0xc8] sm:$0xff] %v11321_v15  ;;  %v11263_v49 = vpop.xlane.xlu1 %11262 }
 0x9dd   : > { %12272 = vrcp.f32 %v11263_v49 }
 0x9de   : > { %v11265_v17 = vpop.xlane.xlu0 %11264 }
 0x9df   : > { %v12269_v2 = vpop.eup %12268  ;;  %12274 = vrcp.f32 %v11265_v17 }
 0x9e0   : > { %v11323_v18 = vmul.f32 %v12269_v2, %v16356_v33 }
 0x9e1   : > { %v12271_v62 = vpop.eup %12270 }
 0x9e2   : > { %11360 = vst [vmem:[%s16380_s11 + $0xd0] sm:$0xff] %v11323_v18  ;;  %v11325_v39 = vmul.f32 %v12271_v62, %v16359_v20 }
 0x9e4   : > { %11361 = vst [vmem:[%s16380_s11 + $0xd8] sm:$0xff] %v11325_v39  ;;  %v11267_v52 = vpop.xlane.xlu1 %11266 }
 0x9e5   : > { %12276 = vrcp.f32 %v11267_v52 }
 0x9e6   : > { %v11269_v26 = vpop.xlane.xlu0 %11268 }
 0x9e7   : > { %v12273_v55 = vpop.eup %12272  ;;  %12278 = vrcp.f32 %v11269_v26 }
 0x9e8   : > { %v11327_v11 = vmul.f32 %v12273_v55, %v16364_v16 }
 0x9e9   : > { %v12275_v38 = vpop.eup %12274 }
 0x9ea   : > { %11362 = vst [vmem:[%s16380_s11 + $0xe0] sm:$0xff] %v11327_v11  ;;  %v11329_v19 = vmul.f32 %v12275_v38, %v16367_v58 }
 0x9ec   : > { %11363 = vst [vmem:[%s16380_s11 + $0xe8] sm:$0xff] %v11329_v19 }
 0x9ef   : > { %v12277_v33 = vpop.eup %12276 }
 0x9f0   : > { %v11331_v9 = vmul.f32 %v12277_v33, %v16370_v4 }
 0x9f1   : > { %v12279_v34 = vpop.eup %12278 }
 0x9f2   : > { %11364 = vst [vmem:[%s16380_s11 + $0xf0] sm:$0xff] %v11331_v9  ;;  %v11333_v20 = vmul.f32 %v12279_v34, %v16373_v51 }
 0x9f4   : > { %11365 = vst [vmem:[%s16380_s11 + $0xf8] sm:$0xff] %v11333_v20 }
 0x9f5 PF: > { %s19_s30 = sadd.s32 1, %s12290_s30  }
 0x9f6   : > { %p16_p4 = scmp.ge.s32.totalorder %s19_s30, 4  }
 0x9f8   :  { %18 = sbr.rel (!%p16_p4) target bundleno = 1 (0x1), region = 93 }

</bundles_post_ra>
